<compile_context>
chip_gen: v7x
topology: tpu7x:2x2x1
jax: 0.10.0
libtpu: 0.0.40
codegen_flags: <defaults>
</compile_context>

<pallas_src>
import numpy as np

import jax
import jax.numpy as jnp
from jax import lax
from jax.experimental import pallas as pl
from jax.experimental.pallas import tpu as pltpu


# ---------------------------------------------------------------------------
# Fused forward kernel (one grid step == one sample)
# ---------------------------------------------------------------------------
def _digits_kernel(x_ref, m1_ref, b1_ref, m2_ref, b2_ref,
                   wf1_ref, bf1_ref, wf2_ref, bf2_ref,
                   o_ref,
                   xp1_ref, xp2_ref):
    f32 = jnp.float32

    # ---- 2x2 max-pool selection matrices (built from iota, folded) ---------
    def sel_rows(n_out, n_in, phase):          # (n_out, n_in): 1 @ [r, 2r+phase]
        r = lax.broadcasted_iota(jnp.int32, (n_out, n_in), 0)
        c = lax.broadcasted_iota(jnp.int32, (n_out, n_in), 1)
        return (c == 2 * r + phase).astype(f32)

    def sel_cols(n_in, n_out, phase):          # (n_in, n_out): 1 @ [2c+phase, c]
        r = lax.broadcasted_iota(jnp.int32, (n_in, n_out), 0)
        c = lax.broadcasted_iota(jnp.int32, (n_in, n_out), 1)
        return (r == 2 * c + phase).astype(f32)

    sh28 = (sel_rows(14, 28, 0), sel_rows(14, 28, 1))
    sw28 = (sel_cols(28, 14, 0), sel_cols(28, 14, 1))
    sh14 = (sel_rows(7, 14, 0), sel_rows(7, 14, 1))
    sw14 = (sel_cols(14, 7, 0), sel_cols(14, 7, 1))

    def pool2x2(a, sh, sw):
        # rows: max(even rows, odd rows); cols: max(even cols, odd cols)
        hmax = jnp.maximum(jnp.dot(sh[0], a, preferred_element_type=f32),
                           jnp.dot(sh[1], a, preferred_element_type=f32))
        return jnp.maximum(jnp.dot(hmax, sw[0], preferred_element_type=f32),
                           jnp.dot(hmax, sw[1], preferred_element_type=f32))

    # ---- zero-padded conv1 input (30, 30) ----------------------------------
    xp1_ref[...] = jnp.zeros(xp1_ref.shape, f32)
    xp1_ref[1:29, 1:29] = x_ref[...][0]

    # ---- zero-padded conv2 input: 6 channels packed along lanes (16, 6*16) --
    xp2_ref[...] = jnp.zeros(xp2_ref.shape, f32)

    # ---- conv1 (1->6) + ReLU + 2x2 max-pool, banded-matmul formulation ------
    m1 = m1_ref[...]                     # (6, 3, 30, 28) banded weight matrices
    b1 = b1_ref[...]                     # (1, 6)
    for oc in range(6):
        acc = jnp.zeros((28, 28), f32)
        for ki in range(3):
            acc = acc + jnp.dot(xp1_ref[ki:ki + 28, :], m1[oc, ki],
                                preferred_element_type=f32)
        acc = jnp.maximum(acc + b1[0, oc], 0.0)
        pooled = pool2x2(acc, sh28, sw28)                     # (14, 14)
        # write straight into conv2's padded input (interior of its 16-block)
        xp2_ref[1:15, oc * 16 + 1: oc * 16 + 15] = pooled

    # ---- conv2 (6->12) + ReLU + 2x2 max-pool -> flat (7, 84) ----------------
    m2 = m2_ref[...]                     # (12, 3, 96, 14) banded weight matrices
    b2 = b2_ref[...]                     # (1, 12)
    flat_cols = []
    for oc in range(12):
        acc = jnp.zeros((14, 14), f32)
        for ki in range(3):
            acc = acc + jnp.dot(xp2_ref[ki:ki + 14, :], m2[oc, ki],
                                preferred_element_type=f32)
        acc = jnp.maximum(acc + b2[0, oc], 0.0)
        flat_cols.append(pool2x2(acc, sh14, sw14))            # (7, 7)
    flat = jnp.concatenate(flat_cols, axis=-1)                # (7, 84): [h, oc*7+w]

    # ---- FC1 (588 -> 120) + ReLU: 7 lane-dense (1,84)@(84,120) matmuls ------
    wf1 = wf1_ref[...]                   # (7, 84, 120)
    fc1 = jnp.zeros((1, 120), f32)
    for h in range(7):
        fc1 = fc1 + jnp.dot(flat[h:h + 1, :], wf1[h],
                            preferred_element_type=f32)
    fc1 = jnp.maximum(fc1 + bf1_ref[...], 0.0)                # (1, 120)

    # ---- FC2 (120 -> 10) ----------------------------------------------------
    out = jnp.dot(fc1, wf2_ref[...], preferred_element_type=f32) + bf2_ref[...]
    o_ref[...] = out.reshape(o_ref.shape)                     # (1, 1, 10)


def digits_forward(x, kparams):
    """x: (B, 1, 28, 28) float32; kparams from prepare_params()."""
    m1, b1, m2, b2, wf1r, bf1, wf2t, bf2 = kparams
    B = x.shape[0]
    x3 = x.reshape(B, 28, 28).astype(jnp.float32)

    def const_spec(a):
        nd = a.ndim
        return pl.BlockSpec(a.shape, lambda b, _nd=nd: (0,) * _nd)

    out = pl.pallas_call(
        _digits_kernel,
        out_shape=jax.ShapeDtypeStruct((B, 1, 10), jnp.float32),
        grid=(B,),
        in_specs=[
            pl.BlockSpec((1, 28, 28), lambda b: (b, 0, 0)),   # x (per sample)
            const_spec(m1),    # conv1 banded weights (6, 3, 30, 28)
            const_spec(b1),    # conv1 bias           (1, 6)
            const_spec(m2),    # conv2 banded weights (12, 3, 96, 14)
            const_spec(b2),    # conv2 bias           (1, 12)
            const_spec(wf1r),  # fc1 weight           (7, 84, 120)
            const_spec(bf1),   # fc1 bias             (1, 120)
            const_spec(wf2t),  # fc2 weight           (120, 10)
            const_spec(bf2),   # fc2 bias             (1, 10)
        ],
        out_specs=pl.BlockSpec((1, 1, 10), lambda b: (b, 0, 0)),
        scratch_shapes=[
            pltpu.VMEM((30, 30), jnp.float32),   # padded conv1 input
            pltpu.VMEM((16, 96), jnp.float32),   # padded conv2 input (6 ch x 16)
        ],
    )(x3, m1, b1, m2, b2, wf1r, bf1, wf2t, bf2)
    return out.reshape(B, 10)


# ---------------------------------------------------------------------------
# Parameters (PyTorch layout) and one-time kernel-layout preparation
# ---------------------------------------------------------------------------
def init_params(key):
    ks = jax.random.split(key, 8)

    def u(k, shape, fan_in):
        bound = 1.0 / jnp.sqrt(float(fan_in))
        return jax.random.uniform(k, shape, jnp.float32, -bound, bound)

    w1 = u(ks[0], (6, 1, 3, 3), 1 * 9)
    b1 = u(ks[1], (6,), 1 * 9)
    w2 = u(ks[2], (12, 6, 3, 3), 6 * 9)
    b2 = u(ks[3], (12,), 6 * 9)
    wf1 = u(ks[4], (120, 7 * 7 * 12), 7 * 7 * 12)
    bf1 = u(ks[5], (120,), 7 * 7 * 12)
    wf2 = u(ks[6], (10, 120), 120)
    bf2 = u(ks[7], (10,), 120)
    return (w1, b1, w2, b2, wf1, bf1, wf2, bf2)


def prepare_params(params):
    """One-time host-side rearrangement of PyTorch-layout weights into the
    kernel layout (banded conv matrices, transposed FC weights)."""
    w1, b1, w2, b2, wf1, bf1, wf2, bf2 = (np.asarray(p) for p in params)

    # conv1: m1[oc, ki, j+kj, j] = w1[oc, 0, ki, kj]
    #   -> out_row = padded_row_slice(28,30) @ m1[oc, ki]
    m1 = np.zeros((6, 3, 30, 28), np.float32)
    for oc in range(6):
        for ki in range(3):
            for kj in range(3):
                for j in range(28):
                    m1[oc, ki, j + kj, j] = w1[oc, 0, ki, kj]

    # conv2 input is lane-packed: column ic*16 + q holds padded channel ic, col q.
    # m2[oc, ki, ic*16 + j + kj, j] = w2[oc, ic, ki, kj]
    m2 = np.zeros((12, 3, 96, 14), np.float32)
    for oc in range(12):
        for ic in range(6):
            for ki in range(3):
                for kj in range(3):
                    for j in range(14):
                        m2[oc, ki, ic * 16 + j + kj, j] = w2[oc, ic, ki, kj]

    # wf1[j, c*49 + h*7 + w]  ->  wf1r[h, c*7 + w, j]
    wf1r = wf1.reshape(120, 12, 7, 7).transpose(2, 1, 3, 0).reshape(7, 84, 120)

    return (jnp.asarray(m1), jnp.asarray(b1).reshape(1, 6),
            jnp.asarray(m2), jnp.asarray(b2).reshape(1, 12),
            jnp.asarray(wf1r), jnp.asarray(bf1).reshape(1, 120),
            jnp.asarray(wf2.T), jnp.asarray(bf2).reshape(1, 10))


# ---------------------------------------------------------------------------
# Pure-JAX reference (same math as the PyTorch module)
# ---------------------------------------------------------------------------
def reference_forward(x, params):
    w1, b1, w2, b2, wf1, bf1, wf2, bf2 = params
    dn = ("NCHW", "OIHW", "NCHW")
    y = jax.lax.conv_general_dilated(x, w1, (1, 1), ((1, 1), (1, 1)),
                                     dimension_numbers=dn)
    y = jnp.maximum(y + b1[None, :, None, None], 0.0)
    y = jax.lax.reduce_window(y, -jnp.inf, jax.lax.max,
                              (1, 1, 2, 2), (1, 1, 2, 2), "VALID")
    y = jax.lax.conv_general_dilated(y, w2, (1, 1), ((1, 1), (1, 1)),
                                     dimension_numbers=dn)
    y = jnp.maximum(y + b2[None, :, None, None], 0.0)
    y = jax.lax.reduce_window(y, -jnp.inf, jax.lax.max,
                              (1, 1, 2, 2), (1, 1, 2, 2), "VALID")
    y = y.reshape(y.shape[0], -1)
    y = jnp.maximum(y @ wf1.T + bf1, 0.0)
    return y @ wf2.T + bf2


if __name__ == "__main__":
    key = jax.random.PRNGKey(0)
    kx, kp = jax.random.split(key)
    # MNIST-style digits input (NCHW): 28x28 so two 2x2 pools give 7x7 for
    # Linear(7*7*12, 120); small batch.
    x = jax.random.normal(kx, (2, 1, 28, 28), jnp.float32)
    params = init_params(kp)
    kparams = prepare_params(params)          # one-time weight re-layout

    fwd = jax.jit(digits_forward)
    out = jax.block_until_ready(fwd(x, kparams))
    ref = jax.block_until_ready(reference_forward(x, params))

    assert out.shape == (2, 10), out.shape
    assert jnp.allclose(out, ref, rtol=1e-4, atol=1e-4), \
        float(jnp.max(jnp.abs(out - ref)))
    print("KERNEL_OK")
</pallas_src>

<mosaic_0001>
module attributes {stable_mosaic.version = 11 : i64} {
  func.func @_digits_kernel(%arg0: i32, %arg1: memref<1x28x28xf32, #tpu.memory_space<vmem>>, %arg2: memref<6x3x30x28xf32, #tpu.memory_space<vmem>>, %arg3: memref<1x6xf32, #tpu.memory_space<vmem>>, %arg4: memref<12x3x96x14xf32, #tpu.memory_space<vmem>>, %arg5: memref<1x12xf32, #tpu.memory_space<vmem>>, %arg6: memref<7x84x120xf32, #tpu.memory_space<vmem>>, %arg7: memref<1x120xf32, #tpu.memory_space<vmem>>, %arg8: memref<120x10xf32, #tpu.memory_space<vmem>>, %arg9: memref<1x10xf32, #tpu.memory_space<vmem>>, %arg10: memref<1x1x10xf32, #tpu.memory_space<vmem>>, %arg11: memref<30x30xf32, #tpu.memory_space<vmem>>, %arg12: memref<16x96xf32, #tpu.memory_space<vmem>>) attributes {dimension_semantics = [#tpu.dimension_semantics<arbitrary>], iteration_bounds = array<i64: 2>, scalar_prefetch = 0 : i64, scratch_operands = 2 : i64, tpu.core_type = #tpu.core_type<tc>, window_params = [{transform_indices = @transform_0, window_bounds = array<i64: 1, 28, 28>}, {pipeline_mode = #tpu.pipeline_mode<synchronous>, transform_indices = @transform_1, window_bounds = array<i64: 6, 3, 30, 28>}, {pipeline_mode = #tpu.pipeline_mode<synchronous>, transform_indices = @transform_2, window_bounds = array<i64: 1, 6>}, {pipeline_mode = #tpu.pipeline_mode<synchronous>, transform_indices = @transform_3, window_bounds = array<i64: 12, 3, 96, 14>}, {pipeline_mode = #tpu.pipeline_mode<synchronous>, transform_indices = @transform_4, window_bounds = array<i64: 1, 12>}, {pipeline_mode = #tpu.pipeline_mode<synchronous>, transform_indices = @transform_5, window_bounds = array<i64: 7, 84, 120>}, {pipeline_mode = #tpu.pipeline_mode<synchronous>, transform_indices = @transform_6, window_bounds = array<i64: 1, 120>}, {pipeline_mode = #tpu.pipeline_mode<synchronous>, transform_indices = @transform_7, window_bounds = array<i64: 120, 10>}, {pipeline_mode = #tpu.pipeline_mode<synchronous>, transform_indices = @transform_8, window_bounds = array<i64: 1, 10>}, {transform_indices = @transform_9, window_bounds = array<i64: 1, 1, 10>}]} {
    %0 = tpu.iota {dimensions = array<i32: 0>} : vector<14x28xi32>
    %1 = tpu.iota {dimensions = array<i32: 1>} : vector<14x28xi32>
    %c2_i32 = arith.constant 2 : i32
    %2 = vector.broadcast %c2_i32 : i32 to vector<14x28xi32>
    %3 = arith.muli %2, %0 : vector<14x28xi32>
    %c0_i32 = arith.constant 0 : i32
    %4 = vector.broadcast %c0_i32 : i32 to vector<14x28xi32>
    %5 = arith.addi %3, %4 : vector<14x28xi32>
    %6 = arith.cmpi eq, %1, %5 : vector<14x28xi32>
    %7 = arith.extui %6 : vector<14x28xi1> to vector<14x28xi32>
    %8 = arith.sitofp %7 : vector<14x28xi32> to vector<14x28xf32>
    %9 = tpu.iota {dimensions = array<i32: 0>} : vector<14x28xi32>
    %10 = tpu.iota {dimensions = array<i32: 1>} : vector<14x28xi32>
    %c2_i32_0 = arith.constant 2 : i32
    %11 = vector.broadcast %c2_i32_0 : i32 to vector<14x28xi32>
    %12 = arith.muli %11, %9 : vector<14x28xi32>
    %c1_i32 = arith.constant 1 : i32
    %13 = vector.broadcast %c1_i32 : i32 to vector<14x28xi32>
    %14 = arith.addi %12, %13 : vector<14x28xi32>
    %15 = arith.cmpi eq, %10, %14 : vector<14x28xi32>
    %16 = arith.extui %15 : vector<14x28xi1> to vector<14x28xi32>
    %17 = arith.sitofp %16 : vector<14x28xi32> to vector<14x28xf32>
    %18 = tpu.iota {dimensions = array<i32: 0>} : vector<28x14xi32>
    %19 = tpu.iota {dimensions = array<i32: 1>} : vector<28x14xi32>
    %c2_i32_1 = arith.constant 2 : i32
    %20 = vector.broadcast %c2_i32_1 : i32 to vector<28x14xi32>
    %21 = arith.muli %20, %19 : vector<28x14xi32>
    %c0_i32_2 = arith.constant 0 : i32
    %22 = vector.broadcast %c0_i32_2 : i32 to vector<28x14xi32>
    %23 = arith.addi %21, %22 : vector<28x14xi32>
    %24 = arith.cmpi eq, %18, %23 : vector<28x14xi32>
    %25 = arith.extui %24 : vector<28x14xi1> to vector<28x14xi32>
    %26 = arith.sitofp %25 : vector<28x14xi32> to vector<28x14xf32>
    %27 = tpu.iota {dimensions = array<i32: 0>} : vector<28x14xi32>
    %28 = tpu.iota {dimensions = array<i32: 1>} : vector<28x14xi32>
    %c2_i32_3 = arith.constant 2 : i32
    %29 = vector.broadcast %c2_i32_3 : i32 to vector<28x14xi32>
    %30 = arith.muli %29, %28 : vector<28x14xi32>
    %c1_i32_4 = arith.constant 1 : i32
    %31 = vector.broadcast %c1_i32_4 : i32 to vector<28x14xi32>
    %32 = arith.addi %30, %31 : vector<28x14xi32>
    %33 = arith.cmpi eq, %27, %32 : vector<28x14xi32>
    %34 = arith.extui %33 : vector<28x14xi1> to vector<28x14xi32>
    %35 = arith.sitofp %34 : vector<28x14xi32> to vector<28x14xf32>
    %36 = tpu.iota {dimensions = array<i32: 0>} : vector<7x14xi32>
    %37 = tpu.iota {dimensions = array<i32: 1>} : vector<7x14xi32>
    %c2_i32_5 = arith.constant 2 : i32
    %38 = vector.broadcast %c2_i32_5 : i32 to vector<7x14xi32>
    %39 = arith.muli %38, %36 : vector<7x14xi32>
    %c0_i32_6 = arith.constant 0 : i32
    %40 = vector.broadcast %c0_i32_6 : i32 to vector<7x14xi32>
    %41 = arith.addi %39, %40 : vector<7x14xi32>
    %42 = arith.cmpi eq, %37, %41 : vector<7x14xi32>
    %43 = arith.extui %42 : vector<7x14xi1> to vector<7x14xi32>
    %44 = arith.sitofp %43 : vector<7x14xi32> to vector<7x14xf32>
    %45 = tpu.iota {dimensions = array<i32: 0>} : vector<7x14xi32>
    %46 = tpu.iota {dimensions = array<i32: 1>} : vector<7x14xi32>
    %c2_i32_7 = arith.constant 2 : i32
    %47 = vector.broadcast %c2_i32_7 : i32 to vector<7x14xi32>
    %48 = arith.muli %47, %45 : vector<7x14xi32>
    %c1_i32_8 = arith.constant 1 : i32
    %49 = vector.broadcast %c1_i32_8 : i32 to vector<7x14xi32>
    %50 = arith.addi %48, %49 : vector<7x14xi32>
    %51 = arith.cmpi eq, %46, %50 : vector<7x14xi32>
    %52 = arith.extui %51 : vector<7x14xi1> to vector<7x14xi32>
    %53 = arith.sitofp %52 : vector<7x14xi32> to vector<7x14xf32>
    %54 = tpu.iota {dimensions = array<i32: 0>} : vector<14x7xi32>
    %55 = tpu.iota {dimensions = array<i32: 1>} : vector<14x7xi32>
    %c2_i32_9 = arith.constant 2 : i32
    %56 = vector.broadcast %c2_i32_9 : i32 to vector<14x7xi32>
    %57 = arith.muli %56, %55 : vector<14x7xi32>
    %c0_i32_10 = arith.constant 0 : i32
    %58 = vector.broadcast %c0_i32_10 : i32 to vector<14x7xi32>
    %59 = arith.addi %57, %58 : vector<14x7xi32>
    %60 = arith.cmpi eq, %54, %59 : vector<14x7xi32>
    %61 = arith.extui %60 : vector<14x7xi1> to vector<14x7xi32>
    %62 = arith.sitofp %61 : vector<14x7xi32> to vector<14x7xf32>
    %63 = tpu.iota {dimensions = array<i32: 0>} : vector<14x7xi32>
    %64 = tpu.iota {dimensions = array<i32: 1>} : vector<14x7xi32>
    %c2_i32_11 = arith.constant 2 : i32
    %65 = vector.broadcast %c2_i32_11 : i32 to vector<14x7xi32>
    %66 = arith.muli %65, %64 : vector<14x7xi32>
    %c1_i32_12 = arith.constant 1 : i32
    %67 = vector.broadcast %c1_i32_12 : i32 to vector<14x7xi32>
    %68 = arith.addi %66, %67 : vector<14x7xi32>
    %69 = arith.cmpi eq, %63, %68 : vector<14x7xi32>
    %70 = arith.extui %69 : vector<14x7xi1> to vector<14x7xi32>
    %71 = arith.sitofp %70 : vector<14x7xi32> to vector<14x7xf32>
    %cst = arith.constant 0.000000e+00 : f32
    %72 = vector.broadcast %cst : f32 to vector<30x30xf32>
    %c0 = arith.constant 0 : index
    %c0_13 = arith.constant 0 : index
    %73 = vector.load %arg11[%c0, %c0_13] : memref<30x30xf32, #tpu.memory_space<vmem>>, vector<30x30xf32>
    tpu.vector_store %arg11[%c0, %c0_13], %72 {strides = array<i32>} : memref<30x30xf32, #tpu.memory_space<vmem>>, vector<30x30xf32>,
    %c0_14 = arith.constant 0 : index
    %c0_15 = arith.constant 0 : index
    %c0_16 = arith.constant 0 : index
    %74 = vector.load %arg1[%c0_14, %c0_15, %c0_16] : memref<1x28x28xf32, #tpu.memory_space<vmem>>, vector<1x28x28xf32>
    %75 = vector.shape_cast %74 : vector<1x28x28xf32> to vector<28x28xf32>
    %c1 = arith.constant 1 : index
    %c1_17 = arith.constant 1 : index
    %76 = vector.load %arg11[%c1, %c1_17] : memref<30x30xf32, #tpu.memory_space<vmem>>, vector<28x28xf32>
    tpu.vector_store %arg11[%c1, %c1_17], %75 {strides = array<i32>} : memref<30x30xf32, #tpu.memory_space<vmem>>, vector<28x28xf32>,
    %cst_18 = arith.constant 0.000000e+00 : f32
    %77 = vector.broadcast %cst_18 : f32 to vector<16x96xf32>
    %c0_19 = arith.constant 0 : index
    %c0_20 = arith.constant 0 : index
    %78 = vector.load %arg12[%c0_19, %c0_20] : memref<16x96xf32, #tpu.memory_space<vmem>>, vector<16x96xf32>
    tpu.vector_store %arg12[%c0_19, %c0_20], %77 {strides = array<i32>} : memref<16x96xf32, #tpu.memory_space<vmem>>, vector<16x96xf32>,
    %c0_21 = arith.constant 0 : index
    %c0_22 = arith.constant 0 : index
    %c0_23 = arith.constant 0 : index
    %c0_24 = arith.constant 0 : index
    %79 = vector.load %arg2[%c0_21, %c0_22, %c0_23, %c0_24] : memref<6x3x30x28xf32, #tpu.memory_space<vmem>>, vector<6x3x30x28xf32>
    %c0_25 = arith.constant 0 : index
    %c0_26 = arith.constant 0 : index
    %80 = vector.load %arg3[%c0_25, %c0_26] : memref<1x6xf32, #tpu.memory_space<vmem>>, vector<1x6xf32>
    %cst_27 = arith.constant 0.000000e+00 : f32
    %81 = vector.broadcast %cst_27 : f32 to vector<28x28xf32>
    %c0_28 = arith.constant 0 : index
    %c0_29 = arith.constant 0 : index
    %82 = vector.load %arg11[%c0_28, %c0_29] : memref<30x30xf32, #tpu.memory_space<vmem>>, vector<28x30xf32>
    %83 = vector.extract_strided_slice %79 {offsets = [0, 0, 0, 0], sizes = [1, 1, 30, 28], strides = [1, 1, 1, 1]} : vector<6x3x30x28xf32> to vector<1x1x30x28xf32>
    %84 = vector.shape_cast %83 : vector<1x1x30x28xf32> to vector<30x28xf32>
    %cst_30 = arith.constant dense<0.000000e+00> : vector<28x28xf32>
    %85 = tpu.matmul %82, %84, %cst_30 {dimension_numbers = #tpu.dot_dimension_numbers<[1], [0], [0], [1], [0, 0, 1, 1], [], []>} : vector<28x30xf32>, vector<30x28xf32>, vector<28x28xf32> -> vector<28x28xf32>
    %86 = arith.addf %81, %85 : vector<28x28xf32>
    %c1_31 = arith.constant 1 : index
    %c0_32 = arith.constant 0 : index
    %87 = vector.load %arg11[%c1_31, %c0_32] : memref<30x30xf32, #tpu.memory_space<vmem>>, vector<28x30xf32>
    %88 = vector.extract_strided_slice %79 {offsets = [0, 1, 0, 0], sizes = [1, 1, 30, 28], strides = [1, 1, 1, 1]} : vector<6x3x30x28xf32> to vector<1x1x30x28xf32>
    %89 = vector.shape_cast %88 : vector<1x1x30x28xf32> to vector<30x28xf32>
    %cst_33 = arith.constant dense<0.000000e+00> : vector<28x28xf32>
    %90 = tpu.matmul %87, %89, %cst_33 {dimension_numbers = #tpu.dot_dimension_numbers<[1], [0], [0], [1], [0, 0, 1, 1], [], []>} : vector<28x30xf32>, vector<30x28xf32>, vector<28x28xf32> -> vector<28x28xf32>
    %91 = arith.addf %86, %90 : vector<28x28xf32>
    %c2 = arith.constant 2 : index
    %c0_34 = arith.constant 0 : index
    %92 = vector.load %arg11[%c2, %c0_34] : memref<30x30xf32, #tpu.memory_space<vmem>>, vector<28x30xf32>
    %93 = vector.extract_strided_slice %79 {offsets = [0, 2, 0, 0], sizes = [1, 1, 30, 28], strides = [1, 1, 1, 1]} : vector<6x3x30x28xf32> to vector<1x1x30x28xf32>
    %94 = vector.shape_cast %93 : vector<1x1x30x28xf32> to vector<30x28xf32>
    %cst_35 = arith.constant dense<0.000000e+00> : vector<28x28xf32>
    %95 = tpu.matmul %92, %94, %cst_35 {dimension_numbers = #tpu.dot_dimension_numbers<[1], [0], [0], [1], [0, 0, 1, 1], [], []>} : vector<28x30xf32>, vector<30x28xf32>, vector<28x28xf32> -> vector<28x28xf32>
    %96 = arith.addf %91, %95 : vector<28x28xf32>
    %97 = vector.extract_strided_slice %80 {offsets = [0, 0], sizes = [1, 1], strides = [1, 1]} : vector<1x6xf32> to vector<1x1xf32>
    %98 = vector.extract %97[0, 0] : f32 from vector<1x1xf32>
    %99 = vector.broadcast %98 : f32 to vector<28x28xf32>
    %100 = arith.addf %96, %99 : vector<28x28xf32>
    %cst_36 = arith.constant 0.000000e+00 : f32
    %101 = vector.broadcast %cst_36 : f32 to vector<28x28xf32>
    %102 = arith.maximumf %100, %101 : vector<28x28xf32>
    %cst_37 = arith.constant dense<0.000000e+00> : vector<14x28xf32>
    %103 = tpu.matmul %8, %102, %cst_37 {dimension_numbers = #tpu.dot_dimension_numbers<[1], [0], [0], [1], [0, 0, 1, 1], [], []>} : vector<14x28xf32>, vector<28x28xf32>, vector<14x28xf32> -> vector<14x28xf32>
    %cst_38 = arith.constant dense<0.000000e+00> : vector<14x28xf32>
    %104 = tpu.matmul %17, %102, %cst_38 {dimension_numbers = #tpu.dot_dimension_numbers<[1], [0], [0], [1], [0, 0, 1, 1], [], []>} : vector<14x28xf32>, vector<28x28xf32>, vector<14x28xf32> -> vector<14x28xf32>
    %105 = arith.maximumf %103, %104 : vector<14x28xf32>
    %cst_39 = arith.constant dense<0.000000e+00> : vector<14x14xf32>
    %106 = tpu.matmul %105, %26, %cst_39 {dimension_numbers = #tpu.dot_dimension_numbers<[1], [0], [0], [1], [0, 0, 1, 1], [], []>} : vector<14x28xf32>, vector<28x14xf32>, vector<14x14xf32> -> vector<14x14xf32>
    %cst_40 = arith.constant dense<0.000000e+00> : vector<14x14xf32>
    %107 = tpu.matmul %105, %35, %cst_40 {dimension_numbers = #tpu.dot_dimension_numbers<[1], [0], [0], [1], [0, 0, 1, 1], [], []>} : vector<14x28xf32>, vector<28x14xf32>, vector<14x14xf32> -> vector<14x14xf32>
    %108 = arith.maximumf %106, %107 : vector<14x14xf32>
    %c1_41 = arith.constant 1 : index
    %c1_42 = arith.constant 1 : index
    %109 = vector.load %arg12[%c1_41, %c1_42] : memref<16x96xf32, #tpu.memory_space<vmem>>, vector<14x14xf32>
    tpu.vector_store %arg12[%c1_41, %c1_42], %108 {strides = array<i32>} : memref<16x96xf32, #tpu.memory_space<vmem>>, vector<14x14xf32>,
    %cst_43 = arith.constant 0.000000e+00 : f32
    %110 = vector.broadcast %cst_43 : f32 to vector<28x28xf32>
    %c0_44 = arith.constant 0 : index
    %c0_45 = arith.constant 0 : index
    %111 = vector.load %arg11[%c0_44, %c0_45] : memref<30x30xf32, #tpu.memory_space<vmem>>, vector<28x30xf32>
    %112 = vector.extract_strided_slice %79 {offsets = [1, 0, 0, 0], sizes = [1, 1, 30, 28], strides = [1, 1, 1, 1]} : vector<6x3x30x28xf32> to vector<1x1x30x28xf32>
    %113 = vector.shape_cast %112 : vector<1x1x30x28xf32> to vector<30x28xf32>
    %cst_46 = arith.constant dense<0.000000e+00> : vector<28x28xf32>
    %114 = tpu.matmul %111, %113, %cst_46 {dimension_numbers = #tpu.dot_dimension_numbers<[1], [0], [0], [1], [0, 0, 1, 1], [], []>} : vector<28x30xf32>, vector<30x28xf32>, vector<28x28xf32> -> vector<28x28xf32>
    %115 = arith.addf %110, %114 : vector<28x28xf32>
    %c1_47 = arith.constant 1 : index
    %c0_48 = arith.constant 0 : index
    %116 = vector.load %arg11[%c1_47, %c0_48] : memref<30x30xf32, #tpu.memory_space<vmem>>, vector<28x30xf32>
    %117 = vector.extract_strided_slice %79 {offsets = [1, 1, 0, 0], sizes = [1, 1, 30, 28], strides = [1, 1, 1, 1]} : vector<6x3x30x28xf32> to vector<1x1x30x28xf32>
    %118 = vector.shape_cast %117 : vector<1x1x30x28xf32> to vector<30x28xf32>
    %cst_49 = arith.constant dense<0.000000e+00> : vector<28x28xf32>
    %119 = tpu.matmul %116, %118, %cst_49 {dimension_numbers = #tpu.dot_dimension_numbers<[1], [0], [0], [1], [0, 0, 1, 1], [], []>} : vector<28x30xf32>, vector<30x28xf32>, vector<28x28xf32> -> vector<28x28xf32>
    %120 = arith.addf %115, %119 : vector<28x28xf32>
    %c2_50 = arith.constant 2 : index
    %c0_51 = arith.constant 0 : index
    %121 = vector.load %arg11[%c2_50, %c0_51] : memref<30x30xf32, #tpu.memory_space<vmem>>, vector<28x30xf32>
    %122 = vector.extract_strided_slice %79 {offsets = [1, 2, 0, 0], sizes = [1, 1, 30, 28], strides = [1, 1, 1, 1]} : vector<6x3x30x28xf32> to vector<1x1x30x28xf32>
    %123 = vector.shape_cast %122 : vector<1x1x30x28xf32> to vector<30x28xf32>
    %cst_52 = arith.constant dense<0.000000e+00> : vector<28x28xf32>
    %124 = tpu.matmul %121, %123, %cst_52 {dimension_numbers = #tpu.dot_dimension_numbers<[1], [0], [0], [1], [0, 0, 1, 1], [], []>} : vector<28x30xf32>, vector<30x28xf32>, vector<28x28xf32> -> vector<28x28xf32>
    %125 = arith.addf %120, %124 : vector<28x28xf32>
    %126 = vector.extract_strided_slice %80 {offsets = [0, 1], sizes = [1, 1], strides = [1, 1]} : vector<1x6xf32> to vector<1x1xf32>
    %127 = vector.extract %126[0, 0] : f32 from vector<1x1xf32>
    %128 = vector.broadcast %127 : f32 to vector<28x28xf32>
    %129 = arith.addf %125, %128 : vector<28x28xf32>
    %cst_53 = arith.constant 0.000000e+00 : f32
    %130 = vector.broadcast %cst_53 : f32 to vector<28x28xf32>
    %131 = arith.maximumf %129, %130 : vector<28x28xf32>
    %cst_54 = arith.constant dense<0.000000e+00> : vector<14x28xf32>
    %132 = tpu.matmul %8, %131, %cst_54 {dimension_numbers = #tpu.dot_dimension_numbers<[1], [0], [0], [1], [0, 0, 1, 1], [], []>} : vector<14x28xf32>, vector<28x28xf32>, vector<14x28xf32> -> vector<14x28xf32>
    %cst_55 = arith.constant dense<0.000000e+00> : vector<14x28xf32>
    %133 = tpu.matmul %17, %131, %cst_55 {dimension_numbers = #tpu.dot_dimension_numbers<[1], [0], [0], [1], [0, 0, 1, 1], [], []>} : vector<14x28xf32>, vector<28x28xf32>, vector<14x28xf32> -> vector<14x28xf32>
    %134 = arith.maximumf %132, %133 : vector<14x28xf32>
    %cst_56 = arith.constant dense<0.000000e+00> : vector<14x14xf32>
    %135 = tpu.matmul %134, %26, %cst_56 {dimension_numbers = #tpu.dot_dimension_numbers<[1], [0], [0], [1], [0, 0, 1, 1], [], []>} : vector<14x28xf32>, vector<28x14xf32>, vector<14x14xf32> -> vector<14x14xf32>
    %cst_57 = arith.constant dense<0.000000e+00> : vector<14x14xf32>
    %136 = tpu.matmul %134, %35, %cst_57 {dimension_numbers = #tpu.dot_dimension_numbers<[1], [0], [0], [1], [0, 0, 1, 1], [], []>} : vector<14x28xf32>, vector<28x14xf32>, vector<14x14xf32> -> vector<14x14xf32>
    %137 = arith.maximumf %135, %136 : vector<14x14xf32>
    %c1_58 = arith.constant 1 : index
    %c17 = arith.constant 17 : index
    %138 = vector.load %arg12[%c1_58, %c17] : memref<16x96xf32, #tpu.memory_space<vmem>>, vector<14x14xf32>
    tpu.vector_store %arg12[%c1_58, %c17], %137 {strides = array<i32>} : memref<16x96xf32, #tpu.memory_space<vmem>>, vector<14x14xf32>,
    %cst_59 = arith.constant 0.000000e+00 : f32
    %139 = vector.broadcast %cst_59 : f32 to vector<28x28xf32>
    %c0_60 = arith.constant 0 : index
    %c0_61 = arith.constant 0 : index
    %140 = vector.load %arg11[%c0_60, %c0_61] : memref<30x30xf32, #tpu.memory_space<vmem>>, vector<28x30xf32>
    %141 = vector.extract_strided_slice %79 {offsets = [2, 0, 0, 0], sizes = [1, 1, 30, 28], strides = [1, 1, 1, 1]} : vector<6x3x30x28xf32> to vector<1x1x30x28xf32>
    %142 = vector.shape_cast %141 : vector<1x1x30x28xf32> to vector<30x28xf32>
    %cst_62 = arith.constant dense<0.000000e+00> : vector<28x28xf32>
    %143 = tpu.matmul %140, %142, %cst_62 {dimension_numbers = #tpu.dot_dimension_numbers<[1], [0], [0], [1], [0, 0, 1, 1], [], []>} : vector<28x30xf32>, vector<30x28xf32>, vector<28x28xf32> -> vector<28x28xf32>
    %144 = arith.addf %139, %143 : vector<28x28xf32>
    %c1_63 = arith.constant 1 : index
    %c0_64 = arith.constant 0 : index
    %145 = vector.load %arg11[%c1_63, %c0_64] : memref<30x30xf32, #tpu.memory_space<vmem>>, vector<28x30xf32>
    %146 = vector.extract_strided_slice %79 {offsets = [2, 1, 0, 0], sizes = [1, 1, 30, 28], strides = [1, 1, 1, 1]} : vector<6x3x30x28xf32> to vector<1x1x30x28xf32>
    %147 = vector.shape_cast %146 : vector<1x1x30x28xf32> to vector<30x28xf32>
    %cst_65 = arith.constant dense<0.000000e+00> : vector<28x28xf32>
    %148 = tpu.matmul %145, %147, %cst_65 {dimension_numbers = #tpu.dot_dimension_numbers<[1], [0], [0], [1], [0, 0, 1, 1], [], []>} : vector<28x30xf32>, vector<30x28xf32>, vector<28x28xf32> -> vector<28x28xf32>
    %149 = arith.addf %144, %148 : vector<28x28xf32>
    %c2_66 = arith.constant 2 : index
    %c0_67 = arith.constant 0 : index
    %150 = vector.load %arg11[%c2_66, %c0_67] : memref<30x30xf32, #tpu.memory_space<vmem>>, vector<28x30xf32>
    %151 = vector.extract_strided_slice %79 {offsets = [2, 2, 0, 0], sizes = [1, 1, 30, 28], strides = [1, 1, 1, 1]} : vector<6x3x30x28xf32> to vector<1x1x30x28xf32>
    %152 = vector.shape_cast %151 : vector<1x1x30x28xf32> to vector<30x28xf32>
    %cst_68 = arith.constant dense<0.000000e+00> : vector<28x28xf32>
    %153 = tpu.matmul %150, %152, %cst_68 {dimension_numbers = #tpu.dot_dimension_numbers<[1], [0], [0], [1], [0, 0, 1, 1], [], []>} : vector<28x30xf32>, vector<30x28xf32>, vector<28x28xf32> -> vector<28x28xf32>
    %154 = arith.addf %149, %153 : vector<28x28xf32>
    %155 = vector.extract_strided_slice %80 {offsets = [0, 2], sizes = [1, 1], strides = [1, 1]} : vector<1x6xf32> to vector<1x1xf32>
    %156 = vector.extract %155[0, 0] : f32 from vector<1x1xf32>
    %157 = vector.broadcast %156 : f32 to vector<28x28xf32>
    %158 = arith.addf %154, %157 : vector<28x28xf32>
    %cst_69 = arith.constant 0.000000e+00 : f32
    %159 = vector.broadcast %cst_69 : f32 to vector<28x28xf32>
    %160 = arith.maximumf %158, %159 : vector<28x28xf32>
    %cst_70 = arith.constant dense<0.000000e+00> : vector<14x28xf32>
    %161 = tpu.matmul %8, %160, %cst_70 {dimension_numbers = #tpu.dot_dimension_numbers<[1], [0], [0], [1], [0, 0, 1, 1], [], []>} : vector<14x28xf32>, vector<28x28xf32>, vector<14x28xf32> -> vector<14x28xf32>
    %cst_71 = arith.constant dense<0.000000e+00> : vector<14x28xf32>
    %162 = tpu.matmul %17, %160, %cst_71 {dimension_numbers = #tpu.dot_dimension_numbers<[1], [0], [0], [1], [0, 0, 1, 1], [], []>} : vector<14x28xf32>, vector<28x28xf32>, vector<14x28xf32> -> vector<14x28xf32>
    %163 = arith.maximumf %161, %162 : vector<14x28xf32>
    %cst_72 = arith.constant dense<0.000000e+00> : vector<14x14xf32>
    %164 = tpu.matmul %163, %26, %cst_72 {dimension_numbers = #tpu.dot_dimension_numbers<[1], [0], [0], [1], [0, 0, 1, 1], [], []>} : vector<14x28xf32>, vector<28x14xf32>, vector<14x14xf32> -> vector<14x14xf32>
    %cst_73 = arith.constant dense<0.000000e+00> : vector<14x14xf32>
    %165 = tpu.matmul %163, %35, %cst_73 {dimension_numbers = #tpu.dot_dimension_numbers<[1], [0], [0], [1], [0, 0, 1, 1], [], []>} : vector<14x28xf32>, vector<28x14xf32>, vector<14x14xf32> -> vector<14x14xf32>
    %166 = arith.maximumf %164, %165 : vector<14x14xf32>
    %c1_74 = arith.constant 1 : index
    %c33 = arith.constant 33 : index
    %167 = vector.load %arg12[%c1_74, %c33] : memref<16x96xf32, #tpu.memory_space<vmem>>, vector<14x14xf32>
    tpu.vector_store %arg12[%c1_74, %c33], %166 {strides = array<i32>} : memref<16x96xf32, #tpu.memory_space<vmem>>, vector<14x14xf32>,
    %cst_75 = arith.constant 0.000000e+00 : f32
    %168 = vector.broadcast %cst_75 : f32 to vector<28x28xf32>
    %c0_76 = arith.constant 0 : index
    %c0_77 = arith.constant 0 : index
    %169 = vector.load %arg11[%c0_76, %c0_77] : memref<30x30xf32, #tpu.memory_space<vmem>>, vector<28x30xf32>
    %170 = vector.extract_strided_slice %79 {offsets = [3, 0, 0, 0], sizes = [1, 1, 30, 28], strides = [1, 1, 1, 1]} : vector<6x3x30x28xf32> to vector<1x1x30x28xf32>
    %171 = vector.shape_cast %170 : vector<1x1x30x28xf32> to vector<30x28xf32>
    %cst_78 = arith.constant dense<0.000000e+00> : vector<28x28xf32>
    %172 = tpu.matmul %169, %171, %cst_78 {dimension_numbers = #tpu.dot_dimension_numbers<[1], [0], [0], [1], [0, 0, 1, 1], [], []>} : vector<28x30xf32>, vector<30x28xf32>, vector<28x28xf32> -> vector<28x28xf32>
    %173 = arith.addf %168, %172 : vector<28x28xf32>
    %c1_79 = arith.constant 1 : index
    %c0_80 = arith.constant 0 : index
    %174 = vector.load %arg11[%c1_79, %c0_80] : memref<30x30xf32, #tpu.memory_space<vmem>>, vector<28x30xf32>
    %175 = vector.extract_strided_slice %79 {offsets = [3, 1, 0, 0], sizes = [1, 1, 30, 28], strides = [1, 1, 1, 1]} : vector<6x3x30x28xf32> to vector<1x1x30x28xf32>
    %176 = vector.shape_cast %175 : vector<1x1x30x28xf32> to vector<30x28xf32>
    %cst_81 = arith.constant dense<0.000000e+00> : vector<28x28xf32>
    %177 = tpu.matmul %174, %176, %cst_81 {dimension_numbers = #tpu.dot_dimension_numbers<[1], [0], [0], [1], [0, 0, 1, 1], [], []>} : vector<28x30xf32>, vector<30x28xf32>, vector<28x28xf32> -> vector<28x28xf32>
    %178 = arith.addf %173, %177 : vector<28x28xf32>
    %c2_82 = arith.constant 2 : index
    %c0_83 = arith.constant 0 : index
    %179 = vector.load %arg11[%c2_82, %c0_83] : memref<30x30xf32, #tpu.memory_space<vmem>>, vector<28x30xf32>
    %180 = vector.extract_strided_slice %79 {offsets = [3, 2, 0, 0], sizes = [1, 1, 30, 28], strides = [1, 1, 1, 1]} : vector<6x3x30x28xf32> to vector<1x1x30x28xf32>
    %181 = vector.shape_cast %180 : vector<1x1x30x28xf32> to vector<30x28xf32>
    %cst_84 = arith.constant dense<0.000000e+00> : vector<28x28xf32>
    %182 = tpu.matmul %179, %181, %cst_84 {dimension_numbers = #tpu.dot_dimension_numbers<[1], [0], [0], [1], [0, 0, 1, 1], [], []>} : vector<28x30xf32>, vector<30x28xf32>, vector<28x28xf32> -> vector<28x28xf32>
    %183 = arith.addf %178, %182 : vector<28x28xf32>
    %184 = vector.extract_strided_slice %80 {offsets = [0, 3], sizes = [1, 1], strides = [1, 1]} : vector<1x6xf32> to vector<1x1xf32>
    %185 = vector.extract %184[0, 0] : f32 from vector<1x1xf32>
    %186 = vector.broadcast %185 : f32 to vector<28x28xf32>
    %187 = arith.addf %183, %186 : vector<28x28xf32>
    %cst_85 = arith.constant 0.000000e+00 : f32
    %188 = vector.broadcast %cst_85 : f32 to vector<28x28xf32>
    %189 = arith.maximumf %187, %188 : vector<28x28xf32>
    %cst_86 = arith.constant dense<0.000000e+00> : vector<14x28xf32>
    %190 = tpu.matmul %8, %189, %cst_86 {dimension_numbers = #tpu.dot_dimension_numbers<[1], [0], [0], [1], [0, 0, 1, 1], [], []>} : vector<14x28xf32>, vector<28x28xf32>, vector<14x28xf32> -> vector<14x28xf32>
    %cst_87 = arith.constant dense<0.000000e+00> : vector<14x28xf32>
    %191 = tpu.matmul %17, %189, %cst_87 {dimension_numbers = #tpu.dot_dimension_numbers<[1], [0], [0], [1], [0, 0, 1, 1], [], []>} : vector<14x28xf32>, vector<28x28xf32>, vector<14x28xf32> -> vector<14x28xf32>
    %192 = arith.maximumf %190, %191 : vector<14x28xf32>
    %cst_88 = arith.constant dense<0.000000e+00> : vector<14x14xf32>
    %193 = tpu.matmul %192, %26, %cst_88 {dimension_numbers = #tpu.dot_dimension_numbers<[1], [0], [0], [1], [0, 0, 1, 1], [], []>} : vector<14x28xf32>, vector<28x14xf32>, vector<14x14xf32> -> vector<14x14xf32>
    %cst_89 = arith.constant dense<0.000000e+00> : vector<14x14xf32>
    %194 = tpu.matmul %192, %35, %cst_89 {dimension_numbers = #tpu.dot_dimension_numbers<[1], [0], [0], [1], [0, 0, 1, 1], [], []>} : vector<14x28xf32>, vector<28x14xf32>, vector<14x14xf32> -> vector<14x14xf32>
    %195 = arith.maximumf %193, %194 : vector<14x14xf32>
    %c1_90 = arith.constant 1 : index
    %c49 = arith.constant 49 : index
    %196 = vector.load %arg12[%c1_90, %c49] : memref<16x96xf32, #tpu.memory_space<vmem>>, vector<14x14xf32>
    tpu.vector_store %arg12[%c1_90, %c49], %195 {strides = array<i32>} : memref<16x96xf32, #tpu.memory_space<vmem>>, vector<14x14xf32>,
    %cst_91 = arith.constant 0.000000e+00 : f32
    %197 = vector.broadcast %cst_91 : f32 to vector<28x28xf32>
    %c0_92 = arith.constant 0 : index
    %c0_93 = arith.constant 0 : index
    %198 = vector.load %arg11[%c0_92, %c0_93] : memref<30x30xf32, #tpu.memory_space<vmem>>, vector<28x30xf32>
    %199 = vector.extract_strided_slice %79 {offsets = [4, 0, 0, 0], sizes = [1, 1, 30, 28], strides = [1, 1, 1, 1]} : vector<6x3x30x28xf32> to vector<1x1x30x28xf32>
    %200 = vector.shape_cast %199 : vector<1x1x30x28xf32> to vector<30x28xf32>
    %cst_94 = arith.constant dense<0.000000e+00> : vector<28x28xf32>
    %201 = tpu.matmul %198, %200, %cst_94 {dimension_numbers = #tpu.dot_dimension_numbers<[1], [0], [0], [1], [0, 0, 1, 1], [], []>} : vector<28x30xf32>, vector<30x28xf32>, vector<28x28xf32> -> vector<28x28xf32>
    %202 = arith.addf %197, %201 : vector<28x28xf32>
    %c1_95 = arith.constant 1 : index
    %c0_96 = arith.constant 0 : index
    %203 = vector.load %arg11[%c1_95, %c0_96] : memref<30x30xf32, #tpu.memory_space<vmem>>, vector<28x30xf32>
    %204 = vector.extract_strided_slice %79 {offsets = [4, 1, 0, 0], sizes = [1, 1, 30, 28], strides = [1, 1, 1, 1]} : vector<6x3x30x28xf32> to vector<1x1x30x28xf32>
    %205 = vector.shape_cast %204 : vector<1x1x30x28xf32> to vector<30x28xf32>
    %cst_97 = arith.constant dense<0.000000e+00> : vector<28x28xf32>
    %206 = tpu.matmul %203, %205, %cst_97 {dimension_numbers = #tpu.dot_dimension_numbers<[1], [0], [0], [1], [0, 0, 1, 1], [], []>} : vector<28x30xf32>, vector<30x28xf32>, vector<28x28xf32> -> vector<28x28xf32>
    %207 = arith.addf %202, %206 : vector<28x28xf32>
    %c2_98 = arith.constant 2 : index
    %c0_99 = arith.constant 0 : index
    %208 = vector.load %arg11[%c2_98, %c0_99] : memref<30x30xf32, #tpu.memory_space<vmem>>, vector<28x30xf32>
    %209 = vector.extract_strided_slice %79 {offsets = [4, 2, 0, 0], sizes = [1, 1, 30, 28], strides = [1, 1, 1, 1]} : vector<6x3x30x28xf32> to vector<1x1x30x28xf32>
    %210 = vector.shape_cast %209 : vector<1x1x30x28xf32> to vector<30x28xf32>
    %cst_100 = arith.constant dense<0.000000e+00> : vector<28x28xf32>
    %211 = tpu.matmul %208, %210, %cst_100 {dimension_numbers = #tpu.dot_dimension_numbers<[1], [0], [0], [1], [0, 0, 1, 1], [], []>} : vector<28x30xf32>, vector<30x28xf32>, vector<28x28xf32> -> vector<28x28xf32>
    %212 = arith.addf %207, %211 : vector<28x28xf32>
    %213 = vector.extract_strided_slice %80 {offsets = [0, 4], sizes = [1, 1], strides = [1, 1]} : vector<1x6xf32> to vector<1x1xf32>
    %214 = vector.extract %213[0, 0] : f32 from vector<1x1xf32>
    %215 = vector.broadcast %214 : f32 to vector<28x28xf32>
    %216 = arith.addf %212, %215 : vector<28x28xf32>
    %cst_101 = arith.constant 0.000000e+00 : f32
    %217 = vector.broadcast %cst_101 : f32 to vector<28x28xf32>
    %218 = arith.maximumf %216, %217 : vector<28x28xf32>
    %cst_102 = arith.constant dense<0.000000e+00> : vector<14x28xf32>
    %219 = tpu.matmul %8, %218, %cst_102 {dimension_numbers = #tpu.dot_dimension_numbers<[1], [0], [0], [1], [0, 0, 1, 1], [], []>} : vector<14x28xf32>, vector<28x28xf32>, vector<14x28xf32> -> vector<14x28xf32>
    %cst_103 = arith.constant dense<0.000000e+00> : vector<14x28xf32>
    %220 = tpu.matmul %17, %218, %cst_103 {dimension_numbers = #tpu.dot_dimension_numbers<[1], [0], [0], [1], [0, 0, 1, 1], [], []>} : vector<14x28xf32>, vector<28x28xf32>, vector<14x28xf32> -> vector<14x28xf32>
    %221 = arith.maximumf %219, %220 : vector<14x28xf32>
    %cst_104 = arith.constant dense<0.000000e+00> : vector<14x14xf32>
    %222 = tpu.matmul %221, %26, %cst_104 {dimension_numbers = #tpu.dot_dimension_numbers<[1], [0], [0], [1], [0, 0, 1, 1], [], []>} : vector<14x28xf32>, vector<28x14xf32>, vector<14x14xf32> -> vector<14x14xf32>
    %cst_105 = arith.constant dense<0.000000e+00> : vector<14x14xf32>
    %223 = tpu.matmul %221, %35, %cst_105 {dimension_numbers = #tpu.dot_dimension_numbers<[1], [0], [0], [1], [0, 0, 1, 1], [], []>} : vector<14x28xf32>, vector<28x14xf32>, vector<14x14xf32> -> vector<14x14xf32>
    %224 = arith.maximumf %222, %223 : vector<14x14xf32>
    %c1_106 = arith.constant 1 : index
    %c65 = arith.constant 65 : index
    %225 = vector.load %arg12[%c1_106, %c65] : memref<16x96xf32, #tpu.memory_space<vmem>>, vector<14x14xf32>
    tpu.vector_store %arg12[%c1_106, %c65], %224 {strides = array<i32>} : memref<16x96xf32, #tpu.memory_space<vmem>>, vector<14x14xf32>,
    %cst_107 = arith.constant 0.000000e+00 : f32
    %226 = vector.broadcast %cst_107 : f32 to vector<28x28xf32>
    %c0_108 = arith.constant 0 : index
    %c0_109 = arith.constant 0 : index
    %227 = vector.load %arg11[%c0_108, %c0_109] : memref<30x30xf32, #tpu.memory_space<vmem>>, vector<28x30xf32>
    %228 = vector.extract_strided_slice %79 {offsets = [5, 0, 0, 0], sizes = [1, 1, 30, 28], strides = [1, 1, 1, 1]} : vector<6x3x30x28xf32> to vector<1x1x30x28xf32>
    %229 = vector.shape_cast %228 : vector<1x1x30x28xf32> to vector<30x28xf32>
    %cst_110 = arith.constant dense<0.000000e+00> : vector<28x28xf32>
    %230 = tpu.matmul %227, %229, %cst_110 {dimension_numbers = #tpu.dot_dimension_numbers<[1], [0], [0], [1], [0, 0, 1, 1], [], []>} : vector<28x30xf32>, vector<30x28xf32>, vector<28x28xf32> -> vector<28x28xf32>
    %231 = arith.addf %226, %230 : vector<28x28xf32>
    %c1_111 = arith.constant 1 : index
    %c0_112 = arith.constant 0 : index
    %232 = vector.load %arg11[%c1_111, %c0_112] : memref<30x30xf32, #tpu.memory_space<vmem>>, vector<28x30xf32>
    %233 = vector.extract_strided_slice %79 {offsets = [5, 1, 0, 0], sizes = [1, 1, 30, 28], strides = [1, 1, 1, 1]} : vector<6x3x30x28xf32> to vector<1x1x30x28xf32>
    %234 = vector.shape_cast %233 : vector<1x1x30x28xf32> to vector<30x28xf32>
    %cst_113 = arith.constant dense<0.000000e+00> : vector<28x28xf32>
    %235 = tpu.matmul %232, %234, %cst_113 {dimension_numbers = #tpu.dot_dimension_numbers<[1], [0], [0], [1], [0, 0, 1, 1], [], []>} : vector<28x30xf32>, vector<30x28xf32>, vector<28x28xf32> -> vector<28x28xf32>
    %236 = arith.addf %231, %235 : vector<28x28xf32>
    %c2_114 = arith.constant 2 : index
    %c0_115 = arith.constant 0 : index
    %237 = vector.load %arg11[%c2_114, %c0_115] : memref<30x30xf32, #tpu.memory_space<vmem>>, vector<28x30xf32>
    %238 = vector.extract_strided_slice %79 {offsets = [5, 2, 0, 0], sizes = [1, 1, 30, 28], strides = [1, 1, 1, 1]} : vector<6x3x30x28xf32> to vector<1x1x30x28xf32>
    %239 = vector.shape_cast %238 : vector<1x1x30x28xf32> to vector<30x28xf32>
    %cst_116 = arith.constant dense<0.000000e+00> : vector<28x28xf32>
    %240 = tpu.matmul %237, %239, %cst_116 {dimension_numbers = #tpu.dot_dimension_numbers<[1], [0], [0], [1], [0, 0, 1, 1], [], []>} : vector<28x30xf32>, vector<30x28xf32>, vector<28x28xf32> -> vector<28x28xf32>
    %241 = arith.addf %236, %240 : vector<28x28xf32>
    %242 = vector.extract_strided_slice %80 {offsets = [0, 5], sizes = [1, 1], strides = [1, 1]} : vector<1x6xf32> to vector<1x1xf32>
    %243 = vector.extract %242[0, 0] : f32 from vector<1x1xf32>
    %244 = vector.broadcast %243 : f32 to vector<28x28xf32>
    %245 = arith.addf %241, %244 : vector<28x28xf32>
    %cst_117 = arith.constant 0.000000e+00 : f32
    %246 = vector.broadcast %cst_117 : f32 to vector<28x28xf32>
    %247 = arith.maximumf %245, %246 : vector<28x28xf32>
    %cst_118 = arith.constant dense<0.000000e+00> : vector<14x28xf32>
    %248 = tpu.matmul %8, %247, %cst_118 {dimension_numbers = #tpu.dot_dimension_numbers<[1], [0], [0], [1], [0, 0, 1, 1], [], []>} : vector<14x28xf32>, vector<28x28xf32>, vector<14x28xf32> -> vector<14x28xf32>
    %cst_119 = arith.constant dense<0.000000e+00> : vector<14x28xf32>
    %249 = tpu.matmul %17, %247, %cst_119 {dimension_numbers = #tpu.dot_dimension_numbers<[1], [0], [0], [1], [0, 0, 1, 1], [], []>} : vector<14x28xf32>, vector<28x28xf32>, vector<14x28xf32> -> vector<14x28xf32>
    %250 = arith.maximumf %248, %249 : vector<14x28xf32>
    %cst_120 = arith.constant dense<0.000000e+00> : vector<14x14xf32>
    %251 = tpu.matmul %250, %26, %cst_120 {dimension_numbers = #tpu.dot_dimension_numbers<[1], [0], [0], [1], [0, 0, 1, 1], [], []>} : vector<14x28xf32>, vector<28x14xf32>, vector<14x14xf32> -> vector<14x14xf32>
    %cst_121 = arith.constant dense<0.000000e+00> : vector<14x14xf32>
    %252 = tpu.matmul %250, %35, %cst_121 {dimension_numbers = #tpu.dot_dimension_numbers<[1], [0], [0], [1], [0, 0, 1, 1], [], []>} : vector<14x28xf32>, vector<28x14xf32>, vector<14x14xf32> -> vector<14x14xf32>
    %253 = arith.maximumf %251, %252 : vector<14x14xf32>
    %c1_122 = arith.constant 1 : index
    %c81 = arith.constant 81 : index
    %254 = vector.load %arg12[%c1_122, %c81] : memref<16x96xf32, #tpu.memory_space<vmem>>, vector<14x14xf32>
    tpu.vector_store %arg12[%c1_122, %c81], %253 {strides = array<i32>} : memref<16x96xf32, #tpu.memory_space<vmem>>, vector<14x14xf32>,
    %c0_123 = arith.constant 0 : index
    %c0_124 = arith.constant 0 : index
    %c0_125 = arith.constant 0 : index
    %c0_126 = arith.constant 0 : index
    %255 = vector.load %arg4[%c0_123, %c0_124, %c0_125, %c0_126] : memref<12x3x96x14xf32, #tpu.memory_space<vmem>>, vector<12x3x96x14xf32>
    %c0_127 = arith.constant 0 : index
    %c0_128 = arith.constant 0 : index
    %256 = vector.load %arg5[%c0_127, %c0_128] : memref<1x12xf32, #tpu.memory_space<vmem>>, vector<1x12xf32>
    %cst_129 = arith.constant 0.000000e+00 : f32
    %257 = vector.broadcast %cst_129 : f32 to vector<14x14xf32>
    %c0_130 = arith.constant 0 : index
    %c0_131 = arith.constant 0 : index
    %258 = vector.load %arg12[%c0_130, %c0_131] : memref<16x96xf32, #tpu.memory_space<vmem>>, vector<14x96xf32>
    %259 = vector.extract_strided_slice %255 {offsets = [0, 0, 0, 0], sizes = [1, 1, 96, 14], strides = [1, 1, 1, 1]} : vector<12x3x96x14xf32> to vector<1x1x96x14xf32>
    %260 = vector.shape_cast %259 : vector<1x1x96x14xf32> to vector<96x14xf32>
    %cst_132 = arith.constant dense<0.000000e+00> : vector<14x14xf32>
    %261 = tpu.matmul %258, %260, %cst_132 {dimension_numbers = #tpu.dot_dimension_numbers<[1], [0], [0], [1], [0, 0, 1, 1], [], []>} : vector<14x96xf32>, vector<96x14xf32>, vector<14x14xf32> -> vector<14x14xf32>
    %262 = arith.addf %257, %261 : vector<14x14xf32>
    %c1_133 = arith.constant 1 : index
    %c0_134 = arith.constant 0 : index
    %263 = vector.load %arg12[%c1_133, %c0_134] : memref<16x96xf32, #tpu.memory_space<vmem>>, vector<14x96xf32>
    %264 = vector.extract_strided_slice %255 {offsets = [0, 1, 0, 0], sizes = [1, 1, 96, 14], strides = [1, 1, 1, 1]} : vector<12x3x96x14xf32> to vector<1x1x96x14xf32>
    %265 = vector.shape_cast %264 : vector<1x1x96x14xf32> to vector<96x14xf32>
    %cst_135 = arith.constant dense<0.000000e+00> : vector<14x14xf32>
    %266 = tpu.matmul %263, %265, %cst_135 {dimension_numbers = #tpu.dot_dimension_numbers<[1], [0], [0], [1], [0, 0, 1, 1], [], []>} : vector<14x96xf32>, vector<96x14xf32>, vector<14x14xf32> -> vector<14x14xf32>
    %267 = arith.addf %262, %266 : vector<14x14xf32>
    %c2_136 = arith.constant 2 : index
    %c0_137 = arith.constant 0 : index
    %268 = vector.load %arg12[%c2_136, %c0_137] : memref<16x96xf32, #tpu.memory_space<vmem>>, vector<14x96xf32>
    %269 = vector.extract_strided_slice %255 {offsets = [0, 2, 0, 0], sizes = [1, 1, 96, 14], strides = [1, 1, 1, 1]} : vector<12x3x96x14xf32> to vector<1x1x96x14xf32>
    %270 = vector.shape_cast %269 : vector<1x1x96x14xf32> to vector<96x14xf32>
    %cst_138 = arith.constant dense<0.000000e+00> : vector<14x14xf32>
    %271 = tpu.matmul %268, %270, %cst_138 {dimension_numbers = #tpu.dot_dimension_numbers<[1], [0], [0], [1], [0, 0, 1, 1], [], []>} : vector<14x96xf32>, vector<96x14xf32>, vector<14x14xf32> -> vector<14x14xf32>
    %272 = arith.addf %267, %271 : vector<14x14xf32>
    %273 = vector.extract_strided_slice %256 {offsets = [0, 0], sizes = [1, 1], strides = [1, 1]} : vector<1x12xf32> to vector<1x1xf32>
    %274 = vector.extract %273[0, 0] : f32 from vector<1x1xf32>
    %275 = vector.broadcast %274 : f32 to vector<14x14xf32>
    %276 = arith.addf %272, %275 : vector<14x14xf32>
    %cst_139 = arith.constant 0.000000e+00 : f32
    %277 = vector.broadcast %cst_139 : f32 to vector<14x14xf32>
    %278 = arith.maximumf %276, %277 : vector<14x14xf32>
    %cst_140 = arith.constant dense<0.000000e+00> : vector<7x14xf32>
    %279 = tpu.matmul %44, %278, %cst_140 {dimension_numbers = #tpu.dot_dimension_numbers<[1], [0], [0], [1], [0, 0, 1, 1], [], []>} : vector<7x14xf32>, vector<14x14xf32>, vector<7x14xf32> -> vector<7x14xf32>
    %cst_141 = arith.constant dense<0.000000e+00> : vector<7x14xf32>
    %280 = tpu.matmul %53, %278, %cst_141 {dimension_numbers = #tpu.dot_dimension_numbers<[1], [0], [0], [1], [0, 0, 1, 1], [], []>} : vector<7x14xf32>, vector<14x14xf32>, vector<7x14xf32> -> vector<7x14xf32>
    %281 = arith.maximumf %279, %280 : vector<7x14xf32>
    %cst_142 = arith.constant dense<0.000000e+00> : vector<7x7xf32>
    %282 = tpu.matmul %281, %62, %cst_142 {dimension_numbers = #tpu.dot_dimension_numbers<[1], [0], [0], [1], [0, 0, 1, 1], [], []>} : vector<7x14xf32>, vector<14x7xf32>, vector<7x7xf32> -> vector<7x7xf32>
    %cst_143 = arith.constant dense<0.000000e+00> : vector<7x7xf32>
    %283 = tpu.matmul %281, %71, %cst_143 {dimension_numbers = #tpu.dot_dimension_numbers<[1], [0], [0], [1], [0, 0, 1, 1], [], []>} : vector<7x14xf32>, vector<14x7xf32>, vector<7x7xf32> -> vector<7x7xf32>
    %284 = arith.maximumf %282, %283 : vector<7x7xf32>
    %cst_144 = arith.constant 0.000000e+00 : f32
    %285 = vector.broadcast %cst_144 : f32 to vector<14x14xf32>
    %c0_145 = arith.constant 0 : index
    %c0_146 = arith.constant 0 : index
    %286 = vector.load %arg12[%c0_145, %c0_146] : memref<16x96xf32, #tpu.memory_space<vmem>>, vector<14x96xf32>
    %287 = vector.extract_strided_slice %255 {offsets = [1, 0, 0, 0], sizes = [1, 1, 96, 14], strides = [1, 1, 1, 1]} : vector<12x3x96x14xf32> to vector<1x1x96x14xf32>
    %288 = vector.shape_cast %287 : vector<1x1x96x14xf32> to vector<96x14xf32>
    %cst_147 = arith.constant dense<0.000000e+00> : vector<14x14xf32>
    %289 = tpu.matmul %286, %288, %cst_147 {dimension_numbers = #tpu.dot_dimension_numbers<[1], [0], [0], [1], [0, 0, 1, 1], [], []>} : vector<14x96xf32>, vector<96x14xf32>, vector<14x14xf32> -> vector<14x14xf32>
    %290 = arith.addf %285, %289 : vector<14x14xf32>
    %c1_148 = arith.constant 1 : index
    %c0_149 = arith.constant 0 : index
    %291 = vector.load %arg12[%c1_148, %c0_149] : memref<16x96xf32, #tpu.memory_space<vmem>>, vector<14x96xf32>
    %292 = vector.extract_strided_slice %255 {offsets = [1, 1, 0, 0], sizes = [1, 1, 96, 14], strides = [1, 1, 1, 1]} : vector<12x3x96x14xf32> to vector<1x1x96x14xf32>
    %293 = vector.shape_cast %292 : vector<1x1x96x14xf32> to vector<96x14xf32>
    %cst_150 = arith.constant dense<0.000000e+00> : vector<14x14xf32>
    %294 = tpu.matmul %291, %293, %cst_150 {dimension_numbers = #tpu.dot_dimension_numbers<[1], [0], [0], [1], [0, 0, 1, 1], [], []>} : vector<14x96xf32>, vector<96x14xf32>, vector<14x14xf32> -> vector<14x14xf32>
    %295 = arith.addf %290, %294 : vector<14x14xf32>
    %c2_151 = arith.constant 2 : index
    %c0_152 = arith.constant 0 : index
    %296 = vector.load %arg12[%c2_151, %c0_152] : memref<16x96xf32, #tpu.memory_space<vmem>>, vector<14x96xf32>
    %297 = vector.extract_strided_slice %255 {offsets = [1, 2, 0, 0], sizes = [1, 1, 96, 14], strides = [1, 1, 1, 1]} : vector<12x3x96x14xf32> to vector<1x1x96x14xf32>
    %298 = vector.shape_cast %297 : vector<1x1x96x14xf32> to vector<96x14xf32>
    %cst_153 = arith.constant dense<0.000000e+00> : vector<14x14xf32>
    %299 = tpu.matmul %296, %298, %cst_153 {dimension_numbers = #tpu.dot_dimension_numbers<[1], [0], [0], [1], [0, 0, 1, 1], [], []>} : vector<14x96xf32>, vector<96x14xf32>, vector<14x14xf32> -> vector<14x14xf32>
    %300 = arith.addf %295, %299 : vector<14x14xf32>
    %301 = vector.extract_strided_slice %256 {offsets = [0, 1], sizes = [1, 1], strides = [1, 1]} : vector<1x12xf32> to vector<1x1xf32>
    %302 = vector.extract %301[0, 0] : f32 from vector<1x1xf32>
    %303 = vector.broadcast %302 : f32 to vector<14x14xf32>
    %304 = arith.addf %300, %303 : vector<14x14xf32>
    %cst_154 = arith.constant 0.000000e+00 : f32
    %305 = vector.broadcast %cst_154 : f32 to vector<14x14xf32>
    %306 = arith.maximumf %304, %305 : vector<14x14xf32>
    %cst_155 = arith.constant dense<0.000000e+00> : vector<7x14xf32>
    %307 = tpu.matmul %44, %306, %cst_155 {dimension_numbers = #tpu.dot_dimension_numbers<[1], [0], [0], [1], [0, 0, 1, 1], [], []>} : vector<7x14xf32>, vector<14x14xf32>, vector<7x14xf32> -> vector<7x14xf32>
    %cst_156 = arith.constant dense<0.000000e+00> : vector<7x14xf32>
    %308 = tpu.matmul %53, %306, %cst_156 {dimension_numbers = #tpu.dot_dimension_numbers<[1], [0], [0], [1], [0, 0, 1, 1], [], []>} : vector<7x14xf32>, vector<14x14xf32>, vector<7x14xf32> -> vector<7x14xf32>
    %309 = arith.maximumf %307, %308 : vector<7x14xf32>
    %cst_157 = arith.constant dense<0.000000e+00> : vector<7x7xf32>
    %310 = tpu.matmul %309, %62, %cst_157 {dimension_numbers = #tpu.dot_dimension_numbers<[1], [0], [0], [1], [0, 0, 1, 1], [], []>} : vector<7x14xf32>, vector<14x7xf32>, vector<7x7xf32> -> vector<7x7xf32>
    %cst_158 = arith.constant dense<0.000000e+00> : vector<7x7xf32>
    %311 = tpu.matmul %309, %71, %cst_158 {dimension_numbers = #tpu.dot_dimension_numbers<[1], [0], [0], [1], [0, 0, 1, 1], [], []>} : vector<7x14xf32>, vector<14x7xf32>, vector<7x7xf32> -> vector<7x7xf32>
    %312 = arith.maximumf %310, %311 : vector<7x7xf32>
    %cst_159 = arith.constant 0.000000e+00 : f32
    %313 = vector.broadcast %cst_159 : f32 to vector<14x14xf32>
    %c0_160 = arith.constant 0 : index
    %c0_161 = arith.constant 0 : index
    %314 = vector.load %arg12[%c0_160, %c0_161] : memref<16x96xf32, #tpu.memory_space<vmem>>, vector<14x96xf32>
    %315 = vector.extract_strided_slice %255 {offsets = [2, 0, 0, 0], sizes = [1, 1, 96, 14], strides = [1, 1, 1, 1]} : vector<12x3x96x14xf32> to vector<1x1x96x14xf32>
    %316 = vector.shape_cast %315 : vector<1x1x96x14xf32> to vector<96x14xf32>
    %cst_162 = arith.constant dense<0.000000e+00> : vector<14x14xf32>
    %317 = tpu.matmul %314, %316, %cst_162 {dimension_numbers = #tpu.dot_dimension_numbers<[1], [0], [0], [1], [0, 0, 1, 1], [], []>} : vector<14x96xf32>, vector<96x14xf32>, vector<14x14xf32> -> vector<14x14xf32>
    %318 = arith.addf %313, %317 : vector<14x14xf32>
    %c1_163 = arith.constant 1 : index
    %c0_164 = arith.constant 0 : index
    %319 = vector.load %arg12[%c1_163, %c0_164] : memref<16x96xf32, #tpu.memory_space<vmem>>, vector<14x96xf32>
    %320 = vector.extract_strided_slice %255 {offsets = [2, 1, 0, 0], sizes = [1, 1, 96, 14], strides = [1, 1, 1, 1]} : vector<12x3x96x14xf32> to vector<1x1x96x14xf32>
    %321 = vector.shape_cast %320 : vector<1x1x96x14xf32> to vector<96x14xf32>
    %cst_165 = arith.constant dense<0.000000e+00> : vector<14x14xf32>
    %322 = tpu.matmul %319, %321, %cst_165 {dimension_numbers = #tpu.dot_dimension_numbers<[1], [0], [0], [1], [0, 0, 1, 1], [], []>} : vector<14x96xf32>, vector<96x14xf32>, vector<14x14xf32> -> vector<14x14xf32>
    %323 = arith.addf %318, %322 : vector<14x14xf32>
    %c2_166 = arith.constant 2 : index
    %c0_167 = arith.constant 0 : index
    %324 = vector.load %arg12[%c2_166, %c0_167] : memref<16x96xf32, #tpu.memory_space<vmem>>, vector<14x96xf32>
    %325 = vector.extract_strided_slice %255 {offsets = [2, 2, 0, 0], sizes = [1, 1, 96, 14], strides = [1, 1, 1, 1]} : vector<12x3x96x14xf32> to vector<1x1x96x14xf32>
    %326 = vector.shape_cast %325 : vector<1x1x96x14xf32> to vector<96x14xf32>
    %cst_168 = arith.constant dense<0.000000e+00> : vector<14x14xf32>
    %327 = tpu.matmul %324, %326, %cst_168 {dimension_numbers = #tpu.dot_dimension_numbers<[1], [0], [0], [1], [0, 0, 1, 1], [], []>} : vector<14x96xf32>, vector<96x14xf32>, vector<14x14xf32> -> vector<14x14xf32>
    %328 = arith.addf %323, %327 : vector<14x14xf32>
    %329 = vector.extract_strided_slice %256 {offsets = [0, 2], sizes = [1, 1], strides = [1, 1]} : vector<1x12xf32> to vector<1x1xf32>
    %330 = vector.extract %329[0, 0] : f32 from vector<1x1xf32>
    %331 = vector.broadcast %330 : f32 to vector<14x14xf32>
    %332 = arith.addf %328, %331 : vector<14x14xf32>
    %cst_169 = arith.constant 0.000000e+00 : f32
    %333 = vector.broadcast %cst_169 : f32 to vector<14x14xf32>
    %334 = arith.maximumf %332, %333 : vector<14x14xf32>
    %cst_170 = arith.constant dense<0.000000e+00> : vector<7x14xf32>
    %335 = tpu.matmul %44, %334, %cst_170 {dimension_numbers = #tpu.dot_dimension_numbers<[1], [0], [0], [1], [0, 0, 1, 1], [], []>} : vector<7x14xf32>, vector<14x14xf32>, vector<7x14xf32> -> vector<7x14xf32>
    %cst_171 = arith.constant dense<0.000000e+00> : vector<7x14xf32>
    %336 = tpu.matmul %53, %334, %cst_171 {dimension_numbers = #tpu.dot_dimension_numbers<[1], [0], [0], [1], [0, 0, 1, 1], [], []>} : vector<7x14xf32>, vector<14x14xf32>, vector<7x14xf32> -> vector<7x14xf32>
    %337 = arith.maximumf %335, %336 : vector<7x14xf32>
    %cst_172 = arith.constant dense<0.000000e+00> : vector<7x7xf32>
    %338 = tpu.matmul %337, %62, %cst_172 {dimension_numbers = #tpu.dot_dimension_numbers<[1], [0], [0], [1], [0, 0, 1, 1], [], []>} : vector<7x14xf32>, vector<14x7xf32>, vector<7x7xf32> -> vector<7x7xf32>
    %cst_173 = arith.constant dense<0.000000e+00> : vector<7x7xf32>
    %339 = tpu.matmul %337, %71, %cst_173 {dimension_numbers = #tpu.dot_dimension_numbers<[1], [0], [0], [1], [0, 0, 1, 1], [], []>} : vector<7x14xf32>, vector<14x7xf32>, vector<7x7xf32> -> vector<7x7xf32>
    %340 = arith.maximumf %338, %339 : vector<7x7xf32>
    %cst_174 = arith.constant 0.000000e+00 : f32
    %341 = vector.broadcast %cst_174 : f32 to vector<14x14xf32>
    %c0_175 = arith.constant 0 : index
    %c0_176 = arith.constant 0 : index
    %342 = vector.load %arg12[%c0_175, %c0_176] : memref<16x96xf32, #tpu.memory_space<vmem>>, vector<14x96xf32>
    %343 = vector.extract_strided_slice %255 {offsets = [3, 0, 0, 0], sizes = [1, 1, 96, 14], strides = [1, 1, 1, 1]} : vector<12x3x96x14xf32> to vector<1x1x96x14xf32>
    %344 = vector.shape_cast %343 : vector<1x1x96x14xf32> to vector<96x14xf32>
    %cst_177 = arith.constant dense<0.000000e+00> : vector<14x14xf32>
    %345 = tpu.matmul %342, %344, %cst_177 {dimension_numbers = #tpu.dot_dimension_numbers<[1], [0], [0], [1], [0, 0, 1, 1], [], []>} : vector<14x96xf32>, vector<96x14xf32>, vector<14x14xf32> -> vector<14x14xf32>
    %346 = arith.addf %341, %345 : vector<14x14xf32>
    %c1_178 = arith.constant 1 : index
    %c0_179 = arith.constant 0 : index
    %347 = vector.load %arg12[%c1_178, %c0_179] : memref<16x96xf32, #tpu.memory_space<vmem>>, vector<14x96xf32>
    %348 = vector.extract_strided_slice %255 {offsets = [3, 1, 0, 0], sizes = [1, 1, 96, 14], strides = [1, 1, 1, 1]} : vector<12x3x96x14xf32> to vector<1x1x96x14xf32>
    %349 = vector.shape_cast %348 : vector<1x1x96x14xf32> to vector<96x14xf32>
    %cst_180 = arith.constant dense<0.000000e+00> : vector<14x14xf32>
    %350 = tpu.matmul %347, %349, %cst_180 {dimension_numbers = #tpu.dot_dimension_numbers<[1], [0], [0], [1], [0, 0, 1, 1], [], []>} : vector<14x96xf32>, vector<96x14xf32>, vector<14x14xf32> -> vector<14x14xf32>
    %351 = arith.addf %346, %350 : vector<14x14xf32>
    %c2_181 = arith.constant 2 : index
    %c0_182 = arith.constant 0 : index
    %352 = vector.load %arg12[%c2_181, %c0_182] : memref<16x96xf32, #tpu.memory_space<vmem>>, vector<14x96xf32>
    %353 = vector.extract_strided_slice %255 {offsets = [3, 2, 0, 0], sizes = [1, 1, 96, 14], strides = [1, 1, 1, 1]} : vector<12x3x96x14xf32> to vector<1x1x96x14xf32>
    %354 = vector.shape_cast %353 : vector<1x1x96x14xf32> to vector<96x14xf32>
    %cst_183 = arith.constant dense<0.000000e+00> : vector<14x14xf32>
    %355 = tpu.matmul %352, %354, %cst_183 {dimension_numbers = #tpu.dot_dimension_numbers<[1], [0], [0], [1], [0, 0, 1, 1], [], []>} : vector<14x96xf32>, vector<96x14xf32>, vector<14x14xf32> -> vector<14x14xf32>
    %356 = arith.addf %351, %355 : vector<14x14xf32>
    %357 = vector.extract_strided_slice %256 {offsets = [0, 3], sizes = [1, 1], strides = [1, 1]} : vector<1x12xf32> to vector<1x1xf32>
    %358 = vector.extract %357[0, 0] : f32 from vector<1x1xf32>
    %359 = vector.broadcast %358 : f32 to vector<14x14xf32>
    %360 = arith.addf %356, %359 : vector<14x14xf32>
    %cst_184 = arith.constant 0.000000e+00 : f32
    %361 = vector.broadcast %cst_184 : f32 to vector<14x14xf32>
    %362 = arith.maximumf %360, %361 : vector<14x14xf32>
    %cst_185 = arith.constant dense<0.000000e+00> : vector<7x14xf32>
    %363 = tpu.matmul %44, %362, %cst_185 {dimension_numbers = #tpu.dot_dimension_numbers<[1], [0], [0], [1], [0, 0, 1, 1], [], []>} : vector<7x14xf32>, vector<14x14xf32>, vector<7x14xf32> -> vector<7x14xf32>
    %cst_186 = arith.constant dense<0.000000e+00> : vector<7x14xf32>
    %364 = tpu.matmul %53, %362, %cst_186 {dimension_numbers = #tpu.dot_dimension_numbers<[1], [0], [0], [1], [0, 0, 1, 1], [], []>} : vector<7x14xf32>, vector<14x14xf32>, vector<7x14xf32> -> vector<7x14xf32>
    %365 = arith.maximumf %363, %364 : vector<7x14xf32>
    %cst_187 = arith.constant dense<0.000000e+00> : vector<7x7xf32>
    %366 = tpu.matmul %365, %62, %cst_187 {dimension_numbers = #tpu.dot_dimension_numbers<[1], [0], [0], [1], [0, 0, 1, 1], [], []>} : vector<7x14xf32>, vector<14x7xf32>, vector<7x7xf32> -> vector<7x7xf32>
    %cst_188 = arith.constant dense<0.000000e+00> : vector<7x7xf32>
    %367 = tpu.matmul %365, %71, %cst_188 {dimension_numbers = #tpu.dot_dimension_numbers<[1], [0], [0], [1], [0, 0, 1, 1], [], []>} : vector<7x14xf32>, vector<14x7xf32>, vector<7x7xf32> -> vector<7x7xf32>
    %368 = arith.maximumf %366, %367 : vector<7x7xf32>
    %cst_189 = arith.constant 0.000000e+00 : f32
    %369 = vector.broadcast %cst_189 : f32 to vector<14x14xf32>
    %c0_190 = arith.constant 0 : index
    %c0_191 = arith.constant 0 : index
    %370 = vector.load %arg12[%c0_190, %c0_191] : memref<16x96xf32, #tpu.memory_space<vmem>>, vector<14x96xf32>
    %371 = vector.extract_strided_slice %255 {offsets = [4, 0, 0, 0], sizes = [1, 1, 96, 14], strides = [1, 1, 1, 1]} : vector<12x3x96x14xf32> to vector<1x1x96x14xf32>
    %372 = vector.shape_cast %371 : vector<1x1x96x14xf32> to vector<96x14xf32>
    %cst_192 = arith.constant dense<0.000000e+00> : vector<14x14xf32>
    %373 = tpu.matmul %370, %372, %cst_192 {dimension_numbers = #tpu.dot_dimension_numbers<[1], [0], [0], [1], [0, 0, 1, 1], [], []>} : vector<14x96xf32>, vector<96x14xf32>, vector<14x14xf32> -> vector<14x14xf32>
    %374 = arith.addf %369, %373 : vector<14x14xf32>
    %c1_193 = arith.constant 1 : index
    %c0_194 = arith.constant 0 : index
    %375 = vector.load %arg12[%c1_193, %c0_194] : memref<16x96xf32, #tpu.memory_space<vmem>>, vector<14x96xf32>
    %376 = vector.extract_strided_slice %255 {offsets = [4, 1, 0, 0], sizes = [1, 1, 96, 14], strides = [1, 1, 1, 1]} : vector<12x3x96x14xf32> to vector<1x1x96x14xf32>
    %377 = vector.shape_cast %376 : vector<1x1x96x14xf32> to vector<96x14xf32>
    %cst_195 = arith.constant dense<0.000000e+00> : vector<14x14xf32>
    %378 = tpu.matmul %375, %377, %cst_195 {dimension_numbers = #tpu.dot_dimension_numbers<[1], [0], [0], [1], [0, 0, 1, 1], [], []>} : vector<14x96xf32>, vector<96x14xf32>, vector<14x14xf32> -> vector<14x14xf32>
    %379 = arith.addf %374, %378 : vector<14x14xf32>
    %c2_196 = arith.constant 2 : index
    %c0_197 = arith.constant 0 : index
    %380 = vector.load %arg12[%c2_196, %c0_197] : memref<16x96xf32, #tpu.memory_space<vmem>>, vector<14x96xf32>
    %381 = vector.extract_strided_slice %255 {offsets = [4, 2, 0, 0], sizes = [1, 1, 96, 14], strides = [1, 1, 1, 1]} : vector<12x3x96x14xf32> to vector<1x1x96x14xf32>
    %382 = vector.shape_cast %381 : vector<1x1x96x14xf32> to vector<96x14xf32>
    %cst_198 = arith.constant dense<0.000000e+00> : vector<14x14xf32>
    %383 = tpu.matmul %380, %382, %cst_198 {dimension_numbers = #tpu.dot_dimension_numbers<[1], [0], [0], [1], [0, 0, 1, 1], [], []>} : vector<14x96xf32>, vector<96x14xf32>, vector<14x14xf32> -> vector<14x14xf32>
    %384 = arith.addf %379, %383 : vector<14x14xf32>
    %385 = vector.extract_strided_slice %256 {offsets = [0, 4], sizes = [1, 1], strides = [1, 1]} : vector<1x12xf32> to vector<1x1xf32>
    %386 = vector.extract %385[0, 0] : f32 from vector<1x1xf32>
    %387 = vector.broadcast %386 : f32 to vector<14x14xf32>
    %388 = arith.addf %384, %387 : vector<14x14xf32>
    %cst_199 = arith.constant 0.000000e+00 : f32
    %389 = vector.broadcast %cst_199 : f32 to vector<14x14xf32>
    %390 = arith.maximumf %388, %389 : vector<14x14xf32>
    %cst_200 = arith.constant dense<0.000000e+00> : vector<7x14xf32>
    %391 = tpu.matmul %44, %390, %cst_200 {dimension_numbers = #tpu.dot_dimension_numbers<[1], [0], [0], [1], [0, 0, 1, 1], [], []>} : vector<7x14xf32>, vector<14x14xf32>, vector<7x14xf32> -> vector<7x14xf32>
    %cst_201 = arith.constant dense<0.000000e+00> : vector<7x14xf32>
    %392 = tpu.matmul %53, %390, %cst_201 {dimension_numbers = #tpu.dot_dimension_numbers<[1], [0], [0], [1], [0, 0, 1, 1], [], []>} : vector<7x14xf32>, vector<14x14xf32>, vector<7x14xf32> -> vector<7x14xf32>
    %393 = arith.maximumf %391, %392 : vector<7x14xf32>
    %cst_202 = arith.constant dense<0.000000e+00> : vector<7x7xf32>
    %394 = tpu.matmul %393, %62, %cst_202 {dimension_numbers = #tpu.dot_dimension_numbers<[1], [0], [0], [1], [0, 0, 1, 1], [], []>} : vector<7x14xf32>, vector<14x7xf32>, vector<7x7xf32> -> vector<7x7xf32>
    %cst_203 = arith.constant dense<0.000000e+00> : vector<7x7xf32>
    %395 = tpu.matmul %393, %71, %cst_203 {dimension_numbers = #tpu.dot_dimension_numbers<[1], [0], [0], [1], [0, 0, 1, 1], [], []>} : vector<7x14xf32>, vector<14x7xf32>, vector<7x7xf32> -> vector<7x7xf32>
    %396 = arith.maximumf %394, %395 : vector<7x7xf32>
    %cst_204 = arith.constant 0.000000e+00 : f32
    %397 = vector.broadcast %cst_204 : f32 to vector<14x14xf32>
    %c0_205 = arith.constant 0 : index
    %c0_206 = arith.constant 0 : index
    %398 = vector.load %arg12[%c0_205, %c0_206] : memref<16x96xf32, #tpu.memory_space<vmem>>, vector<14x96xf32>
    %399 = vector.extract_strided_slice %255 {offsets = [5, 0, 0, 0], sizes = [1, 1, 96, 14], strides = [1, 1, 1, 1]} : vector<12x3x96x14xf32> to vector<1x1x96x14xf32>
    %400 = vector.shape_cast %399 : vector<1x1x96x14xf32> to vector<96x14xf32>
    %cst_207 = arith.constant dense<0.000000e+00> : vector<14x14xf32>
    %401 = tpu.matmul %398, %400, %cst_207 {dimension_numbers = #tpu.dot_dimension_numbers<[1], [0], [0], [1], [0, 0, 1, 1], [], []>} : vector<14x96xf32>, vector<96x14xf32>, vector<14x14xf32> -> vector<14x14xf32>
    %402 = arith.addf %397, %401 : vector<14x14xf32>
    %c1_208 = arith.constant 1 : index
    %c0_209 = arith.constant 0 : index
    %403 = vector.load %arg12[%c1_208, %c0_209] : memref<16x96xf32, #tpu.memory_space<vmem>>, vector<14x96xf32>
    %404 = vector.extract_strided_slice %255 {offsets = [5, 1, 0, 0], sizes = [1, 1, 96, 14], strides = [1, 1, 1, 1]} : vector<12x3x96x14xf32> to vector<1x1x96x14xf32>
    %405 = vector.shape_cast %404 : vector<1x1x96x14xf32> to vector<96x14xf32>
    %cst_210 = arith.constant dense<0.000000e+00> : vector<14x14xf32>
    %406 = tpu.matmul %403, %405, %cst_210 {dimension_numbers = #tpu.dot_dimension_numbers<[1], [0], [0], [1], [0, 0, 1, 1], [], []>} : vector<14x96xf32>, vector<96x14xf32>, vector<14x14xf32> -> vector<14x14xf32>
    %407 = arith.addf %402, %406 : vector<14x14xf32>
    %c2_211 = arith.constant 2 : index
    %c0_212 = arith.constant 0 : index
    %408 = vector.load %arg12[%c2_211, %c0_212] : memref<16x96xf32, #tpu.memory_space<vmem>>, vector<14x96xf32>
    %409 = vector.extract_strided_slice %255 {offsets = [5, 2, 0, 0], sizes = [1, 1, 96, 14], strides = [1, 1, 1, 1]} : vector<12x3x96x14xf32> to vector<1x1x96x14xf32>
    %410 = vector.shape_cast %409 : vector<1x1x96x14xf32> to vector<96x14xf32>
    %cst_213 = arith.constant dense<0.000000e+00> : vector<14x14xf32>
    %411 = tpu.matmul %408, %410, %cst_213 {dimension_numbers = #tpu.dot_dimension_numbers<[1], [0], [0], [1], [0, 0, 1, 1], [], []>} : vector<14x96xf32>, vector<96x14xf32>, vector<14x14xf32> -> vector<14x14xf32>
    %412 = arith.addf %407, %411 : vector<14x14xf32>
    %413 = vector.extract_strided_slice %256 {offsets = [0, 5], sizes = [1, 1], strides = [1, 1]} : vector<1x12xf32> to vector<1x1xf32>
    %414 = vector.extract %413[0, 0] : f32 from vector<1x1xf32>
    %415 = vector.broadcast %414 : f32 to vector<14x14xf32>
    %416 = arith.addf %412, %415 : vector<14x14xf32>
    %cst_214 = arith.constant 0.000000e+00 : f32
    %417 = vector.broadcast %cst_214 : f32 to vector<14x14xf32>
    %418 = arith.maximumf %416, %417 : vector<14x14xf32>
    %cst_215 = arith.constant dense<0.000000e+00> : vector<7x14xf32>
    %419 = tpu.matmul %44, %418, %cst_215 {dimension_numbers = #tpu.dot_dimension_numbers<[1], [0], [0], [1], [0, 0, 1, 1], [], []>} : vector<7x14xf32>, vector<14x14xf32>, vector<7x14xf32> -> vector<7x14xf32>
    %cst_216 = arith.constant dense<0.000000e+00> : vector<7x14xf32>
    %420 = tpu.matmul %53, %418, %cst_216 {dimension_numbers = #tpu.dot_dimension_numbers<[1], [0], [0], [1], [0, 0, 1, 1], [], []>} : vector<7x14xf32>, vector<14x14xf32>, vector<7x14xf32> -> vector<7x14xf32>
    %421 = arith.maximumf %419, %420 : vector<7x14xf32>
    %cst_217 = arith.constant dense<0.000000e+00> : vector<7x7xf32>
    %422 = tpu.matmul %421, %62, %cst_217 {dimension_numbers = #tpu.dot_dimension_numbers<[1], [0], [0], [1], [0, 0, 1, 1], [], []>} : vector<7x14xf32>, vector<14x7xf32>, vector<7x7xf32> -> vector<7x7xf32>
    %cst_218 = arith.constant dense<0.000000e+00> : vector<7x7xf32>
    %423 = tpu.matmul %421, %71, %cst_218 {dimension_numbers = #tpu.dot_dimension_numbers<[1], [0], [0], [1], [0, 0, 1, 1], [], []>} : vector<7x14xf32>, vector<14x7xf32>, vector<7x7xf32> -> vector<7x7xf32>
    %424 = arith.maximumf %422, %423 : vector<7x7xf32>
    %cst_219 = arith.constant 0.000000e+00 : f32
    %425 = vector.broadcast %cst_219 : f32 to vector<14x14xf32>
    %c0_220 = arith.constant 0 : index
    %c0_221 = arith.constant 0 : index
    %426 = vector.load %arg12[%c0_220, %c0_221] : memref<16x96xf32, #tpu.memory_space<vmem>>, vector<14x96xf32>
    %427 = vector.extract_strided_slice %255 {offsets = [6, 0, 0, 0], sizes = [1, 1, 96, 14], strides = [1, 1, 1, 1]} : vector<12x3x96x14xf32> to vector<1x1x96x14xf32>
    %428 = vector.shape_cast %427 : vector<1x1x96x14xf32> to vector<96x14xf32>
    %cst_222 = arith.constant dense<0.000000e+00> : vector<14x14xf32>
    %429 = tpu.matmul %426, %428, %cst_222 {dimension_numbers = #tpu.dot_dimension_numbers<[1], [0], [0], [1], [0, 0, 1, 1], [], []>} : vector<14x96xf32>, vector<96x14xf32>, vector<14x14xf32> -> vector<14x14xf32>
    %430 = arith.addf %425, %429 : vector<14x14xf32>
    %c1_223 = arith.constant 1 : index
    %c0_224 = arith.constant 0 : index
    %431 = vector.load %arg12[%c1_223, %c0_224] : memref<16x96xf32, #tpu.memory_space<vmem>>, vector<14x96xf32>
    %432 = vector.extract_strided_slice %255 {offsets = [6, 1, 0, 0], sizes = [1, 1, 96, 14], strides = [1, 1, 1, 1]} : vector<12x3x96x14xf32> to vector<1x1x96x14xf32>
    %433 = vector.shape_cast %432 : vector<1x1x96x14xf32> to vector<96x14xf32>
    %cst_225 = arith.constant dense<0.000000e+00> : vector<14x14xf32>
    %434 = tpu.matmul %431, %433, %cst_225 {dimension_numbers = #tpu.dot_dimension_numbers<[1], [0], [0], [1], [0, 0, 1, 1], [], []>} : vector<14x96xf32>, vector<96x14xf32>, vector<14x14xf32> -> vector<14x14xf32>
    %435 = arith.addf %430, %434 : vector<14x14xf32>
    %c2_226 = arith.constant 2 : index
    %c0_227 = arith.constant 0 : index
    %436 = vector.load %arg12[%c2_226, %c0_227] : memref<16x96xf32, #tpu.memory_space<vmem>>, vector<14x96xf32>
    %437 = vector.extract_strided_slice %255 {offsets = [6, 2, 0, 0], sizes = [1, 1, 96, 14], strides = [1, 1, 1, 1]} : vector<12x3x96x14xf32> to vector<1x1x96x14xf32>
    %438 = vector.shape_cast %437 : vector<1x1x96x14xf32> to vector<96x14xf32>
    %cst_228 = arith.constant dense<0.000000e+00> : vector<14x14xf32>
    %439 = tpu.matmul %436, %438, %cst_228 {dimension_numbers = #tpu.dot_dimension_numbers<[1], [0], [0], [1], [0, 0, 1, 1], [], []>} : vector<14x96xf32>, vector<96x14xf32>, vector<14x14xf32> -> vector<14x14xf32>
    %440 = arith.addf %435, %439 : vector<14x14xf32>
    %441 = vector.extract_strided_slice %256 {offsets = [0, 6], sizes = [1, 1], strides = [1, 1]} : vector<1x12xf32> to vector<1x1xf32>
    %442 = vector.extract %441[0, 0] : f32 from vector<1x1xf32>
    %443 = vector.broadcast %442 : f32 to vector<14x14xf32>
    %444 = arith.addf %440, %443 : vector<14x14xf32>
    %cst_229 = arith.constant 0.000000e+00 : f32
    %445 = vector.broadcast %cst_229 : f32 to vector<14x14xf32>
    %446 = arith.maximumf %444, %445 : vector<14x14xf32>
    %cst_230 = arith.constant dense<0.000000e+00> : vector<7x14xf32>
    %447 = tpu.matmul %44, %446, %cst_230 {dimension_numbers = #tpu.dot_dimension_numbers<[1], [0], [0], [1], [0, 0, 1, 1], [], []>} : vector<7x14xf32>, vector<14x14xf32>, vector<7x14xf32> -> vector<7x14xf32>
    %cst_231 = arith.constant dense<0.000000e+00> : vector<7x14xf32>
    %448 = tpu.matmul %53, %446, %cst_231 {dimension_numbers = #tpu.dot_dimension_numbers<[1], [0], [0], [1], [0, 0, 1, 1], [], []>} : vector<7x14xf32>, vector<14x14xf32>, vector<7x14xf32> -> vector<7x14xf32>
    %449 = arith.maximumf %447, %448 : vector<7x14xf32>
    %cst_232 = arith.constant dense<0.000000e+00> : vector<7x7xf32>
    %450 = tpu.matmul %449, %62, %cst_232 {dimension_numbers = #tpu.dot_dimension_numbers<[1], [0], [0], [1], [0, 0, 1, 1], [], []>} : vector<7x14xf32>, vector<14x7xf32>, vector<7x7xf32> -> vector<7x7xf32>
    %cst_233 = arith.constant dense<0.000000e+00> : vector<7x7xf32>
    %451 = tpu.matmul %449, %71, %cst_233 {dimension_numbers = #tpu.dot_dimension_numbers<[1], [0], [0], [1], [0, 0, 1, 1], [], []>} : vector<7x14xf32>, vector<14x7xf32>, vector<7x7xf32> -> vector<7x7xf32>
    %452 = arith.maximumf %450, %451 : vector<7x7xf32>
    %cst_234 = arith.constant 0.000000e+00 : f32
    %453 = vector.broadcast %cst_234 : f32 to vector<14x14xf32>
    %c0_235 = arith.constant 0 : index
    %c0_236 = arith.constant 0 : index
    %454 = vector.load %arg12[%c0_235, %c0_236] : memref<16x96xf32, #tpu.memory_space<vmem>>, vector<14x96xf32>
    %455 = vector.extract_strided_slice %255 {offsets = [7, 0, 0, 0], sizes = [1, 1, 96, 14], strides = [1, 1, 1, 1]} : vector<12x3x96x14xf32> to vector<1x1x96x14xf32>
    %456 = vector.shape_cast %455 : vector<1x1x96x14xf32> to vector<96x14xf32>
    %cst_237 = arith.constant dense<0.000000e+00> : vector<14x14xf32>
    %457 = tpu.matmul %454, %456, %cst_237 {dimension_numbers = #tpu.dot_dimension_numbers<[1], [0], [0], [1], [0, 0, 1, 1], [], []>} : vector<14x96xf32>, vector<96x14xf32>, vector<14x14xf32> -> vector<14x14xf32>
    %458 = arith.addf %453, %457 : vector<14x14xf32>
    %c1_238 = arith.constant 1 : index
    %c0_239 = arith.constant 0 : index
    %459 = vector.load %arg12[%c1_238, %c0_239] : memref<16x96xf32, #tpu.memory_space<vmem>>, vector<14x96xf32>
    %460 = vector.extract_strided_slice %255 {offsets = [7, 1, 0, 0], sizes = [1, 1, 96, 14], strides = [1, 1, 1, 1]} : vector<12x3x96x14xf32> to vector<1x1x96x14xf32>
    %461 = vector.shape_cast %460 : vector<1x1x96x14xf32> to vector<96x14xf32>
    %cst_240 = arith.constant dense<0.000000e+00> : vector<14x14xf32>
    %462 = tpu.matmul %459, %461, %cst_240 {dimension_numbers = #tpu.dot_dimension_numbers<[1], [0], [0], [1], [0, 0, 1, 1], [], []>} : vector<14x96xf32>, vector<96x14xf32>, vector<14x14xf32> -> vector<14x14xf32>
    %463 = arith.addf %458, %462 : vector<14x14xf32>
    %c2_241 = arith.constant 2 : index
    %c0_242 = arith.constant 0 : index
    %464 = vector.load %arg12[%c2_241, %c0_242] : memref<16x96xf32, #tpu.memory_space<vmem>>, vector<14x96xf32>
    %465 = vector.extract_strided_slice %255 {offsets = [7, 2, 0, 0], sizes = [1, 1, 96, 14], strides = [1, 1, 1, 1]} : vector<12x3x96x14xf32> to vector<1x1x96x14xf32>
    %466 = vector.shape_cast %465 : vector<1x1x96x14xf32> to vector<96x14xf32>
    %cst_243 = arith.constant dense<0.000000e+00> : vector<14x14xf32>
    %467 = tpu.matmul %464, %466, %cst_243 {dimension_numbers = #tpu.dot_dimension_numbers<[1], [0], [0], [1], [0, 0, 1, 1], [], []>} : vector<14x96xf32>, vector<96x14xf32>, vector<14x14xf32> -> vector<14x14xf32>
    %468 = arith.addf %463, %467 : vector<14x14xf32>
    %469 = vector.extract_strided_slice %256 {offsets = [0, 7], sizes = [1, 1], strides = [1, 1]} : vector<1x12xf32> to vector<1x1xf32>
    %470 = vector.extract %469[0, 0] : f32 from vector<1x1xf32>
    %471 = vector.broadcast %470 : f32 to vector<14x14xf32>
    %472 = arith.addf %468, %471 : vector<14x14xf32>
    %cst_244 = arith.constant 0.000000e+00 : f32
    %473 = vector.broadcast %cst_244 : f32 to vector<14x14xf32>
    %474 = arith.maximumf %472, %473 : vector<14x14xf32>
    %cst_245 = arith.constant dense<0.000000e+00> : vector<7x14xf32>
    %475 = tpu.matmul %44, %474, %cst_245 {dimension_numbers = #tpu.dot_dimension_numbers<[1], [0], [0], [1], [0, 0, 1, 1], [], []>} : vector<7x14xf32>, vector<14x14xf32>, vector<7x14xf32> -> vector<7x14xf32>
    %cst_246 = arith.constant dense<0.000000e+00> : vector<7x14xf32>
    %476 = tpu.matmul %53, %474, %cst_246 {dimension_numbers = #tpu.dot_dimension_numbers<[1], [0], [0], [1], [0, 0, 1, 1], [], []>} : vector<7x14xf32>, vector<14x14xf32>, vector<7x14xf32> -> vector<7x14xf32>
    %477 = arith.maximumf %475, %476 : vector<7x14xf32>
    %cst_247 = arith.constant dense<0.000000e+00> : vector<7x7xf32>
    %478 = tpu.matmul %477, %62, %cst_247 {dimension_numbers = #tpu.dot_dimension_numbers<[1], [0], [0], [1], [0, 0, 1, 1], [], []>} : vector<7x14xf32>, vector<14x7xf32>, vector<7x7xf32> -> vector<7x7xf32>
    %cst_248 = arith.constant dense<0.000000e+00> : vector<7x7xf32>
    %479 = tpu.matmul %477, %71, %cst_248 {dimension_numbers = #tpu.dot_dimension_numbers<[1], [0], [0], [1], [0, 0, 1, 1], [], []>} : vector<7x14xf32>, vector<14x7xf32>, vector<7x7xf32> -> vector<7x7xf32>
    %480 = arith.maximumf %478, %479 : vector<7x7xf32>
    %cst_249 = arith.constant 0.000000e+00 : f32
    %481 = vector.broadcast %cst_249 : f32 to vector<14x14xf32>
    %c0_250 = arith.constant 0 : index
    %c0_251 = arith.constant 0 : index
    %482 = vector.load %arg12[%c0_250, %c0_251] : memref<16x96xf32, #tpu.memory_space<vmem>>, vector<14x96xf32>
    %483 = vector.extract_strided_slice %255 {offsets = [8, 0, 0, 0], sizes = [1, 1, 96, 14], strides = [1, 1, 1, 1]} : vector<12x3x96x14xf32> to vector<1x1x96x14xf32>
    %484 = vector.shape_cast %483 : vector<1x1x96x14xf32> to vector<96x14xf32>
    %cst_252 = arith.constant dense<0.000000e+00> : vector<14x14xf32>
    %485 = tpu.matmul %482, %484, %cst_252 {dimension_numbers = #tpu.dot_dimension_numbers<[1], [0], [0], [1], [0, 0, 1, 1], [], []>} : vector<14x96xf32>, vector<96x14xf32>, vector<14x14xf32> -> vector<14x14xf32>
    %486 = arith.addf %481, %485 : vector<14x14xf32>
    %c1_253 = arith.constant 1 : index
    %c0_254 = arith.constant 0 : index
    %487 = vector.load %arg12[%c1_253, %c0_254] : memref<16x96xf32, #tpu.memory_space<vmem>>, vector<14x96xf32>
    %488 = vector.extract_strided_slice %255 {offsets = [8, 1, 0, 0], sizes = [1, 1, 96, 14], strides = [1, 1, 1, 1]} : vector<12x3x96x14xf32> to vector<1x1x96x14xf32>
    %489 = vector.shape_cast %488 : vector<1x1x96x14xf32> to vector<96x14xf32>
    %cst_255 = arith.constant dense<0.000000e+00> : vector<14x14xf32>
    %490 = tpu.matmul %487, %489, %cst_255 {dimension_numbers = #tpu.dot_dimension_numbers<[1], [0], [0], [1], [0, 0, 1, 1], [], []>} : vector<14x96xf32>, vector<96x14xf32>, vector<14x14xf32> -> vector<14x14xf32>
    %491 = arith.addf %486, %490 : vector<14x14xf32>
    %c2_256 = arith.constant 2 : index
    %c0_257 = arith.constant 0 : index
    %492 = vector.load %arg12[%c2_256, %c0_257] : memref<16x96xf32, #tpu.memory_space<vmem>>, vector<14x96xf32>
    %493 = vector.extract_strided_slice %255 {offsets = [8, 2, 0, 0], sizes = [1, 1, 96, 14], strides = [1, 1, 1, 1]} : vector<12x3x96x14xf32> to vector<1x1x96x14xf32>
    %494 = vector.shape_cast %493 : vector<1x1x96x14xf32> to vector<96x14xf32>
    %cst_258 = arith.constant dense<0.000000e+00> : vector<14x14xf32>
    %495 = tpu.matmul %492, %494, %cst_258 {dimension_numbers = #tpu.dot_dimension_numbers<[1], [0], [0], [1], [0, 0, 1, 1], [], []>} : vector<14x96xf32>, vector<96x14xf32>, vector<14x14xf32> -> vector<14x14xf32>
    %496 = arith.addf %491, %495 : vector<14x14xf32>
    %497 = vector.extract_strided_slice %256 {offsets = [0, 8], sizes = [1, 1], strides = [1, 1]} : vector<1x12xf32> to vector<1x1xf32>
    %498 = vector.extract %497[0, 0] : f32 from vector<1x1xf32>
    %499 = vector.broadcast %498 : f32 to vector<14x14xf32>
    %500 = arith.addf %496, %499 : vector<14x14xf32>
    %cst_259 = arith.constant 0.000000e+00 : f32
    %501 = vector.broadcast %cst_259 : f32 to vector<14x14xf32>
    %502 = arith.maximumf %500, %501 : vector<14x14xf32>
    %cst_260 = arith.constant dense<0.000000e+00> : vector<7x14xf32>
    %503 = tpu.matmul %44, %502, %cst_260 {dimension_numbers = #tpu.dot_dimension_numbers<[1], [0], [0], [1], [0, 0, 1, 1], [], []>} : vector<7x14xf32>, vector<14x14xf32>, vector<7x14xf32> -> vector<7x14xf32>
    %cst_261 = arith.constant dense<0.000000e+00> : vector<7x14xf32>
    %504 = tpu.matmul %53, %502, %cst_261 {dimension_numbers = #tpu.dot_dimension_numbers<[1], [0], [0], [1], [0, 0, 1, 1], [], []>} : vector<7x14xf32>, vector<14x14xf32>, vector<7x14xf32> -> vector<7x14xf32>
    %505 = arith.maximumf %503, %504 : vector<7x14xf32>
    %cst_262 = arith.constant dense<0.000000e+00> : vector<7x7xf32>
    %506 = tpu.matmul %505, %62, %cst_262 {dimension_numbers = #tpu.dot_dimension_numbers<[1], [0], [0], [1], [0, 0, 1, 1], [], []>} : vector<7x14xf32>, vector<14x7xf32>, vector<7x7xf32> -> vector<7x7xf32>
    %cst_263 = arith.constant dense<0.000000e+00> : vector<7x7xf32>
    %507 = tpu.matmul %505, %71, %cst_263 {dimension_numbers = #tpu.dot_dimension_numbers<[1], [0], [0], [1], [0, 0, 1, 1], [], []>} : vector<7x14xf32>, vector<14x7xf32>, vector<7x7xf32> -> vector<7x7xf32>
    %508 = arith.maximumf %506, %507 : vector<7x7xf32>
    %cst_264 = arith.constant 0.000000e+00 : f32
    %509 = vector.broadcast %cst_264 : f32 to vector<14x14xf32>
    %c0_265 = arith.constant 0 : index
    %c0_266 = arith.constant 0 : index
    %510 = vector.load %arg12[%c0_265, %c0_266] : memref<16x96xf32, #tpu.memory_space<vmem>>, vector<14x96xf32>
    %511 = vector.extract_strided_slice %255 {offsets = [9, 0, 0, 0], sizes = [1, 1, 96, 14], strides = [1, 1, 1, 1]} : vector<12x3x96x14xf32> to vector<1x1x96x14xf32>
    %512 = vector.shape_cast %511 : vector<1x1x96x14xf32> to vector<96x14xf32>
    %cst_267 = arith.constant dense<0.000000e+00> : vector<14x14xf32>
    %513 = tpu.matmul %510, %512, %cst_267 {dimension_numbers = #tpu.dot_dimension_numbers<[1], [0], [0], [1], [0, 0, 1, 1], [], []>} : vector<14x96xf32>, vector<96x14xf32>, vector<14x14xf32> -> vector<14x14xf32>
    %514 = arith.addf %509, %513 : vector<14x14xf32>
    %c1_268 = arith.constant 1 : index
    %c0_269 = arith.constant 0 : index
    %515 = vector.load %arg12[%c1_268, %c0_269] : memref<16x96xf32, #tpu.memory_space<vmem>>, vector<14x96xf32>
    %516 = vector.extract_strided_slice %255 {offsets = [9, 1, 0, 0], sizes = [1, 1, 96, 14], strides = [1, 1, 1, 1]} : vector<12x3x96x14xf32> to vector<1x1x96x14xf32>
    %517 = vector.shape_cast %516 : vector<1x1x96x14xf32> to vector<96x14xf32>
    %cst_270 = arith.constant dense<0.000000e+00> : vector<14x14xf32>
    %518 = tpu.matmul %515, %517, %cst_270 {dimension_numbers = #tpu.dot_dimension_numbers<[1], [0], [0], [1], [0, 0, 1, 1], [], []>} : vector<14x96xf32>, vector<96x14xf32>, vector<14x14xf32> -> vector<14x14xf32>
    %519 = arith.addf %514, %518 : vector<14x14xf32>
    %c2_271 = arith.constant 2 : index
    %c0_272 = arith.constant 0 : index
    %520 = vector.load %arg12[%c2_271, %c0_272] : memref<16x96xf32, #tpu.memory_space<vmem>>, vector<14x96xf32>
    %521 = vector.extract_strided_slice %255 {offsets = [9, 2, 0, 0], sizes = [1, 1, 96, 14], strides = [1, 1, 1, 1]} : vector<12x3x96x14xf32> to vector<1x1x96x14xf32>
    %522 = vector.shape_cast %521 : vector<1x1x96x14xf32> to vector<96x14xf32>
    %cst_273 = arith.constant dense<0.000000e+00> : vector<14x14xf32>
    %523 = tpu.matmul %520, %522, %cst_273 {dimension_numbers = #tpu.dot_dimension_numbers<[1], [0], [0], [1], [0, 0, 1, 1], [], []>} : vector<14x96xf32>, vector<96x14xf32>, vector<14x14xf32> -> vector<14x14xf32>
    %524 = arith.addf %519, %523 : vector<14x14xf32>
    %525 = vector.extract_strided_slice %256 {offsets = [0, 9], sizes = [1, 1], strides = [1, 1]} : vector<1x12xf32> to vector<1x1xf32>
    %526 = vector.extract %525[0, 0] : f32 from vector<1x1xf32>
    %527 = vector.broadcast %526 : f32 to vector<14x14xf32>
    %528 = arith.addf %524, %527 : vector<14x14xf32>
    %cst_274 = arith.constant 0.000000e+00 : f32
    %529 = vector.broadcast %cst_274 : f32 to vector<14x14xf32>
    %530 = arith.maximumf %528, %529 : vector<14x14xf32>
    %cst_275 = arith.constant dense<0.000000e+00> : vector<7x14xf32>
    %531 = tpu.matmul %44, %530, %cst_275 {dimension_numbers = #tpu.dot_dimension_numbers<[1], [0], [0], [1], [0, 0, 1, 1], [], []>} : vector<7x14xf32>, vector<14x14xf32>, vector<7x14xf32> -> vector<7x14xf32>
    %cst_276 = arith.constant dense<0.000000e+00> : vector<7x14xf32>
    %532 = tpu.matmul %53, %530, %cst_276 {dimension_numbers = #tpu.dot_dimension_numbers<[1], [0], [0], [1], [0, 0, 1, 1], [], []>} : vector<7x14xf32>, vector<14x14xf32>, vector<7x14xf32> -> vector<7x14xf32>
    %533 = arith.maximumf %531, %532 : vector<7x14xf32>
    %cst_277 = arith.constant dense<0.000000e+00> : vector<7x7xf32>
    %534 = tpu.matmul %533, %62, %cst_277 {dimension_numbers = #tpu.dot_dimension_numbers<[1], [0], [0], [1], [0, 0, 1, 1], [], []>} : vector<7x14xf32>, vector<14x7xf32>, vector<7x7xf32> -> vector<7x7xf32>
    %cst_278 = arith.constant dense<0.000000e+00> : vector<7x7xf32>
    %535 = tpu.matmul %533, %71, %cst_278 {dimension_numbers = #tpu.dot_dimension_numbers<[1], [0], [0], [1], [0, 0, 1, 1], [], []>} : vector<7x14xf32>, vector<14x7xf32>, vector<7x7xf32> -> vector<7x7xf32>
    %536 = arith.maximumf %534, %535 : vector<7x7xf32>
    %cst_279 = arith.constant 0.000000e+00 : f32
    %537 = vector.broadcast %cst_279 : f32 to vector<14x14xf32>
    %c0_280 = arith.constant 0 : index
    %c0_281 = arith.constant 0 : index
    %538 = vector.load %arg12[%c0_280, %c0_281] : memref<16x96xf32, #tpu.memory_space<vmem>>, vector<14x96xf32>
    %539 = vector.extract_strided_slice %255 {offsets = [10, 0, 0, 0], sizes = [1, 1, 96, 14], strides = [1, 1, 1, 1]} : vector<12x3x96x14xf32> to vector<1x1x96x14xf32>
    %540 = vector.shape_cast %539 : vector<1x1x96x14xf32> to vector<96x14xf32>
    %cst_282 = arith.constant dense<0.000000e+00> : vector<14x14xf32>
    %541 = tpu.matmul %538, %540, %cst_282 {dimension_numbers = #tpu.dot_dimension_numbers<[1], [0], [0], [1], [0, 0, 1, 1], [], []>} : vector<14x96xf32>, vector<96x14xf32>, vector<14x14xf32> -> vector<14x14xf32>
    %542 = arith.addf %537, %541 : vector<14x14xf32>
    %c1_283 = arith.constant 1 : index
    %c0_284 = arith.constant 0 : index
    %543 = vector.load %arg12[%c1_283, %c0_284] : memref<16x96xf32, #tpu.memory_space<vmem>>, vector<14x96xf32>
    %544 = vector.extract_strided_slice %255 {offsets = [10, 1, 0, 0], sizes = [1, 1, 96, 14], strides = [1, 1, 1, 1]} : vector<12x3x96x14xf32> to vector<1x1x96x14xf32>
    %545 = vector.shape_cast %544 : vector<1x1x96x14xf32> to vector<96x14xf32>
    %cst_285 = arith.constant dense<0.000000e+00> : vector<14x14xf32>
    %546 = tpu.matmul %543, %545, %cst_285 {dimension_numbers = #tpu.dot_dimension_numbers<[1], [0], [0], [1], [0, 0, 1, 1], [], []>} : vector<14x96xf32>, vector<96x14xf32>, vector<14x14xf32> -> vector<14x14xf32>
    %547 = arith.addf %542, %546 : vector<14x14xf32>
    %c2_286 = arith.constant 2 : index
    %c0_287 = arith.constant 0 : index
    %548 = vector.load %arg12[%c2_286, %c0_287] : memref<16x96xf32, #tpu.memory_space<vmem>>, vector<14x96xf32>
    %549 = vector.extract_strided_slice %255 {offsets = [10, 2, 0, 0], sizes = [1, 1, 96, 14], strides = [1, 1, 1, 1]} : vector<12x3x96x14xf32> to vector<1x1x96x14xf32>
    %550 = vector.shape_cast %549 : vector<1x1x96x14xf32> to vector<96x14xf32>
    %cst_288 = arith.constant dense<0.000000e+00> : vector<14x14xf32>
    %551 = tpu.matmul %548, %550, %cst_288 {dimension_numbers = #tpu.dot_dimension_numbers<[1], [0], [0], [1], [0, 0, 1, 1], [], []>} : vector<14x96xf32>, vector<96x14xf32>, vector<14x14xf32> -> vector<14x14xf32>
    %552 = arith.addf %547, %551 : vector<14x14xf32>
    %553 = vector.extract_strided_slice %256 {offsets = [0, 10], sizes = [1, 1], strides = [1, 1]} : vector<1x12xf32> to vector<1x1xf32>
    %554 = vector.extract %553[0, 0] : f32 from vector<1x1xf32>
    %555 = vector.broadcast %554 : f32 to vector<14x14xf32>
    %556 = arith.addf %552, %555 : vector<14x14xf32>
    %cst_289 = arith.constant 0.000000e+00 : f32
    %557 = vector.broadcast %cst_289 : f32 to vector<14x14xf32>
    %558 = arith.maximumf %556, %557 : vector<14x14xf32>
    %cst_290 = arith.constant dense<0.000000e+00> : vector<7x14xf32>
    %559 = tpu.matmul %44, %558, %cst_290 {dimension_numbers = #tpu.dot_dimension_numbers<[1], [0], [0], [1], [0, 0, 1, 1], [], []>} : vector<7x14xf32>, vector<14x14xf32>, vector<7x14xf32> -> vector<7x14xf32>
    %cst_291 = arith.constant dense<0.000000e+00> : vector<7x14xf32>
    %560 = tpu.matmul %53, %558, %cst_291 {dimension_numbers = #tpu.dot_dimension_numbers<[1], [0], [0], [1], [0, 0, 1, 1], [], []>} : vector<7x14xf32>, vector<14x14xf32>, vector<7x14xf32> -> vector<7x14xf32>
    %561 = arith.maximumf %559, %560 : vector<7x14xf32>
    %cst_292 = arith.constant dense<0.000000e+00> : vector<7x7xf32>
    %562 = tpu.matmul %561, %62, %cst_292 {dimension_numbers = #tpu.dot_dimension_numbers<[1], [0], [0], [1], [0, 0, 1, 1], [], []>} : vector<7x14xf32>, vector<14x7xf32>, vector<7x7xf32> -> vector<7x7xf32>
    %cst_293 = arith.constant dense<0.000000e+00> : vector<7x7xf32>
    %563 = tpu.matmul %561, %71, %cst_293 {dimension_numbers = #tpu.dot_dimension_numbers<[1], [0], [0], [1], [0, 0, 1, 1], [], []>} : vector<7x14xf32>, vector<14x7xf32>, vector<7x7xf32> -> vector<7x7xf32>
    %564 = arith.maximumf %562, %563 : vector<7x7xf32>
    %cst_294 = arith.constant 0.000000e+00 : f32
    %565 = vector.broadcast %cst_294 : f32 to vector<14x14xf32>
    %c0_295 = arith.constant 0 : index
    %c0_296 = arith.constant 0 : index
    %566 = vector.load %arg12[%c0_295, %c0_296] : memref<16x96xf32, #tpu.memory_space<vmem>>, vector<14x96xf32>
    %567 = vector.extract_strided_slice %255 {offsets = [11, 0, 0, 0], sizes = [1, 1, 96, 14], strides = [1, 1, 1, 1]} : vector<12x3x96x14xf32> to vector<1x1x96x14xf32>
    %568 = vector.shape_cast %567 : vector<1x1x96x14xf32> to vector<96x14xf32>
    %cst_297 = arith.constant dense<0.000000e+00> : vector<14x14xf32>
    %569 = tpu.matmul %566, %568, %cst_297 {dimension_numbers = #tpu.dot_dimension_numbers<[1], [0], [0], [1], [0, 0, 1, 1], [], []>} : vector<14x96xf32>, vector<96x14xf32>, vector<14x14xf32> -> vector<14x14xf32>
    %570 = arith.addf %565, %569 : vector<14x14xf32>
    %c1_298 = arith.constant 1 : index
    %c0_299 = arith.constant 0 : index
    %571 = vector.load %arg12[%c1_298, %c0_299] : memref<16x96xf32, #tpu.memory_space<vmem>>, vector<14x96xf32>
    %572 = vector.extract_strided_slice %255 {offsets = [11, 1, 0, 0], sizes = [1, 1, 96, 14], strides = [1, 1, 1, 1]} : vector<12x3x96x14xf32> to vector<1x1x96x14xf32>
    %573 = vector.shape_cast %572 : vector<1x1x96x14xf32> to vector<96x14xf32>
    %cst_300 = arith.constant dense<0.000000e+00> : vector<14x14xf32>
    %574 = tpu.matmul %571, %573, %cst_300 {dimension_numbers = #tpu.dot_dimension_numbers<[1], [0], [0], [1], [0, 0, 1, 1], [], []>} : vector<14x96xf32>, vector<96x14xf32>, vector<14x14xf32> -> vector<14x14xf32>
    %575 = arith.addf %570, %574 : vector<14x14xf32>
    %c2_301 = arith.constant 2 : index
    %c0_302 = arith.constant 0 : index
    %576 = vector.load %arg12[%c2_301, %c0_302] : memref<16x96xf32, #tpu.memory_space<vmem>>, vector<14x96xf32>
    %577 = vector.extract_strided_slice %255 {offsets = [11, 2, 0, 0], sizes = [1, 1, 96, 14], strides = [1, 1, 1, 1]} : vector<12x3x96x14xf32> to vector<1x1x96x14xf32>
    %578 = vector.shape_cast %577 : vector<1x1x96x14xf32> to vector<96x14xf32>
    %cst_303 = arith.constant dense<0.000000e+00> : vector<14x14xf32>
    %579 = tpu.matmul %576, %578, %cst_303 {dimension_numbers = #tpu.dot_dimension_numbers<[1], [0], [0], [1], [0, 0, 1, 1], [], []>} : vector<14x96xf32>, vector<96x14xf32>, vector<14x14xf32> -> vector<14x14xf32>
    %580 = arith.addf %575, %579 : vector<14x14xf32>
    %581 = vector.extract_strided_slice %256 {offsets = [0, 11], sizes = [1, 1], strides = [1, 1]} : vector<1x12xf32> to vector<1x1xf32>
    %582 = vector.extract %581[0, 0] : f32 from vector<1x1xf32>
    %583 = vector.broadcast %582 : f32 to vector<14x14xf32>
    %584 = arith.addf %580, %583 : vector<14x14xf32>
    %cst_304 = arith.constant 0.000000e+00 : f32
    %585 = vector.broadcast %cst_304 : f32 to vector<14x14xf32>
    %586 = arith.maximumf %584, %585 : vector<14x14xf32>
    %cst_305 = arith.constant dense<0.000000e+00> : vector<7x14xf32>
    %587 = tpu.matmul %44, %586, %cst_305 {dimension_numbers = #tpu.dot_dimension_numbers<[1], [0], [0], [1], [0, 0, 1, 1], [], []>} : vector<7x14xf32>, vector<14x14xf32>, vector<7x14xf32> -> vector<7x14xf32>
    %cst_306 = arith.constant dense<0.000000e+00> : vector<7x14xf32>
    %588 = tpu.matmul %53, %586, %cst_306 {dimension_numbers = #tpu.dot_dimension_numbers<[1], [0], [0], [1], [0, 0, 1, 1], [], []>} : vector<7x14xf32>, vector<14x14xf32>, vector<7x14xf32> -> vector<7x14xf32>
    %589 = arith.maximumf %587, %588 : vector<7x14xf32>
    %cst_307 = arith.constant dense<0.000000e+00> : vector<7x7xf32>
    %590 = tpu.matmul %589, %62, %cst_307 {dimension_numbers = #tpu.dot_dimension_numbers<[1], [0], [0], [1], [0, 0, 1, 1], [], []>} : vector<7x14xf32>, vector<14x7xf32>, vector<7x7xf32> -> vector<7x7xf32>
    %cst_308 = arith.constant dense<0.000000e+00> : vector<7x7xf32>
    %591 = tpu.matmul %589, %71, %cst_308 {dimension_numbers = #tpu.dot_dimension_numbers<[1], [0], [0], [1], [0, 0, 1, 1], [], []>} : vector<7x14xf32>, vector<14x7xf32>, vector<7x7xf32> -> vector<7x7xf32>
    %592 = arith.maximumf %590, %591 : vector<7x7xf32>
    %593 = tpu.concatenate %284, %312, %340, %368, %396, %424, %452, %480, %508, %536, %564, %592 in 1 : vector<7x7xf32>, vector<7x7xf32>, vector<7x7xf32>, vector<7x7xf32>, vector<7x7xf32>, vector<7x7xf32>, vector<7x7xf32>, vector<7x7xf32>, vector<7x7xf32>, vector<7x7xf32>, vector<7x7xf32>, vector<7x7xf32> -> vector<7x84xf32>
    %c0_309 = arith.constant 0 : index
    %c0_310 = arith.constant 0 : index
    %c0_311 = arith.constant 0 : index
    %594 = vector.load %arg6[%c0_309, %c0_310, %c0_311] : memref<7x84x120xf32, #tpu.memory_space<vmem>>, vector<7x84x120xf32>
    %cst_312 = arith.constant 0.000000e+00 : f32
    %595 = vector.broadcast %cst_312 : f32 to vector<1x120xf32>
    %596 = vector.extract_strided_slice %593 {offsets = [0, 0], sizes = [1, 84], strides = [1, 1]} : vector<7x84xf32> to vector<1x84xf32>
    %597 = vector.extract_strided_slice %594 {offsets = [0, 0, 0], sizes = [1, 84, 120], strides = [1, 1, 1]} : vector<7x84x120xf32> to vector<1x84x120xf32>
    %598 = vector.shape_cast %597 : vector<1x84x120xf32> to vector<84x120xf32>
    %cst_313 = arith.constant dense<0.000000e+00> : vector<1x120xf32>
    %599 = tpu.matmul %596, %598, %cst_313 {dimension_numbers = #tpu.dot_dimension_numbers<[1], [0], [0], [1], [0, 0, 1, 1], [], []>} : vector<1x84xf32>, vector<84x120xf32>, vector<1x120xf32> -> vector<1x120xf32>
    %600 = arith.addf %595, %599 : vector<1x120xf32>
    %601 = vector.extract_strided_slice %593 {offsets = [1, 0], sizes = [1, 84], strides = [1, 1]} : vector<7x84xf32> to vector<1x84xf32>
    %602 = vector.extract_strided_slice %594 {offsets = [1, 0, 0], sizes = [1, 84, 120], strides = [1, 1, 1]} : vector<7x84x120xf32> to vector<1x84x120xf32>
    %603 = vector.shape_cast %602 : vector<1x84x120xf32> to vector<84x120xf32>
    %cst_314 = arith.constant dense<0.000000e+00> : vector<1x120xf32>
    %604 = tpu.matmul %601, %603, %cst_314 {dimension_numbers = #tpu.dot_dimension_numbers<[1], [0], [0], [1], [0, 0, 1, 1], [], []>} : vector<1x84xf32>, vector<84x120xf32>, vector<1x120xf32> -> vector<1x120xf32>
    %605 = arith.addf %600, %604 : vector<1x120xf32>
    %606 = vector.extract_strided_slice %593 {offsets = [2, 0], sizes = [1, 84], strides = [1, 1]} : vector<7x84xf32> to vector<1x84xf32>
    %607 = vector.extract_strided_slice %594 {offsets = [2, 0, 0], sizes = [1, 84, 120], strides = [1, 1, 1]} : vector<7x84x120xf32> to vector<1x84x120xf32>
    %608 = vector.shape_cast %607 : vector<1x84x120xf32> to vector<84x120xf32>
    %cst_315 = arith.constant dense<0.000000e+00> : vector<1x120xf32>
    %609 = tpu.matmul %606, %608, %cst_315 {dimension_numbers = #tpu.dot_dimension_numbers<[1], [0], [0], [1], [0, 0, 1, 1], [], []>} : vector<1x84xf32>, vector<84x120xf32>, vector<1x120xf32> -> vector<1x120xf32>
    %610 = arith.addf %605, %609 : vector<1x120xf32>
    %611 = vector.extract_strided_slice %593 {offsets = [3, 0], sizes = [1, 84], strides = [1, 1]} : vector<7x84xf32> to vector<1x84xf32>
    %612 = vector.extract_strided_slice %594 {offsets = [3, 0, 0], sizes = [1, 84, 120], strides = [1, 1, 1]} : vector<7x84x120xf32> to vector<1x84x120xf32>
    %613 = vector.shape_cast %612 : vector<1x84x120xf32> to vector<84x120xf32>
    %cst_316 = arith.constant dense<0.000000e+00> : vector<1x120xf32>
    %614 = tpu.matmul %611, %613, %cst_316 {dimension_numbers = #tpu.dot_dimension_numbers<[1], [0], [0], [1], [0, 0, 1, 1], [], []>} : vector<1x84xf32>, vector<84x120xf32>, vector<1x120xf32> -> vector<1x120xf32>
    %615 = arith.addf %610, %614 : vector<1x120xf32>
    %616 = vector.extract_strided_slice %593 {offsets = [4, 0], sizes = [1, 84], strides = [1, 1]} : vector<7x84xf32> to vector<1x84xf32>
    %617 = vector.extract_strided_slice %594 {offsets = [4, 0, 0], sizes = [1, 84, 120], strides = [1, 1, 1]} : vector<7x84x120xf32> to vector<1x84x120xf32>
    %618 = vector.shape_cast %617 : vector<1x84x120xf32> to vector<84x120xf32>
    %cst_317 = arith.constant dense<0.000000e+00> : vector<1x120xf32>
    %619 = tpu.matmul %616, %618, %cst_317 {dimension_numbers = #tpu.dot_dimension_numbers<[1], [0], [0], [1], [0, 0, 1, 1], [], []>} : vector<1x84xf32>, vector<84x120xf32>, vector<1x120xf32> -> vector<1x120xf32>
    %620 = arith.addf %615, %619 : vector<1x120xf32>
    %621 = vector.extract_strided_slice %593 {offsets = [5, 0], sizes = [1, 84], strides = [1, 1]} : vector<7x84xf32> to vector<1x84xf32>
    %622 = vector.extract_strided_slice %594 {offsets = [5, 0, 0], sizes = [1, 84, 120], strides = [1, 1, 1]} : vector<7x84x120xf32> to vector<1x84x120xf32>
    %623 = vector.shape_cast %622 : vector<1x84x120xf32> to vector<84x120xf32>
    %cst_318 = arith.constant dense<0.000000e+00> : vector<1x120xf32>
    %624 = tpu.matmul %621, %623, %cst_318 {dimension_numbers = #tpu.dot_dimension_numbers<[1], [0], [0], [1], [0, 0, 1, 1], [], []>} : vector<1x84xf32>, vector<84x120xf32>, vector<1x120xf32> -> vector<1x120xf32>
    %625 = arith.addf %620, %624 : vector<1x120xf32>
    %626 = vector.extract_strided_slice %593 {offsets = [6, 0], sizes = [1, 84], strides = [1, 1]} : vector<7x84xf32> to vector<1x84xf32>
    %627 = vector.extract_strided_slice %594 {offsets = [6, 0, 0], sizes = [1, 84, 120], strides = [1, 1, 1]} : vector<7x84x120xf32> to vector<1x84x120xf32>
    %628 = vector.shape_cast %627 : vector<1x84x120xf32> to vector<84x120xf32>
    %cst_319 = arith.constant dense<0.000000e+00> : vector<1x120xf32>
    %629 = tpu.matmul %626, %628, %cst_319 {dimension_numbers = #tpu.dot_dimension_numbers<[1], [0], [0], [1], [0, 0, 1, 1], [], []>} : vector<1x84xf32>, vector<84x120xf32>, vector<1x120xf32> -> vector<1x120xf32>
    %630 = arith.addf %625, %629 : vector<1x120xf32>
    %c0_320 = arith.constant 0 : index
    %c0_321 = arith.constant 0 : index
    %631 = vector.load %arg7[%c0_320, %c0_321] : memref<1x120xf32, #tpu.memory_space<vmem>>, vector<1x120xf32>
    %632 = arith.addf %630, %631 : vector<1x120xf32>
    %cst_322 = arith.constant 0.000000e+00 : f32
    %633 = vector.broadcast %cst_322 : f32 to vector<1x120xf32>
    %634 = arith.maximumf %632, %633 : vector<1x120xf32>
    %c0_323 = arith.constant 0 : index
    %c0_324 = arith.constant 0 : index
    %635 = vector.load %arg8[%c0_323, %c0_324] : memref<120x10xf32, #tpu.memory_space<vmem>>, vector<120x10xf32>
    %cst_325 = arith.constant dense<0.000000e+00> : vector<1x10xf32>
    %636 = tpu.matmul %634, %635, %cst_325 {dimension_numbers = #tpu.dot_dimension_numbers<[1], [0], [0], [1], [0, 0, 1, 1], [], []>} : vector<1x120xf32>, vector<120x10xf32>, vector<1x10xf32> -> vector<1x10xf32>
    %c0_326 = arith.constant 0 : index
    %c0_327 = arith.constant 0 : index
    %637 = vector.load %arg9[%c0_326, %c0_327] : memref<1x10xf32, #tpu.memory_space<vmem>>, vector<1x10xf32>
    %638 = arith.addf %636, %637 : vector<1x10xf32>
    %639 = vector.shape_cast %638 : vector<1x10xf32> to vector<1x1x10xf32>
    %c0_328 = arith.constant 0 : index
    %c0_329 = arith.constant 0 : index
    %c0_330 = arith.constant 0 : index
    %640 = vector.load %arg10[%c0_328, %c0_329, %c0_330] : memref<1x1x10xf32, #tpu.memory_space<vmem>>, vector<1x1x10xf32>
    tpu.vector_store %arg10[%c0_328, %c0_329, %c0_330], %639 {strides = array<i32>} : memref<1x1x10xf32, #tpu.memory_space<vmem>>, vector<1x1x10xf32>,
    return
  }
  func.func @transform_0(%arg0: i32) -> (i32, i32, i32) {
    %c0_i32 = arith.constant 0 : i32
    %c0_i32_0 = arith.constant 0 : i32
    %c0_i32_1 = arith.constant 0 : i32
    return %arg0, %c0_i32, %c0_i32_0 : i32, i32, i32
  }
  func.func @transform_1(%arg0: i32) -> (i32, i32, i32, i32) {
    %c0_i32 = arith.constant 0 : i32
    %c0_i32_0 = arith.constant 0 : i32
    %c0_i32_1 = arith.constant 0 : i32
    %c0_i32_2 = arith.constant 0 : i32
    %c0_i32_3 = arith.constant 0 : i32
    return %c0_i32, %c0_i32_0, %c0_i32_1, %c0_i32_2 : i32, i32, i32, i32
  }
  func.func @transform_2(%arg0: i32) -> (i32, i32) {
    %c0_i32 = arith.constant 0 : i32
    %c0_i32_0 = arith.constant 0 : i32
    %c0_i32_1 = arith.constant 0 : i32
    return %c0_i32, %c0_i32_0 : i32, i32
  }
  func.func @transform_3(%arg0: i32) -> (i32, i32, i32, i32) {
    %c0_i32 = arith.constant 0 : i32
    %c0_i32_0 = arith.constant 0 : i32
    %c0_i32_1 = arith.constant 0 : i32
    %c0_i32_2 = arith.constant 0 : i32
    %c0_i32_3 = arith.constant 0 : i32
    return %c0_i32, %c0_i32_0, %c0_i32_1, %c0_i32_2 : i32, i32, i32, i32
  }
  func.func @transform_4(%arg0: i32) -> (i32, i32) {
    %c0_i32 = arith.constant 0 : i32
    %c0_i32_0 = arith.constant 0 : i32
    %c0_i32_1 = arith.constant 0 : i32
    return %c0_i32, %c0_i32_0 : i32, i32
  }
  func.func @transform_5(%arg0: i32) -> (i32, i32, i32) {
    %c0_i32 = arith.constant 0 : i32
    %c0_i32_0 = arith.constant 0 : i32
    %c0_i32_1 = arith.constant 0 : i32
    %c0_i32_2 = arith.constant 0 : i32
    return %c0_i32, %c0_i32_0, %c0_i32_1 : i32, i32, i32
  }
  func.func @transform_6(%arg0: i32) -> (i32, i32) {
    %c0_i32 = arith.constant 0 : i32
    %c0_i32_0 = arith.constant 0 : i32
    %c0_i32_1 = arith.constant 0 : i32
    return %c0_i32, %c0_i32_0 : i32, i32
  }
  func.func @transform_7(%arg0: i32) -> (i32, i32) {
    %c0_i32 = arith.constant 0 : i32
    %c0_i32_0 = arith.constant 0 : i32
    %c0_i32_1 = arith.constant 0 : i32
    return %c0_i32, %c0_i32_0 : i32, i32
  }
  func.func @transform_8(%arg0: i32) -> (i32, i32) {
    %c0_i32 = arith.constant 0 : i32
    %c0_i32_0 = arith.constant 0 : i32
    %c0_i32_1 = arith.constant 0 : i32
    return %c0_i32, %c0_i32_0 : i32, i32
  }
  func.func @transform_9(%arg0: i32) -> (i32, i32, i32) {
    %c0_i32 = arith.constant 0 : i32
    %c0_i32_0 = arith.constant 0 : i32
    %c0_i32_1 = arith.constant 0 : i32
    return %arg0, %c0_i32, %c0_i32_0 : i32, i32, i32
  }
}

</mosaic_0001>

<bundles_post_ra>
// kernel: digits_forward.1
= control target key start
LH: loop header
LB: loop body
LE: loop exit
PB: predicated region body
PF: predicated region fallthrough
CT: control target
= control target key end

     0   :  { %14 = vsyncpa [#allocation5], 0  ;;  %s20630_s0 = inlined_call_operand.vmem [shape: f32[2,28,28], index: 0, kind: input, shape index: {}]   ;;  %s20631_s1 = inlined_call_operand.vmem [shape: f32[6,3,30,28], index: 1, kind: input, shape index: {}]   ;;  %s20632_s2 = inlined_call_operand.vmem [shape: f32[1,6], index: 2, kind: input, shape index: {}]   ;;  %s20633_s3 = inlined_call_operand.vmem [shape: f32[12,3,96,14], index: 3, kind: input, shape index: {}]   ;;  %s20634_s4 = inlined_call_operand.vmem [shape: f32[1,12], index: 4, kind: input, shape index: {}]   ;;  %s20635_s5 = inlined_call_operand.vmem [shape: f32[7,84,120], index: 5, kind: input, shape index: {}]   ;;  %s20636_s6 = inlined_call_operand.vmem [shape: f32[1,120], index: 6, kind: input, shape index: {}]   ;;  %s20637_s7 = inlined_call_operand.vmem [shape: f32[120,10], index: 7, kind: input, shape index: {}]   ;;  %s20638_s8 = inlined_call_operand.vmem [shape: f32[1,10], index: 8, kind: input, shape index: {}]   ;;  %s20639_s9 = inlined_call_operand.hbm [shape: f32[2,1,10], index: 9, kind: output, shape index: {}]  }
   0x1   :  { %16 = vsyncpa [#allocation5 + $0x1], 0  ;;  %s17469_s30 = smov 0   ;;  %s17471_s10 = smov 0  }
   0x2   :  { %s17473_s11 = smov 0   ;;  %s17475_s12 = smov 0  }
   0x3 LB: > { %s17490_s13 = sadd.s32 4294967295, %s17383_s12   ;;  %s12008_s14 = sadd.s32 4294967294, %s17383_s12   ;;  %s17383_s12 = sphi %s17475_s12, %s20669_s12   ;;  %s17379_s11 = sphi %s17473_s11, %s20668_s11   ;;  %s17375_s10 = sphi %s17471_s10, %s20667_s10   ;;  %s17371_s30 = sphi %s17469_s30, %s20666_s30  }
   0x4   : > { %s17494_s15 = sadd.s32 1, %s17383_s12   ;;  %s223_s16 = sadd.s32 1, %s17379_s11 }
   0x5   : > { %s220_s17 = ssub.s32 %s17383_s12, %s17494_s15  ;;  %p233_p0 = scmp.ne.s32.totalorder %s17379_s11, %s17375_s10 }
   0x6   : > { %p221_p1 = scmp.eq.s32.totalorder %s220_s17, 0  ;;  %p234_p2 = scmp.eq.s32.totalorder %s17490_s13, 1 }
   0x7   : > { %p239_p3 = scmp.ne.s32.totalorder %s17375_s10, %s17371_s30  ;;  %p240_p4 = scmp.eq.s32.totalorder %s12008_s14, 1 }
   0x8   : > { %s17505_s18 = scalar_select %p221_p1, %s17379_s11, %s223_s16  }
   0x9   : > { %p17507_p5 = por %p234_p2, %p233_p0  ;;  %p17511_p6 = por %p240_p4, %p239_p3 }
   0xa   : > { %p12011_p7 = scmp.ge.s32.totalorder %s17383_s12, 1  ;;  %p290_p8 = scmp.lt.s32.totalorder %s17383_s12, 3 }
   0xc   : > { %p291_p9 = pnand %p12011_p7, %p290_p8 }
   0xd   : > { %p325_p10 = scmp.lt.s32.totalorder (!%p291_p9), %s17490_s13, 1  ;;  %vm379_vm0 = vcmask (!%p291_p9), 244736   ;;  %vm383_vm1 = vcmask (!%p291_p9), 242688   ;;  %v17385_v0 = vmov (!%p291_p9), 0.0   ;;  %v418_v1 = vld [vmem:[%s20631_s1 + $0x20] sm:$0xff] (!%p291_p9)  ;;  %v419_v2 = vld [vmem:[%s20631_s1 + $0x28] sm:$0xff] (!%p291_p9)  ;;  %v330_v41 = vlaneseq (!%p291_p9) }
   0xe   : > { %294 = sbr.rel (%p291_p9) target bundleno = 10343 (0x2867), region = 56  ;;  %382 = vst.msk [vmem:[#allocation2 + $0x10] sm:$0xff] (!%p291_p9), %vm379_vm0, %v17385_v0  ;;  %380 = vst.msk [vmem:[#allocation2] sm:$0xff] (!%p291_p9), %vm379_vm0, %v17385_v0  ;;  %v420_v3 = vld [vmem:[%s20631_s1 + $0x30] sm:$0xff] (!%p291_p9)  ;;  %vm507_vm2 = vcmask (!%p291_p9), 1045504   ;;  %v15503_v4 = vpack.c.bf16 (!%p291_p9), %v419_v2, %v418_v1  ;;  %vm17386_vm3 = vmmov (!%p291_p9), 1  }
   0xf   : > { %384 = vst.msk [vmem:[#allocation2 + $0x18] sm:$0x3f] (!%p291_p9), %vm383_vm1, %v17385_v0  ;;  %v421_v5 = vld [vmem:[%s20631_s1 + $0x38] sm:$0x3f] (!%p291_p9)  ;;  %vm17540_vm4 = vmpackc.low (!%p291_p9), %vm507_vm2, %vm17386_vm3  ;;  %v414_v8 = vld [vmem:[%s20631_s1] sm:$0xff] (!%p291_p9)  ;;  %s17387_s26 = smov (!%p291_p9), 1  }
  0x10   : > { %381 = vst.msk [vmem:[#allocation2 + $0x8] sm:$0xff] (!%p291_p9), %vm379_vm0, %v17385_v0  ;;  %v15507_v6 = vpack.c.bf16 (!%p291_p9), %v421_v5, %v420_v3  ;;  %v415_v9 = vld [vmem:[%s20631_s1 + $0x8] sm:$0xff] (!%p291_p9)  ;;  %15504 = vmatprep.subr.bf16.mxu0 (!%p291_p9), %v15503_v4  ;;  %v17564_v15 = vld [vmem:[%s20632_s2] sm:$0x1] (!%p291_p9)  ;;  %vm405_vm5 = vcmask (!%p291_p9), 236552   ;;  %vm409_vm6 = vcmask (!%p291_p9), 232456  }
  0x11   : > { %15506 = vmatpush3.bf16.msra.mxu0 (!%p291_p9), %v15503_v4  ;;  %v15513_v12 = vpack.c.bf16 (!%p291_p9), %v415_v9, %v414_v8  ;;  %17201 = vpush (!%p291_p9), %v17564_v15  ;;  %v416_v21 = vld [vmem:[%s20631_s1 + $0x10] sm:$0xff] (!%p291_p9)  ;;  %v417_v22 = vld [vmem:[%s20631_s1 + $0x18] sm:$0x3f] (!%p291_p9)  ;;  %v422_v26 = vld [vmem:[%s20631_s1 + $0x40] sm:$0xff] (!%p291_p9)  ;;  %v17632_v42 = vshrl.u32 (!%p291_p9), %v330_v41, 7  ;;  %v334_v43 = vand.u32 (!%p291_p9), 127, %v330_v41 }
  0x12   : > { %15509 = vmatprep.subr.msk.bf16.mxu0 (!%p291_p9), %vm17540_vm4, %v15507_v6  ;;  %v15517_v24 = vpack.c.bf16 (!%p291_p9), %v417_v22, %v416_v21  ;;  %v423_v27 = vld [vmem:[%s20631_s1 + $0x48] sm:$0xff] (!%p291_p9)  ;;  %v424_v30 = vld [vmem:[%s20631_s1 + $0x50] sm:$0xff] (!%p291_p9)  ;;  %v425_v31 = vld [vmem:[%s20631_s1 + $0x58] sm:$0x3f] (!%p291_p9)  ;;  %vm814_vm7 = vcmask (!%p291_p9), 228352   ;;  %v17388_v51 = vmov (!%p291_p9), 1.0  }
  0x13   : > { %v15523_v29 = vpack.c.bf16 (!%p291_p9), %v423_v27, %v422_v26  ;;  %v15527_v33 = vpack.c.bf16 (!%p291_p9), %v425_v31, %v424_v30  ;;  %v335_v44 = vmul.u32 (!%p291_p9), 2, %v17632_v42  ;;  %v332_v45 = vadd.s32 (!%p291_p9), 8, %v17632_v42  ;;  %v431_v30 = vld [vmem:[%s20631_s1 + $0x88] sm:$0xff] (!%p291_p9)  ;;  %s17390_s23 = smov (!%p291_p9), 127   ;;  %s17391_s24 = smov (!%p291_p9), 126   ;;  %v432_v41 = vld [vmem:[%s20631_s1 + $0x90] sm:$0xff] (!%p291_p9) }
  0x14   : > { %v17636_v46 = vmul.u32 (!%p291_p9), 2, %v334_v43  ;;  %vm821_vm1 = vcmask (!%p291_p9), 1043456   ;;  %s20640_s28 = smov (!%p291_p9), 123   ;;  %s20642_s29 = smov (!%p291_p9), 49   ;;  %v4437_v27 = vld [vmem:[%s20633_s3 + $0x68] sm:$0xff] (!%p291_p9) }
  0x15   : > { %s326_s27 = scalar_select %p325_p10, %s17490_s13, 1  ;;  %15512 = vmatpush3.bf16.msk.msra.mxu0 %vm17540_vm4, %v15507_v6  ;;  %vm337_vm8 = vcmp.eq.s32.totalorder %v334_v43, %v335_v44  ;;  %v343_v55 = vadd.s32 1, %v335_v44  ;;  %v336_v6 = vmul.u32 2, %v332_v45 }
  0x16   : > { %15514 = vmatprep.subr.bf16.mxu0 %v15513_v12  ;;  %v17639_v47 = vsel %vm337_vm8, 1.0, %v17385_v0  ;;  %vm354_vm9 = vcmp.eq.s32.totalorder %v17632_v42, %v17636_v46  ;;  %vm355_vm10 = vcmp.eq.s32.totalorder %v332_v45, %v17636_v46  ;;  %v17648_v49 = vadd.s32 1, %v17636_v46  ;;  %s20659_s17 = smov 125   ;;  %s20660_s21 = smov 123  }
  0x17   : > { %s12434_s22 = sshll.u32 %s326_s27, 5  ;;  %13521 = vmatprep.mubr.msk.f32.mxu1 %vm814_vm7, %v17639_v47  ;;  %v12019_v48 = vsel %vm355_vm10, 1.0, %v17385_v0  ;;  %vm17653_vm11 = vmpackc.low %vm355_vm10, %vm354_vm9  ;;  %vm345_vm15 = vcmp.eq.s32.totalorder %v334_v43, %v343_v55  ;;  %s20643_s27 = smov 124  }
  0x18   : > { %s329_s25 = scalar_lea.vmem %s20630_s0, %s12434_s22  ;;  %v17657_v52 = vpack.c.bf16 %v12019_v48, %v17388_v51  ;;  %vm367_vm12 = vcmp.eq.s32.totalorder %v17632_v42, %v17648_v49  ;;  %vm368_vm13 = vcmp.eq.s32.totalorder %v332_v45, %v17648_v49  ;;  %s17404_s22 = smov 118  }
  0x19   : > { %v387_v10 = vld [vmem:[%s329_s25 + $0x10] sm:$0xff]  ;;  %v385_v11 = vld [vmem:[%s329_s25] sm:$0xff]  ;;  %v388_v13 = vld [vmem:[%s329_s25 + $0x18] sm:$0xf]  ;;  %v12023_v53 = vsel %vm368_vm13, 1.0, %v17385_v0 }
  0x1a   : > { %397 = vrot.lane.b32.xlu1 %v387_v10, %s17387_s26  ;;  %393 = vrot.lane.b32.xlu0 %v385_v11, %s17387_s26  ;;  %v386_v14 = vld [vmem:[%s329_s25 + $0x8] sm:$0xff]  ;;  %vm17666_vm14 = vmpackc.low %vm368_vm13, %vm367_vm12  ;;  %v17670_v56 = vpack.c.bf16 %v12023_v53, %v17388_v51  ;;  %s20641_s25 = smov 125  }
  0x1b   : > { %v427_v53 = vld [vmem:[%s20631_s1 + $0x68] sm:$0xff] }
  0x1e   : > { %399 = vrot.lane.b32.xlu1 %v388_v13, %s17387_s26  ;;  %395 = vrot.lane.b32.xlu0 %v386_v14, %s17387_s26  ;;  %v17687_v13 = vsel %vm345_vm15, 1.0, %v17385_v0  ;;  %v344_v14 = vadd.s32 1, %v336_v6 }
  0x22   : > { %1475 = vrot.lane.b32.xlu0 %v17564_v15, %s17390_s23  ;;  %2128 = vrot.lane.b32.xlu1 %v17564_v15, %s17391_s24 }
  0x26   : > { %2781 = vrot.lane.b32.xlu0 %v17564_v15, %s20641_s25  ;;  %3434 = vrot.lane.b32.xlu1 %v17564_v15, %s20643_s27  ;;  %s17395_s25 = smov 17   ;;  %s17407_s27 = smov 119  }
  0x2a   : > { %4087 = vrot.lane.b32.xlu0 %v17564_v15, %s20640_s28  ;;  %v426_v15 = vld [vmem:[%s20631_s1 + $0x60] sm:$0xff] }
  0x2b   : > { %v15583_v55 = vpack.c.bf16 %v427_v53, %v426_v15 }
  0x42   : > { %s17202_s14 = spop %17201 }
  0x43   : > { %v805_v57 = vstv %s17202_s14  ;;  %s17396_s14 = smov 33  }
  0x8c   : > { %v398_v16 = vpop.permute.xlu1 %397  ;;  %v394_v17 = vpop.permute.xlu0 %393 }
  0x8d   : > { %408 = vst.msk [vmem:[#allocation2 + $0x11] sm:$0xff] %vm405_vm5, %v398_v16  ;;  %406 = vst.msk [vmem:[#allocation2 + $0x1] sm:$0xff] %vm405_vm5, %v394_v17  ;;  %v352_v17 = vadd.s32 24, %v17632_v42 }
  0x8f   : > { %vm357_vm8 = vcmp.eq.s32.totalorder %v352_v17, %v17636_v46  ;;  %vm370_vm10 = vcmp.eq.s32.totalorder %v352_v17, %v17648_v49 }
  0x90   : > { %v400_v18 = vpop.permute.xlu1 %399  ;;  %v396_v19 = vpop.permute.xlu0 %395  ;;  %v12025_v21 = vsel %vm370_vm10, 1.0, %v17385_v0  ;;  %vm1157_vm10 = vcmask 119816  }
  0x91   : > { %410 = vst.msk [vmem:[#allocation2 + $0x19] sm:$0xf] %vm409_vm6, %v400_v18  ;;  %vm338_vm6 = vcmp.eq.s32.totalorder %v334_v43, %v336_v6  ;;  %v17389_v18 = vmov 1.0|1.0   ;;  %v17722_v26 = vpack.c.bf16 %v12025_v21, %v17388_v51 }
  0x92   : > { %407 = vst.msk [vmem:[#allocation2 + $0x9] sm:$0xff] %vm405_vm5, %v396_v19  ;;  %vm17674_vm5 = vmpackc.low %vm821_vm1, %vm17386_vm3  ;;  %vm346_vm3 = vcmp.eq.s32.totalorder %v334_v43, %v344_v14  ;;  %v12021_v19 = vsel %vm357_vm8, 1.0, %v17385_v0  ;;  %v433_v43 = vld [vmem:[%s20631_s1 + $0x98] sm:$0x3f]  ;;  %vm411_vm8 = vcmask 785408  }
  0x93   : > { %v17698_v16 = vsel %vm346_vm3, 1.0, %v17385_v0  ;;  %v17719_v22 = vpack.c.bf16 %v12021_v19, %v17388_v51  ;;  %v15577_v51 = vpack.c.bf16 %v433_v43, %v432_v41  ;;  %413 = vst.msk [vmem:[#allocation3 + $0x8] sm:$0xff] %vm411_vm8, %v17385_v0  ;;  %412 = vst.msk [vmem:[#allocation3] sm:$0xff] %vm411_vm8, %v17385_v0 }
  0x94   : > { %v17567_v20 = vld [vmem:[#allocation2 + $0x1] sm:$0xff]  ;;  %v17577_v23 = vld [vmem:[#allocation2 + $0x11] sm:$0xff] }
  0x95   : > { %13479 = vmatprep.mubr.msk.f32.mxu0 %vm379_vm0, %v17567_v20  ;;  %v17600_v32 = vld [vmem:[#allocation2] sm:$0xff] }
  0x98   : > { %v494_v28 = vld [vmem:[#allocation2 + $0x19] sm:$0xf] }
  0x99   : > { %v17579_v25 = vld [vmem:[#allocation2 + $0x9] sm:$0xff]  ;;  %v490_v36 = vld [vmem:[#allocation2 + $0x18] sm:$0xf] }
  0x9a   : > { %13480 = vmatmul.mubr.msk.f32.vlgmr.msra.gmra.mrb[0].mxu0 %vm379_vm0, %v17579_v25  ;;  %v17606_v34 = vld [vmem:[#allocation2 + $0x8] sm:$0xff]  ;;  %v17610_v35 = vld [vmem:[#allocation2 + $0x10] sm:$0xff]  ;;  %v699_v40 = vld [vmem:[#allocation2 + $0x1a] sm:$0xf] }
  0x9b   : > { %13482 = vmatprep.mubr.msk.f32.mxu0 %vm379_vm0, %v17577_v23  ;;  %15516 = vmatpush3.bf16.msra.mxu0 %v15513_v12  ;;  %v17617_v37 = vld [vmem:[#allocation2 + $0x2] sm:$0xff]  ;;  %v17623_v38 = vld [vmem:[#allocation2 + $0xa] sm:$0xff]  ;;  %v17627_v39 = vld [vmem:[#allocation2 + $0x12] sm:$0xff]  ;;  %v17683_v12 = vsel %vm338_vm6, 1.0, %v17385_v0 }
  0x9c   : > { %15519 = vmatprep.subr.msk.bf16.mxu0 %vm17540_vm4, %v15517_v24  ;;  %v1370_v6 = vld [vmem:[#allocation2 + $0x1a] sm:$0xf] }
  0x9e   : > { %13483 = vmatmul.mubr.msk.f32.gmra.mrb[2].mxu0 %vm379_vm0, %v494_v28 }
  0x9f   : > { %15522 = vmatpush3.bf16.msk.msra.mxu0 %vm17540_vm4, %v15517_v24  ;;  %13493 = vmatprep.mubr.msk.f32.mxu0 %vm379_vm0, %v17600_v32  ;;  %v351_v24 = vadd.s32 16, %v17632_v42 }
  0xa0   : > { %15524 = vmatprep.subr.bf16.mxu0 %v15523_v29 }
  0xa1   : > { %vm356_vm13 = vcmp.eq.s32.totalorder %v351_v24, %v17636_v46  ;;  %vm369_vm6 = vcmp.eq.s32.totalorder %v351_v24, %v17648_v49  ;;  %v4472_v46 = vld [vmem:[%s20633_s3 + $0x180] sm:$0xff] }
  0xa2   : > { %13494 = vmatmul.mubr.msk.f32.vlgmr.msra.gmra.mrb[0].mxu0 %vm379_vm0, %v17606_v34  ;;  %vm17726_vm15 = vmpackc.low %vm821_vm1, %vm356_vm13  ;;  %vm1155_vm13 = vcmask 121864   ;;  %v4476_v49 = vld [vmem:[%s20633_s3 + $0x1a0] sm:$0xff] }
  0xa3   : > { %13496 = vmatprep.mubr.msk.f32.mxu0 %vm379_vm0, %v17610_v35  ;;  %15526 = vmatpush3.bf16.msra.mxu0 %v15523_v29  ;;  %vm17735_vm3 = vmpackc.low %vm821_vm1, %vm369_vm6  ;;  %v430_v29 = vld [vmem:[%s20631_s1 + $0x80] sm:$0xff]  ;;  %vm1810_vm6 = vcmask 251016  }
  0xa4   : > { %15529 = vmatprep.subr.msk.bf16.mxu0 %vm17540_vm4, %v15527_v33  ;;  %v15573_v31 = vpack.c.bf16 %v431_v30, %v430_v29 }
  0xa6   : > { %13497 = vmatmul.mubr.msk.f32.gmra.mrb[2].mxu0 %vm379_vm0, %v490_v36 }
  0xa7   : > { %15532 = vmatpush3.bf16.msk.msra.mxu0 %vm17540_vm4, %v15527_v33  ;;  %13507 = vmatprep.mubr.msk.f32.mxu0 %vm379_vm0, %v17617_v37 }
  0xa8   : > { %15564 = vmatprep.subr.msk.bf16.mxu0 %vm17666_vm14, %v17389_v18 }
  0xaa   : > { %13508 = vmatmul.mubr.msk.f32.vlgmr.msra.gmra.mrb[0].mxu0 %vm379_vm0, %v17623_v38 }
  0xab   : > { %13510 = vmatprep.mubr.msk.f32.mxu0 %vm379_vm0, %v17627_v39  ;;  %15566 = vmatpush3.bf16.msk.msra.mxu0 %vm17666_vm14, %v17389_v18 }
  0xac   : > { %15569 = vmatprep.subr.msk.bf16.mxu0 %vm17735_vm3, %v17722_v26 }
  0xae   : > { %13511 = vmatmul.mubr.msk.f32.gmra.mrb[2].mxu0 %vm379_vm0, %v699_v40 }
  0xaf   : > { %15572 = vmatpush3.bf16.msk.msra.mxu0 %vm17735_vm3, %v17722_v26 }
 0x17d   : > { %v13509_v58 = vpop.f32.mrb[0].mxu0 }
 0x17e   : > { %v807_v59 = vadd.f32 %v13509_v58, %v805_v57  ;;  %v781_v60 = vpop.f32.mrb[1].mxu0  ;;  %v429_v58 = vld [vmem:[%s20631_s1 + $0x78] sm:$0x3f] }
 0x17f   : > { %v806_v61 = vadd.f32 %v805_v57, %v781_v60  ;;  %v434_v60 = vld [vmem:[%s20631_s1 + $0xa0] sm:$0xff] }
 0x180   : > { %v811_v62 = vmax.f32 %v807_v59, 0.0 }
 0x181   : > { %v810_v63 = vmax.f32 %v806_v61, 0.0  ;;  %v13512_v1 = vpop.f32.mrb[2].mxu0  ;;  %v435_v61 = vld [vmem:[%s20631_s1 + $0xa8] sm:$0xff] }
 0x182   : > { %v809_v2 = vadd.f32 %v13512_v1, %v805_v57  ;;  %v791_v3 = vpop.f32.mrb[3].mxu0  ;;  %v436_v1 = vld [vmem:[%s20631_s1 + $0xb0] sm:$0xff] }
 0x183   : > { %v15533_v4 = vpack.c.bf16 %v811_v62, %v810_v63  ;;  %v808_v5 = vadd.f32 %v805_v57, %v791_v3  ;;  %v428_v57 = vld [vmem:[%s20631_s1 + $0x70] sm:$0xff]  ;;  %v15593_v62 = vpack.c.bf16 %v435_v61, %v434_v60  ;;  %v1166_v63 = vld [vmem:[#allocation2 + $0x19] sm:$0xf] }
 0x184   : > { %v813_v8 = vmax.f32 %v809_v2, 0.0  ;;  %v15587_v59 = vpack.c.bf16 %v429_v58, %v428_v57  ;;  %v437_v2 = vld [vmem:[%s20631_s1 + $0xb8] sm:$0x3f]  ;;  %v442_v61 = vld [vmem:[%s20631_s1 + $0xe0] sm:$0xff] }
 0x185   : > { %v812_v9 = vmax.f32 %v808_v5, 0.0  ;;  %15534 = vmatprep.subr.bf16.mxu1 %v15533_v4  ;;  %v15597_v3 = vpack.c.bf16 %v437_v2, %v436_v1  ;;  %v1162_v5 = vld [vmem:[#allocation2 + $0x18] sm:$0xf] }
 0x186   : > { %15536 = vmatpush3.bf16.msra.mxu1 %v15533_v4 }
 0x187   : > { %v15537_v11 = vpack.c.bf16 %v813_v8, %v812_v9  ;;  %v2129_v9 = vpop.permute.xlu1 %2128 }
 0x189   : > { %15539 = vmatprep.subr.msk.bf16.mxu1 %vm17674_vm5, %v15537_v11 }
 0x18a   : > { %15542 = vmatpush3.bf16.msk.msra.mxu1 %vm17674_vm5, %v15537_v11 }
 0x18b   : > { %15544 = vmatprep.subr.bf16.mxu1 %v15533_v4 }
 0x18d   : > { %13522 = vmatmul.mubr.msk.f32.vlgmr.msra.gmra.mrb[0].mxu1 %vm814_vm7, %v17683_v12 }
 0x18e   : > { %15546 = vmatpush3.bf16.msra.mxu1 %v15533_v4  ;;  %13532 = vmatprep.mubr.msk.f32.mxu1 %vm814_vm7, %v17687_v13  ;;  %v1476_v4 = vpop.permute.xlu0 %1475 }
 0x18f   : > { %15549 = vmatprep.subr.msk.bf16.mxu1 %vm17674_vm5, %v15537_v11  ;;  %17203 = vpush %v1476_v4  ;;  %v444_v4 = vld [vmem:[%s20631_s1 + $0xf0] sm:$0xff] }
 0x190   : > { %17205 = vpush %v2129_v9 }
 0x192   : > { %15552 = vmatpush3.bf16.msk.msra.mxu1 %vm17674_vm5, %v15537_v11  ;;  %v2782_v8 = vpop.permute.xlu0 %2781  ;;  %v3435_v11 = vpop.permute.xlu1 %3434 }
 0x193   : > { %15554 = vmatprep.subr.msk.bf16.mxu1 %vm17653_vm11, %v17389_v18  ;;  %17207 = vpush %v2782_v8 }
 0x194   : > { %17209 = vpush %v3435_v11 }
 0x195   : > { %13533 = vmatmul.mubr.msk.f32.vlgmr.msra.gmra.mrb[2].mxu1 %vm814_vm7, %v17698_v16 }
 0x196   : > { %15556 = vmatpush3.bf16.msk.msra.mxu1 %vm17653_vm11, %v17389_v18  ;;  %v4088_v14 = vpop.permute.xlu0 %4087 }
 0x197   : > { %15559 = vmatprep.subr.msk.bf16.mxu1 %vm17726_vm15, %v17719_v22  ;;  %17211 = vpush %v4088_v14  ;;  %v438_v14 = vld [vmem:[%s20631_s1 + $0xc0] sm:$0xff] }
 0x19a   : > { %15562 = vmatpush3.bf16.msk.msra.mxu1 %vm17726_vm15, %v17719_v22 }
 0x19b   : > { %15574 = vmatprep.subr.bf16.mxu1 %v15573_v31 }
 0x1c0   : > { %s17204_s16 = spop %17203 }
 0x1c1   : > { %s17206_s28 = spop %17205 }
 0x260   : > { %v13523_v33 = vpop.f32.mrb[0].mxu1 }
 0x261   : > { %v891_v36 = vpop.f32.mrb[1].mxu1 }
 0x268   : > { %v13534_v40 = vpop.f32.mrb[2].mxu1 }
 0x269   : > { %v982_v44 = vmax.f32 %v13523_v33, %v13534_v40  ;;  %v972_v45 = vpop.f32.mrb[3].mxu1 }
 0x26a   : > { %v981_v48 = vmax.f32 %v891_v36, %v972_v45 }
 0x26c   : > { %13543 = vmatprep.mubr.msk.f32.mxu1 %vm814_vm7, %v981_v48  ;;  %13554 = vmatprep.mubr.msk.f32.mxu0 %vm814_vm7, %v981_v48 }
 0x26d   : > { %13544 = vmatmul.mubr.msk.f32.vlgmr.msra.gmra.mrb[4].mxu1 %vm814_vm7, %v982_v44  ;;  %13555 = vmatmul.mubr.msk.f32.vlgmr.msra.gmra.mrb[4].mxu0 %vm814_vm7, %v982_v44 }
 0x26e   : > { %15576 = vmatpush3.bf16.msra.mxu1 %v15573_v31  ;;  %13565 = vmatprep.mubr.msk.f32.mxu1 %vm379_vm0, %v17567_v20  ;;  %v1478_v31 = vstv %s17204_s16 }
 0x26f   : > { %15579 = vmatprep.subr.msk.bf16.mxu1 %vm17540_vm4, %v15577_v51  ;;  %13607 = vmatprep.mubr.msk.f32.mxu0 %vm814_vm7, %v17639_v47 }
 0x272   : > { %15582 = vmatpush3.bf16.msk.msra.mxu1 %vm17540_vm4, %v15577_v51 }
 0x273   : > { %15584 = vmatprep.subr.bf16.mxu1 %v15583_v55 }
 0x275   : > { %13566 = vmatmul.mubr.msk.f32.vlgmr.msra.gmra.mrb[6].mxu1 %vm379_vm0, %v17579_v25 }
 0x276   : > { %13568 = vmatprep.mubr.msk.f32.mxu1 %vm379_vm0, %v17577_v23  ;;  %15586 = vmatpush3.bf16.msra.mxu1 %v15583_v55 }
 0x277   : > { %15589 = vmatprep.subr.msk.bf16.mxu1 %vm17540_vm4, %v15587_v59 }
 0x279   : > { %13569 = vmatmul.mubr.msk.f32.gmra.mrb[8].mxu1 %vm379_vm0, %v1166_v63 }
 0x27a   : > { %15592 = vmatpush3.bf16.msk.msra.mxu1 %vm17540_vm4, %v15587_v59  ;;  %13579 = vmatprep.mubr.msk.f32.mxu1 %vm379_vm0, %v17600_v32 }
 0x27b   : > { %15594 = vmatprep.subr.bf16.mxu1 %v15593_v62 }
 0x27d   : > { %13580 = vmatmul.mubr.msk.f32.vlgmr.msra.gmra.mrb[6].mxu1 %vm379_vm0, %v17606_v34 }
 0x27e   : > { %13582 = vmatprep.mubr.msk.f32.mxu1 %vm379_vm0, %v17610_v35  ;;  %15596 = vmatpush3.bf16.msra.mxu1 %v15593_v62  ;;  %v443_v62 = vld [vmem:[%s20631_s1 + $0xe8] sm:$0xff] }
 0x27f   : > { %15599 = vmatprep.subr.msk.bf16.mxu1 %vm17540_vm4, %v15597_v3  ;;  %v15643_v63 = vpack.c.bf16 %v443_v62, %v442_v61 }
 0x281   : > { %13583 = vmatmul.mubr.msk.f32.gmra.mrb[8].mxu1 %vm379_vm0, %v1162_v5  ;;  %v445_v5 = vld [vmem:[%s20631_s1 + $0xf8] sm:$0x3f] }
 0x282   : > { %15602 = vmatpush3.bf16.msk.msra.mxu1 %vm17540_vm4, %v15597_v3  ;;  %13593 = vmatprep.mubr.msk.f32.mxu1 %vm379_vm0, %v17617_v37  ;;  %v15647_v11 = vpack.c.bf16 %v445_v5, %v444_v4 }
 0x283   : > { %15634 = vmatprep.subr.msk.bf16.mxu1 %vm17666_vm14, %v17389_v18 }
 0x285   : > { %13594 = vmatmul.mubr.msk.f32.vlgmr.msra.gmra.mrb[6].mxu1 %vm379_vm0, %v17623_v38 }
 0x286   : > { %13596 = vmatprep.mubr.msk.f32.mxu1 %vm379_vm0, %v17627_v39  ;;  %15636 = vmatpush3.bf16.msk.msra.mxu1 %vm17666_vm14, %v17389_v18 }
 0x287   : > { %15639 = vmatprep.subr.msk.bf16.mxu1 %vm17735_vm3, %v17722_v26 }
 0x289   : > { %13597 = vmatmul.mubr.msk.f32.gmra.mrb[8].mxu1 %vm379_vm0, %v1370_v6 }
 0x28a   : > { %15642 = vmatpush3.bf16.msk.msra.mxu1 %vm17735_vm3, %v17722_v26 }
 0x340   : > { %v13545_v17 = vpop.f32.mrb[4].mxu1  ;;  %v13556_v19 = vpop.f32.mrb[4].mxu0 }
 0x341   : > { %v1146_v21 = vmax.f32 %v13545_v17, %v13556_v19  ;;  %v1058_v24 = vpop.f32.mrb[5].mxu1  ;;  %v1136_v29 = vpop.f32.mrb[5].mxu0  ;;  %v439_v17 = vld [vmem:[%s20631_s1 + $0xc8] sm:$0xff] }
 0x342   : > { %v1145_v30 = vmax.f32 %v1058_v24, %v1136_v29  ;;  %v15653_v19 = vpack.c.bf16 %v439_v17, %v438_v14  ;;  %v441_v24 = vld [vmem:[%s20631_s1 + $0xd8] sm:$0x3f] }
 0x343   : > { %1151 = vrot.lane.b32.xlu0 %v1146_v21, %s17387_s26  ;;  %v440_v21 = vld [vmem:[%s20631_s1 + $0xd0] sm:$0xff] }
 0x344   : > { %1149 = vrot.lane.b32.xlu1 %v1145_v30, %s17387_s26  ;;  %v15657_v29 = vpack.c.bf16 %v441_v24, %v440_v21  ;;  %v446_v30 = vld [vmem:[%s20631_s1 + $0x100] sm:$0xff]  ;;  %v455_v21 = vld [vmem:[%s20631_s1 + $0x148] sm:$0xff]  ;;  %s20658_s26 = smov 124  }
 0x358   : > { %v13595_v33 = vpop.f32.mrb[6].mxu1 }
 0x359   : > { %v1480_v36 = vadd.f32 %v13595_v33, %v1478_v31  ;;  %v1452_v40 = vpop.f32.mrb[7].mxu1 }
 0x35a   : > { %v1479_v41 = vadd.f32 %v1478_v31, %v1452_v40  ;;  %v448_v40 = vld [vmem:[%s20631_s1 + $0x110] sm:$0xff] }
 0x35b   : > { %v1484_v43 = vmax.f32 %v1480_v36, 0.0  ;;  %v1819_v36 = vld [vmem:[#allocation2 + $0x19] sm:$0xf] }
 0x35c   : > { %v1483_v44 = vmax.f32 %v1479_v41, 0.0  ;;  %v13598_v45 = vpop.f32.mrb[8].mxu1  ;;  %v449_v41 = vld [vmem:[%s20631_s1 + $0x118] sm:$0x3f] }
 0x35d   : > { %v1482_v48 = vadd.f32 %v13598_v45, %v1478_v31  ;;  %v1462_v51 = vpop.f32.mrb[9].mxu1  ;;  %v2023_v45 = vld [vmem:[#allocation2 + $0x1a] sm:$0xf] }
 0x35e   : > { %v15603_v15 = vpack.c.bf16 %v1484_v43, %v1483_v44  ;;  %v1481_v53 = vadd.f32 %v1478_v31, %v1462_v51  ;;  %v447_v31 = vld [vmem:[%s20631_s1 + $0x108] sm:$0xff]  ;;  %v15667_v43 = vpack.c.bf16 %v449_v41, %v448_v40  ;;  %v1815_v44 = vld [vmem:[#allocation2 + $0x18] sm:$0xf] }
 0x35f   : > { %v1486_v55 = vmax.f32 %v1482_v48, 0.0  ;;  %v15663_v33 = vpack.c.bf16 %v447_v31, %v446_v30 }
 0x360   : > { %v1485_v57 = vmax.f32 %v1481_v53, 0.0  ;;  %15604 = vmatprep.subr.bf16.mxu0 %v15603_v15 }
 0x361   : > { %15606 = vmatpush3.bf16.msra.mxu0 %v15603_v15 }
 0x362   : > { %v15607_v58 = vpack.c.bf16 %v1486_v55, %v1485_v57 }
 0x364   : > { %15609 = vmatprep.subr.msk.bf16.mxu0 %vm17674_vm5, %v15607_v58 }
 0x365   : > { %15612 = vmatpush3.bf16.msk.msra.mxu0 %vm17674_vm5, %v15607_v58 }
 0x366   : > { %15614 = vmatprep.subr.bf16.mxu0 %v15603_v15 }
 0x368   : > { %13608 = vmatmul.mubr.msk.f32.vlgmr.msra.gmra.mrb[6].mxu0 %vm814_vm7, %v17683_v12 }
 0x369   : > { %15616 = vmatpush3.bf16.msra.mxu0 %v15603_v15  ;;  %13618 = vmatprep.mubr.msk.f32.mxu0 %vm814_vm7, %v17687_v13 }
 0x36a   : > { %15619 = vmatprep.subr.msk.bf16.mxu0 %vm17674_vm5, %v15607_v58 }
 0x36d   : > { %15622 = vmatpush3.bf16.msk.msra.mxu0 %vm17674_vm5, %v15607_v58  ;;  %v2131_v58 = vstv %s17206_s28 }
 0x36e   : > { %15624 = vmatprep.subr.msk.bf16.mxu0 %vm17653_vm11, %v17389_v18 }
 0x370   : > { %13619 = vmatmul.mubr.msk.f32.vlgmr.msra.gmra.mrb[8].mxu0 %vm814_vm7, %v17698_v16 }
 0x371   : > { %15626 = vmatpush3.bf16.msk.msra.mxu0 %vm17653_vm11, %v17389_v18 }
 0x372   : > { %15629 = vmatprep.subr.msk.bf16.mxu0 %vm17726_vm15, %v17719_v22 }
 0x375   : > { %15632 = vmatpush3.bf16.msk.msra.mxu0 %vm17726_vm15, %v17719_v22 }
 0x376   : > { %15644 = vmatprep.subr.bf16.mxu0 %v15643_v63 }
 0x3b5   : > { %v1152_v59 = vpop.permute.xlu0 %1151 }
 0x3b6   : > { %1158 = vst.msk [vmem:[#allocation3 + $0x9] sm:$0x3f] %vm1157_vm10, %v1152_v59  ;;  %v1150_v60 = vpop.permute.xlu1 %1149  ;;  %vm1808_vm10 = vcmask 253064  }
 0x3b7   : > { %1156 = vst.msk [vmem:[#allocation3 + $0x1] sm:$0xff] %vm1155_vm13, %v1150_v60  ;;  %vm2463_vm13 = vcmask 382216  }
 0x43b   : > { %v13609_v1 = vpop.f32.mrb[6].mxu0 }
 0x43c   : > { %v1556_v2 = vpop.f32.mrb[7].mxu0 }
 0x443   : > { %v13620_v3 = vpop.f32.mrb[8].mxu0 }
 0x444   : > { %v1641_v6 = vmax.f32 %v13609_v1, %v13620_v3  ;;  %v1631_v8 = vpop.f32.mrb[9].mxu0 }
 0x445   : > { %v1640_v9 = vmax.f32 %v1556_v2, %v1631_v8 }
 0x447   : > { %13629 = vmatprep.mubr.msk.f32.mxu0 %vm814_vm7, %v1640_v9  ;;  %13640 = vmatprep.mubr.msk.f32.mxu1 %vm814_vm7, %v1640_v9 }
 0x448   : > { %13630 = vmatmul.mubr.msk.f32.vlgmr.msra.gmra.mrb[10].mxu0 %vm814_vm7, %v1641_v6  ;;  %13641 = vmatmul.mubr.msk.f32.vlgmr.msra.gmra.mrb[10].mxu1 %vm814_vm7, %v1641_v6 }
 0x449   : > { %15646 = vmatpush3.bf16.msra.mxu0 %v15643_v63  ;;  %13651 = vmatprep.mubr.msk.f32.mxu0 %vm379_vm0, %v17567_v20 }
 0x44a   : > { %15649 = vmatprep.subr.msk.bf16.mxu0 %vm17540_vm4, %v15647_v11  ;;  %13693 = vmatprep.mubr.msk.f32.mxu1 %vm814_vm7, %v17639_v47 }
 0x44d   : > { %15652 = vmatpush3.bf16.msk.msra.mxu0 %vm17540_vm4, %v15647_v11 }
 0x44e   : > { %15654 = vmatprep.subr.bf16.mxu0 %v15653_v19 }
 0x450   : > { %13652 = vmatmul.mubr.msk.f32.vlgmr.msra.gmra.mrb[12].mxu0 %vm379_vm0, %v17579_v25 }
 0x451   : > { %13654 = vmatprep.mubr.msk.f32.mxu0 %vm379_vm0, %v17577_v23  ;;  %15656 = vmatpush3.bf16.msra.mxu0 %v15653_v19  ;;  %v454_v19 = vld [vmem:[%s20631_s1 + $0x140] sm:$0xff] }
 0x452   : > { %15659 = vmatprep.subr.msk.bf16.mxu0 %vm17540_vm4, %v15657_v29  ;;  %v15713_v24 = vpack.c.bf16 %v455_v21, %v454_v19 }
 0x454   : > { %13655 = vmatmul.mubr.msk.f32.gmra.mrb[14].mxu0 %vm379_vm0, %v1819_v36  ;;  %v457_v36 = vld [vmem:[%s20631_s1 + $0x158] sm:$0x3f] }
 0x455   : > { %15662 = vmatpush3.bf16.msk.msra.mxu0 %vm17540_vm4, %v15657_v29  ;;  %13665 = vmatprep.mubr.msk.f32.mxu0 %vm379_vm0, %v17600_v32 }
 0x456   : > { %15664 = vmatprep.subr.bf16.mxu0 %v15663_v33 }
 0x458   : > { %13666 = vmatmul.mubr.msk.f32.vlgmr.msra.gmra.mrb[12].mxu0 %vm379_vm0, %v17606_v34 }
 0x459   : > { %13668 = vmatprep.mubr.msk.f32.mxu0 %vm379_vm0, %v17610_v35  ;;  %15666 = vmatpush3.bf16.msra.mxu0 %v15663_v33  ;;  %v456_v33 = vld [vmem:[%s20631_s1 + $0x150] sm:$0xff] }
 0x45a   : > { %15669 = vmatprep.subr.msk.bf16.mxu0 %vm17540_vm4, %v15667_v43 }
 0x45c   : > { %13669 = vmatmul.mubr.msk.f32.gmra.mrb[14].mxu0 %vm379_vm0, %v1815_v44  ;;  %v15717_v44 = vpack.c.bf16 %v457_v36, %v456_v33  ;;  %v466_v33 = vld [vmem:[%s20631_s1 + $0x1a0] sm:$0xff]  ;;  %v467_v36 = vld [vmem:[%s20631_s1 + $0x1a8] sm:$0xff] }
 0x45d   : > { %15672 = vmatpush3.bf16.msk.msra.mxu0 %vm17540_vm4, %v15667_v43  ;;  %13679 = vmatprep.mubr.msk.f32.mxu0 %vm379_vm0, %v17617_v37 }
 0x45e   : > { %15704 = vmatprep.subr.msk.bf16.mxu0 %vm17666_vm14, %v17389_v18 }
 0x460   : > { %13680 = vmatmul.mubr.msk.f32.vlgmr.msra.gmra.mrb[12].mxu0 %vm379_vm0, %v17623_v38 }
 0x461   : > { %13682 = vmatprep.mubr.msk.f32.mxu0 %vm379_vm0, %v17627_v39  ;;  %15706 = vmatpush3.bf16.msk.msra.mxu0 %vm17666_vm14, %v17389_v18 }
 0x462   : > { %15709 = vmatprep.subr.msk.bf16.mxu0 %vm17735_vm3, %v17722_v26 }
 0x464   : > { %13683 = vmatmul.mubr.msk.f32.gmra.mrb[14].mxu0 %vm379_vm0, %v2023_v45  ;;  %v450_v45 = vld [vmem:[%s20631_s1 + $0x120] sm:$0xff] }
 0x465   : > { %15712 = vmatpush3.bf16.msk.msra.mxu0 %vm17735_vm3, %v17722_v26 }
 0x51b   : > { %v13631_v48 = vpop.f32.mrb[10].mxu0  ;;  %v13642_v51 = vpop.f32.mrb[10].mxu1 }
 0x51c   : > { %v1799_v15 = vmax.f32 %v13631_v48, %v13642_v51  ;;  %v1714_v53 = vpop.f32.mrb[11].mxu0  ;;  %v1789_v55 = vpop.f32.mrb[11].mxu1  ;;  %v451_v48 = vld [vmem:[%s20631_s1 + $0x128] sm:$0xff] }
 0x51d   : > { %v1798_v57 = vmax.f32 %v1714_v53, %v1789_v55  ;;  %v15723_v51 = vpack.c.bf16 %v451_v48, %v450_v45  ;;  %v453_v53 = vld [vmem:[%s20631_s1 + $0x138] sm:$0x3f]  ;;  %v468_v45 = vld [vmem:[%s20631_s1 + $0x1b0] sm:$0xff] }
 0x51e   : > { %1804 = vrot.lane.b32.xlu0 %v1799_v15, %s17395_s25  ;;  %v452_v15 = vld [vmem:[%s20631_s1 + $0x130] sm:$0xff]  ;;  %v469_v48 = vld [vmem:[%s20631_s1 + $0x1b8] sm:$0x3f] }
 0x51f   : > { %1802 = vrot.lane.b32.xlu1 %v1798_v57, %s17395_s25  ;;  %v15727_v55 = vpack.c.bf16 %v453_v53, %v452_v15  ;;  %v458_v57 = vld [vmem:[%s20631_s1 + $0x160] sm:$0xff]  ;;  %s17208_s25 = spop %17207 }
 0x533   : > { %v13681_v59 = vpop.f32.mrb[12].mxu0 }
 0x534   : > { %v2133_v60 = vadd.f32 %v13681_v59, %v2131_v58  ;;  %v2105_v61 = vpop.f32.mrb[13].mxu0 }
 0x535   : > { %v2132_v62 = vadd.f32 %v2131_v58, %v2105_v61  ;;  %v460_v61 = vld [vmem:[%s20631_s1 + $0x170] sm:$0xff] }
 0x536   : > { %v2137_v63 = vmax.f32 %v2133_v60, 0.0  ;;  %v2472_v60 = vld [vmem:[#allocation2 + $0x19] sm:$0xf] }
 0x537   : > { %v2136_v1 = vmax.f32 %v2132_v62, 0.0  ;;  %v13684_v2 = vpop.f32.mrb[14].mxu0  ;;  %v461_v62 = vld [vmem:[%s20631_s1 + $0x178] sm:$0x3f] }
 0x538   : > { %v2135_v3 = vadd.f32 %v13684_v2, %v2131_v58  ;;  %v2115_v4 = vpop.f32.mrb[15].mxu0 }
 0x539   : > { %v15673_v5 = vpack.c.bf16 %v2137_v63, %v2136_v1  ;;  %v2134_v6 = vadd.f32 %v2131_v58, %v2115_v4  ;;  %v459_v58 = vld [vmem:[%s20631_s1 + $0x168] sm:$0xff]  ;;  %v2784_v1 = vstv %s17208_s25  ;;  %s17398_s25 = smov 65  }
 0x53a   : > { %v2139_v8 = vmax.f32 %v2135_v3, 0.0  ;;  %v15733_v59 = vpack.c.bf16 %v459_v58, %v458_v57  ;;  %v462_v57 = vld [vmem:[%s20631_s1 + $0x180] sm:$0xff]  ;;  %v463_v58 = vld [vmem:[%s20631_s1 + $0x188] sm:$0xff] }
 0x53b   : > { %v2138_v9 = vmax.f32 %v2134_v6, 0.0  ;;  %15674 = vmatprep.subr.bf16.mxu1 %v15673_v5 }
 0x53c   : > { %15676 = vmatpush3.bf16.msra.mxu1 %v15673_v5 }
 0x53d   : > { %v15677_v11 = vpack.c.bf16 %v2139_v8, %v2138_v9 }
 0x53f   : > { %15679 = vmatprep.subr.msk.bf16.mxu1 %vm17674_vm5, %v15677_v11 }
 0x540   : > { %15682 = vmatpush3.bf16.msk.msra.mxu1 %vm17674_vm5, %v15677_v11 }
 0x541   : > { %15684 = vmatprep.subr.bf16.mxu1 %v15673_v5 }
 0x543   : > { %13694 = vmatmul.mubr.msk.f32.vlgmr.msra.gmra.mrb[12].mxu1 %vm814_vm7, %v17683_v12 }
 0x544   : > { %15686 = vmatpush3.bf16.msra.mxu1 %v15673_v5  ;;  %13704 = vmatprep.mubr.msk.f32.mxu1 %vm814_vm7, %v17687_v13 }
 0x545   : > { %15689 = vmatprep.subr.msk.bf16.mxu1 %vm17674_vm5, %v15677_v11 }
 0x548   : > { %15692 = vmatpush3.bf16.msk.msra.mxu1 %vm17674_vm5, %v15677_v11 }
 0x549   : > { %15694 = vmatprep.subr.msk.bf16.mxu1 %vm17653_vm11, %v17389_v18 }
 0x54b   : > { %13705 = vmatmul.mubr.msk.f32.vlgmr.msra.gmra.mrb[14].mxu1 %vm814_vm7, %v17698_v16 }
 0x54c   : > { %15696 = vmatpush3.bf16.msk.msra.mxu1 %vm17653_vm11, %v17389_v18 }
 0x54d   : > { %15699 = vmatprep.subr.msk.bf16.mxu1 %vm17726_vm15, %v17719_v22 }
 0x550   : > { %15702 = vmatpush3.bf16.msk.msra.mxu1 %vm17726_vm15, %v17719_v22 }
 0x551   : > { %15714 = vmatprep.subr.bf16.mxu1 %v15713_v24 }
 0x590   : > { %v1805_v14 = vpop.permute.xlu0 %1804 }
 0x591   : > { %1811 = vst.msk [vmem:[#allocation3 + $0x9] sm:$0x3f] %vm1810_vm6, %v1805_v14  ;;  %v1803_v17 = vpop.permute.xlu1 %1802  ;;  %vm2461_vm6 = vcmask 384264  }
 0x592   : > { %1809 = vst.msk [vmem:[#allocation3 + $0x1] sm:$0xff] %vm1808_vm10, %v1803_v17  ;;  %vm3116_vm10 = vcmask 513416  }
 0x616   : > { %v13695_v29 = vpop.f32.mrb[12].mxu1 }
 0x617   : > { %v2209_v30 = vpop.f32.mrb[13].mxu1 }
 0x61e   : > { %v13706_v31 = vpop.f32.mrb[14].mxu1 }
 0x61f   : > { %v2294_v40 = vmax.f32 %v13695_v29, %v13706_v31  ;;  %v2284_v41 = vpop.f32.mrb[15].mxu1 }
 0x620   : > { %v2293_v43 = vmax.f32 %v2209_v30, %v2284_v41 }
 0x622   : > { %13715 = vmatprep.mubr.msk.f32.mxu1 %vm814_vm7, %v2293_v43  ;;  %13726 = vmatprep.mubr.msk.f32.mxu0 %vm814_vm7, %v2293_v43 }
 0x623   : > { %13716 = vmatmul.mubr.msk.f32.vlgmr.msra.gmra.mrb[16].mxu1 %vm814_vm7, %v2294_v40  ;;  %13727 = vmatmul.mubr.msk.f32.vlgmr.msra.gmra.mrb[16].mxu0 %vm814_vm7, %v2294_v40  ;;  %v15783_v40 = vpack.c.bf16 %v467_v36, %v466_v33 }
 0x624   : > { %15716 = vmatpush3.bf16.msra.mxu1 %v15713_v24  ;;  %13737 = vmatprep.mubr.msk.f32.mxu1 %vm379_vm0, %v17567_v20 }
 0x625   : > { %15719 = vmatprep.subr.msk.bf16.mxu1 %vm17540_vm4, %v15717_v44  ;;  %13779 = vmatprep.mubr.msk.f32.mxu0 %vm814_vm7, %v17639_v47 }
 0x628   : > { %15722 = vmatpush3.bf16.msk.msra.mxu1 %vm17540_vm4, %v15717_v44 }
 0x629   : > { %15724 = vmatprep.subr.bf16.mxu1 %v15723_v51 }
 0x62b   : > { %13738 = vmatmul.mubr.msk.f32.vlgmr.msra.gmra.mrb[18].mxu1 %vm379_vm0, %v17579_v25  ;;  %v2468_v25 = vld [vmem:[#allocation2 + $0x18] sm:$0xf] }
 0x62c   : > { %13740 = vmatprep.mubr.msk.f32.mxu1 %vm379_vm0, %v17577_v23  ;;  %15726 = vmatpush3.bf16.msra.mxu1 %v15723_v51  ;;  %v15737_v23 = vpack.c.bf16 %v461_v62, %v460_v61  ;;  %v465_v61 = vld [vmem:[%s20631_s1 + $0x198] sm:$0x3f] }
 0x62d   : > { %15729 = vmatprep.subr.msk.bf16.mxu1 %vm17540_vm4, %v15727_v55  ;;  %v18139_v62 = vld [vmem:[#allocation2 + $0x9] sm:$0xff] }
 0x62f   : > { %13741 = vmatmul.mubr.msk.f32.gmra.mrb[20].mxu1 %vm379_vm0, %v2472_v60  ;;  %v464_v60 = vld [vmem:[%s20631_s1 + $0x190] sm:$0xff] }
 0x630   : > { %15732 = vmatpush3.bf16.msk.msra.mxu1 %vm17540_vm4, %v15727_v55  ;;  %13751 = vmatprep.mubr.msk.f32.mxu1 %vm379_vm0, %v17600_v32  ;;  %v2676_v32 = vld [vmem:[#allocation2 + $0x1a] sm:$0xf]  ;;  %v15787_v55 = vpack.c.bf16 %v469_v48, %v468_v45 }
 0x631   : > { %15734 = vmatprep.subr.bf16.mxu1 %v15733_v59 }
 0x633   : > { %13752 = vmatmul.mubr.msk.f32.vlgmr.msra.gmra.mrb[18].mxu1 %vm379_vm0, %v17606_v34 }
 0x634   : > { %13754 = vmatprep.mubr.msk.f32.mxu1 %vm379_vm0, %v17610_v35  ;;  %15736 = vmatpush3.bf16.msra.mxu1 %v15733_v59  ;;  %v15793_v59 = vpack.c.bf16 %v463_v58, %v462_v57  ;;  %v478_v58 = vld [vmem:[%s20631_s1 + $0x200] sm:$0xff] }
 0x635   : > { %15739 = vmatprep.subr.msk.bf16.mxu1 %vm17540_vm4, %v15737_v23 }
 0x637   : > { %13755 = vmatmul.mubr.msk.f32.gmra.mrb[20].mxu1 %vm379_vm0, %v2468_v25  ;;  %v471_v25 = vld [vmem:[%s20631_s1 + $0x1c8] sm:$0xff] }
 0x638   : > { %15742 = vmatpush3.bf16.msk.msra.mxu1 %vm17540_vm4, %v15737_v23  ;;  %13765 = vmatprep.mubr.msk.f32.mxu1 %vm379_vm0, %v17617_v37  ;;  %v470_v23 = vld [vmem:[%s20631_s1 + $0x1c0] sm:$0xff] }
 0x639   : > { %15774 = vmatprep.subr.msk.bf16.mxu1 %vm17666_vm14, %v17389_v18 }
 0x63b   : > { %13766 = vmatmul.mubr.msk.f32.vlgmr.msra.gmra.mrb[18].mxu1 %vm379_vm0, %v17623_v38 }
 0x63c   : > { %13768 = vmatprep.mubr.msk.f32.mxu1 %vm379_vm0, %v17627_v39  ;;  %15776 = vmatpush3.bf16.msk.msra.mxu1 %vm17666_vm14, %v17389_v18 }
 0x63d   : > { %15779 = vmatprep.subr.msk.bf16.mxu1 %vm17735_vm3, %v17722_v26 }
 0x63f   : > { %13769 = vmatmul.mubr.msk.f32.gmra.mrb[20].mxu1 %vm379_vm0, %v2676_v32  ;;  %v18149_v32 = vld [vmem:[#allocation2 + $0x11] sm:$0xff] }
 0x640   : > { %15782 = vmatpush3.bf16.msk.msra.mxu1 %vm17735_vm3, %v17722_v26 }
 0x6f6   : > { %v13717_v34 = vpop.f32.mrb[16].mxu1  ;;  %v13728_v35 = vpop.f32.mrb[16].mxu0 }
 0x6f7   : > { %v2452_v37 = vmax.f32 %v13717_v34, %v13728_v35  ;;  %v2367_v38 = vpop.f32.mrb[17].mxu1  ;;  %v2442_v39 = vpop.f32.mrb[17].mxu0  ;;  %v15803_v34 = vpack.c.bf16 %v471_v25, %v470_v23  ;;  %v3125_v35 = vld [vmem:[#allocation2 + $0x19] sm:$0xf]  ;;  %v480_v25 = vld [vmem:[%s20631_s1 + $0x210] sm:$0xff] }
 0x6f8   : > { %v2451_v63 = vmax.f32 %v2367_v38, %v2442_v39  ;;  %v473_v38 = vld [vmem:[%s20631_s1 + $0x1d8] sm:$0x3f]  ;;  %v18162_v39 = vld [vmem:[#allocation2] sm:$0xff] }
 0x6f9   : > { %2457 = vrot.lane.b32.xlu0 %v2452_v37, %s17396_s14  ;;  %v472_v37 = vld [vmem:[%s20631_s1 + $0x1d0] sm:$0xff] }
 0x6fa   : > { %2455 = vrot.lane.b32.xlu1 %v2451_v63, %s17396_s14  ;;  %v15807_v63 = vpack.c.bf16 %v473_v38, %v472_v37  ;;  %s17210_s14 = spop %17209 }
 0x6fb   : > { %s17212_s28 = spop %17211 }
 0x6fc   : > { %v4090_v54 = vstv %s17212_s28 }
 0x70e   : > { %v13767_v2 = vpop.f32.mrb[18].mxu1 }
 0x70f   : > { %v2786_v3 = vadd.f32 %v13767_v2, %v2784_v1  ;;  %v2758_v4 = vpop.f32.mrb[19].mxu1  ;;  %v18172_v2 = vld [vmem:[#allocation2 + $0x10] sm:$0xff] }
 0x710   : > { %v2785_v5 = vadd.f32 %v2784_v1, %v2758_v4  ;;  %v18179_v4 = vld [vmem:[#allocation2 + $0x2] sm:$0xff] }
 0x711   : > { %v2790_v6 = vmax.f32 %v2786_v3, 0.0  ;;  %v3121_v3 = vld [vmem:[#allocation2 + $0x18] sm:$0xf] }
 0x712   : > { %v2789_v8 = vmax.f32 %v2785_v5, 0.0  ;;  %v13770_v9 = vpop.f32.mrb[20].mxu1  ;;  %v18188_v5 = vld [vmem:[#allocation2 + $0xa] sm:$0xff] }
 0x713   : > { %v2788_v11 = vadd.f32 %v13770_v9, %v2784_v1  ;;  %v2768_v14 = vpop.f32.mrb[21].mxu1 }
 0x714   : > { %v15743_v17 = vpack.c.bf16 %v2790_v6, %v2789_v8  ;;  %v2787_v19 = vadd.f32 %v2784_v1, %v2768_v14  ;;  %v18168_v1 = vld [vmem:[#allocation2 + $0x8] sm:$0xff]  ;;  %v18192_v6 = vld [vmem:[#allocation2 + $0x12] sm:$0xff]  ;;  %v3329_v8 = vld [vmem:[#allocation2 + $0x1a] sm:$0xf] }
 0x715   : > { %v2792_v21 = vmax.f32 %v2788_v11, 0.0 }
 0x716   : > { %v2791_v24 = vmax.f32 %v2787_v19, 0.0  ;;  %15744 = vmatprep.subr.bf16.mxu0 %v15743_v17 }
 0x717   : > { %15746 = vmatpush3.bf16.msra.mxu0 %v15743_v17 }
 0x718   : > { %v15747_v29 = vpack.c.bf16 %v2792_v21, %v2791_v24  ;;  %v3437_v24 = vstv %s17210_s14  ;;  %s17406_s14 = smov 121  }
 0x71a   : > { %15749 = vmatprep.subr.msk.bf16.mxu0 %vm17674_vm5, %v15747_v29 }
 0x71b   : > { %15752 = vmatpush3.bf16.msk.msra.mxu0 %vm17674_vm5, %v15747_v29 }
 0x71c   : > { %15754 = vmatprep.subr.bf16.mxu0 %v15743_v17 }
 0x71e   : > { %13780 = vmatmul.mubr.msk.f32.vlgmr.msra.gmra.mrb[18].mxu0 %vm814_vm7, %v17683_v12 }
 0x71f   : > { %15756 = vmatpush3.bf16.msra.mxu0 %v15743_v17  ;;  %13790 = vmatprep.mubr.msk.f32.mxu0 %vm814_vm7, %v17687_v13 }
 0x720   : > { %15759 = vmatprep.subr.msk.bf16.mxu0 %vm17674_vm5, %v15747_v29 }
 0x723   : > { %15762 = vmatpush3.bf16.msk.msra.mxu0 %vm17674_vm5, %v15747_v29 }
 0x724   : > { %15764 = vmatprep.subr.msk.bf16.mxu0 %vm17653_vm11, %v17389_v18 }
 0x726   : > { %13791 = vmatmul.mubr.msk.f32.vlgmr.msra.gmra.mrb[20].mxu0 %vm814_vm7, %v17698_v16 }
 0x727   : > { %15766 = vmatpush3.bf16.msk.msra.mxu0 %vm17653_vm11, %v17389_v18 }
 0x728   : > { %15769 = vmatprep.subr.msk.bf16.mxu0 %vm17726_vm15, %v17719_v22 }
 0x72b   : > { %15772 = vmatpush3.bf16.msk.msra.mxu0 %vm17726_vm15, %v17719_v22 }
 0x72c   : > { %15784 = vmatprep.subr.bf16.mxu0 %v15783_v40 }
 0x76b   : > { %v2458_v30 = vpop.permute.xlu0 %2457 }
 0x76c   : > { %2464 = vst.msk [vmem:[#allocation3 + $0x9] sm:$0x3f] %vm2463_vm13, %v2458_v30  ;;  %v2456_v31 = vpop.permute.xlu1 %2455  ;;  %vm3114_vm13 = vcmask 515464  }
 0x76d   : > { %2462 = vst.msk [vmem:[#allocation3 + $0x1] sm:$0xff] %vm2461_vm6, %v2456_v31  ;;  %vm18512_vm6 = vmpackc.low %vm507_vm2, %vm354_vm9 }
 0x76e   : > { %vm18540_vm9 = vmpackc.low %vm507_vm2, %vm367_vm12  ;;  %vm11210_vm2 = vcmask 56320   ;;  %vm11216_vm12 = vcmask 285696  }
 0x7f1   : > { %v13781_v41 = vpop.f32.mrb[18].mxu0 }
 0x7f2   : > { %v2862_v43 = vpop.f32.mrb[19].mxu0 }
 0x7f9   : > { %v13792_v44 = vpop.f32.mrb[20].mxu0 }
 0x7fa   : > { %v2947_v51 = vmax.f32 %v13781_v41, %v13792_v44  ;;  %v2937_v15 = vpop.f32.mrb[21].mxu0 }
 0x7fb   : > { %v2946_v53 = vmax.f32 %v2862_v43, %v2937_v15 }
 0x7fd   : > { %13801 = vmatprep.mubr.msk.f32.mxu0 %vm814_vm7, %v2946_v53  ;;  %13812 = vmatprep.mubr.msk.f32.mxu1 %vm814_vm7, %v2946_v53 }
 0x7fe   : > { %13802 = vmatmul.mubr.msk.f32.vlgmr.msra.gmra.mrb[22].mxu0 %vm814_vm7, %v2947_v51  ;;  %13813 = vmatmul.mubr.msk.f32.vlgmr.msra.gmra.mrb[22].mxu1 %vm814_vm7, %v2947_v51 }
 0x7ff   : > { %15786 = vmatpush3.bf16.msra.mxu0 %v15783_v40  ;;  %13823 = vmatprep.mubr.msk.f32.mxu0 %vm379_vm0, %v17567_v20  ;;  %v15797_v20 = vpack.c.bf16 %v465_v61, %v464_v60 }
 0x800   : > { %15789 = vmatprep.subr.msk.bf16.mxu0 %vm17540_vm4, %v15787_v55  ;;  %13865 = vmatprep.mubr.msk.f32.mxu1 %vm814_vm7, %v17639_v47 }
 0x803   : > { %15792 = vmatpush3.bf16.msk.msra.mxu0 %vm17540_vm4, %v15787_v55 }
 0x804   : > { %15794 = vmatprep.subr.bf16.mxu0 %v15793_v59 }
 0x806   : > { %13824 = vmatmul.mubr.msk.f32.vlgmr.msra.gmra.mrb[24].mxu0 %vm379_vm0, %v18139_v62 }
 0x807   : > { %13826 = vmatprep.mubr.msk.f32.mxu0 %vm379_vm0, %v18149_v32  ;;  %15796 = vmatpush3.bf16.msra.mxu0 %v15793_v59  ;;  %v479_v59 = vld [vmem:[%s20631_s1 + $0x208] sm:$0xff] }
 0x808   : > { %15799 = vmatprep.subr.msk.bf16.mxu0 %vm17540_vm4, %v15797_v20  ;;  %v15853_v60 = vpack.c.bf16 %v479_v59, %v478_v58 }
 0x80a   : > { %13827 = vmatmul.mubr.msk.f32.gmra.mrb[26].mxu0 %vm379_vm0, %v3125_v35 }
 0x80b   : > { %15802 = vmatpush3.bf16.msk.msra.mxu0 %vm17540_vm4, %v15797_v20  ;;  %13837 = vmatprep.mubr.msk.f32.mxu0 %vm379_vm0, %v18162_v39 }
 0x80c   : > { %15804 = vmatprep.subr.bf16.mxu0 %v15803_v34 }
 0x80e   : > { %13838 = vmatmul.mubr.msk.f32.vlgmr.msra.gmra.mrb[24].mxu0 %vm379_vm0, %v18168_v1 }
 0x80f   : > { %13840 = vmatprep.mubr.msk.f32.mxu0 %vm379_vm0, %v18172_v2  ;;  %15806 = vmatpush3.bf16.msra.mxu0 %v15803_v34  ;;  %v481_v34 = vld [vmem:[%s20631_s1 + $0x218] sm:$0x3f] }
 0x810   : > { %15809 = vmatprep.subr.msk.bf16.mxu0 %vm17540_vm4, %v15807_v63 }
 0x812   : > { %13841 = vmatmul.mubr.msk.f32.gmra.mrb[26].mxu0 %vm379_vm0, %v3121_v3  ;;  %v474_v3 = vld [vmem:[%s20631_s1 + $0x1e0] sm:$0xff] }
 0x813   : > { %15812 = vmatpush3.bf16.msk.msra.mxu0 %vm17540_vm4, %v15807_v63  ;;  %13851 = vmatprep.mubr.msk.f32.mxu0 %vm379_vm0, %v18179_v4  ;;  %v15857_v63 = vpack.c.bf16 %v481_v34, %v480_v25  ;;  %v4439_v25 = vld [vmem:[%s20633_s3 + $0x78] sm:$0xff] }
 0x814   : > { %15844 = vmatprep.subr.msk.bf16.mxu0 %vm17666_vm14, %v17389_v18 }
 0x816   : > { %13852 = vmatmul.mubr.msk.f32.vlgmr.msra.gmra.mrb[24].mxu0 %vm379_vm0, %v18188_v5 }
 0x817   : > { %13854 = vmatprep.mubr.msk.f32.mxu0 %vm379_vm0, %v18192_v6  ;;  %15846 = vmatpush3.bf16.msk.msra.mxu0 %vm17666_vm14, %v17389_v18 }
 0x818   : > { %15849 = vmatprep.subr.msk.bf16.mxu0 %vm17735_vm3, %v17722_v26 }
 0x81a   : > { %13855 = vmatmul.mubr.msk.f32.gmra.mrb[26].mxu0 %vm379_vm0, %v3329_v8  ;;  %v475_v8 = vld [vmem:[%s20631_s1 + $0x1e8] sm:$0xff] }
 0x81b   : > { %15852 = vmatpush3.bf16.msk.msra.mxu0 %vm17735_vm3, %v17722_v26 }
 0x8d1   : > { %v13803_v9 = vpop.f32.mrb[22].mxu0  ;;  %v13814_v11 = vpop.f32.mrb[22].mxu1 }
 0x8d2   : > { %v3105_v14 = vmax.f32 %v13803_v9, %v13814_v11  ;;  %v3020_v17 = vpop.f32.mrb[23].mxu0  ;;  %v3095_v19 = vpop.f32.mrb[23].mxu1  ;;  %v3775_v9 = vld [vmem:[#allocation2 + $0x1] sm:$0xff]  ;;  %v15863_v11 = vpack.c.bf16 %v475_v8, %v474_v3  ;;  %v4443_v3 = vld [vmem:[%s20633_s3 + $0x98] sm:$0xff] }
 0x8d3   : > { %v3104_v21 = vmax.f32 %v3020_v17, %v3095_v19  ;;  %v477_v17 = vld [vmem:[%s20631_s1 + $0x1f8] sm:$0x3f] }
 0x8d4   : > { %3110 = vrot.lane.b32.xlu0 %v3105_v14, %s20642_s29  ;;  %v476_v14 = vld [vmem:[%s20631_s1 + $0x1f0] sm:$0xff] }
 0x8d5   : > { %3108 = vrot.lane.b32.xlu1 %v3104_v21, %s20642_s29  ;;  %v15867_v19 = vpack.c.bf16 %v477_v17, %v476_v14  ;;  %v482_v21 = vld [vmem:[%s20631_s1 + $0x220] sm:$0xff]  ;;  %v4446_v17 = vld [vmem:[%s20633_s3 + $0xb0] sm:$0xff]  ;;  %s17408_s29 = smov 117  }
 0x8e9   : > { %v13853_v29 = vpop.f32.mrb[24].mxu0 }
 0x8ea   : > { %v3439_v30 = vadd.f32 %v13853_v29, %v3437_v24  ;;  %v3411_v31 = vpop.f32.mrb[25].mxu0 }
 0x8eb   : > { %v3438_v33 = vadd.f32 %v3437_v24, %v3411_v31  ;;  %v484_v31 = vld [vmem:[%s20631_s1 + $0x230] sm:$0xff] }
 0x8ec   : > { %v3443_v36 = vmax.f32 %v3439_v30, 0.0  ;;  %v3778_v30 = vld [vmem:[#allocation2 + $0x19] sm:$0xf] }
 0x8ed   : > { %v3442_v40 = vmax.f32 %v3438_v33, 0.0  ;;  %v13856_v41 = vpop.f32.mrb[26].mxu0  ;;  %v485_v33 = vld [vmem:[%s20631_s1 + $0x238] sm:$0x3f] }
 0x8ee   : > { %v3441_v43 = vadd.f32 %v13856_v41, %v3437_v24  ;;  %v3421_v44 = vpop.f32.mrb[27].mxu0 }
 0x8ef   : > { %v15813_v45 = vpack.c.bf16 %v3443_v36, %v3442_v40  ;;  %v3440_v48 = vadd.f32 %v3437_v24, %v3421_v44  ;;  %v483_v24 = vld [vmem:[%s20631_s1 + $0x228] sm:$0xff] }
 0x8f0   : > { %v3445_v51 = vmax.f32 %v3441_v43, 0.0  ;;  %v15873_v29 = vpack.c.bf16 %v483_v24, %v482_v21  ;;  %v4424_v24 = vld [vmem:[%s20633_s3] sm:$0xff] }
 0x8f1   : > { %v3444_v15 = vmax.f32 %v3440_v48, 0.0  ;;  %15814 = vmatprep.subr.bf16.mxu1 %v15813_v45 }
 0x8f2   : > { %15816 = vmatpush3.bf16.msra.mxu1 %v15813_v45 }
 0x8f3   : > { %v15817_v53 = vpack.c.bf16 %v3445_v51, %v3444_v15 }
 0x8f5   : > { %15819 = vmatprep.subr.msk.bf16.mxu1 %vm17674_vm5, %v15817_v53 }
 0x8f6   : > { %15822 = vmatpush3.bf16.msk.msra.mxu1 %vm17674_vm5, %v15817_v53 }
 0x8f7   : > { %15824 = vmatprep.subr.bf16.mxu1 %v15813_v45 }
 0x8f9   : > { %13866 = vmatmul.mubr.msk.f32.vlgmr.msra.gmra.mrb[24].mxu1 %vm814_vm7, %v17683_v12 }
 0x8fa   : > { %15826 = vmatpush3.bf16.msra.mxu1 %v15813_v45  ;;  %13876 = vmatprep.mubr.msk.f32.mxu1 %vm814_vm7, %v17687_v13 }
 0x8fb   : > { %15829 = vmatprep.subr.msk.bf16.mxu1 %vm17674_vm5, %v15817_v53 }
 0x8fe   : > { %15832 = vmatpush3.bf16.msk.msra.mxu1 %vm17674_vm5, %v15817_v53 }
 0x8ff   : > { %15834 = vmatprep.subr.msk.bf16.mxu1 %vm17653_vm11, %v17389_v18 }
 0x901   : > { %13877 = vmatmul.mubr.msk.f32.vlgmr.msra.gmra.mrb[26].mxu1 %vm814_vm7, %v17698_v16 }
 0x902   : > { %15836 = vmatpush3.bf16.msk.msra.mxu1 %vm17653_vm11, %v17389_v18 }
 0x903   : > { %15839 = vmatprep.subr.msk.bf16.mxu1 %vm17726_vm15, %v17719_v22 }
 0x906   : > { %15842 = vmatpush3.bf16.msk.msra.mxu1 %vm17726_vm15, %v17719_v22 }
 0x907   : > { %15854 = vmatprep.subr.bf16.mxu1 %v15853_v60 }
 0x946   : > { %v3111_v55 = vpop.permute.xlu0 %3110 }
 0x947   : > { %3117 = vst.msk [vmem:[#allocation3 + $0x9] sm:$0x3f] %vm3116_vm10, %v3111_v55  ;;  %v3109_v57 = vpop.permute.xlu1 %3108  ;;  %vm11220_vm10 = vcmask 400384  }
 0x948   : > { %3115 = vst.msk [vmem:[#allocation3 + $0x1] sm:$0xff] %vm3114_vm13, %v3109_v57  ;;  %vm11222_vm13 = vcmask 457728  }
 0x9cc   : > { %v13867_v61 = vpop.f32.mrb[24].mxu1 }
 0x9cd   : > { %v3515_v20 = vpop.f32.mrb[25].mxu1 }
 0x9d4   : > { %v13878_v23 = vpop.f32.mrb[26].mxu1 }
 0x9d5   : > { %v3600_v35 = vmax.f32 %v13867_v61, %v13878_v23  ;;  %v3590_v37 = vpop.f32.mrb[27].mxu1 }
 0x9d6   : > { %v3599_v38 = vmax.f32 %v3515_v20, %v3590_v37  ;;  %v4438_v20 = vld [vmem:[%s20633_s3 + $0x70] sm:$0xff]  ;;  %v4441_v37 = vld [vmem:[%s20633_s3 + $0x88] sm:$0xff] }
 0x9d7   : > { %v15927_v34 = vpack.c.bf16 %v4439_v25, %v4438_v20  ;;  %v4454_v25 = vld [vmem:[%s20633_s3 + $0xf0] sm:$0xff] }
 0x9d8   : > { %13887 = vmatprep.mubr.msk.f32.mxu1 %vm814_vm7, %v3599_v38  ;;  %13898 = vmatprep.mubr.msk.f32.mxu0 %vm814_vm7, %v3599_v38 }
 0x9d9   : > { %13888 = vmatmul.mubr.msk.f32.vlgmr.msra.gmra.mrb[28].mxu1 %vm814_vm7, %v3600_v35  ;;  %13899 = vmatmul.mubr.msk.f32.vlgmr.msra.gmra.mrb[28].mxu0 %vm814_vm7, %v3600_v35  ;;  %v4440_v35 = vld [vmem:[%s20633_s3 + $0x80] sm:$0xff] }
 0x9da   : > { %15856 = vmatpush3.bf16.msra.mxu1 %v15853_v60  ;;  %13909 = vmatprep.mubr.msk.f32.mxu1 %vm379_vm0, %v3775_v9  ;;  %v15931_v38 = vpack.c.bf16 %v4441_v37, %v4440_v35  ;;  %v4444_v9 = vld [vmem:[%s20633_s3 + $0xa0] sm:$0xff] }
 0x9db   : > { %15859 = vmatprep.subr.msk.bf16.mxu1 %vm17540_vm4, %v15857_v63  ;;  %13951 = vmatprep.mubr.msk.f32.mxu0 %vm814_vm7, %v17639_v47  ;;  %v4456_v37 = vld [vmem:[%s20633_s3 + $0x100] sm:$0xff] }
 0x9de   : > { %15862 = vmatpush3.bf16.msk.msra.mxu1 %vm17540_vm4, %v15857_v63  ;;  %v4442_v63 = vld [vmem:[%s20633_s3 + $0x90] sm:$0xff] }
 0x9df   : > { %15864 = vmatprep.subr.bf16.mxu1 %v15863_v11  ;;  %v15935_v8 = vpack.c.bf16 %v4443_v3, %v4442_v63  ;;  %v4458_v3 = vld [vmem:[%s20633_s3 + $0x110] sm:$0xff] }
 0x9e1   : > { %13910 = vmatmul.mubr.msk.f32.vlgmr.msra.gmra.mrb[30].mxu1 %vm379_vm0, %v18139_v62  ;;  %v15877_v62 = vpack.c.bf16 %v485_v33, %v484_v31 }
 0x9e2   : > { %13912 = vmatprep.mubr.msk.f32.mxu1 %vm379_vm0, %v18149_v32  ;;  %15866 = vmatpush3.bf16.msra.mxu1 %v15863_v11  ;;  %v3774_v32 = vld [vmem:[#allocation2 + $0x18] sm:$0xf]  ;;  %v4445_v11 = vld [vmem:[%s20633_s3 + $0xa8] sm:$0xff] }
 0x9e3   : > { %15869 = vmatprep.subr.msk.bf16.mxu1 %vm17540_vm4, %v15867_v19  ;;  %v15939_v14 = vpack.c.bf16 %v4445_v11, %v4444_v9 }
 0x9e5   : > { %13913 = vmatmul.mubr.msk.f32.gmra.mrb[32].mxu1 %vm379_vm0, %v3778_v30 }
 0x9e6   : > { %15872 = vmatpush3.bf16.msk.msra.mxu1 %vm17540_vm4, %v15867_v19  ;;  %13923 = vmatprep.mubr.msk.f32.mxu1 %vm379_vm0, %v18162_v39  ;;  %v3982_v39 = vld [vmem:[#allocation2 + $0x1a] sm:$0xf]  ;;  %v4447_v19 = vld [vmem:[%s20633_s3 + $0xb8] sm:$0xff] }
 0x9e7   : > { %15874 = vmatprep.subr.bf16.mxu1 %v15873_v29  ;;  %v15943_v21 = vpack.c.bf16 %v4447_v19, %v4446_v17 }
 0x9e9   : > { %13924 = vmatmul.mubr.msk.f32.vlgmr.msra.gmra.mrb[30].mxu1 %vm379_vm0, %v18168_v1 }
 0x9ea   : > { %13926 = vmatprep.mubr.msk.f32.mxu1 %vm379_vm0, %v18172_v2  ;;  %15876 = vmatpush3.bf16.msra.mxu1 %v15873_v29  ;;  %v4425_v29 = vld [vmem:[%s20633_s3 + $0x8] sm:$0xff] }
 0x9eb   : > { %15879 = vmatprep.subr.msk.bf16.mxu1 %vm17540_vm4, %v15877_v62  ;;  %v15947_v33 = vpack.c.bf16 %v4425_v29, %v4424_v24 }
 0x9ed   : > { %13927 = vmatmul.mubr.msk.f32.gmra.mrb[32].mxu1 %vm379_vm0, %v3774_v32 }
 0x9ee   : > { %15882 = vmatpush3.bf16.msk.msra.mxu1 %vm17540_vm4, %v15877_v62  ;;  %13937 = vmatprep.mubr.msk.f32.mxu1 %vm379_vm0, %v18179_v4 }
 0x9ef   : > { %15914 = vmatprep.subr.msk.bf16.mxu1 %vm17666_vm14, %v17389_v18 }
 0x9f1   : > { %13938 = vmatmul.mubr.msk.f32.vlgmr.msra.gmra.mrb[30].mxu1 %vm379_vm0, %v18188_v5 }
 0x9f2   : > { %13940 = vmatprep.mubr.msk.f32.mxu1 %vm379_vm0, %v18192_v6  ;;  %15916 = vmatpush3.bf16.msk.msra.mxu1 %vm17666_vm14, %v17389_v18  ;;  %vm3767_vm14 = vcmask 646664  }
 0x9f3   : > { %15919 = vmatprep.subr.msk.bf16.mxu1 %vm17735_vm3, %v17722_v26 }
 0x9f5   : > { %13941 = vmatmul.mubr.msk.f32.gmra.mrb[32].mxu1 %vm379_vm0, %v3982_v39  ;;  %vm3769_vm0 = vcmask 644616  }
 0x9f6   : > { %15922 = vmatpush3.bf16.msk.msra.mxu1 %vm17735_vm3, %v17722_v26  ;;  %vm5114_vm3 = vcmask 113664  }
 0xaac   : > { %v13889_v1 = vpop.f32.mrb[28].mxu1  ;;  %v13900_v2 = vpop.f32.mrb[28].mxu0 }
 0xaad   : > { %v3758_v4 = vmax.f32 %v13889_v1, %v13900_v2  ;;  %v3673_v5 = vpop.f32.mrb[29].mxu1  ;;  %v3748_v6 = vpop.f32.mrb[29].mxu0  ;;  %v18395_v2 = vld [vmem:[%s20634_s4] sm:$0x1] }
 0xaae   : > { %v3757_v36 = vmax.f32 %v3673_v5, %v3748_v6  ;;  %17213 = vpush %v18395_v2  ;;  %v4426_v6 = vld [vmem:[%s20633_s3 + $0x10] sm:$0xff] }
 0xaaf   : > { %3763 = vrot.lane.b32.xlu0 %v3758_v4, %s17398_s25 }
 0xab0   : > { %3761 = vrot.lane.b32.xlu1 %v3757_v36, %s17398_s25  ;;  %s17399_s25 = smov 81   ;;  %v4427_v36 = vld [vmem:[%s20633_s3 + $0x18] sm:$0xff] }
 0xac4   : > { %v13939_v40 = vpop.f32.mrb[30].mxu1 }
 0xac5   : > { %v4092_v41 = vadd.f32 %v13939_v40, %v4090_v54  ;;  %v4064_v43 = vpop.f32.mrb[31].mxu1  ;;  %v15951_v40 = vpack.c.bf16 %v4427_v36, %v4426_v6 }
 0xac6   : > { %v4091_v44 = vadd.f32 %v4090_v54, %v4064_v43  ;;  %v4428_v43 = vld [vmem:[%s20633_s3 + $0x20] sm:$0xff] }
 0xac7   : > { %v4096_v45 = vmax.f32 %v4092_v41, 0.0 }
 0xac8   : > { %v4095_v48 = vmax.f32 %v4091_v44, 0.0  ;;  %v13942_v51 = vpop.f32.mrb[32].mxu1  ;;  %v4429_v44 = vld [vmem:[%s20633_s3 + $0x28] sm:$0xff] }
 0xac9   : > { %v4094_v28 = vadd.f32 %v13942_v51, %v4090_v54  ;;  %v4074_v26 = vpop.f32.mrb[33].mxu1  ;;  %v4430_v51 = vld [vmem:[%s20633_s3 + $0x30] sm:$0xff] }
 0xaca   : > { %v15883_v15 = vpack.c.bf16 %v4096_v45, %v4095_v48  ;;  %v4093_v53 = vadd.f32 %v4090_v54, %v4074_v26  ;;  %v15955_v48 = vpack.c.bf16 %v4429_v44, %v4428_v43  ;;  %v4474_v43 = vld [vmem:[%s20633_s3 + $0x190] sm:$0xff]  ;;  %v4475_v44 = vld [vmem:[%s20633_s3 + $0x198] sm:$0xff] }
 0xacb   : > { %v4098_v55 = vmax.f32 %v4094_v28, 0.0  ;;  %v4431_v28 = vld [vmem:[%s20633_s3 + $0x38] sm:$0xff]  ;;  %v16015_v42 = vpack.c.bf16 %v4475_v44, %v4474_v43  ;;  %v4494_v43 = vld [vmem:[%s20633_s3 + $0x230] sm:$0xff] }
 0xacc   : > { %v4097_v57 = vmax.f32 %v4093_v53, 0.0  ;;  %15884 = vmatprep.subr.bf16.mxu0 %v15883_v15  ;;  %v15959_v26 = vpack.c.bf16 %v4431_v28, %v4430_v51  ;;  %v4433_v53 = vld [vmem:[%s20633_s3 + $0x48] sm:$0xff]  ;;  %v4478_v28 = vld [vmem:[%s20633_s3 + $0x1b0] sm:$0xff]  ;;  %v4495_v44 = vld [vmem:[%s20633_s3 + $0x238] sm:$0xff] }
 0xacd   : > { %15886 = vmatpush3.bf16.msra.mxu0 %v15883_v15 }
 0xace   : > { %v15887_v58 = vpack.c.bf16 %v4098_v55, %v4097_v57  ;;  %v4434_v57 = vld [vmem:[%s20633_s3 + $0x50] sm:$0xff] }
 0xad0   : > { %15889 = vmatprep.subr.msk.bf16.mxu0 %vm17674_vm5, %v15887_v58 }
 0xad1   : > { %15892 = vmatpush3.bf16.msk.msra.mxu0 %vm17674_vm5, %v15887_v58 }
 0xad2   : > { %15894 = vmatprep.subr.bf16.mxu0 %v15883_v15 }
 0xad4   : > { %13952 = vmatmul.mubr.msk.f32.vlgmr.msra.gmra.mrb[30].mxu0 %vm814_vm7, %v17683_v12 }
 0xad5   : > { %15896 = vmatpush3.bf16.msra.mxu0 %v15883_v15  ;;  %13962 = vmatprep.mubr.msk.f32.mxu0 %vm814_vm7, %v17687_v13  ;;  %v4432_v15 = vld [vmem:[%s20633_s3 + $0x40] sm:$0xff] }
 0xad6   : > { %15899 = vmatprep.subr.msk.bf16.mxu0 %vm17674_vm5, %v15887_v58  ;;  %v15963_v55 = vpack.c.bf16 %v4433_v53, %v4432_v15  ;;  %v4480_v53 = vld [vmem:[%s20633_s3 + $0x1c0] sm:$0xff] }
 0xad9   : > { %15902 = vmatpush3.bf16.msk.msra.mxu0 %vm17674_vm5, %v15887_v58  ;;  %vm4420_vm5 = vcmask 777864   ;;  %v4435_v58 = vld [vmem:[%s20633_s3 + $0x58] sm:$0xff] }
 0xada   : > { %15904 = vmatprep.subr.msk.bf16.mxu0 %vm17653_vm11, %v17389_v18 }
 0xadc   : > { %13963 = vmatmul.mubr.msk.f32.vlgmr.msra.gmra.mrb[32].mxu0 %vm814_vm7, %v17698_v16 }
 0xadd   : > { %15906 = vmatpush3.bf16.msk.msra.mxu0 %vm17653_vm11, %v17389_v18  ;;  %vm4422_vm11 = vcmask 775816  }
 0xade   : > { %15909 = vmatprep.subr.msk.bf16.mxu0 %vm17726_vm15, %v17719_v22 }
 0xadf   : > { %s17214_s16 = spop %17213 }
 0xae0   : > { %v5109_v17 = vstv %s17214_s16  ;;  %s17410_s16 = smov 21  }
 0xae1   : > { %15912 = vmatpush3.bf16.msk.msra.mxu0 %vm17726_vm15, %v17719_v22  ;;  %v4436_v22 = vld [vmem:[%s20633_s3 + $0x60] sm:$0xff]  ;;  %vm17401_vm15 = vmmov 0  }
 0xae2   : > { %v15923_v23 = vpack.c.bf16 %v4437_v27, %v4436_v22  ;;  %v4452_v22 = vld [vmem:[%s20633_s3 + $0xe0] sm:$0xff]  ;;  %v4453_v27 = vld [vmem:[%s20633_s3 + $0xe8] sm:$0xff] }
 0xae4   : > { %15924 = vmatprep.subr.bf16.mxu0 %v15923_v23 }
 0xb21   : > { %v3764_v10 = vpop.permute.xlu0 %3763 }
 0xb22   : > { %3770 = vst.msk [vmem:[#allocation3 + $0x9] sm:$0x3f] %vm3769_vm0, %v3764_v10  ;;  %v3762_v12 = vpop.permute.xlu1 %3761  ;;  %v15967_v10 = vpack.c.bf16 %v4435_v58, %v4434_v57  ;;  %v4482_v58 = vld [vmem:[%s20633_s3 + $0x1d0] sm:$0xff]  ;;  %vm11224_vm0 = vcmask 515072  }
 0xb23   : > { %3768 = vst.msk [vmem:[#allocation3 + $0x1] sm:$0xff] %vm3767_vm14, %v3762_v12  ;;  %v4448_v12 = vld [vmem:[%s20633_s3 + $0xc0] sm:$0xff]  ;;  %vm11226_vm14 = vcmask 572416  }
 0xba7   : > { %v13953_v59 = vpop.f32.mrb[30].mxu0 }
 0xba8   : > { %v4168_v16 = vpop.f32.mrb[31].mxu0 }
 0xbaf   : > { %v13964_v60 = vpop.f32.mrb[32].mxu0 }
 0xbb0   : > { %v4253_v61 = vmax.f32 %v13953_v59, %v13964_v60  ;;  %v4243_v50 = vpop.f32.mrb[33].mxu0  ;;  %v4449_v59 = vld [vmem:[%s20633_s3 + $0xc8] sm:$0xff]  ;;  %v4450_v60 = vld [vmem:[%s20633_s3 + $0xd0] sm:$0xff] }
 0xbb1   : > { %v4252_v18 = vmax.f32 %v4168_v16, %v4243_v50  ;;  %v15971_v16 = vpack.c.bf16 %v4449_v59, %v4448_v12  ;;  %v4460_v59 = vld [vmem:[%s20633_s3 + $0x120] sm:$0xff] }
 0xbb3   : > { %13973 = vmatprep.mubr.msk.f32.mxu0 %vm814_vm7, %v4252_v18  ;;  %13984 = vmatprep.mubr.msk.f32.mxu1 %vm814_vm7, %v4252_v18 }
 0xbb4   : > { %13974 = vmatmul.mubr.msk.f32.vlgmr.msra.gmra.mrb[34].mxu0 %vm814_vm7, %v4253_v61  ;;  %13985 = vmatmul.mubr.msk.f32.vlgmr.msra.gmra.mrb[34].mxu1 %vm814_vm7, %v4253_v61  ;;  %v4451_v61 = vld [vmem:[%s20633_s3 + $0xd8] sm:$0xff] }
 0xbb5   : > { %15926 = vmatpush3.bf16.msra.mxu0 %v15923_v23  ;;  %v15975_v50 = vpack.c.bf16 %v4451_v61, %v4450_v60  ;;  %v15979_v23 = vpack.c.bf16 %v4453_v27, %v4452_v22  ;;  %14079 = vmatprep.mubr.msk.f32.mxu1 %vm17401_vm15, %v17385_v0  ;;  %v4462_v61 = vld [vmem:[%s20633_s3 + $0x130] sm:$0xff]  ;;  %v4464_v27 = vld [vmem:[%s20633_s3 + $0x140] sm:$0xff] }
 0xbb6   : > { %15928 = vmatprep.subr.bf16.mxu0 %v15927_v34 }
 0xbb9   : > { %15930 = vmatpush3.bf16.msra.mxu0 %v15927_v34  ;;  %v4455_v34 = vld [vmem:[%s20633_s3 + $0xf8] sm:$0xff] }
 0xbba   : > { %15932 = vmatprep.subr.bf16.mxu0 %v15931_v38  ;;  %v15983_v35 = vpack.c.bf16 %v4455_v34, %v4454_v25  ;;  %v4466_v34 = vld [vmem:[%s20633_s3 + $0x150] sm:$0xff] }
 0xbbd   : > { %15934 = vmatpush3.bf16.msra.mxu0 %v15931_v38  ;;  %v4457_v38 = vld [vmem:[%s20633_s3 + $0x108] sm:$0xff] }
 0xbbe   : > { %15936 = vmatprep.subr.bf16.mxu0 %v15935_v8  ;;  %v15987_v63 = vpack.c.bf16 %v4457_v38, %v4456_v37  ;;  %v4468_v38 = vld [vmem:[%s20633_s3 + $0x160] sm:$0xff] }
 0xbc1   : > { %15938 = vmatpush3.bf16.msra.mxu0 %v15935_v8  ;;  %v4459_v8 = vld [vmem:[%s20633_s3 + $0x118] sm:$0xff] }
 0xbc2   : > { %15940 = vmatprep.subr.bf16.mxu0 %v15939_v14  ;;  %v15991_v9 = vpack.c.bf16 %v4459_v8, %v4458_v3  ;;  %v4470_v8 = vld [vmem:[%s20633_s3 + $0x170] sm:$0xff] }
 0xbc5   : > { %15942 = vmatpush3.bf16.msra.mxu0 %v15939_v14  ;;  %v17400_v14 = vmov 0.0|0.0  }
 0xbc6   : > { %15944 = vmatprep.subr.bf16.mxu0 %v15943_v21  ;;  %15999 = vmatprep.subr.bf16.mxu1 %v17400_v14 }
 0xbc9   : > { %15946 = vmatpush3.bf16.msra.mxu0 %v15943_v21 }
 0xbca   : > { %15948 = vmatprep.subr.bf16.mxu0 %v15947_v33 }
 0xc87   : > { %v13975_v30 = vpop.f32.mrb[34].mxu0  ;;  %v13986_v31 = vpop.f32.mrb[34].mxu1 }
 0xc88   : > { %v4411_v62 = vmax.f32 %v13975_v30, %v13986_v31  ;;  %v4326_v32 = vpop.f32.mrb[35].mxu0  ;;  %v4401_v39 = vpop.f32.mrb[35].mxu1 }
 0xc89   : > { %v4410_v1 = vmax.f32 %v4326_v32, %v4401_v39  ;;  %v4473_v32 = vld [vmem:[%s20633_s3 + $0x188] sm:$0xff] }
 0xc8a   : > { %4416 = vrot.lane.b32.xlu0 %v4411_v62, %s17399_s25 }
 0xc8b   : > { %4414 = vrot.lane.b32.xlu1 %v4410_v1, %s17399_s25  ;;  %s17409_s25 = smov 14  }
 0xc8e   : > { %6163 = vrot.lane.b32.xlu0 %v18395_v2, %s17391_s24 }
 0xc8f   : > { %5640 = vrot.lane.b32.xlu1 %v18395_v2, %s17390_s23  ;;  %s17405_s23 = smov 7  }
 0xc92   : > { %7209 = vrot.lane.b32.xlu0 %v18395_v2, %s20658_s26 }
 0xc93   : > { %6686 = vrot.lane.b32.xlu1 %v18395_v2, %s20659_s17  ;;  %s17402_s17 = smov 122  }
 0xc96   : > { %8255 = vrot.lane.b32.xlu0 %v18395_v2, %s17402_s17  ;;  %s17411_s17 = smov 28  }
 0xc97   : > { %7732 = vrot.lane.b32.xlu1 %v18395_v2, %s20660_s21  ;;  %s17403_s21 = smov 120  }
 0xc9a   : > { %9301 = vrot.lane.b32.xlu0 %v18395_v2, %s17403_s21 }
 0xc9b   : > { %8778 = vrot.lane.b32.xlu1 %v18395_v2, %s17406_s14 }
 0xc9e   : > { %10347 = vrot.lane.b32.xlu0 %v18395_v2, %s17404_s22  ;;  %s17412_s22 = smov 35  }
 0xc9f   : > { %9824 = vrot.lane.b32.xlu1 %v18395_v2, %s17407_s27  ;;  %s20665_s27 = smov 49  }
 0xca3   : > { %10870 = vrot.lane.b32.xlu1 %v18395_v2, %s17408_s29 }
 0xcfc   : > { %v4417_v4 = vpop.permute.xlu0 %4416 }
 0xcfd   : > { %4423 = vst.msk [vmem:[#allocation3 + $0x9] sm:$0x3f] %vm4422_vm11, %v4417_v4  ;;  %v4415_v5 = vpop.permute.xlu1 %4414  ;;  %v11242_v4 = vld [vmem:[%s20635_s5 + $0x60] sm:$0xff]  ;;  %vm11228_vm11 = vcmask 629760  }
 0xcfe   : > { %4421 = vst.msk [vmem:[#allocation3 + $0x1] sm:$0xff] %vm4420_vm5, %v4415_v5  ;;  %vm11938_vm5 = vcmask 73728  }
 0xd04   : > { %v18416_v41 = vld [vmem:[#allocation3 + $0x9] sm:$0x3f] }
 0xd05   : > { %v18414_v54 = vld [vmem:[#allocation3 + $0x1] sm:$0xff]  ;;  %v18494_v11 = vld [vmem:[#allocation3 + $0xa] sm:$0x3f] }
 0xd06   : > { %14011 = vmatprep.mubr.msk.f32.mxu0 %vm411_vm8, %v18414_v54  ;;  %v18426_v45 = vld [vmem:[#allocation3] sm:$0xff]  ;;  %v18462_v18 = vld [vmem:[#allocation3 + $0x8] sm:$0x3f] }
 0xd07   : > { %14012 = vmatmul.mubr.msk.f32.vlgmr.msra.gmra.mrb[36].mxu0 %vm411_vm8, %v18416_v41  ;;  %v18470_v20 = vld [vmem:[#allocation3 + $0x2] sm:$0xff] }
 0xd08   : > { %15950 = vmatpush3.bf16.msra.mxu0 %v15947_v33  ;;  %14038 = vmatprep.mubr.msk.f32.mxu0 %vm411_vm8, %v18426_v45 }
 0xd09   : > { %15952 = vmatprep.subr.bf16.mxu0 %v15951_v40 }
 0xd0c   : > { %15954 = vmatpush3.bf16.msra.mxu0 %v15951_v40  ;;  %v16011_v40 = vpack.c.bf16 %v4473_v32, %v4472_v46  ;;  %v4489_v46 = vld [vmem:[%s20633_s3 + $0x208] sm:$0xff] }
 0xd0d   : > { %15956 = vmatprep.subr.bf16.mxu0 %v15955_v48 }
 0xd10   : > { %15958 = vmatpush3.bf16.msra.mxu0 %v15955_v48  ;;  %v4477_v48 = vld [vmem:[%s20633_s3 + $0x1a8] sm:$0xff] }
 0xd11   : > { %15960 = vmatprep.subr.bf16.mxu0 %v15959_v26  ;;  %v16019_v51 = vpack.c.bf16 %v4477_v48, %v4476_v49  ;;  %v5641_v49 = vpop.permute.xlu1 %5640 }
 0xd12   : > { %17215 = vpush %v5641_v49 }
 0xd14   : > { %15962 = vmatpush3.bf16.msra.mxu0 %v15959_v26  ;;  %v4479_v26 = vld [vmem:[%s20633_s3 + $0x1b8] sm:$0xff] }
 0xd15   : > { %15964 = vmatprep.subr.bf16.mxu0 %v15963_v55  ;;  %v16023_v15 = vpack.c.bf16 %v4479_v26, %v4478_v28 }
 0xd18   : > { %15966 = vmatpush3.bf16.msra.mxu0 %v15963_v55  ;;  %v4481_v55 = vld [vmem:[%s20633_s3 + $0x1c8] sm:$0xff] }
 0xd19   : > { %15968 = vmatprep.subr.bf16.mxu0 %v15967_v10  ;;  %v16027_v57 = vpack.c.bf16 %v4481_v55, %v4480_v53 }
 0xd1c   : > { %15970 = vmatpush3.bf16.msra.mxu0 %v15967_v10  ;;  %v4483_v10 = vld [vmem:[%s20633_s3 + $0x1d8] sm:$0xff] }
 0xd1d   : > { %15972 = vmatprep.subr.bf16.mxu0 %v15971_v16  ;;  %v16031_v12 = vpack.c.bf16 %v4483_v10, %v4482_v58 }
 0xd1f   : > { %14039 = vmatmul.mubr.msk.f32.vlgmr.msra.gmra.mrb[36].mxu0 %vm411_vm8, %v18462_v18 }
 0xd20   : > { %15974 = vmatpush3.bf16.msra.mxu0 %v15971_v16  ;;  %14065 = vmatprep.mubr.msk.f32.mxu0 %vm411_vm8, %v18470_v20  ;;  %v4461_v16 = vld [vmem:[%s20633_s3 + $0x128] sm:$0xff] }
 0xd21   : > { %15976 = vmatprep.subr.bf16.mxu0 %v15975_v50  ;;  %v16035_v60 = vpack.c.bf16 %v4461_v16, %v4460_v59 }
 0xd24   : > { %15978 = vmatpush3.bf16.msra.mxu0 %v15975_v50  ;;  %v4463_v50 = vld [vmem:[%s20633_s3 + $0x138] sm:$0xff] }
 0xd25   : > { %15980 = vmatprep.subr.bf16.mxu0 %v15979_v23  ;;  %v16039_v22 = vpack.c.bf16 %v4463_v50, %v4462_v61  ;;  %v4508_v50 = vld [vmem:[%s20633_s3 + $0x2a0] sm:$0xff] }
 0xd28   : > { %15982 = vmatpush3.bf16.msra.mxu0 %v15979_v23  ;;  %v4465_v23 = vld [vmem:[%s20633_s3 + $0x148] sm:$0xff] }
 0xd29   : > { %15984 = vmatprep.subr.bf16.mxu0 %v15983_v35  ;;  %v16043_v25 = vpack.c.bf16 %v4465_v23, %v4464_v27 }
 0xd2c   : > { %15986 = vmatpush3.bf16.msra.mxu0 %v15983_v35  ;;  %v4467_v35 = vld [vmem:[%s20633_s3 + $0x158] sm:$0xff] }
 0xd2d   : > { %15988 = vmatprep.subr.bf16.mxu0 %v15987_v63  ;;  %v16047_v37 = vpack.c.bf16 %v4467_v35, %v4466_v34  ;;  %v4510_v35 = vld [vmem:[%s20633_s3 + $0x2b0] sm:$0xff] }
 0xd30   : > { %15990 = vmatpush3.bf16.msra.mxu0 %v15987_v63  ;;  %v4469_v63 = vld [vmem:[%s20633_s3 + $0x168] sm:$0xff] }
 0xd31   : > { %15992 = vmatprep.subr.bf16.mxu0 %v15991_v9  ;;  %v16051_v3 = vpack.c.bf16 %v4469_v63, %v4468_v38  ;;  %v4512_v63 = vld [vmem:[%s20633_s3 + $0x2c0] sm:$0xff] }
 0xd34   : > { %15994 = vmatpush3.bf16.msra.mxu0 %v15991_v9  ;;  %v4471_v9 = vld [vmem:[%s20633_s3 + $0x178] sm:$0xff] }
 0xd35   : > { %15995 = vmatprep.subr.bf16.mxu0 %v17400_v14 }
 0xd37   : > { %14066 = vmatmul.mubr.msk.f32.vlgmr.msra.gmra.mrb[36].mxu0 %vm411_vm8, %v18494_v11 }
 0xd38   : > { %14072 = vmatprep.mubr.msk.f32.mxu0 %vm17401_vm15, %v17385_v0 }
 0xd43   : > { %s17216_s26 = spop %17215 }
 0xd44   : > { %v5643_v53 = vstv %s17216_s26 }
 0xe0a   : > { %v14067_v19 = vpop.f32.mrb[36].mxu0 }
 0xe0b   : > { %v5111_v21 = vadd.f32 %v14067_v19, %v5109_v17  ;;  %v5097_v24 = vpop.f32.mrb[37].mxu0  ;;  %v4484_v19 = vld [vmem:[%s20633_s3 + $0x1e0] sm:$0xff] }
 0xe0c   : > { %v5110_v29 = vadd.f32 %v5109_v17, %v5097_v24  ;;  %v16055_v17 = vpack.c.bf16 %v4471_v9, %v4470_v8  ;;  %v4514_v9 = vld [vmem:[%s20633_s3 + $0x2d0] sm:$0xff] }
 0xe0d   : > { %v5113_v30 = vmax.f32 %v5111_v21, 0.0  ;;  %v4485_v21 = vld [vmem:[%s20633_s3 + $0x1e8] sm:$0xff] }
 0xe0e   : > { %v5112_v31 = vmax.f32 %v5110_v29, 0.0  ;;  %v16059_v24 = vpack.c.bf16 %v4485_v21, %v4484_v19  ;;  %v4486_v29 = vld [vmem:[%s20633_s3 + $0x1f0] sm:$0xff]  ;;  %v4516_v21 = vld [vmem:[%s20633_s3 + $0x2e0] sm:$0xff] }
 0xe10   : > { %v15996_v33 = vpack.c.bf16 %v5113_v30, %v5112_v31  ;;  %v4487_v30 = vld [vmem:[%s20633_s3 + $0x1f8] sm:$0xff] }
 0xe11   : > { %v16063_v31 = vpack.c.bf16 %v4487_v30, %v4486_v29  ;;  %v4518_v30 = vld [vmem:[%s20633_s3 + $0x2f0] sm:$0xff] }
 0xe12   : > { %15998 = vmatpush3.bf16.msk.msra.mxu0 %vm17540_vm4, %v15996_v33  ;;  %16002 = vmatpush3.bf16.msk.msra.mxu1 %vm17540_vm4, %v15996_v33  ;;  %v4488_v33 = vld [vmem:[%s20633_s3 + $0x200] sm:$0xff] }
 0xe13   : > { %16003 = vmatprep.subr.bf16.mxu1 %v17400_v14  ;;  %16083 = vmatprep.subr.bf16.mxu0 %v17400_v14  ;;  %v16067_v32 = vpack.c.bf16 %v4489_v46, %v4488_v33  ;;  %v4496_v46 = vld [vmem:[%s20633_s3 + $0x240] sm:$0xff] }
 0xe15   : > { %14073 = vmatmul.mubr.msk.f32.vlgmr.msra.gmra.mrb[38].mxu0 %vm5114_vm3, %v17639_v47  ;;  %14080 = vmatmul.mubr.msk.f32.vlgmr.msra.gmra.mrb[36].mxu1 %vm5114_vm3, %v17687_v13 }
 0xe16   : > { %16006 = vmatpush3.bf16.msk.msra.mxu1 %vm18512_vm6, %v17657_v52  ;;  %14086 = vmatprep.mubr.msk.f32.mxu1 %vm17401_vm15, %v17385_v0 }
 0xe17   : > { %16007 = vmatprep.subr.bf16.mxu1 %v17400_v14  ;;  %14181 = vmatprep.mubr.msk.f32.mxu0 %vm17401_vm15, %v17385_v0 }
 0xee8   : > { %v5186_v39 = vpop.f32.mrb[38].mxu0  ;;  %v5258_v1 = vpop.f32.mrb[36].mxu1 }
 0xee9   : > { %v5262_v5 = vmax.f32 %v5186_v39, %v5258_v1  ;;  %v14074_v6 = vpop.f32.mrb[39].mxu0  ;;  %v14081_v36 = vpop.f32.mrb[37].mxu1  ;;  %v4490_v39 = vld [vmem:[%s20633_s3 + $0x210] sm:$0xff]  ;;  %v4491_v1 = vld [vmem:[%s20633_s3 + $0x218] sm:$0xff] }
 0xeea   : > { %v4492_v6 = vld [vmem:[%s20633_s3 + $0x220] sm:$0xff]  ;;  %v4493_v36 = vld [vmem:[%s20633_s3 + $0x228] sm:$0xff] }
 0xeeb   : > { %14087 = vmatmul.mubr.msk.f32.vlgmr.msra.gmra.mrb[38].mxu1 %vm5114_vm3, %v5262_v5 }
 0xeec   : > { %16010 = vmatpush3.bf16.msk.msra.mxu1 %vm18540_vm9, %v17670_v56  ;;  %14093 = vmatprep.mubr.msk.f32.mxu1 %vm17401_vm15, %v17385_v0 }
 0xeed   : > { %16012 = vmatprep.subr.bf16.mxu1 %v16011_v40 }
 0xeef   : > { %14094 = vmatmul.mubr.msk.f32.vlgmr.msra.gmra.mrb[40].mxu1 %vm5114_vm3, %v5262_v5  ;;  %v16071_v5 = vpack.c.bf16 %v4491_v1, %v4490_v39  ;;  %v4498_v1 = vld [vmem:[%s20633_s3 + $0x250] sm:$0xff] }
 0xef0   : > { %16014 = vmatpush3.bf16.msra.mxu1 %v16011_v40  ;;  %14120 = vmatprep.mubr.msk.f32.mxu1 %vm411_vm8, %v18414_v54  ;;  %v16075_v40 = vpack.c.bf16 %v4493_v36, %v4492_v6  ;;  %v4500_v36 = vld [vmem:[%s20633_s3 + $0x260] sm:$0xff] }
 0xef1   : > { %16016 = vmatprep.subr.bf16.mxu1 %v16015_v42 }
 0xef4   : > { %16018 = vmatpush3.bf16.msra.mxu1 %v16015_v42  ;;  %v16079_v42 = vpack.c.bf16 %v4495_v44, %v4494_v43  ;;  %v4502_v44 = vld [vmem:[%s20633_s3 + $0x270] sm:$0xff] }
 0xef5   : > { %16020 = vmatprep.subr.bf16.mxu1 %v16019_v51 }
 0xef8   : > { %16022 = vmatpush3.bf16.msra.mxu1 %v16019_v51 }
 0xef9   : > { %16024 = vmatprep.subr.bf16.mxu1 %v16023_v15 }
 0xefc   : > { %16026 = vmatpush3.bf16.msra.mxu1 %v16023_v15 }
 0xefd   : > { %16028 = vmatprep.subr.bf16.mxu1 %v16027_v57 }
 0xf00   : > { %16030 = vmatpush3.bf16.msra.mxu1 %v16027_v57 }
 0xf01   : > { %16032 = vmatprep.subr.bf16.mxu1 %v16031_v12 }
 0xf04   : > { %16034 = vmatpush3.bf16.msra.mxu1 %v16031_v12 }
 0xf05   : > { %16036 = vmatprep.subr.bf16.mxu1 %v16035_v60 }
 0xf07   : > { %14121 = vmatmul.mubr.msk.f32.vlgmr.msra.gmra.mrb[42].mxu1 %vm411_vm8, %v18416_v41 }
 0xf08   : > { %16038 = vmatpush3.bf16.msra.mxu1 %v16035_v60  ;;  %14147 = vmatprep.mubr.msk.f32.mxu1 %vm411_vm8, %v18426_v45 }
 0xf09   : > { %16040 = vmatprep.subr.bf16.mxu1 %v16039_v22 }
 0xf0c   : > { %16042 = vmatpush3.bf16.msra.mxu1 %v16039_v22  ;;  %v4509_v22 = vld [vmem:[%s20633_s3 + $0x2a8] sm:$0xff] }
 0xf0d   : > { %16044 = vmatprep.subr.bf16.mxu1 %v16043_v25  ;;  %v16099_v34 = vpack.c.bf16 %v4509_v22, %v4508_v50  ;;  %v4524_v50 = vld [vmem:[%s20633_s3 + $0x320] sm:$0xff]  ;;  %v4525_v22 = vld [vmem:[%s20633_s3 + $0x328] sm:$0xff] }
 0xf10   : > { %16046 = vmatpush3.bf16.msra.mxu1 %v16043_v25 }
 0xf11   : > { %16048 = vmatprep.subr.bf16.mxu1 %v16047_v37 }
 0xf14   : > { %16050 = vmatpush3.bf16.msra.mxu1 %v16047_v37  ;;  %v4511_v37 = vld [vmem:[%s20633_s3 + $0x2b8] sm:$0xff] }
 0xf15   : > { %16052 = vmatprep.subr.bf16.mxu1 %v16051_v3  ;;  %v16103_v38 = vpack.c.bf16 %v4511_v37, %v4510_v35  ;;  %v4528_v35 = vld [vmem:[%s20633_s3 + $0x340] sm:$0xff]  ;;  %v4529_v37 = vld [vmem:[%s20633_s3 + $0x348] sm:$0xff] }
 0xf18   : > { %16054 = vmatpush3.bf16.msra.mxu1 %v16051_v3  ;;  %v4513_v3 = vld [vmem:[%s20633_s3 + $0x2c8] sm:$0xff] }
 0xf19   : > { %16056 = vmatprep.subr.bf16.mxu1 %v16055_v17  ;;  %v16107_v8 = vpack.c.bf16 %v4513_v3, %v4512_v63  ;;  %v4530_v63 = vld [vmem:[%s20633_s3 + $0x350] sm:$0xff]  ;;  %v4531_v3 = vld [vmem:[%s20633_s3 + $0x358] sm:$0xff] }
 0xf1c   : > { %16058 = vmatpush3.bf16.msra.mxu1 %v16055_v17  ;;  %v4515_v17 = vld [vmem:[%s20633_s3 + $0x2d8] sm:$0xff] }
 0xf1d   : > { %16060 = vmatprep.subr.bf16.mxu1 %v16059_v24  ;;  %v16111_v19 = vpack.c.bf16 %v4515_v17, %v4514_v9  ;;  %v6164_v9 = vpop.permute.xlu0 %6163 }
 0xf1e   : > { %17217 = vpush %v6164_v9  ;;  %v4538_v9 = vld [vmem:[%s20633_s3 + $0x390] sm:$0xff] }
 0xf1f   : > { %14148 = vmatmul.mubr.msk.f32.vlgmr.msra.gmra.mrb[42].mxu1 %vm411_vm8, %v18462_v18 }
 0xf20   : > { %16062 = vmatpush3.bf16.msra.mxu1 %v16059_v24  ;;  %14174 = vmatprep.mubr.msk.f32.mxu1 %vm411_vm8, %v18470_v20  ;;  %v4517_v24 = vld [vmem:[%s20633_s3 + $0x2e8] sm:$0xff] }
 0xf21   : > { %16064 = vmatprep.subr.bf16.mxu1 %v16063_v31  ;;  %v16115_v29 = vpack.c.bf16 %v4517_v24, %v4516_v21 }
 0xf24   : > { %16066 = vmatpush3.bf16.msra.mxu1 %v16063_v31  ;;  %v4519_v31 = vld [vmem:[%s20633_s3 + $0x2f8] sm:$0xff] }
 0xf25   : > { %16068 = vmatprep.subr.bf16.mxu1 %v16067_v32  ;;  %v16119_v33 = vpack.c.bf16 %v4519_v31, %v4518_v30 }
 0xf28   : > { %16070 = vmatpush3.bf16.msra.mxu1 %v16067_v32  ;;  %v4497_v32 = vld [vmem:[%s20633_s3 + $0x248] sm:$0xff] }
 0xf29   : > { %16072 = vmatprep.subr.bf16.mxu1 %v16071_v5  ;;  %v16123_v39 = vpack.c.bf16 %v4497_v32, %v4496_v46 }
 0xf2c   : > { %16074 = vmatpush3.bf16.msra.mxu1 %v16071_v5  ;;  %v4499_v5 = vld [vmem:[%s20633_s3 + $0x258] sm:$0xff] }
 0xf2d   : > { %16076 = vmatprep.subr.bf16.mxu1 %v16075_v40  ;;  %v16127_v6 = vpack.c.bf16 %v4499_v5, %v4498_v1 }
 0xf30   : > { %16078 = vmatpush3.bf16.msra.mxu1 %v16075_v40  ;;  %v4501_v40 = vld [vmem:[%s20633_s3 + $0x268] sm:$0xff] }
 0xf31   : > { %16080 = vmatprep.subr.bf16.mxu1 %v16079_v42  ;;  %v16131_v43 = vpack.c.bf16 %v4501_v40, %v4500_v36  ;;  %v4544_v40 = vld [vmem:[%s20633_s3 + $0x3c0] sm:$0xff] }
 0xf34   : > { %16082 = vmatpush3.bf16.msra.mxu1 %v16079_v42  ;;  %v4503_v42 = vld [vmem:[%s20633_s3 + $0x278] sm:$0xff] }
 0xf35   : > { %16171 = vmatprep.subr.bf16.mxu1 %v17400_v14  ;;  %v16135_v49 = vpack.c.bf16 %v4503_v42, %v4502_v44 }
 0xf37   : > { %14175 = vmatmul.mubr.msk.f32.vlgmr.msra.gmra.mrb[42].mxu1 %vm411_vm8, %v18494_v11 }
 0xf38   : > { %14290 = vmatprep.mubr.msk.f32.mxu1 %vm17401_vm15, %v17385_v0 }
 0xf4f   : > { %s17218_s24 = spop %17217 }
 0xf50   : > { %v6166_v30 = vstv %s17218_s24  ;;  %s17413_s24 = smov 42  }
 0xfbe   : > { %v18668_v48 = vpop.f32.mrb[38].mxu1 }
 0xfbf   : > { %v14088_v51 = vpop.f32.mrb[39].mxu1 }
 0xfc0   : > { %v4504_v51 = vld [vmem:[%s20633_s3 + $0x280] sm:$0xff] }
 0xfc2   : > { %v18670_v28 = vpop.f32.mrb[40].mxu1 }
 0xfc3   : > { %v5412_v26 = vmax.f32 %v18668_v48, %v18670_v28  ;;  %v14095_v15 = vpop.f32.mrb[41].mxu1  ;;  %v11263_v48 = vld [vmem:[%s20635_s5 + $0x108] sm:$0xff]  ;;  %v11264_v28 = vld [vmem:[%s20635_s5 + $0x110] sm:$0xff] }
 0xfc4   : > { %v4505_v15 = vld [vmem:[%s20633_s3 + $0x288] sm:$0xff] }
0x100a   : > { %v14176_v55 = vpop.f32.mrb[42].mxu1 }
0x100b   : > { %v5645_v57 = vadd.f32 %v14176_v55, %v5643_v53  ;;  %v5629_v58 = vpop.f32.mrb[43].mxu1  ;;  %v4506_v55 = vld [vmem:[%s20633_s3 + $0x290] sm:$0xff] }
0x100c   : > { %v5644_v10 = vadd.f32 %v5643_v53, %v5629_v58  ;;  %v16139_v53 = vpack.c.bf16 %v4505_v15, %v4504_v51  ;;  %v4546_v15 = vld [vmem:[%s20633_s3 + $0x3d0] sm:$0xff] }
0x100d   : > { %v5647_v12 = vmax.f32 %v5645_v57, 0.0  ;;  %v4507_v57 = vld [vmem:[%s20633_s3 + $0x298] sm:$0xff] }
0x100e   : > { %v5646_v59 = vmax.f32 %v5644_v10, 0.0  ;;  %v16143_v58 = vpack.c.bf16 %v4507_v57, %v4506_v55  ;;  %v4520_v10 = vld [vmem:[%s20633_s3 + $0x300] sm:$0xff] }
0x100f   : > { %v4548_v57 = vld [vmem:[%s20633_s3 + $0x3e0] sm:$0xff] }
0x1010   : > { %v16084_v16 = vpack.c.bf16 %v5647_v12, %v5646_v59  ;;  %v4521_v12 = vld [vmem:[%s20633_s3 + $0x308] sm:$0xff] }
0x1011   : > { %v16147_v59 = vpack.c.bf16 %v4521_v12, %v4520_v10  ;;  %v4550_v12 = vld [vmem:[%s20633_s3 + $0x3f0] sm:$0xff] }
0x1012   : > { %16086 = vmatpush3.bf16.msk.msra.mxu0 %vm17540_vm4, %v16084_v16 }
0x1013   : > { %16087 = vmatprep.subr.bf16.mxu0 %v17400_v14 }
0x1015   : > { %14182 = vmatmul.mubr.msk.f32.vlgmr.msra.gmra.mrb[40].mxu0 %vm5114_vm3, %v17639_v47 }
0x1016   : > { %16090 = vmatpush3.bf16.msk.msra.mxu0 %vm17540_vm4, %v16084_v16  ;;  %14188 = vmatprep.mubr.msk.f32.mxu0 %vm17401_vm15, %v17385_v0  ;;  %v4522_v16 = vld [vmem:[%s20633_s3 + $0x310] sm:$0xff] }
0x1017   : > { %16091 = vmatprep.subr.bf16.mxu0 %v17400_v14 }
0x1019   : > { %14189 = vmatmul.mubr.msk.f32.vlgmr.msra.gmra.mrb[42].mxu0 %vm5114_vm3, %v17687_v13 }
0x101a   : > { %16094 = vmatpush3.bf16.msk.msra.mxu0 %vm18512_vm6, %v17657_v52  ;;  %14195 = vmatprep.mubr.msk.f32.mxu0 %vm17401_vm15, %v17385_v0 }
0x101b   : > { %16095 = vmatprep.subr.bf16.mxu0 %v17400_v14 }
0x10e8   : > { %v5717_v60 = vpop.f32.mrb[40].mxu0 }
0x10e9   : > { %v14183_v61 = vpop.f32.mrb[41].mxu0 }
0x10ec   : > { %v5787_v27 = vpop.f32.mrb[42].mxu0 }
0x10ed   : > { %v5791_v23 = vmax.f32 %v5717_v60, %v5787_v27  ;;  %v14190_v25 = vpop.f32.mrb[43].mxu0  ;;  %v4523_v60 = vld [vmem:[%s20633_s3 + $0x318] sm:$0xff]  ;;  %v16155_v27 = vpack.c.bf16 %v4525_v22, %v4524_v50  ;;  %v4554_v50 = vld [vmem:[%s20633_s3 + $0x410] sm:$0xff] }
0x10ee   : > { %v16151_v61 = vpack.c.bf16 %v4523_v60, %v4522_v16  ;;  %v4527_v25 = vld [vmem:[%s20633_s3 + $0x338] sm:$0xff]  ;;  %v4552_v60 = vld [vmem:[%s20633_s3 + $0x400] sm:$0xff] }
0x10ef   : > { %14196 = vmatmul.mubr.msk.f32.vlgmr.msra.gmra.mrb[44].mxu0 %vm5114_vm3, %v5791_v23  ;;  %v4555_v22 = vld [vmem:[%s20633_s3 + $0x418] sm:$0xff] }
0x10f0   : > { %16098 = vmatpush3.bf16.msk.msra.mxu0 %vm18540_vm9, %v17670_v56  ;;  %14202 = vmatprep.mubr.msk.f32.mxu0 %vm17401_vm15, %v17385_v0 }
0x10f1   : > { %16100 = vmatprep.subr.bf16.mxu0 %v16099_v34 }
0x10f3   : > { %14203 = vmatmul.mubr.msk.f32.vlgmr.msra.gmra.mrb[46].mxu0 %vm5114_vm3, %v5791_v23  ;;  %v4526_v23 = vld [vmem:[%s20633_s3 + $0x330] sm:$0xff] }
0x10f4   : > { %16102 = vmatpush3.bf16.msra.mxu0 %v16099_v34  ;;  %14229 = vmatprep.mubr.msk.f32.mxu0 %vm411_vm8, %v18414_v54  ;;  %v16159_v34 = vpack.c.bf16 %v4527_v25, %v4526_v23  ;;  %v4532_v23 = vld [vmem:[%s20633_s3 + $0x360] sm:$0xff]  ;;  %v4533_v25 = vld [vmem:[%s20633_s3 + $0x368] sm:$0xff] }
0x10f5   : > { %16104 = vmatprep.subr.bf16.mxu0 %v16103_v38 }
0x10f8   : > { %16106 = vmatpush3.bf16.msra.mxu0 %v16103_v38  ;;  %v16163_v38 = vpack.c.bf16 %v4529_v37, %v4528_v35  ;;  %v4534_v35 = vld [vmem:[%s20633_s3 + $0x370] sm:$0xff]  ;;  %v4535_v37 = vld [vmem:[%s20633_s3 + $0x378] sm:$0xff] }
0x10f9   : > { %16108 = vmatprep.subr.bf16.mxu0 %v16107_v8 }
0x10fc   : > { %16110 = vmatpush3.bf16.msra.mxu0 %v16107_v8  ;;  %v16167_v8 = vpack.c.bf16 %v4531_v3, %v4530_v63  ;;  %v4536_v63 = vld [vmem:[%s20633_s3 + $0x380] sm:$0xff]  ;;  %v4537_v3 = vld [vmem:[%s20633_s3 + $0x388] sm:$0xff] }
0x10fd   : > { %16112 = vmatprep.subr.bf16.mxu0 %v16111_v19 }
0x1100   : > { %16114 = vmatpush3.bf16.msra.mxu0 %v16111_v19 }
0x1101   : > { %16116 = vmatprep.subr.bf16.mxu0 %v16115_v29 }
0x1104   : > { %16118 = vmatpush3.bf16.msra.mxu0 %v16115_v29 }
0x1105   : > { %16120 = vmatprep.subr.bf16.mxu0 %v16119_v33 }
0x1108   : > { %16122 = vmatpush3.bf16.msra.mxu0 %v16119_v33 }
0x1109   : > { %16124 = vmatprep.subr.bf16.mxu0 %v16123_v39 }
0x110b   : > { %14230 = vmatmul.mubr.msk.f32.vlgmr.msra.gmra.mrb[48].mxu0 %vm411_vm8, %v18416_v41 }
0x110c   : > { %16126 = vmatpush3.bf16.msra.mxu0 %v16123_v39  ;;  %14256 = vmatprep.mubr.msk.f32.mxu0 %vm411_vm8, %v18426_v45 }
0x110d   : > { %16128 = vmatprep.subr.bf16.mxu0 %v16127_v6 }
0x1110   : > { %16130 = vmatpush3.bf16.msra.mxu0 %v16127_v6 }
0x1111   : > { %16132 = vmatprep.subr.bf16.mxu0 %v16131_v43 }
0x1114   : > { %16134 = vmatpush3.bf16.msra.mxu0 %v16131_v43  ;;  %v4545_v43 = vld [vmem:[%s20633_s3 + $0x3c8] sm:$0xff] }
0x1115   : > { %16136 = vmatprep.subr.bf16.mxu0 %v16135_v49  ;;  %v16187_v51 = vpack.c.bf16 %v4545_v43, %v4544_v40  ;;  %v4562_v40 = vld [vmem:[%s20633_s3 + $0x450] sm:$0xff]  ;;  %v4563_v43 = vld [vmem:[%s20633_s3 + $0x458] sm:$0xff] }
0x1118   : > { %16138 = vmatpush3.bf16.msra.mxu0 %v16135_v49 }
0x1119   : > { %16140 = vmatprep.subr.bf16.mxu0 %v16139_v53 }
0x111c   : > { %16142 = vmatpush3.bf16.msra.mxu0 %v16139_v53  ;;  %v4547_v53 = vld [vmem:[%s20633_s3 + $0x3d8] sm:$0xff] }
0x111d   : > { %16144 = vmatprep.subr.bf16.mxu0 %v16143_v58  ;;  %v16191_v55 = vpack.c.bf16 %v4547_v53, %v4546_v15  ;;  %v6687_v53 = vpop.permute.xlu1 %6686 }
0x111e   : > { %17219 = vpush %v6687_v53  ;;  %v4572_v53 = vld [vmem:[%s20633_s3 + $0x4a0] sm:$0xff] }
0x1120   : > { %16146 = vmatpush3.bf16.msra.mxu0 %v16143_v58  ;;  %v4549_v58 = vld [vmem:[%s20633_s3 + $0x3e8] sm:$0xff] }
0x1121   : > { %16148 = vmatprep.subr.bf16.mxu0 %v16147_v59  ;;  %v16195_v10 = vpack.c.bf16 %v4549_v58, %v4548_v57  ;;  %v7733_v58 = vpop.permute.xlu1 %7732 }
0x1123   : > { %14257 = vmatmul.mubr.msk.f32.vlgmr.msra.gmra.mrb[48].mxu0 %vm411_vm8, %v18462_v18 }
0x1124   : > { %16150 = vmatpush3.bf16.msra.mxu0 %v16147_v59  ;;  %14283 = vmatprep.mubr.msk.f32.mxu0 %vm411_vm8, %v18470_v20  ;;  %v4551_v59 = vld [vmem:[%s20633_s3 + $0x3f8] sm:$0xff] }
0x1125   : > { %16152 = vmatprep.subr.bf16.mxu0 %v16151_v61  ;;  %v16199_v16 = vpack.c.bf16 %v4551_v59, %v4550_v12  ;;  %v8779_v12 = vpop.permute.xlu1 %8778 }
0x1128   : > { %16154 = vmatpush3.bf16.msra.mxu0 %v16151_v61 }
0x1129   : > { %16156 = vmatprep.subr.bf16.mxu0 %v16155_v27  ;;  %v9825_v59 = vpop.permute.xlu1 %9824 }
0x112c   : > { %16158 = vmatpush3.bf16.msra.mxu0 %v16155_v27  ;;  %v16207_v27 = vpack.c.bf16 %v4555_v22, %v4554_v50 }
0x112d   : > { %16160 = vmatprep.subr.bf16.mxu0 %v16159_v34 }
0x1130   : > { %16162 = vmatpush3.bf16.msra.mxu0 %v16159_v34  ;;  %v16211_v34 = vpack.c.bf16 %v4533_v25, %v4532_v23 }
0x1131   : > { %16164 = vmatprep.subr.bf16.mxu0 %v16163_v38 }
0x1134   : > { %16166 = vmatpush3.bf16.msra.mxu0 %v16163_v38  ;;  %v16215_v38 = vpack.c.bf16 %v4535_v37, %v4534_v35 }
0x1135   : > { %16168 = vmatprep.subr.bf16.mxu0 %v16167_v8 }
0x1138   : > { %16170 = vmatpush3.bf16.msra.mxu0 %v16167_v8  ;;  %v16219_v8 = vpack.c.bf16 %v4537_v3, %v4536_v63 }
0x1139   : > { %16259 = vmatprep.subr.bf16.mxu0 %v17400_v14 }
0x113b   : > { %14284 = vmatmul.mubr.msk.f32.vlgmr.msra.gmra.mrb[48].mxu0 %vm411_vm8, %v18494_v11 }
0x113c   : > { %14399 = vmatprep.mubr.msk.f32.mxu0 %vm17401_vm15, %v17385_v0 }
0x114f   : > { %s17220_s28 = spop %17219 }
0x1150   : > { %v6689_v22 = vstv %s17220_s28 }
0x11c2   : > { %v5861_v17 = vpop.f32.mrb[44].mxu0 }
0x11c3   : > { %v14197_v19 = vpop.f32.mrb[45].mxu0 }
0x11c6   : > { %v5931_v21 = vpop.f32.mrb[46].mxu0 }
0x11c7   : > { %v5935_v24 = vmax.f32 %v5861_v17, %v5931_v21  ;;  %v14204_v29 = vpop.f32.mrb[47].mxu0  ;;  %v4539_v17 = vld [vmem:[%s20633_s3 + $0x398] sm:$0xff] }
0x11c8   : > { %v16223_v19 = vpack.c.bf16 %v4539_v17, %v4538_v9  ;;  %v4543_v29 = vld [vmem:[%s20633_s3 + $0x3b8] sm:$0xff]  ;;  %v4581_v9 = vld [vmem:[%s20633_s3 + $0x4e8] sm:$0xff] }
0x11c9   : > { %11167 = vrot.lane.b32.xlu0 %v5935_v24, %s17405_s23  ;;  %v4542_v24 = vld [vmem:[%s20633_s3 + $0x3b0] sm:$0xff] }
0x120e   : > { %v14285_v31 = vpop.f32.mrb[48].mxu0 }
0x120f   : > { %v6168_v33 = vadd.f32 %v14285_v31, %v6166_v30  ;;  %v6152_v46 = vpop.f32.mrb[49].mxu0  ;;  %v4556_v31 = vld [vmem:[%s20633_s3 + $0x420] sm:$0xff] }
0x1210   : > { %v6167_v32 = vadd.f32 %v6166_v30, %v6152_v46  ;;  %v16231_v30 = vpack.c.bf16 %v4543_v29, %v4542_v24  ;;  %v4583_v24 = vld [vmem:[%s20633_s3 + $0x4f8] sm:$0xff] }
0x1211   : > { %v6170_v39 = vmax.f32 %v6168_v33, 0.0  ;;  %v4557_v33 = vld [vmem:[%s20633_s3 + $0x428] sm:$0xff] }
0x1212   : > { %v6169_v1 = vmax.f32 %v6167_v32, 0.0  ;;  %v16235_v46 = vpack.c.bf16 %v4557_v33, %v4556_v31  ;;  %v4558_v32 = vld [vmem:[%s20633_s3 + $0x430] sm:$0xff]  ;;  %v4585_v31 = vld [vmem:[%s20633_s3 + $0x508] sm:$0xff] }
0x1213   : > { %v19019_v33 = vld [vmem:[#allocation3 + $0x1] sm:$0xff] }
0x1214   : > { %v16172_v5 = vpack.c.bf16 %v6170_v39, %v6169_v1  ;;  %v4559_v39 = vld [vmem:[%s20633_s3 + $0x438] sm:$0xff] }
0x1215   : > { %v16239_v1 = vpack.c.bf16 %v4559_v39, %v4558_v32  ;;  %v4586_v32 = vld [vmem:[%s20633_s3 + $0x510] sm:$0xff]  ;;  %v4587_v39 = vld [vmem:[%s20633_s3 + $0x518] sm:$0xff] }
0x1216   : > { %16174 = vmatpush3.bf16.msk.msra.mxu1 %vm17540_vm4, %v16172_v5 }
0x1217   : > { %16175 = vmatprep.subr.bf16.mxu1 %v17400_v14 }
0x1219   : > { %14291 = vmatmul.mubr.msk.f32.vlgmr.msra.gmra.mrb[44].mxu1 %vm5114_vm3, %v17639_v47 }
0x121a   : > { %16178 = vmatpush3.bf16.msk.msra.mxu1 %vm17540_vm4, %v16172_v5  ;;  %14297 = vmatprep.mubr.msk.f32.mxu1 %vm17401_vm15, %v17385_v0  ;;  %v4560_v5 = vld [vmem:[%s20633_s3 + $0x440] sm:$0xff] }
0x121b   : > { %16179 = vmatprep.subr.bf16.mxu1 %v17400_v14 }
0x121d   : > { %14298 = vmatmul.mubr.msk.f32.vlgmr.msra.gmra.mrb[46].mxu1 %vm5114_vm3, %v17687_v13 }
0x121e   : > { %16182 = vmatpush3.bf16.msk.msra.mxu1 %vm18512_vm6, %v17657_v52  ;;  %14304 = vmatprep.mubr.msk.f32.mxu1 %vm17401_vm15, %v17385_v0 }
0x121f   : > { %16183 = vmatprep.subr.bf16.mxu1 %v17400_v14 }
0x12ec   : > { %v6240_v6 = vpop.f32.mrb[44].mxu1 }
0x12ed   : > { %v14292_v36 = vpop.f32.mrb[45].mxu1 }
0x12f0   : > { %v6310_v44 = vpop.f32.mrb[46].mxu1 }
0x12f1   : > { %v6314_v42 = vmax.f32 %v6240_v6, %v6310_v44  ;;  %v14299_v49 = vpop.f32.mrb[47].mxu1  ;;  %v4561_v6 = vld [vmem:[%s20633_s3 + $0x448] sm:$0xff]  ;;  %v16247_v44 = vpack.c.bf16 %v4563_v43, %v4562_v40  ;;  %v4590_v40 = vld [vmem:[%s20633_s3 + $0x530] sm:$0xff]  ;;  %v4591_v43 = vld [vmem:[%s20633_s3 + $0x538] sm:$0xff] }
0x12f2   : > { %v16243_v36 = vpack.c.bf16 %v4561_v6, %v4560_v5  ;;  %v4566_v49 = vld [vmem:[%s20633_s3 + $0x470] sm:$0xff]  ;;  %v4588_v5 = vld [vmem:[%s20633_s3 + $0x520] sm:$0xff]  ;;  %v4589_v6 = vld [vmem:[%s20633_s3 + $0x528] sm:$0xff] }
0x12f3   : > { %14305 = vmatmul.mubr.msk.f32.vlgmr.msra.gmra.mrb[48].mxu1 %vm5114_vm3, %v6314_v42 }
0x12f4   : > { %16186 = vmatpush3.bf16.msk.msra.mxu1 %vm18540_vm9, %v17670_v56  ;;  %14311 = vmatprep.mubr.msk.f32.mxu1 %vm17401_vm15, %v17385_v0 }
0x12f5   : > { %16188 = vmatprep.subr.bf16.mxu1 %v16187_v51 }
0x12f7   : > { %14312 = vmatmul.mubr.msk.f32.vlgmr.msra.gmra.mrb[50].mxu1 %vm5114_vm3, %v6314_v42 }
0x12f8   : > { %16190 = vmatpush3.bf16.msra.mxu1 %v16187_v51  ;;  %14338 = vmatprep.mubr.msk.f32.mxu1 %vm411_vm8, %v18414_v54  ;;  %v4553_v54 = vld [vmem:[%s20633_s3 + $0x408] sm:$0xff]  ;;  %v4567_v51 = vld [vmem:[%s20633_s3 + $0x478] sm:$0xff] }
0x12f9   : > { %16192 = vmatprep.subr.bf16.mxu1 %v16191_v55  ;;  %v16203_v61 = vpack.c.bf16 %v4553_v54, %v4552_v60  ;;  %v16255_v15 = vpack.c.bf16 %v4567_v51, %v4566_v49  ;;  %v4570_v49 = vld [vmem:[%s20633_s3 + $0x490] sm:$0xff]  ;;  %v4571_v51 = vld [vmem:[%s20633_s3 + $0x498] sm:$0xff] }
0x12fc   : > { %16194 = vmatpush3.bf16.msra.mxu1 %v16191_v55  ;;  %v7210_v55 = vpop.permute.xlu0 %7209 }
0x12fd   : > { %16196 = vmatprep.subr.bf16.mxu1 %v16195_v10  ;;  %17221 = vpush %v7210_v55  ;;  %v4573_v55 = vld [vmem:[%s20633_s3 + $0x4a8] sm:$0xff] }
0x12fe   : > { %17223 = vpush %v7733_v58  ;;  %v19063_v58 = vld [vmem:[#allocation3] sm:$0xff] }
0x1300   : > { %16198 = vmatpush3.bf16.msra.mxu1 %v16195_v10  ;;  %v8256_v57 = vpop.permute.xlu0 %8255 }
0x1301   : > { %16200 = vmatprep.subr.bf16.mxu1 %v16199_v16  ;;  %17225 = vpush %v8256_v57  ;;  %v19059_v57 = vld [vmem:[#allocation3 + $0x9] sm:$0x3f] }
0x1302   : > { %17227 = vpush %v8779_v12  ;;  %v4574_v12 = vld [vmem:[%s20633_s3 + $0x4b0] sm:$0xff] }
0x1304   : > { %16202 = vmatpush3.bf16.msra.mxu1 %v16199_v16  ;;  %v9302_v10 = vpop.permute.xlu0 %9301  ;;  %v10871_v16 = vpop.permute.xlu1 %10870 }
0x1305   : > { %16204 = vmatprep.subr.bf16.mxu1 %v16203_v61  ;;  %17229 = vpush %v9302_v10  ;;  %v16307_v10 = vpack.c.bf16 %v4573_v55, %v4572_v53  ;;  %v4617_v53 = vld [vmem:[%s20633_s3 + $0x608] sm:$0xff] }
0x1306   : > { %17231 = vpush %v9825_v59  ;;  %v4575_v59 = vld [vmem:[%s20633_s3 + $0x4b8] sm:$0xff] }
0x1308   : > { %16206 = vmatpush3.bf16.msra.mxu1 %v16203_v61 }
0x1309   : > { %16208 = vmatprep.subr.bf16.mxu1 %v16207_v27 }
0x130c   : > { %16210 = vmatpush3.bf16.msra.mxu1 %v16207_v27 }
0x130d   : > { %16212 = vmatprep.subr.bf16.mxu1 %v16211_v34 }
0x130f   : > { %14339 = vmatmul.mubr.msk.f32.vlgmr.msra.gmra.mrb[52].mxu1 %vm411_vm8, %v18416_v41  ;;  %v4540_v41 = vld [vmem:[%s20633_s3 + $0x3a0] sm:$0xff] }
0x1310   : > { %16214 = vmatpush3.bf16.msra.mxu1 %v16211_v34  ;;  %14365 = vmatprep.mubr.msk.f32.mxu1 %vm411_vm8, %v18426_v45  ;;  %v4541_v45 = vld [vmem:[%s20633_s3 + $0x3a8] sm:$0xff] }
0x1311   : > { %16216 = vmatprep.subr.bf16.mxu1 %v16215_v38  ;;  %v16227_v21 = vpack.c.bf16 %v4541_v45, %v4540_v41 }
0x1314   : > { %16218 = vmatpush3.bf16.msra.mxu1 %v16215_v38 }
0x1315   : > { %16220 = vmatprep.subr.bf16.mxu1 %v16219_v8 }
0x1318   : > { %16222 = vmatpush3.bf16.msra.mxu1 %v16219_v8  ;;  %v4580_v8 = vld [vmem:[%s20633_s3 + $0x4e0] sm:$0xff] }
0x1319   : > { %16224 = vmatprep.subr.bf16.mxu1 %v16223_v19  ;;  %v16275_v45 = vpack.c.bf16 %v4581_v9, %v4580_v8  ;;  %v4598_v9 = vld [vmem:[%s20633_s3 + $0x570] sm:$0xff] }
0x131c   : > { %16226 = vmatpush3.bf16.msra.mxu1 %v16223_v19 }
0x131d   : > { %16228 = vmatprep.subr.bf16.mxu1 %v16227_v21 }
0x1320   : > { %16230 = vmatpush3.bf16.msra.mxu1 %v16227_v21  ;;  %v4582_v21 = vld [vmem:[%s20633_s3 + $0x4f0] sm:$0xff] }
0x1321   : > { %16232 = vmatprep.subr.bf16.mxu1 %v16231_v30  ;;  %v16279_v29 = vpack.c.bf16 %v4583_v24, %v4582_v21  ;;  %v4602_v24 = vld [vmem:[%s20633_s3 + $0x590] sm:$0xff] }
0x1324   : > { %16234 = vmatpush3.bf16.msra.mxu1 %v16231_v30  ;;  %v4584_v30 = vld [vmem:[%s20633_s3 + $0x500] sm:$0xff] }
0x1325   : > { %16236 = vmatprep.subr.bf16.mxu1 %v16235_v46 }
0x1327   : > { %14366 = vmatmul.mubr.msk.f32.vlgmr.msra.gmra.mrb[52].mxu1 %vm411_vm8, %v18462_v18  ;;  %v4564_v18 = vld [vmem:[%s20633_s3 + $0x460] sm:$0xff] }
0x1328   : > { %16238 = vmatpush3.bf16.msra.mxu1 %v16235_v46  ;;  %14392 = vmatprep.mubr.msk.f32.mxu1 %vm411_vm8, %v18470_v20  ;;  %v4565_v20 = vld [vmem:[%s20633_s3 + $0x468] sm:$0xff]  ;;  %v16283_v46 = vpack.c.bf16 %v4585_v31, %v4584_v30  ;;  %v19130_v31 = vld [vmem:[#allocation3 + $0xa] sm:$0x3f] }
0x1329   : > { %16240 = vmatprep.subr.bf16.mxu1 %v16239_v1  ;;  %v16251_v42 = vpack.c.bf16 %v4565_v20, %v4564_v18  ;;  %v4568_v18 = vld [vmem:[%s20633_s3 + $0x480] sm:$0xff]  ;;  %v4569_v20 = vld [vmem:[%s20633_s3 + $0x488] sm:$0xff] }
0x132c   : > { %16242 = vmatpush3.bf16.msra.mxu1 %v16239_v1  ;;  %v16287_v1 = vpack.c.bf16 %v4587_v39, %v4586_v32 }
0x132d   : > { %16244 = vmatprep.subr.bf16.mxu1 %v16243_v36 }
0x132e   : > { %s17222_s26 = spop %17221 }
0x132f   : > { %s17224_s21 = spop %17223 }
0x1330   : > { %16246 = vmatpush3.bf16.msra.mxu1 %v16243_v36  ;;  %v16291_v36 = vpack.c.bf16 %v4589_v6, %v4588_v5  ;;  %v7212_v6 = vstv %s17222_s26 }
0x1331   : > { %16248 = vmatprep.subr.bf16.mxu1 %v16247_v44 }
0x1332   : > { %s17226_s23 = spop %17225 }
0x1333   : > { %s17228_s14 = spop %17227 }
0x1334   : > { %16250 = vmatpush3.bf16.msra.mxu1 %v16247_v44  ;;  %v16295_v44 = vpack.c.bf16 %v4591_v43, %v4590_v40 }
0x1335   : > { %16252 = vmatprep.subr.bf16.mxu1 %v16251_v42 }
0x1336   : > { %s17230_s29 = spop %17229 }
0x1337   : > { %s17232_s28 = spop %17231 }
0x1338   : > { %16254 = vmatpush3.bf16.msra.mxu1 %v16251_v42  ;;  %v16299_v42 = vpack.c.bf16 %v4569_v20, %v4568_v18 }
0x1339   : > { %16256 = vmatprep.subr.bf16.mxu1 %v16255_v15 }
0x133c   : > { %16258 = vmatpush3.bf16.msra.mxu1 %v16255_v15  ;;  %v16303_v15 = vpack.c.bf16 %v4571_v51, %v4570_v49 }
0x133d   : > { %16347 = vmatprep.subr.bf16.mxu1 %v17400_v14 }
0x133f   : > { %14393 = vmatmul.mubr.msk.f32.vlgmr.msra.gmra.mrb[52].mxu1 %vm411_vm8, %v18494_v11  ;;  %v10348_v11 = vpop.permute.xlu0 %10347 }
0x1340   : > { %14508 = vmatprep.mubr.msk.f32.mxu1 %vm17401_vm15, %v17385_v0  ;;  %17233 = vpush %v10348_v11  ;;  %v16311_v11 = vpack.c.bf16 %v4575_v59, %v4574_v12 }
0x1341   : > { %17235 = vpush %v10871_v16  ;;  %v4576_v16 = vld [vmem:[%s20633_s3 + $0x4c0] sm:$0xff] }
0x1371   : > { %s17234_s26 = spop %17233 }
0x13c6   : > { %v6384_v60 = vpop.f32.mrb[48].mxu1 }
0x13c7   : > { %v14306_v2 = vpop.f32.mrb[49].mxu1 }
0x13ca   : > { %v6454_v54 = vpop.f32.mrb[50].mxu1 }
0x13cb   : > { %v6458_v61 = vmax.f32 %v6384_v60, %v6454_v54  ;;  %v14313_v50 = vpop.f32.mrb[51].mxu1  ;;  %v4577_v60 = vld [vmem:[%s20633_s3 + $0x4c8] sm:$0xff]  ;;  %v4578_v54 = vld [vmem:[%s20633_s3 + $0x4d0] sm:$0xff] }
0x13cc   : > { %v16315_v2 = vpack.c.bf16 %v4577_v60, %v4576_v16  ;;  %v4619_v16 = vld [vmem:[%s20633_s3 + $0x618] sm:$0xff] }
0x13cd   : > { %11171 = vrot.lane.b32.xlu1 %v6458_v61, %s17409_s25  ;;  %v4579_v61 = vld [vmem:[%s20633_s3 + $0x4d8] sm:$0xff]  ;;  %s17414_s25 = smov 56  }
0x13ce   : > { %v16319_v50 = vpack.c.bf16 %v4579_v61, %v4578_v54  ;;  %v4621_v54 = vld [vmem:[%s20633_s3 + $0x628] sm:$0xff] }
0x1412   : > { %v14394_v27 = vpop.f32.mrb[52].mxu1 }
0x1413   : > { %v6691_v23 = vadd.f32 %v14394_v27, %v6689_v22  ;;  %v6675_v25 = vpop.f32.mrb[53].mxu1  ;;  %v4593_v27 = vld [vmem:[%s20633_s3 + $0x548] sm:$0xff] }
0x1414   : > { %v6690_v34 = vadd.f32 %v6689_v22, %v6675_v25  ;;  %v4592_v22 = vld [vmem:[%s20633_s3 + $0x540] sm:$0xff]  ;;  %v4594_v25 = vld [vmem:[%s20633_s3 + $0x550] sm:$0xff] }
0x1415   : > { %v6693_v35 = vmax.f32 %v6691_v23, 0.0  ;;  %v16323_v23 = vpack.c.bf16 %v4593_v27, %v4592_v22  ;;  %v4623_v22 = vld [vmem:[%s20633_s3 + $0x638] sm:$0xff] }
0x1416   : > { %v6692_v37 = vmax.f32 %v6690_v34, 0.0  ;;  %v4595_v34 = vld [vmem:[%s20633_s3 + $0x558] sm:$0xff] }
0x1418   : > { %v16260_v38 = vpack.c.bf16 %v6693_v35, %v6692_v37  ;;  %v16327_v35 = vpack.c.bf16 %v4595_v34, %v4594_v25  ;;  %v4596_v37 = vld [vmem:[%s20633_s3 + $0x560] sm:$0xff]  ;;  %v4625_v25 = vld [vmem:[%s20633_s3 + $0x648] sm:$0xff] }
0x141a   : > { %16262 = vmatpush3.bf16.msk.msra.mxu0 %vm17540_vm4, %v16260_v38 }
0x141b   : > { %16263 = vmatprep.subr.bf16.mxu0 %v17400_v14 }
0x141d   : > { %14400 = vmatmul.mubr.msk.f32.vlgmr.msra.gmra.mrb[50].mxu0 %vm5114_vm3, %v17639_v47 }
0x141e   : > { %16266 = vmatpush3.bf16.msk.msra.mxu0 %vm17540_vm4, %v16260_v38  ;;  %14406 = vmatprep.mubr.msk.f32.mxu0 %vm17401_vm15, %v17385_v0  ;;  %v4597_v38 = vld [vmem:[%s20633_s3 + $0x568] sm:$0xff] }
0x141f   : > { %16267 = vmatprep.subr.bf16.mxu0 %v17400_v14  ;;  %v16331_v8 = vpack.c.bf16 %v4597_v38, %v4596_v37  ;;  %v4627_v37 = vld [vmem:[%s20633_s3 + $0x658] sm:$0xff] }
0x1421   : > { %14407 = vmatmul.mubr.msk.f32.vlgmr.msra.gmra.mrb[52].mxu0 %vm5114_vm3, %v17687_v13 }
0x1422   : > { %16270 = vmatpush3.bf16.msk.msra.mxu0 %vm18512_vm6, %v17657_v52  ;;  %14413 = vmatprep.mubr.msk.f32.mxu0 %vm17401_vm15, %v17385_v0 }
0x1423   : > { %16271 = vmatprep.subr.bf16.mxu0 %v17400_v14 }
0x14f0   : > { %v6763_v63 = vpop.f32.mrb[50].mxu0 }
0x14f1   : > { %v14401_v3 = vpop.f32.mrb[51].mxu0 }
0x14f2   : > { %v19107_v3 = vld [vmem:[#allocation3 + $0x2] sm:$0xff] }
0x14f4   : > { %v6833_v17 = vpop.f32.mrb[52].mxu0 }
0x14f5   : > { %v6837_v19 = vmax.f32 %v6763_v63, %v6833_v17  ;;  %v14408_v41 = vpop.f32.mrb[53].mxu0  ;;  %v19103_v63 = vld [vmem:[#allocation3 + $0x8] sm:$0x3f]  ;;  %v4599_v17 = vld [vmem:[%s20633_s3 + $0x578] sm:$0xff] }
0x14f6   : > { %v4600_v41 = vld [vmem:[%s20633_s3 + $0x580] sm:$0xff] }
0x14f7   : > { %14414 = vmatmul.mubr.msk.f32.vlgmr.msra.gmra.mrb[54].mxu0 %vm5114_vm3, %v6837_v19 }
0x14f8   : > { %16274 = vmatpush3.bf16.msk.msra.mxu0 %vm18540_vm9, %v17670_v56  ;;  %14420 = vmatprep.mubr.msk.f32.mxu0 %vm17401_vm15, %v17385_v0 }
0x14f9   : > { %16276 = vmatprep.subr.bf16.mxu0 %v16275_v45 }
0x14fb   : > { %14421 = vmatmul.mubr.msk.f32.vlgmr.msra.gmra.mrb[56].mxu0 %vm5114_vm3, %v6837_v19  ;;  %v16335_v19 = vpack.c.bf16 %v4599_v17, %v4598_v9  ;;  %v4605_v9 = vld [vmem:[%s20633_s3 + $0x5a8] sm:$0xff] }
0x14fc   : > { %16278 = vmatpush3.bf16.msra.mxu0 %v16275_v45  ;;  %14447 = vmatprep.mubr.msk.f32.mxu0 %vm411_vm8, %v19019_v33  ;;  %v4601_v45 = vld [vmem:[%s20633_s3 + $0x588] sm:$0xff] }
0x14fd   : > { %16280 = vmatprep.subr.bf16.mxu0 %v16279_v29  ;;  %v16339_v21 = vpack.c.bf16 %v4601_v45, %v4600_v41  ;;  %v4607_v41 = vld [vmem:[%s20633_s3 + $0x5b8] sm:$0xff] }
0x1500   : > { %16282 = vmatpush3.bf16.msra.mxu0 %v16279_v29  ;;  %v4603_v29 = vld [vmem:[%s20633_s3 + $0x598] sm:$0xff] }
0x1501   : > { %16284 = vmatprep.subr.bf16.mxu0 %v16283_v46  ;;  %v16343_v30 = vpack.c.bf16 %v4603_v29, %v4602_v24  ;;  %v4609_v24 = vld [vmem:[%s20633_s3 + $0x5c8] sm:$0xff] }
0x1504   : > { %16286 = vmatpush3.bf16.msra.mxu0 %v16283_v46 }
0x1505   : > { %16288 = vmatprep.subr.bf16.mxu0 %v16287_v1 }
0x1508   : > { %16290 = vmatpush3.bf16.msra.mxu0 %v16287_v1 }
0x1509   : > { %16292 = vmatprep.subr.bf16.mxu0 %v16291_v36 }
0x150c   : > { %16294 = vmatpush3.bf16.msra.mxu0 %v16291_v36 }
0x150d   : > { %16296 = vmatprep.subr.bf16.mxu0 %v16295_v44 }
0x1510   : > { %16298 = vmatpush3.bf16.msra.mxu0 %v16295_v44 }
0x1511   : > { %16300 = vmatprep.subr.bf16.mxu0 %v16299_v42 }
0x1513   : > { %14448 = vmatmul.mubr.msk.f32.vlgmr.msra.gmra.mrb[58].mxu0 %vm411_vm8, %v19059_v57 }
0x1514   : > { %16302 = vmatpush3.bf16.msra.mxu0 %v16299_v42  ;;  %14474 = vmatprep.mubr.msk.f32.mxu0 %vm411_vm8, %v19063_v58 }
0x1515   : > { %16304 = vmatprep.subr.bf16.mxu0 %v16303_v15 }
0x1518   : > { %16306 = vmatpush3.bf16.msra.mxu0 %v16303_v15  ;;  %v4616_v15 = vld [vmem:[%s20633_s3 + $0x600] sm:$0xff] }
0x1519   : > { %16308 = vmatprep.subr.bf16.mxu0 %v16307_v10  ;;  %v16363_v59 = vpack.c.bf16 %v4617_v53, %v4616_v15  ;;  %v4633_v15 = vld [vmem:[%s20633_s3 + $0x688] sm:$0xff] }
0x151c   : > { %16310 = vmatpush3.bf16.msra.mxu0 %v16307_v10 }
0x151d   : > { %16312 = vmatprep.subr.bf16.mxu0 %v16311_v11 }
0x1520   : > { %16314 = vmatpush3.bf16.msra.mxu0 %v16311_v11  ;;  %v4618_v11 = vld [vmem:[%s20633_s3 + $0x610] sm:$0xff] }
0x1521   : > { %16316 = vmatprep.subr.bf16.mxu0 %v16315_v2  ;;  %v16367_v60 = vpack.c.bf16 %v4619_v16, %v4618_v11  ;;  %v4637_v11 = vld [vmem:[%s20633_s3 + $0x6a8] sm:$0xff] }
0x1524   : > { %16318 = vmatpush3.bf16.msra.mxu0 %v16315_v2  ;;  %v4620_v2 = vld [vmem:[%s20633_s3 + $0x620] sm:$0xff] }
0x1525   : > { %16320 = vmatprep.subr.bf16.mxu0 %v16319_v50  ;;  %v16371_v61 = vpack.c.bf16 %v4621_v54, %v4620_v2  ;;  %v4639_v2 = vld [vmem:[%s20633_s3 + $0x6b8] sm:$0xff] }
0x1528   : > { %16322 = vmatpush3.bf16.msra.mxu0 %v16319_v50  ;;  %v4622_v50 = vld [vmem:[%s20633_s3 + $0x630] sm:$0xff] }
0x1529   : > { %16324 = vmatprep.subr.bf16.mxu0 %v16323_v23  ;;  %v16375_v27 = vpack.c.bf16 %v4623_v22, %v4622_v50 }
0x152b   : > { %14475 = vmatmul.mubr.msk.f32.vlgmr.msra.gmra.mrb[58].mxu0 %vm411_vm8, %v19103_v63 }
0x152c   : > { %16326 = vmatpush3.bf16.msra.mxu0 %v16323_v23  ;;  %14501 = vmatprep.mubr.msk.f32.mxu0 %vm411_vm8, %v19107_v3  ;;  %v4624_v23 = vld [vmem:[%s20633_s3 + $0x640] sm:$0xff] }
0x152d   : > { %16328 = vmatprep.subr.bf16.mxu0 %v16327_v35  ;;  %v16379_v34 = vpack.c.bf16 %v4625_v25, %v4624_v23  ;;  %v7735_v25 = vstv %s17224_s21  ;;  %s17236_s21 = spop %17235 }
0x1530   : > { %16330 = vmatpush3.bf16.msra.mxu0 %v16327_v35  ;;  %v4626_v35 = vld [vmem:[%s20633_s3 + $0x650] sm:$0xff] }
0x1531   : > { %16332 = vmatprep.subr.bf16.mxu0 %v16331_v8  ;;  %v16383_v38 = vpack.c.bf16 %v4627_v37, %v4626_v35 }
0x1534   : > { %16334 = vmatpush3.bf16.msra.mxu0 %v16331_v8  ;;  %v4604_v8 = vld [vmem:[%s20633_s3 + $0x5a0] sm:$0xff] }
0x1535   : > { %16336 = vmatprep.subr.bf16.mxu0 %v16335_v19  ;;  %v16387_v17 = vpack.c.bf16 %v4605_v9, %v4604_v8 }
0x1538   : > { %16338 = vmatpush3.bf16.msra.mxu0 %v16335_v19  ;;  %v4606_v19 = vld [vmem:[%s20633_s3 + $0x5b0] sm:$0xff] }
0x1539   : > { %16340 = vmatprep.subr.bf16.mxu0 %v16339_v21  ;;  %v16391_v45 = vpack.c.bf16 %v4607_v41, %v4606_v19 }
0x153c   : > { %16342 = vmatpush3.bf16.msra.mxu0 %v16339_v21  ;;  %v4608_v21 = vld [vmem:[%s20633_s3 + $0x5c0] sm:$0xff] }
0x153d   : > { %16344 = vmatprep.subr.bf16.mxu0 %v16343_v30  ;;  %v16395_v29 = vpack.c.bf16 %v4609_v24, %v4608_v21  ;;  %v4653_v21 = vld [vmem:[%s20633_s3 + $0x728] sm:$0xff] }
0x1540   : > { %16346 = vmatpush3.bf16.msra.mxu0 %v16343_v30  ;;  %v4610_v30 = vld [vmem:[%s20633_s3 + $0x5d0] sm:$0xff] }
0x1541   : > { %16435 = vmatprep.subr.bf16.mxu0 %v17400_v14 }
0x1543   : > { %14502 = vmatmul.mubr.msk.f32.vlgmr.msra.gmra.mrb[58].mxu0 %vm411_vm8, %v19130_v31 }
0x1544   : > { %14617 = vmatprep.mubr.msk.f32.mxu0 %vm17401_vm15, %v17385_v0 }
0x15ca   : > { %v6907_v46 = vpop.f32.mrb[54].mxu0 }
0x15cb   : > { %v14415_v32 = vpop.f32.mrb[55].mxu0 }
0x15ce   : > { %v6977_v39 = vpop.f32.mrb[56].mxu0 }
0x15cf   : > { %v6981_v1 = vmax.f32 %v6907_v46, %v6977_v39  ;;  %v14422_v5 = vpop.f32.mrb[57].mxu0  ;;  %v4611_v46 = vld [vmem:[%s20633_s3 + $0x5d8] sm:$0xff]  ;;  %v4612_v39 = vld [vmem:[%s20633_s3 + $0x5e0] sm:$0xff] }
0x15d0   : > { %v16399_v32 = vpack.c.bf16 %v4611_v46, %v4610_v30 }
0x15d1   : > { %11175 = vrot.lane.b32.xlu0 %v6981_v1, %s17410_s16  ;;  %v4613_v1 = vld [vmem:[%s20633_s3 + $0x5e8] sm:$0xff]  ;;  %s17415_s16 = smov 63  }
0x15d2   : > { %v16403_v5 = vpack.c.bf16 %v4613_v1, %v4612_v39  ;;  %v4655_v39 = vld [vmem:[%s20633_s3 + $0x738] sm:$0xff] }
0x1616   : > { %v14503_v36 = vpop.f32.mrb[58].mxu0 }
0x1617   : > { %v7214_v40 = vadd.f32 %v14503_v36, %v7212_v6  ;;  %v7198_v43 = vpop.f32.mrb[59].mxu0  ;;  %v4615_v36 = vld [vmem:[%s20633_s3 + $0x5f8] sm:$0xff] }
0x1618   : > { %v7213_v44 = vadd.f32 %v7212_v6, %v7198_v43  ;;  %v4614_v6 = vld [vmem:[%s20633_s3 + $0x5f0] sm:$0xff]  ;;  %v4628_v43 = vld [vmem:[%s20633_s3 + $0x660] sm:$0xff] }
0x1619   : > { %v7216_v18 = vmax.f32 %v7214_v40, 0.0  ;;  %v16407_v40 = vpack.c.bf16 %v4615_v36, %v4614_v6  ;;  %v4657_v6 = vld [vmem:[%s20633_s3 + $0x748] sm:$0xff] }
0x161a   : > { %v7215_v20 = vmax.f32 %v7213_v44, 0.0  ;;  %v4629_v44 = vld [vmem:[%s20633_s3 + $0x668] sm:$0xff] }
0x161c   : > { %v16348_v42 = vpack.c.bf16 %v7216_v18, %v7215_v20  ;;  %v16411_v18 = vpack.c.bf16 %v4629_v44, %v4628_v43  ;;  %v4630_v20 = vld [vmem:[%s20633_s3 + $0x670] sm:$0xff]  ;;  %v4659_v43 = vld [vmem:[%s20633_s3 + $0x758] sm:$0xff] }
0x161e   : > { %16350 = vmatpush3.bf16.msk.msra.mxu1 %vm17540_vm4, %v16348_v42 }
0x161f   : > { %16351 = vmatprep.subr.bf16.mxu1 %v17400_v14 }
0x1621   : > { %14509 = vmatmul.mubr.msk.f32.vlgmr.msra.gmra.mrb[54].mxu1 %vm5114_vm3, %v17639_v47 }
0x1622   : > { %16354 = vmatpush3.bf16.msk.msra.mxu1 %vm17540_vm4, %v16348_v42  ;;  %14515 = vmatprep.mubr.msk.f32.mxu1 %vm17401_vm15, %v17385_v0  ;;  %v4631_v42 = vld [vmem:[%s20633_s3 + $0x678] sm:$0xff] }
0x1623   : > { %16355 = vmatprep.subr.bf16.mxu1 %v17400_v14 }
0x1625   : > { %14516 = vmatmul.mubr.msk.f32.vlgmr.msra.gmra.mrb[56].mxu1 %vm5114_vm3, %v17687_v13 }
0x1626   : > { %16358 = vmatpush3.bf16.msk.msra.mxu1 %vm18512_vm6, %v17657_v52  ;;  %14522 = vmatprep.mubr.msk.f32.mxu1 %vm17401_vm15, %v17385_v0 }
0x1627   : > { %16359 = vmatprep.subr.bf16.mxu1 %v17400_v14 }
0x16f4   : > { %v7286_v49 = vpop.f32.mrb[54].mxu1 }
0x16f5   : > { %v14510_v51 = vpop.f32.mrb[55].mxu1 }
0x16f6   : > { %v4632_v51 = vld [vmem:[%s20633_s3 + $0x680] sm:$0xff] }
0x16f7   : > { %v16419_v53 = vpack.c.bf16 %v4633_v15, %v4632_v51  ;;  %v4663_v51 = vld [vmem:[%s20633_s3 + $0x778] sm:$0xff] }
0x16f8   : > { %v7356_v55 = vpop.f32.mrb[56].mxu1 }
0x16f9   : > { %v7360_v10 = vmax.f32 %v7286_v49, %v7356_v55  ;;  %v14517_v12 = vpop.f32.mrb[57].mxu1  ;;  %v16415_v49 = vpack.c.bf16 %v4631_v42, %v4630_v20  ;;  %v4634_v55 = vld [vmem:[%s20633_s3 + $0x690] sm:$0xff]  ;;  %v4661_v20 = vld [vmem:[%s20633_s3 + $0x768] sm:$0xff] }
0x16fb   : > { %14523 = vmatmul.mubr.msk.f32.vlgmr.msra.gmra.mrb[58].mxu1 %vm5114_vm3, %v7360_v10 }
0x16fc   : > { %16362 = vmatpush3.bf16.msk.msra.mxu1 %vm18540_vm9, %v17670_v56  ;;  %14529 = vmatprep.mubr.msk.f32.mxu1 %vm17401_vm15, %v17385_v0 }
0x16fd   : > { %16364 = vmatprep.subr.bf16.mxu1 %v16363_v59 }
0x16ff   : > { %14530 = vmatmul.mubr.msk.f32.vlgmr.msra.gmra.mrb[60].mxu1 %vm5114_vm3, %v7360_v10  ;;  %v4635_v10 = vld [vmem:[%s20633_s3 + $0x698] sm:$0xff] }
0x1700   : > { %16366 = vmatpush3.bf16.msra.mxu1 %v16363_v59  ;;  %14556 = vmatprep.mubr.msk.f32.mxu1 %vm411_vm8, %v19019_v33  ;;  %v16423_v12 = vpack.c.bf16 %v4635_v10, %v4634_v55  ;;  %v4636_v59 = vld [vmem:[%s20633_s3 + $0x6a0] sm:$0xff]  ;;  %v4641_v55 = vld [vmem:[%s20633_s3 + $0x6c8] sm:$0xff] }
0x1701   : > { %16368 = vmatprep.subr.bf16.mxu1 %v16367_v60  ;;  %v16427_v16 = vpack.c.bf16 %v4637_v11, %v4636_v59  ;;  %v4643_v59 = vld [vmem:[%s20633_s3 + $0x6d8] sm:$0xff] }
0x1704   : > { %16370 = vmatpush3.bf16.msra.mxu1 %v16367_v60  ;;  %v4638_v60 = vld [vmem:[%s20633_s3 + $0x6b0] sm:$0xff] }
0x1705   : > { %16372 = vmatprep.subr.bf16.mxu1 %v16371_v61  ;;  %v16431_v54 = vpack.c.bf16 %v4639_v2, %v4638_v60  ;;  %v4645_v60 = vld [vmem:[%s20633_s3 + $0x6e8] sm:$0xff] }
0x1708   : > { %16374 = vmatpush3.bf16.msra.mxu1 %v16371_v61 }
0x1709   : > { %16376 = vmatprep.subr.bf16.mxu1 %v16375_v27 }
0x170c   : > { %16378 = vmatpush3.bf16.msra.mxu1 %v16375_v27 }
0x170d   : > { %16380 = vmatprep.subr.bf16.mxu1 %v16379_v34 }
0x1710   : > { %16382 = vmatpush3.bf16.msra.mxu1 %v16379_v34 }
0x1711   : > { %16384 = vmatprep.subr.bf16.mxu1 %v16383_v38 }
0x1714   : > { %16386 = vmatpush3.bf16.msra.mxu1 %v16383_v38 }
0x1715   : > { %16388 = vmatprep.subr.bf16.mxu1 %v16387_v17 }
0x1717   : > { %14557 = vmatmul.mubr.msk.f32.vlgmr.msra.gmra.mrb[62].mxu1 %vm411_vm8, %v19059_v57 }
0x1718   : > { %16390 = vmatpush3.bf16.msra.mxu1 %v16387_v17  ;;  %14583 = vmatprep.mubr.msk.f32.mxu1 %vm411_vm8, %v19063_v58 }
0x1719   : > { %16392 = vmatprep.subr.bf16.mxu1 %v16391_v45 }
0x171c   : > { %16394 = vmatpush3.bf16.msra.mxu1 %v16391_v45  ;;  %v4652_v45 = vld [vmem:[%s20633_s3 + $0x720] sm:$0xff] }
0x171d   : > { %16396 = vmatprep.subr.bf16.mxu1 %v16395_v29  ;;  %v16451_v46 = vpack.c.bf16 %v4653_v21, %v4652_v45  ;;  %v4669_v45 = vld [vmem:[%s20633_s3 + $0x7a8] sm:$0xff] }
0x1720   : > { %16398 = vmatpush3.bf16.msra.mxu1 %v16395_v29 }
0x1721   : > { %16400 = vmatprep.subr.bf16.mxu1 %v16399_v32 }
0x1724   : > { %16402 = vmatpush3.bf16.msra.mxu1 %v16399_v32  ;;  %v4654_v32 = vld [vmem:[%s20633_s3 + $0x730] sm:$0xff] }
0x1725   : > { %16404 = vmatprep.subr.bf16.mxu1 %v16403_v5  ;;  %v16455_v1 = vpack.c.bf16 %v4655_v39, %v4654_v32  ;;  %v4673_v32 = vld [vmem:[%s20633_s3 + $0x7c8] sm:$0xff] }
0x1728   : > { %16406 = vmatpush3.bf16.msra.mxu1 %v16403_v5  ;;  %v4656_v5 = vld [vmem:[%s20633_s3 + $0x740] sm:$0xff] }
0x1729   : > { %16408 = vmatprep.subr.bf16.mxu1 %v16407_v40  ;;  %v16459_v36 = vpack.c.bf16 %v4657_v6, %v4656_v5  ;;  %v4675_v5 = vld [vmem:[%s20633_s3 + $0x7d8] sm:$0xff] }
0x172c   : > { %16410 = vmatpush3.bf16.msra.mxu1 %v16407_v40  ;;  %v4658_v40 = vld [vmem:[%s20633_s3 + $0x750] sm:$0xff] }
0x172d   : > { %16412 = vmatprep.subr.bf16.mxu1 %v16411_v18  ;;  %v16463_v44 = vpack.c.bf16 %v4659_v43, %v4658_v40 }
0x172f   : > { %14584 = vmatmul.mubr.msk.f32.vlgmr.msra.gmra.mrb[62].mxu1 %vm411_vm8, %v19103_v63 }
0x1730   : > { %16414 = vmatpush3.bf16.msra.mxu1 %v16411_v18  ;;  %14610 = vmatprep.mubr.msk.f32.mxu1 %vm411_vm8, %v19107_v3  ;;  %v4660_v18 = vld [vmem:[%s20633_s3 + $0x760] sm:$0xff] }
0x1731   : > { %16416 = vmatprep.subr.bf16.mxu1 %v16415_v49  ;;  %v16467_v42 = vpack.c.bf16 %v4661_v20, %v4660_v18  ;;  %v8258_v20 = vstv %s17226_s23 }
0x1734   : > { %16418 = vmatpush3.bf16.msra.mxu1 %v16415_v49  ;;  %v4662_v49 = vld [vmem:[%s20633_s3 + $0x770] sm:$0xff] }
0x1735   : > { %16420 = vmatprep.subr.bf16.mxu1 %v16419_v53  ;;  %v16471_v15 = vpack.c.bf16 %v4663_v51, %v4662_v49 }
0x1738   : > { %16422 = vmatpush3.bf16.msra.mxu1 %v16419_v53  ;;  %v4640_v53 = vld [vmem:[%s20633_s3 + $0x6c0] sm:$0xff] }
0x1739   : > { %16424 = vmatprep.subr.bf16.mxu1 %v16423_v12  ;;  %v16475_v10 = vpack.c.bf16 %v4641_v55, %v4640_v53 }
0x173c   : > { %16426 = vmatpush3.bf16.msra.mxu1 %v16423_v12  ;;  %v4642_v12 = vld [vmem:[%s20633_s3 + $0x6d0] sm:$0xff] }
0x173d   : > { %16428 = vmatprep.subr.bf16.mxu1 %v16427_v16  ;;  %v16479_v11 = vpack.c.bf16 %v4643_v59, %v4642_v12 }
0x1740   : > { %16430 = vmatpush3.bf16.msra.mxu1 %v16427_v16  ;;  %v4644_v16 = vld [vmem:[%s20633_s3 + $0x6e0] sm:$0xff] }
0x1741   : > { %16432 = vmatprep.subr.bf16.mxu1 %v16431_v54  ;;  %v16483_v2 = vpack.c.bf16 %v4645_v60, %v4644_v16  ;;  %v4689_v16 = vld [vmem:[%s20633_s3 + $0x848] sm:$0xff] }
0x1744   : > { %16434 = vmatpush3.bf16.msra.mxu1 %v16431_v54  ;;  %v4646_v54 = vld [vmem:[%s20633_s3 + $0x6f0] sm:$0xff] }
0x1745   : > { %16523 = vmatprep.subr.bf16.mxu1 %v17400_v14 }
0x1747   : > { %14611 = vmatmul.mubr.msk.f32.vlgmr.msra.gmra.mrb[62].mxu1 %vm411_vm8, %v19130_v31 }
0x1748   : > { %14726 = vmatprep.mubr.msk.f32.mxu1 %vm17401_vm15, %v17385_v0 }
0x17ce   : > { %v7430_v61 = vpop.f32.mrb[58].mxu1 }
0x17cf   : > { %v14524_v50 = vpop.f32.mrb[59].mxu1 }
0x17d2   : > { %v7500_v22 = vpop.f32.mrb[60].mxu1 }
0x17d3   : > { %v7504_v27 = vmax.f32 %v7430_v61, %v7500_v22  ;;  %v14531_v23 = vpop.f32.mrb[61].mxu1  ;;  %v4647_v61 = vld [vmem:[%s20633_s3 + $0x6f8] sm:$0xff]  ;;  %v4648_v22 = vld [vmem:[%s20633_s3 + $0x700] sm:$0xff] }
0x17d4   : > { %v16487_v50 = vpack.c.bf16 %v4647_v61, %v4646_v54 }
0x17d5   : > { %11179 = vrot.lane.b32.xlu1 %v7504_v27, %s17411_s17  ;;  %v4649_v27 = vld [vmem:[%s20633_s3 + $0x708] sm:$0xff]  ;;  %s17416_s17 = smov 70  }
0x17d6   : > { %v16491_v23 = vpack.c.bf16 %v4649_v27, %v4648_v22  ;;  %v4691_v22 = vld [vmem:[%s20633_s3 + $0x858] sm:$0xff] }
0x181a   : > { %v14612_v34 = vpop.f32.mrb[62].mxu1 }
0x181b   : > { %v7737_v35 = vadd.f32 %v14612_v34, %v7735_v25  ;;  %v7721_v37 = vpop.f32.mrb[63].mxu1  ;;  %v4651_v34 = vld [vmem:[%s20633_s3 + $0x718] sm:$0xff] }
0x181c   : > { %v7736_v38 = vadd.f32 %v7735_v25, %v7721_v37  ;;  %v4650_v25 = vld [vmem:[%s20633_s3 + $0x710] sm:$0xff]  ;;  %v4664_v37 = vld [vmem:[%s20633_s3 + $0x780] sm:$0xff] }
0x181d   : > { %v7739_v8 = vmax.f32 %v7737_v35, 0.0  ;;  %v16495_v35 = vpack.c.bf16 %v4651_v34, %v4650_v25  ;;  %v4693_v25 = vld [vmem:[%s20633_s3 + $0x868] sm:$0xff] }
0x181e   : > { %v7738_v9 = vmax.f32 %v7736_v38, 0.0  ;;  %v4665_v38 = vld [vmem:[%s20633_s3 + $0x788] sm:$0xff] }
0x1820   : > { %v16436_v17 = vpack.c.bf16 %v7739_v8, %v7738_v9  ;;  %v16499_v8 = vpack.c.bf16 %v4665_v38, %v4664_v37  ;;  %v4666_v9 = vld [vmem:[%s20633_s3 + $0x790] sm:$0xff]  ;;  %v4695_v37 = vld [vmem:[%s20633_s3 + $0x878] sm:$0xff] }
0x1822   : > { %16438 = vmatpush3.bf16.msk.msra.mxu0 %vm17540_vm4, %v16436_v17 }
0x1823   : > { %16439 = vmatprep.subr.bf16.mxu0 %v17400_v14 }
0x1825   : > { %14618 = vmatmul.mubr.msk.f32.vlgmr.msra.gmra.mrb[60].mxu0 %vm5114_vm3, %v17639_v47 }
0x1826   : > { %16442 = vmatpush3.bf16.msk.msra.mxu0 %vm17540_vm4, %v16436_v17  ;;  %14624 = vmatprep.mubr.msk.f32.mxu0 %vm17401_vm15, %v17385_v0  ;;  %v4667_v17 = vld [vmem:[%s20633_s3 + $0x798] sm:$0xff] }
0x1827   : > { %16443 = vmatprep.subr.bf16.mxu0 %v17400_v14 }
0x1829   : > { %14625 = vmatmul.mubr.msk.f32.vlgmr.msra.gmra.mrb[62].mxu0 %vm5114_vm3, %v17687_v13 }
0x182a   : > { %16446 = vmatpush3.bf16.msk.msra.mxu0 %vm18512_vm6, %v17657_v52  ;;  %14631 = vmatprep.mubr.msk.f32.mxu0 %vm17401_vm15, %v17385_v0 }
0x182b   : > { %16447 = vmatprep.subr.bf16.mxu0 %v17400_v14 }
0x18f8   : > { %v7809_v19 = vpop.f32.mrb[60].mxu0 }
0x18f9   : > { %v14619_v41 = vpop.f32.mrb[61].mxu0 }
0x18fa   : > { %v4668_v41 = vld [vmem:[%s20633_s3 + $0x7a0] sm:$0xff] }
0x18fb   : > { %v16507_v21 = vpack.c.bf16 %v4669_v45, %v4668_v41  ;;  %v4676_v45 = vld [vmem:[%s20633_s3 + $0x7e0] sm:$0xff] }
0x18fc   : > { %v7879_v24 = vpop.f32.mrb[62].mxu0 }
0x18fd   : > { %v7883_v29 = vmax.f32 %v7809_v19, %v7879_v24  ;;  %v14626_v30 = vpop.f32.mrb[63].mxu0  ;;  %v16503_v19 = vpack.c.bf16 %v4667_v17, %v4666_v9  ;;  %v4670_v24 = vld [vmem:[%s20633_s3 + $0x7b0] sm:$0xff] }
0x18fe   : > { %v4698_v17 = vld [vmem:[%s20633_s3 + $0x890] sm:$0xff] }
0x18ff   : > { %14632 = vmatmul.mubr.msk.f32.vlgmr.msra.gmra.mrb[64].mxu0 %vm5114_vm3, %v7883_v29 }
0x1900   : > { %16450 = vmatpush3.bf16.msk.msra.mxu0 %vm18540_vm9, %v17670_v56  ;;  %14638 = vmatprep.mubr.msk.f32.mxu0 %vm17401_vm15, %v17385_v0 }
0x1901   : > { %16452 = vmatprep.subr.bf16.mxu0 %v16451_v46 }
0x1903   : > { %14639 = vmatmul.mubr.msk.f32.vlgmr.msra.gmra.mrb[66].mxu0 %vm5114_vm3, %v7883_v29  ;;  %v4671_v29 = vld [vmem:[%s20633_s3 + $0x7b8] sm:$0xff] }
0x1904   : > { %16454 = vmatpush3.bf16.msra.mxu0 %v16451_v46  ;;  %14665 = vmatprep.mubr.msk.f32.mxu0 %vm411_vm8, %v19019_v33  ;;  %v16511_v30 = vpack.c.bf16 %v4671_v29, %v4670_v24  ;;  %v4672_v46 = vld [vmem:[%s20633_s3 + $0x7c0] sm:$0xff]  ;;  %v4678_v29 = vld [vmem:[%s20633_s3 + $0x7f0] sm:$0xff] }
0x1905   : > { %16456 = vmatprep.subr.bf16.mxu0 %v16455_v1  ;;  %v16515_v39 = vpack.c.bf16 %v4673_v32, %v4672_v46  ;;  %v4680_v32 = vld [vmem:[%s20633_s3 + $0x800] sm:$0xff] }
0x1908   : > { %16458 = vmatpush3.bf16.msra.mxu0 %v16455_v1  ;;  %v4674_v1 = vld [vmem:[%s20633_s3 + $0x7d0] sm:$0xff] }
0x1909   : > { %16460 = vmatprep.subr.bf16.mxu0 %v16459_v36  ;;  %v16519_v6 = vpack.c.bf16 %v4675_v5, %v4674_v1  ;;  %v4682_v5 = vld [vmem:[%s20633_s3 + $0x810] sm:$0xff] }
0x190c   : > { %16462 = vmatpush3.bf16.msra.mxu0 %v16459_v36 }
0x190d   : > { %16464 = vmatprep.subr.bf16.mxu0 %v16463_v44 }
0x1910   : > { %16466 = vmatpush3.bf16.msra.mxu0 %v16463_v44 }
0x1911   : > { %16468 = vmatprep.subr.bf16.mxu0 %v16467_v42 }
0x1914   : > { %16470 = vmatpush3.bf16.msra.mxu0 %v16467_v42 }
0x1915   : > { %16472 = vmatprep.subr.bf16.mxu0 %v16471_v15 }
0x1918   : > { %16474 = vmatpush3.bf16.msra.mxu0 %v16471_v15 }
0x1919   : > { %16476 = vmatprep.subr.bf16.mxu0 %v16475_v10 }
0x191b   : > { %14666 = vmatmul.mubr.msk.f32.vlgmr.msra.gmra.mrb[68].mxu0 %vm411_vm8, %v19059_v57 }
0x191c   : > { %16478 = vmatpush3.bf16.msra.mxu0 %v16475_v10  ;;  %14692 = vmatprep.mubr.msk.f32.mxu0 %vm411_vm8, %v19063_v58 }
0x191d   : > { %16480 = vmatprep.subr.bf16.mxu0 %v16479_v11 }
0x1920   : > { %16482 = vmatpush3.bf16.msra.mxu0 %v16479_v11  ;;  %v4688_v11 = vld [vmem:[%s20633_s3 + $0x840] sm:$0xff] }
0x1921   : > { %16484 = vmatprep.subr.bf16.mxu0 %v16483_v2  ;;  %v16539_v61 = vpack.c.bf16 %v4689_v16, %v4688_v11  ;;  %v4707_v11 = vld [vmem:[%s20633_s3 + $0x8d8] sm:$0xff] }
0x1924   : > { %16486 = vmatpush3.bf16.msra.mxu0 %v16483_v2 }
0x1925   : > { %16488 = vmatprep.subr.bf16.mxu0 %v16487_v50 }
0x1928   : > { %16490 = vmatpush3.bf16.msra.mxu0 %v16487_v50  ;;  %v4690_v50 = vld [vmem:[%s20633_s3 + $0x850] sm:$0xff] }
0x1929   : > { %16492 = vmatprep.subr.bf16.mxu0 %v16491_v23  ;;  %v16543_v27 = vpack.c.bf16 %v4691_v22, %v4690_v50 }
0x192c   : > { %16494 = vmatpush3.bf16.msra.mxu0 %v16491_v23  ;;  %v4692_v23 = vld [vmem:[%s20633_s3 + $0x860] sm:$0xff] }
0x192d   : > { %16496 = vmatprep.subr.bf16.mxu0 %v16495_v35  ;;  %v16547_v34 = vpack.c.bf16 %v4693_v25, %v4692_v23 }
0x1930   : > { %16498 = vmatpush3.bf16.msra.mxu0 %v16495_v35  ;;  %v4694_v35 = vld [vmem:[%s20633_s3 + $0x870] sm:$0xff] }
0x1931   : > { %16500 = vmatprep.subr.bf16.mxu0 %v16499_v8  ;;  %v16551_v38 = vpack.c.bf16 %v4695_v37, %v4694_v35 }
0x1933   : > { %14693 = vmatmul.mubr.msk.f32.vlgmr.msra.gmra.mrb[68].mxu0 %vm411_vm8, %v19103_v63 }
0x1934   : > { %16502 = vmatpush3.bf16.msra.mxu0 %v16499_v8  ;;  %14719 = vmatprep.mubr.msk.f32.mxu0 %vm411_vm8, %v19107_v3  ;;  %v4696_v8 = vld [vmem:[%s20633_s3 + $0x880] sm:$0xff] }
0x1935   : > { %16504 = vmatprep.subr.bf16.mxu0 %v16503_v19 }
0x1938   : > { %16506 = vmatpush3.bf16.msra.mxu0 %v16503_v19  ;;  %v4699_v19 = vld [vmem:[%s20633_s3 + $0x898] sm:$0xff] }
0x1939   : > { %16508 = vmatprep.subr.bf16.mxu0 %v16507_v21  ;;  %v16559_v41 = vpack.c.bf16 %v4699_v19, %v4698_v17 }
0x193c   : > { %16510 = vmatpush3.bf16.msra.mxu0 %v16507_v21  ;;  %v4677_v21 = vld [vmem:[%s20633_s3 + $0x7e8] sm:$0xff] }
0x193d   : > { %16512 = vmatprep.subr.bf16.mxu0 %v16511_v30  ;;  %v16563_v24 = vpack.c.bf16 %v4677_v21, %v4676_v45  ;;  %v4725_v45 = vld [vmem:[%s20633_s3 + $0x968] sm:$0xff] }
0x1940   : > { %16514 = vmatpush3.bf16.msra.mxu0 %v16511_v30  ;;  %v4679_v30 = vld [vmem:[%s20633_s3 + $0x7f8] sm:$0xff] }
0x1941   : > { %16516 = vmatprep.subr.bf16.mxu0 %v16515_v39  ;;  %v16567_v46 = vpack.c.bf16 %v4679_v30, %v4678_v29 }
0x1944   : > { %16518 = vmatpush3.bf16.msra.mxu0 %v16515_v39  ;;  %v4681_v39 = vld [vmem:[%s20633_s3 + $0x808] sm:$0xff] }
0x1945   : > { %16520 = vmatprep.subr.bf16.mxu0 %v16519_v6  ;;  %v16571_v1 = vpack.c.bf16 %v4681_v39, %v4680_v32  ;;  %v4727_v32 = vld [vmem:[%s20633_s3 + $0x978] sm:$0xff] }
0x1948   : > { %16522 = vmatpush3.bf16.msra.mxu0 %v16519_v6  ;;  %v4683_v6 = vld [vmem:[%s20633_s3 + $0x818] sm:$0xff] }
0x1949   : > { %16611 = vmatprep.subr.bf16.mxu0 %v17400_v14 }
0x194b   : > { %14720 = vmatmul.mubr.msk.f32.vlgmr.msra.gmra.mrb[68].mxu0 %vm411_vm8, %v19130_v31 }
0x194c   : > { %14835 = vmatprep.mubr.msk.f32.mxu0 %vm17401_vm15, %v17385_v0 }
0x19d2   : > { %v7953_v36 = vpop.f32.mrb[64].mxu0 }
0x19d3   : > { %v14633_v40 = vpop.f32.mrb[65].mxu0 }
0x19d6   : > { %v8023_v43 = vpop.f32.mrb[66].mxu0 }
0x19d7   : > { %v8027_v44 = vmax.f32 %v7953_v36, %v8023_v43  ;;  %v14640_v18 = vpop.f32.mrb[67].mxu0  ;;  %v16575_v36 = vpack.c.bf16 %v4683_v6, %v4682_v5  ;;  %v4686_v43 = vld [vmem:[%s20633_s3 + $0x830] sm:$0xff]  ;;  %v4729_v5 = vld [vmem:[%s20633_s3 + $0x988] sm:$0xff] }
0x19d8   : > { %v19623_v6 = vld [vmem:[#allocation3 + $0x1] sm:$0xff] }
0x19d9   : > { %11183 = vrot.lane.b32.xlu0 %v8027_v44, %s17412_s22  ;;  %v4687_v44 = vld [vmem:[%s20633_s3 + $0x838] sm:$0xff] }
0x19da   : > { %v16583_v18 = vpack.c.bf16 %v4687_v44, %v4686_v43  ;;  %v4732_v43 = vld [vmem:[%s20633_s3 + $0x9a0] sm:$0xff]  ;;  %v4733_v44 = vld [vmem:[%s20633_s3 + $0x9a8] sm:$0xff] }
0x1a1e   : > { %v14721_v42 = vpop.f32.mrb[68].mxu0 }
0x1a1f   : > { %v8260_v49 = vadd.f32 %v14721_v42, %v8258_v20  ;;  %v8244_v51 = vpop.f32.mrb[69].mxu0  ;;  %v4701_v42 = vld [vmem:[%s20633_s3 + $0x8a8] sm:$0xff] }
0x1a20   : > { %v8259_v15 = vadd.f32 %v8258_v20, %v8244_v51  ;;  %v4700_v20 = vld [vmem:[%s20633_s3 + $0x8a0] sm:$0xff]  ;;  %v4702_v51 = vld [vmem:[%s20633_s3 + $0x8b0] sm:$0xff] }
0x1a21   : > { %v8262_v53 = vmax.f32 %v8260_v49, 0.0  ;;  %v16587_v49 = vpack.c.bf16 %v4701_v42, %v4700_v20  ;;  %v4734_v20 = vld [vmem:[%s20633_s3 + $0x9b0] sm:$0xff]  ;;  %v4735_v42 = vld [vmem:[%s20633_s3 + $0x9b8] sm:$0xff] }
0x1a22   : > { %v8261_v55 = vmax.f32 %v8259_v15, 0.0  ;;  %v4703_v15 = vld [vmem:[%s20633_s3 + $0x8b8] sm:$0xff] }
0x1a24   : > { %v16524_v10 = vpack.c.bf16 %v8262_v53, %v8261_v55  ;;  %v16591_v53 = vpack.c.bf16 %v4703_v15, %v4702_v51  ;;  %v4704_v55 = vld [vmem:[%s20633_s3 + $0x8c0] sm:$0xff]  ;;  %v4713_v15 = vld [vmem:[%s20633_s3 + $0x908] sm:$0xff] }
0x1a25   : > { %v4712_v51 = vld [vmem:[%s20633_s3 + $0x900] sm:$0xff] }
0x1a26   : > { %16526 = vmatpush3.bf16.msk.msra.mxu1 %vm17540_vm4, %v16524_v10 }
0x1a27   : > { %16527 = vmatprep.subr.bf16.mxu1 %v17400_v14 }
0x1a29   : > { %14727 = vmatmul.mubr.msk.f32.vlgmr.msra.gmra.mrb[64].mxu1 %vm5114_vm3, %v17639_v47 }
0x1a2a   : > { %16530 = vmatpush3.bf16.msk.msra.mxu1 %vm17540_vm4, %v16524_v10  ;;  %14733 = vmatprep.mubr.msk.f32.mxu1 %vm17401_vm15, %v17385_v0  ;;  %v4705_v10 = vld [vmem:[%s20633_s3 + $0x8c8] sm:$0xff] }
0x1a2b   : > { %16531 = vmatprep.subr.bf16.mxu1 %v17400_v14 }
0x1a2d   : > { %14734 = vmatmul.mubr.msk.f32.vlgmr.msra.gmra.mrb[66].mxu1 %vm5114_vm3, %v17687_v13 }
0x1a2e   : > { %16534 = vmatpush3.bf16.msk.msra.mxu1 %vm18512_vm6, %v17657_v52  ;;  %14740 = vmatprep.mubr.msk.f32.mxu1 %vm17401_vm15, %v17385_v0 }
0x1a2f   : > { %16535 = vmatprep.subr.bf16.mxu1 %v17400_v14 }
0x1afc   : > { %v8332_v12 = vpop.f32.mrb[64].mxu1 }
0x1afd   : > { %v14728_v59 = vpop.f32.mrb[65].mxu1 }
0x1afe   : > { %v4706_v59 = vld [vmem:[%s20633_s3 + $0x8d0] sm:$0xff] }
0x1aff   : > { %v16599_v16 = vpack.c.bf16 %v4707_v11, %v4706_v59  ;;  %v4716_v59 = vld [vmem:[%s20633_s3 + $0x920] sm:$0xff]  ;;  %v4717_v11 = vld [vmem:[%s20633_s3 + $0x928] sm:$0xff] }
0x1b00   : > { %v8402_v60 = vpop.f32.mrb[66].mxu1 }
0x1b01   : > { %v8406_v2 = vmax.f32 %v8332_v12, %v8402_v60  ;;  %v14735_v54 = vpop.f32.mrb[67].mxu1  ;;  %v16595_v12 = vpack.c.bf16 %v4705_v10, %v4704_v55  ;;  %v4714_v55 = vld [vmem:[%s20633_s3 + $0x910] sm:$0xff]  ;;  %v4715_v10 = vld [vmem:[%s20633_s3 + $0x918] sm:$0xff] }
0x1b02   : > { %v4711_v54 = vld [vmem:[%s20633_s3 + $0x8f8] sm:$0xff] }
0x1b03   : > { %14741 = vmatmul.mubr.msk.f32.vlgmr.msra.gmra.mrb[68].mxu1 %vm5114_vm3, %v8406_v2 }
0x1b04   : > { %16538 = vmatpush3.bf16.msk.msra.mxu1 %vm18540_vm9, %v17670_v56  ;;  %14747 = vmatprep.mubr.msk.f32.mxu1 %vm17401_vm15, %v17385_v0 }
0x1b05   : > { %16540 = vmatprep.subr.bf16.mxu1 %v16539_v61 }
0x1b07   : > { %14748 = vmatmul.mubr.msk.f32.vlgmr.msra.gmra.mrb[70].mxu1 %vm5114_vm3, %v8406_v2  ;;  %v4710_v2 = vld [vmem:[%s20633_s3 + $0x8f0] sm:$0xff] }
0x1b08   : > { %16542 = vmatpush3.bf16.msra.mxu1 %v16539_v61  ;;  %14774 = vmatprep.mubr.msk.f32.mxu1 %vm411_vm8, %v19019_v33  ;;  %v4697_v33 = vld [vmem:[%s20633_s3 + $0x888] sm:$0xff]  ;;  %v16607_v61 = vpack.c.bf16 %v4711_v54, %v4710_v2  ;;  %v4719_v2 = vld [vmem:[%s20633_s3 + $0x938] sm:$0xff] }
0x1b09   : > { %16544 = vmatprep.subr.bf16.mxu1 %v16543_v27  ;;  %v16555_v9 = vpack.c.bf16 %v4697_v33, %v4696_v8 }
0x1b0c   : > { %16546 = vmatpush3.bf16.msra.mxu1 %v16543_v27 }
0x1b0d   : > { %16548 = vmatprep.subr.bf16.mxu1 %v16547_v34 }
0x1b10   : > { %16550 = vmatpush3.bf16.msra.mxu1 %v16547_v34  ;;  %v8781_v34 = vstv %s17228_s14 }
0x1b11   : > { %16552 = vmatprep.subr.bf16.mxu1 %v16551_v38 }
0x1b14   : > { %16554 = vmatpush3.bf16.msra.mxu1 %v16551_v38 }
0x1b15   : > { %16556 = vmatprep.subr.bf16.mxu1 %v16555_v9 }
0x1b18   : > { %16558 = vmatpush3.bf16.msra.mxu1 %v16555_v9 }
0x1b19   : > { %16560 = vmatprep.subr.bf16.mxu1 %v16559_v41 }
0x1b1c   : > { %16562 = vmatpush3.bf16.msra.mxu1 %v16559_v41  ;;  %v4724_v41 = vld [vmem:[%s20633_s3 + $0x960] sm:$0xff] }
0x1b1d   : > { %16564 = vmatprep.subr.bf16.mxu1 %v16563_v24  ;;  %v16627_v30 = vpack.c.bf16 %v4725_v45, %v4724_v41  ;;  %v4742_v45 = vld [vmem:[%s20633_s3 + $0x9f0] sm:$0xff] }
0x1b1f   : > { %14775 = vmatmul.mubr.msk.f32.vlgmr.msra.gmra.mrb[72].mxu1 %vm411_vm8, %v19059_v57  ;;  %v4684_v57 = vld [vmem:[%s20633_s3 + $0x820] sm:$0xff] }
0x1b20   : > { %16566 = vmatpush3.bf16.msra.mxu1 %v16563_v24  ;;  %14801 = vmatprep.mubr.msk.f32.mxu1 %vm411_vm8, %v19063_v58  ;;  %v4685_v58 = vld [vmem:[%s20633_s3 + $0x828] sm:$0xff] }
0x1b21   : > { %16568 = vmatprep.subr.bf16.mxu1 %v16567_v46  ;;  %v16579_v40 = vpack.c.bf16 %v4685_v58, %v4684_v57  ;;  %v4730_v57 = vld [vmem:[%s20633_s3 + $0x990] sm:$0xff]  ;;  %v4731_v58 = vld [vmem:[%s20633_s3 + $0x998] sm:$0xff] }
0x1b24   : > { %16570 = vmatpush3.bf16.msra.mxu1 %v16567_v46  ;;  %v4726_v46 = vld [vmem:[%s20633_s3 + $0x970] sm:$0xff] }
0x1b25   : > { %16572 = vmatprep.subr.bf16.mxu1 %v16571_v1  ;;  %v16631_v39 = vpack.c.bf16 %v4727_v32, %v4726_v46  ;;  %v4746_v32 = vld [vmem:[%s20633_s3 + $0xa10] sm:$0xff] }
0x1b28   : > { %16574 = vmatpush3.bf16.msra.mxu1 %v16571_v1  ;;  %v4728_v1 = vld [vmem:[%s20633_s3 + $0x980] sm:$0xff] }
0x1b29   : > { %16576 = vmatprep.subr.bf16.mxu1 %v16575_v36 }
0x1b2c   : > { %16578 = vmatpush3.bf16.msra.mxu1 %v16575_v36  ;;  %v16635_v36 = vpack.c.bf16 %v4729_v5, %v4728_v1  ;;  %v19734_v5 = vld [vmem:[#allocation3 + $0xa] sm:$0x3f] }
0x1b2d   : > { %16580 = vmatprep.subr.bf16.mxu1 %v16579_v40 }
0x1b30   : > { %16582 = vmatpush3.bf16.msra.mxu1 %v16579_v40  ;;  %v16639_v40 = vpack.c.bf16 %v4731_v58, %v4730_v57 }
0x1b31   : > { %16584 = vmatprep.subr.bf16.mxu1 %v16583_v18 }
0x1b34   : > { %16586 = vmatpush3.bf16.msra.mxu1 %v16583_v18  ;;  %v16643_v18 = vpack.c.bf16 %v4733_v44, %v4732_v43  ;;  %v9304_v44 = vstv %s17230_s29 }
0x1b35   : > { %16588 = vmatprep.subr.bf16.mxu1 %v16587_v49 }
0x1b37   : > { %14802 = vmatmul.mubr.msk.f32.vlgmr.msra.gmra.mrb[72].mxu1 %vm411_vm8, %v19103_v63  ;;  %v4708_v63 = vld [vmem:[%s20633_s3 + $0x8e0] sm:$0xff] }
0x1b38   : > { %16590 = vmatpush3.bf16.msra.mxu1 %v16587_v49  ;;  %14828 = vmatprep.mubr.msk.f32.mxu1 %vm411_vm8, %v19107_v3  ;;  %v4709_v3 = vld [vmem:[%s20633_s3 + $0x8e8] sm:$0xff]  ;;  %v16647_v49 = vpack.c.bf16 %v4735_v42, %v4734_v20 }
0x1b39   : > { %16592 = vmatprep.subr.bf16.mxu1 %v16591_v53  ;;  %v16603_v60 = vpack.c.bf16 %v4709_v3, %v4708_v63  ;;  %v19667_v63 = vld [vmem:[#allocation3] sm:$0xff]  ;;  %v16659_v3 = vpack.c.bf16 %v4717_v11, %v4716_v59 }
0x1b3a   : > { %v4761_v59 = vld [vmem:[%s20633_s3 + $0xa88] sm:$0xff] }
0x1b3c   : > { %16594 = vmatpush3.bf16.msra.mxu1 %v16591_v53  ;;  %v16651_v53 = vpack.c.bf16 %v4713_v15, %v4712_v51 }
0x1b3d   : > { %16596 = vmatprep.subr.bf16.mxu1 %v16595_v12 }
0x1b40   : > { %16598 = vmatpush3.bf16.msra.mxu1 %v16595_v12  ;;  %v16655_v12 = vpack.c.bf16 %v4715_v10, %v4714_v55 }
0x1b41   : > { %16600 = vmatprep.subr.bf16.mxu1 %v16599_v16 }
0x1b44   : > { %16602 = vmatpush3.bf16.msra.mxu1 %v16599_v16  ;;  %v19663_v16 = vld [vmem:[#allocation3 + $0x9] sm:$0x3f] }
0x1b45   : > { %16604 = vmatprep.subr.bf16.mxu1 %v16603_v60 }
0x1b48   : > { %16606 = vmatpush3.bf16.msra.mxu1 %v16603_v60  ;;  %v4718_v60 = vld [vmem:[%s20633_s3 + $0x930] sm:$0xff] }
0x1b49   : > { %16608 = vmatprep.subr.bf16.mxu1 %v16607_v61  ;;  %v16663_v54 = vpack.c.bf16 %v4719_v2, %v4718_v60 }
0x1b4c   : > { %16610 = vmatpush3.bf16.msra.mxu1 %v16607_v61  ;;  %v4720_v61 = vld [vmem:[%s20633_s3 + $0x940] sm:$0xff] }
0x1b4d   : > { %16699 = vmatprep.subr.bf16.mxu1 %v17400_v14 }
0x1b4f   : > { %14829 = vmatmul.mubr.msk.f32.vlgmr.msra.gmra.mrb[72].mxu1 %vm411_vm8, %v19130_v31 }
0x1b50   : > { %14944 = vmatprep.mubr.msk.f32.mxu1 %vm17401_vm15, %v17385_v0 }
0x1bd6   : > { %v8476_v50 = vpop.f32.mrb[68].mxu1 }
0x1bd7   : > { %v14742_v22 = vpop.f32.mrb[69].mxu1 }
0x1bda   : > { %v8546_v27 = vpop.f32.mrb[70].mxu1 }
0x1bdb   : > { %v8550_v23 = vmax.f32 %v8476_v50, %v8546_v27  ;;  %v14749_v25 = vpop.f32.mrb[71].mxu1  ;;  %v4721_v50 = vld [vmem:[%s20633_s3 + $0x948] sm:$0xff]  ;;  %v4722_v27 = vld [vmem:[%s20633_s3 + $0x950] sm:$0xff] }
0x1bdc   : > { %v16667_v22 = vpack.c.bf16 %v4721_v50, %v4720_v61  ;;  %v4763_v61 = vld [vmem:[%s20633_s3 + $0xa98] sm:$0xff] }
0x1bdd   : > { %11187 = vrot.lane.b32.xlu1 %v8550_v23, %s17413_s24  ;;  %v4723_v23 = vld [vmem:[%s20633_s3 + $0x958] sm:$0xff] }
0x1bde   : > { %v16671_v25 = vpack.c.bf16 %v4723_v23, %v4722_v27  ;;  %v4765_v27 = vld [vmem:[%s20633_s3 + $0xaa8] sm:$0xff] }
0x1c22   : > { %v14830_v35 = vpop.f32.mrb[72].mxu1 }
0x1c23   : > { %v8783_v37 = vadd.f32 %v14830_v35, %v8781_v34  ;;  %v8767_v38 = vpop.f32.mrb[73].mxu1  ;;  %v4737_v35 = vld [vmem:[%s20633_s3 + $0x9c8] sm:$0xff] }
0x1c24   : > { %v8782_v8 = vadd.f32 %v8781_v34, %v8767_v38  ;;  %v4736_v34 = vld [vmem:[%s20633_s3 + $0x9c0] sm:$0xff]  ;;  %v4738_v38 = vld [vmem:[%s20633_s3 + $0x9d0] sm:$0xff] }
0x1c25   : > { %v8785_v33 = vmax.f32 %v8783_v37, 0.0  ;;  %v16675_v37 = vpack.c.bf16 %v4737_v35, %v4736_v34  ;;  %v4767_v34 = vld [vmem:[%s20633_s3 + $0xab8] sm:$0xff] }
0x1c26   : > { %v8784_v9 = vmax.f32 %v8782_v8, 0.0  ;;  %v4739_v8 = vld [vmem:[%s20633_s3 + $0x9d8] sm:$0xff] }
0x1c28   : > { %v16612_v17 = vpack.c.bf16 %v8785_v33, %v8784_v9  ;;  %v16679_v33 = vpack.c.bf16 %v4739_v8, %v4738_v38  ;;  %v4740_v9 = vld [vmem:[%s20633_s3 + $0x9e0] sm:$0xff]  ;;  %v4769_v38 = vld [vmem:[%s20633_s3 + $0xac8] sm:$0xff] }
0x1c2a   : > { %16614 = vmatpush3.bf16.msk.msra.mxu0 %vm17540_vm4, %v16612_v17 }
0x1c2b   : > { %16615 = vmatprep.subr.bf16.mxu0 %v17400_v14 }
0x1c2d   : > { %14836 = vmatmul.mubr.msk.f32.vlgmr.msra.gmra.mrb[70].mxu0 %vm5114_vm3, %v17639_v47 }
0x1c2e   : > { %16618 = vmatpush3.bf16.msk.msra.mxu0 %vm17540_vm4, %v16612_v17  ;;  %14842 = vmatprep.mubr.msk.f32.mxu0 %vm17401_vm15, %v17385_v0  ;;  %v4741_v17 = vld [vmem:[%s20633_s3 + $0x9e8] sm:$0xff] }
0x1c2f   : > { %16619 = vmatprep.subr.bf16.mxu0 %v17400_v14  ;;  %v16683_v41 = vpack.c.bf16 %v4741_v17, %v4740_v9  ;;  %v4771_v9 = vld [vmem:[%s20633_s3 + $0xad8] sm:$0xff] }
0x1c31   : > { %14843 = vmatmul.mubr.msk.f32.vlgmr.msra.gmra.mrb[72].mxu0 %vm5114_vm3, %v17687_v13 }
0x1c32   : > { %16622 = vmatpush3.bf16.msk.msra.mxu0 %vm18512_vm6, %v17657_v52  ;;  %14849 = vmatprep.mubr.msk.f32.mxu0 %vm17401_vm15, %v17385_v0 }
0x1c33   : > { %16623 = vmatprep.subr.bf16.mxu0 %v17400_v14 }
0x1d00   : > { %v8855_v31 = vpop.f32.mrb[70].mxu0 }
0x1d01   : > { %v14837_v19 = vpop.f32.mrb[71].mxu0 }
0x1d02   : > { %v19711_v19 = vld [vmem:[#allocation3 + $0x2] sm:$0xff] }
0x1d04   : > { %v8925_v21 = vpop.f32.mrb[72].mxu0 }
0x1d05   : > { %v8929_v24 = vmax.f32 %v8855_v31, %v8925_v21  ;;  %v14844_v29 = vpop.f32.mrb[73].mxu0  ;;  %v19707_v31 = vld [vmem:[#allocation3 + $0x8] sm:$0x3f]  ;;  %v4743_v21 = vld [vmem:[%s20633_s3 + $0x9f8] sm:$0xff] }
0x1d06   : > { %v4744_v29 = vld [vmem:[%s20633_s3 + $0xa00] sm:$0xff] }
0x1d07   : > { %14850 = vmatmul.mubr.msk.f32.vlgmr.msra.gmra.mrb[74].mxu0 %vm5114_vm3, %v8929_v24 }
0x1d08   : > { %16626 = vmatpush3.bf16.msk.msra.mxu0 %vm18540_vm9, %v17670_v56  ;;  %14856 = vmatprep.mubr.msk.f32.mxu0 %vm17401_vm15, %v17385_v0 }
0x1d09   : > { %16628 = vmatprep.subr.bf16.mxu0 %v16627_v30 }
0x1d0b   : > { %14857 = vmatmul.mubr.msk.f32.vlgmr.msra.gmra.mrb[76].mxu0 %vm5114_vm3, %v8929_v24  ;;  %v16687_v24 = vpack.c.bf16 %v4743_v21, %v4742_v45  ;;  %v4749_v45 = vld [vmem:[%s20633_s3 + $0xa28] sm:$0xff] }
0x1d0c   : > { %16630 = vmatpush3.bf16.msra.mxu0 %v16627_v30  ;;  %14883 = vmatprep.mubr.msk.f32.mxu0 %vm411_vm8, %v19623_v6  ;;  %v4745_v30 = vld [vmem:[%s20633_s3 + $0xa08] sm:$0xff] }
0x1d0d   : > { %16632 = vmatprep.subr.bf16.mxu0 %v16631_v39  ;;  %v16691_v46 = vpack.c.bf16 %v4745_v30, %v4744_v29  ;;  %v4751_v29 = vld [vmem:[%s20633_s3 + $0xa38] sm:$0xff] }
0x1d10   : > { %16634 = vmatpush3.bf16.msra.mxu0 %v16631_v39  ;;  %v4747_v39 = vld [vmem:[%s20633_s3 + $0xa18] sm:$0xff] }
0x1d11   : > { %16636 = vmatprep.subr.bf16.mxu0 %v16635_v36  ;;  %v16695_v1 = vpack.c.bf16 %v4747_v39, %v4746_v32  ;;  %v4753_v32 = vld [vmem:[%s20633_s3 + $0xa48] sm:$0xff] }
0x1d14   : > { %16638 = vmatpush3.bf16.msra.mxu0 %v16635_v36 }
0x1d15   : > { %16640 = vmatprep.subr.bf16.mxu0 %v16639_v40 }
0x1d18   : > { %16642 = vmatpush3.bf16.msra.mxu0 %v16639_v40 }
0x1d19   : > { %16644 = vmatprep.subr.bf16.mxu0 %v16643_v18 }
0x1d1c   : > { %16646 = vmatpush3.bf16.msra.mxu0 %v16643_v18 }
0x1d1d   : > { %16648 = vmatprep.subr.bf16.mxu0 %v16647_v49 }
0x1d20   : > { %16650 = vmatpush3.bf16.msra.mxu0 %v16647_v49 }
0x1d21   : > { %16652 = vmatprep.subr.bf16.mxu0 %v16651_v53 }
0x1d23   : > { %14884 = vmatmul.mubr.msk.f32.vlgmr.msra.gmra.mrb[78].mxu0 %vm411_vm8, %v19663_v16 }
0x1d24   : > { %16654 = vmatpush3.bf16.msra.mxu0 %v16651_v53  ;;  %14910 = vmatprep.mubr.msk.f32.mxu0 %vm411_vm8, %v19667_v63 }
0x1d25   : > { %16656 = vmatprep.subr.bf16.mxu0 %v16655_v12 }
0x1d28   : > { %16658 = vmatpush3.bf16.msra.mxu0 %v16655_v12  ;;  %v4760_v12 = vld [vmem:[%s20633_s3 + $0xa80] sm:$0xff] }
0x1d29   : > { %16660 = vmatprep.subr.bf16.mxu0 %v16659_v3  ;;  %v16715_v2 = vpack.c.bf16 %v4761_v59, %v4760_v12  ;;  %v4777_v12 = vld [vmem:[%s20633_s3 + $0xb08] sm:$0xff] }
0x1d2c   : > { %16662 = vmatpush3.bf16.msra.mxu0 %v16659_v3 }
0x1d2d   : > { %16664 = vmatprep.subr.bf16.mxu0 %v16663_v54 }
0x1d30   : > { %16666 = vmatpush3.bf16.msra.mxu0 %v16663_v54  ;;  %v4762_v54 = vld [vmem:[%s20633_s3 + $0xa90] sm:$0xff] }
0x1d31   : > { %16668 = vmatprep.subr.bf16.mxu0 %v16667_v22  ;;  %v16719_v50 = vpack.c.bf16 %v4763_v61, %v4762_v54  ;;  %v4781_v54 = vld [vmem:[%s20633_s3 + $0xb28] sm:$0xff] }
0x1d34   : > { %16670 = vmatpush3.bf16.msra.mxu0 %v16667_v22  ;;  %v4764_v22 = vld [vmem:[%s20633_s3 + $0xaa0] sm:$0xff] }
0x1d35   : > { %16672 = vmatprep.subr.bf16.mxu0 %v16671_v25  ;;  %v16723_v23 = vpack.c.bf16 %v4765_v27, %v4764_v22  ;;  %v4783_v22 = vld [vmem:[%s20633_s3 + $0xb38] sm:$0xff] }
0x1d38   : > { %16674 = vmatpush3.bf16.msra.mxu0 %v16671_v25  ;;  %v4766_v25 = vld [vmem:[%s20633_s3 + $0xab0] sm:$0xff] }
0x1d39   : > { %16676 = vmatprep.subr.bf16.mxu0 %v16675_v37  ;;  %v16727_v35 = vpack.c.bf16 %v4767_v34, %v4766_v25 }
0x1d3b   : > { %14911 = vmatmul.mubr.msk.f32.vlgmr.msra.gmra.mrb[78].mxu0 %vm411_vm8, %v19707_v31 }
0x1d3c   : > { %16678 = vmatpush3.bf16.msra.mxu0 %v16675_v37  ;;  %14937 = vmatprep.mubr.msk.f32.mxu0 %vm411_vm8, %v19711_v19  ;;  %v4768_v37 = vld [vmem:[%s20633_s3 + $0xac0] sm:$0xff] }
0x1d3d   : > { %16680 = vmatprep.subr.bf16.mxu0 %v16679_v33  ;;  %v16731_v8 = vpack.c.bf16 %v4769_v38, %v4768_v37  ;;  %v9827_v38 = vstv %s17232_s28  ;;  %s323_s28 = sand.u32 1, %s17375_s10  }
0x1d40   : > { %16682 = vmatpush3.bf16.msra.mxu0 %v16679_v33  ;;  %v4770_v33 = vld [vmem:[%s20633_s3 + $0xad0] sm:$0xff] }
0x1d41   : > { %16684 = vmatprep.subr.bf16.mxu0 %v16683_v41  ;;  %v16735_v17 = vpack.c.bf16 %v4771_v9, %v4770_v33 }
0x1d44   : > { %16686 = vmatpush3.bf16.msra.mxu0 %v16683_v41  ;;  %v4748_v41 = vld [vmem:[%s20633_s3 + $0xa20] sm:$0xff] }
0x1d45   : > { %16688 = vmatprep.subr.bf16.mxu0 %v16687_v24  ;;  %v16739_v21 = vpack.c.bf16 %v4749_v45, %v4748_v41 }
0x1d48   : > { %16690 = vmatpush3.bf16.msra.mxu0 %v16687_v24  ;;  %v4750_v24 = vld [vmem:[%s20633_s3 + $0xa30] sm:$0xff] }
0x1d49   : > { %16692 = vmatprep.subr.bf16.mxu0 %v16691_v46  ;;  %v16743_v30 = vpack.c.bf16 %v4751_v29, %v4750_v24 }
0x1d4c   : > { %16694 = vmatpush3.bf16.msra.mxu0 %v16691_v46  ;;  %v4752_v46 = vld [vmem:[%s20633_s3 + $0xa40] sm:$0xff] }
0x1d4d   : > { %16696 = vmatprep.subr.bf16.mxu0 %v16695_v1  ;;  %v16747_v39 = vpack.c.bf16 %v4753_v32, %v4752_v46  ;;  %v4797_v46 = vld [vmem:[%s20633_s3 + $0xba8] sm:$0xff] }
0x1d50   : > { %16698 = vmatpush3.bf16.msra.mxu0 %v16695_v1  ;;  %v4754_v1 = vld [vmem:[%s20633_s3 + $0xa50] sm:$0xff] }
0x1d51   : > { %16787 = vmatprep.subr.bf16.mxu0 %v17400_v14 }
0x1d53   : > { %14938 = vmatmul.mubr.msk.f32.vlgmr.msra.gmra.mrb[78].mxu0 %vm411_vm8, %v19734_v5 }
0x1d54   : > { %15053 = vmatprep.mubr.msk.f32.mxu0 %vm17401_vm15, %v17385_v0 }
0x1dda   : > { %v8999_v36 = vpop.f32.mrb[74].mxu0 }
0x1ddb   : > { %v14851_v57 = vpop.f32.mrb[75].mxu0 }
0x1dde   : > { %v9069_v58 = vpop.f32.mrb[76].mxu0 }
0x1ddf   : > { %v9073_v40 = vmax.f32 %v8999_v36, %v9069_v58  ;;  %v14858_v43 = vpop.f32.mrb[77].mxu0  ;;  %v4755_v36 = vld [vmem:[%s20633_s3 + $0xa58] sm:$0xff]  ;;  %v4756_v58 = vld [vmem:[%s20633_s3 + $0xa60] sm:$0xff] }
0x1de0   : > { %v16751_v57 = vpack.c.bf16 %v4755_v36, %v4754_v1 }
0x1de1   : > { %11191 = vrot.lane.b32.xlu0 %v9073_v40, %s20665_s27  ;;  %v4757_v40 = vld [vmem:[%s20633_s3 + $0xa68] sm:$0xff]  ;;  %s11941_s27 = scalar_lea.sflag [#allocation5], %s323_s28 }
0x1de2   : > { %v16755_v43 = vpack.c.bf16 %v4757_v40, %v4756_v58  ;;  %v4799_v58 = vld [vmem:[%s20633_s3 + $0xbb8] sm:$0xff] }
0x1e26   : > { %v14939_v18 = vpop.f32.mrb[78].mxu0 }
0x1e27   : > { %v9306_v20 = vadd.f32 %v14939_v18, %v9304_v44  ;;  %v9290_v42 = vpop.f32.mrb[79].mxu0  ;;  %v4759_v18 = vld [vmem:[%s20633_s3 + $0xa78] sm:$0xff] }
0x1e28   : > { %v9305_v49 = vadd.f32 %v9304_v44, %v9290_v42  ;;  %v4758_v44 = vld [vmem:[%s20633_s3 + $0xa70] sm:$0xff]  ;;  %v4772_v42 = vld [vmem:[%s20633_s3 + $0xae0] sm:$0xff] }
0x1e29   : > { %v9308_v51 = vmax.f32 %v9306_v20, 0.0  ;;  %v16759_v20 = vpack.c.bf16 %v4759_v18, %v4758_v44  ;;  %v4801_v44 = vld [vmem:[%s20633_s3 + $0xbc8] sm:$0xff] }
0x1e2a   : > { %v9307_v15 = vmax.f32 %v9305_v49, 0.0  ;;  %v4773_v49 = vld [vmem:[%s20633_s3 + $0xae8] sm:$0xff] }
0x1e2c   : > { %v16700_v53 = vpack.c.bf16 %v9308_v51, %v9307_v15  ;;  %v16763_v51 = vpack.c.bf16 %v4773_v49, %v4772_v42  ;;  %v4774_v15 = vld [vmem:[%s20633_s3 + $0xaf0] sm:$0xff]  ;;  %v4803_v42 = vld [vmem:[%s20633_s3 + $0xbd8] sm:$0xff] }
0x1e2e   : > { %16702 = vmatpush3.bf16.msk.msra.mxu1 %vm17540_vm4, %v16700_v53 }
0x1e2f   : > { %16703 = vmatprep.subr.bf16.mxu1 %v17400_v14 }
0x1e31   : > { %14945 = vmatmul.mubr.msk.f32.vlgmr.msra.gmra.mrb[74].mxu1 %vm5114_vm3, %v17639_v47 }
0x1e32   : > { %16706 = vmatpush3.bf16.msk.msra.mxu1 %vm17540_vm4, %v16700_v53  ;;  %14951 = vmatprep.mubr.msk.f32.mxu1 %vm17401_vm15, %v17385_v0  ;;  %v4775_v53 = vld [vmem:[%s20633_s3 + $0xaf8] sm:$0xff] }
0x1e33   : > { %16707 = vmatprep.subr.bf16.mxu1 %v17400_v14 }
0x1e35   : > { %14952 = vmatmul.mubr.msk.f32.vlgmr.msra.gmra.mrb[76].mxu1 %vm5114_vm3, %v17687_v13 }
0x1e36   : > { %16710 = vmatpush3.bf16.msk.msra.mxu1 %vm18512_vm6, %v17657_v52  ;;  %14958 = vmatprep.mubr.msk.f32.mxu1 %vm17401_vm15, %v17385_v0 }
0x1e37   : > { %16711 = vmatprep.subr.bf16.mxu1 %v17400_v14 }
0x1f04   : > { %v9378_v55 = vpop.f32.mrb[74].mxu1 }
0x1f05   : > { %v14946_v10 = vpop.f32.mrb[75].mxu1 }
0x1f06   : > { %v4776_v10 = vld [vmem:[%s20633_s3 + $0xb00] sm:$0xff] }
0x1f07   : > { %v16771_v59 = vpack.c.bf16 %v4777_v12, %v4776_v10  ;;  %v4807_v10 = vld [vmem:[%s20633_s3 + $0xbf8] sm:$0xff] }
0x1f08   : > { %v9448_v11 = vpop.f32.mrb[76].mxu1 }
0x1f09   : > { %v9452_v3 = vmax.f32 %v9378_v55, %v9448_v11  ;;  %v14953_v60 = vpop.f32.mrb[77].mxu1  ;;  %v16767_v55 = vpack.c.bf16 %v4775_v53, %v4774_v15  ;;  %v4778_v11 = vld [vmem:[%s20633_s3 + $0xb10] sm:$0xff]  ;;  %v4805_v15 = vld [vmem:[%s20633_s3 + $0xbe8] sm:$0xff] }
0x1f0b   : > { %14959 = vmatmul.mubr.msk.f32.vlgmr.msra.gmra.mrb[78].mxu1 %vm5114_vm3, %v9452_v3 }
0x1f0c   : > { %16714 = vmatpush3.bf16.msk.msra.mxu1 %vm18540_vm9, %v17670_v56  ;;  %14965 = vmatprep.mubr.msk.f32.mxu1 %vm17401_vm15, %v17385_v0 }
0x1f0d   : > { %16716 = vmatprep.subr.bf16.mxu1 %v16715_v2 }
0x1f0f   : > { %14966 = vmatmul.mubr.msk.f32.vlgmr.msra.gmra.mrb[80].mxu1 %vm5114_vm3, %v9452_v3  ;;  %v4779_v3 = vld [vmem:[%s20633_s3 + $0xb18] sm:$0xff] }
0x1f10   : > { %16718 = vmatpush3.bf16.msra.mxu1 %v16715_v2  ;;  %14992 = vmatprep.mubr.msk.f32.mxu1 %vm411_vm8, %v19623_v6  ;;  %v16775_v60 = vpack.c.bf16 %v4779_v3, %v4778_v11  ;;  %v4780_v2 = vld [vmem:[%s20633_s3 + $0xb20] sm:$0xff]  ;;  %v4785_v11 = vld [vmem:[%s20633_s3 + $0xb48] sm:$0xff] }
0x1f11   : > { %16720 = vmatprep.subr.bf16.mxu1 %v16719_v50  ;;  %v16779_v61 = vpack.c.bf16 %v4781_v54, %v4780_v2  ;;  %v4787_v2 = vld [vmem:[%s20633_s3 + $0xb58] sm:$0xff] }
0x1f14   : > { %16722 = vmatpush3.bf16.msra.mxu1 %v16719_v50  ;;  %v4782_v50 = vld [vmem:[%s20633_s3 + $0xb30] sm:$0xff] }
0x1f15   : > { %16724 = vmatprep.subr.bf16.mxu1 %v16723_v23  ;;  %v16783_v27 = vpack.c.bf16 %v4783_v22, %v4782_v50  ;;  %v4789_v50 = vld [vmem:[%s20633_s3 + $0xb68] sm:$0xff] }
0x1f18   : > { %16726 = vmatpush3.bf16.msra.mxu1 %v16723_v23 }
0x1f19   : > { %16728 = vmatprep.subr.bf16.mxu1 %v16727_v35 }
0x1f1c   : > { %16730 = vmatpush3.bf16.msra.mxu1 %v16727_v35 }
0x1f1d   : > { %16732 = vmatprep.subr.bf16.mxu1 %v16731_v8 }
0x1f20   : > { %16734 = vmatpush3.bf16.msra.mxu1 %v16731_v8 }
0x1f21   : > { %16736 = vmatprep.subr.bf16.mxu1 %v16735_v17 }
0x1f24   : > { %16738 = vmatpush3.bf16.msra.mxu1 %v16735_v17 }
0x1f25   : > { %16740 = vmatprep.subr.bf16.mxu1 %v16739_v21 }
0x1f27   : > { %14993 = vmatmul.mubr.msk.f32.vlgmr.msra.gmra.mrb[82].mxu1 %vm411_vm8, %v19663_v16 }
0x1f28   : > { %16742 = vmatpush3.bf16.msra.mxu1 %v16739_v21  ;;  %15019 = vmatprep.mubr.msk.f32.mxu1 %vm411_vm8, %v19667_v63 }
0x1f29   : > { %16744 = vmatprep.subr.bf16.mxu1 %v16743_v30 }
0x1f2c   : > { %16746 = vmatpush3.bf16.msra.mxu1 %v16743_v30  ;;  %v4796_v30 = vld [vmem:[%s20633_s3 + $0xba0] sm:$0xff] }
0x1f2d   : > { %16748 = vmatprep.subr.bf16.mxu1 %v16747_v39  ;;  %v16803_v36 = vpack.c.bf16 %v4797_v46, %v4796_v30  ;;  %v4813_v30 = vld [vmem:[%s20633_s3 + $0xc28] sm:$0xff] }
0x1f30   : > { %16750 = vmatpush3.bf16.msra.mxu1 %v16747_v39 }
0x1f31   : > { %16752 = vmatprep.subr.bf16.mxu1 %v16751_v57 }
0x1f34   : > { %16754 = vmatpush3.bf16.msra.mxu1 %v16751_v57  ;;  %v4798_v57 = vld [vmem:[%s20633_s3 + $0xbb0] sm:$0xff] }
0x1f35   : > { %16756 = vmatprep.subr.bf16.mxu1 %v16755_v43  ;;  %v16807_v40 = vpack.c.bf16 %v4799_v58, %v4798_v57  ;;  %v4817_v57 = vld [vmem:[%s20633_s3 + $0xc48] sm:$0xff] }
0x1f38   : > { %16758 = vmatpush3.bf16.msra.mxu1 %v16755_v43  ;;  %v4800_v43 = vld [vmem:[%s20633_s3 + $0xbc0] sm:$0xff] }
0x1f39   : > { %16760 = vmatprep.subr.bf16.mxu1 %v16759_v20  ;;  %v16811_v18 = vpack.c.bf16 %v4801_v44, %v4800_v43  ;;  %v4819_v43 = vld [vmem:[%s20633_s3 + $0xc58] sm:$0xff] }
0x1f3c   : > { %16762 = vmatpush3.bf16.msra.mxu1 %v16759_v20  ;;  %v4802_v20 = vld [vmem:[%s20633_s3 + $0xbd0] sm:$0xff] }
0x1f3d   : > { %16764 = vmatprep.subr.bf16.mxu1 %v16763_v51  ;;  %v16815_v49 = vpack.c.bf16 %v4803_v42, %v4802_v20 }
0x1f3f   : > { %15020 = vmatmul.mubr.msk.f32.vlgmr.msra.gmra.mrb[82].mxu1 %vm411_vm8, %v19707_v31 }
0x1f40   : > { %16766 = vmatpush3.bf16.msra.mxu1 %v16763_v51  ;;  %15046 = vmatprep.mubr.msk.f32.mxu1 %vm411_vm8, %v19711_v19  ;;  %v4804_v51 = vld [vmem:[%s20633_s3 + $0xbe0] sm:$0xff] }
0x1f41   : > { %16768 = vmatprep.subr.bf16.mxu1 %v16767_v55  ;;  %v16819_v53 = vpack.c.bf16 %v4805_v15, %v4804_v51  ;;  %v10350_v15 = vstv %s17234_s26 }
0x1f44   : > { %16770 = vmatpush3.bf16.msra.mxu1 %v16767_v55  ;;  %v4806_v55 = vld [vmem:[%s20633_s3 + $0xbf0] sm:$0xff] }
0x1f45   : > { %16772 = vmatprep.subr.bf16.mxu1 %v16771_v59  ;;  %v16823_v12 = vpack.c.bf16 %v4807_v10, %v4806_v55 }
0x1f48   : > { %16774 = vmatpush3.bf16.msra.mxu1 %v16771_v59  ;;  %v4784_v59 = vld [vmem:[%s20633_s3 + $0xb40] sm:$0xff] }
0x1f49   : > { %16776 = vmatprep.subr.bf16.mxu1 %v16775_v60  ;;  %v16827_v3 = vpack.c.bf16 %v4785_v11, %v4784_v59 }
0x1f4c   : > { %16778 = vmatpush3.bf16.msra.mxu1 %v16775_v60  ;;  %v4786_v60 = vld [vmem:[%s20633_s3 + $0xb50] sm:$0xff] }
0x1f4d   : > { %16780 = vmatprep.subr.bf16.mxu1 %v16779_v61  ;;  %v16831_v54 = vpack.c.bf16 %v4787_v2, %v4786_v60 }
0x1f50   : > { %16782 = vmatpush3.bf16.msra.mxu1 %v16779_v61  ;;  %v4788_v61 = vld [vmem:[%s20633_s3 + $0xb60] sm:$0xff] }
0x1f51   : > { %16784 = vmatprep.subr.bf16.mxu1 %v16783_v27  ;;  %v16835_v22 = vpack.c.bf16 %v4789_v50, %v4788_v61  ;;  %v4833_v61 = vld [vmem:[%s20633_s3 + $0xcc8] sm:$0xff] }
0x1f54   : > { %16786 = vmatpush3.bf16.msra.mxu1 %v16783_v27  ;;  %v4790_v27 = vld [vmem:[%s20633_s3 + $0xb70] sm:$0xff] }
0x1f55   : > { %16875 = vmatprep.subr.bf16.mxu1 %v17400_v14 }
0x1f57   : > { %15047 = vmatmul.mubr.msk.f32.vlgmr.msra.gmra.mrb[82].mxu1 %vm411_vm8, %v19734_v5 }
0x1f58   : > { %15162 = vmatprep.mubr.msk.f32.mxu1 %vm17401_vm15, %v17385_v0 }
0x1fde   : > { %v9522_v23 = vpop.f32.mrb[78].mxu1 }
0x1fdf   : > { %v14960_v25 = vpop.f32.mrb[79].mxu1 }
0x1fe2   : > { %v9592_v34 = vpop.f32.mrb[80].mxu1 }
0x1fe3   : > { %v9596_v35 = vmax.f32 %v9522_v23, %v9592_v34  ;;  %v14967_v37 = vpop.f32.mrb[81].mxu1  ;;  %v4791_v23 = vld [vmem:[%s20633_s3 + $0xb78] sm:$0xff]  ;;  %v4792_v34 = vld [vmem:[%s20633_s3 + $0xb80] sm:$0xff] }
0x1fe4   : > { %v16839_v25 = vpack.c.bf16 %v4791_v23, %v4790_v27 }
0x1fe5   : > { %11195 = vrot.lane.b32.xlu1 %v9596_v35, %s17414_s25  ;;  %v4793_v35 = vld [vmem:[%s20633_s3 + $0xb88] sm:$0xff] }
0x1fe6   : > { %v16843_v37 = vpack.c.bf16 %v4793_v35, %v4792_v34  ;;  %v4835_v34 = vld [vmem:[%s20633_s3 + $0xcd8] sm:$0xff] }
0x202a   : > { %v15048_v8 = vpop.f32.mrb[82].mxu1 }
0x202b   : > { %v9829_v33 = vadd.f32 %v15048_v8, %v9827_v38  ;;  %v9813_v9 = vpop.f32.mrb[83].mxu1  ;;  %v4795_v8 = vld [vmem:[%s20633_s3 + $0xb98] sm:$0xff] }
0x202c   : > { %v9828_v17 = vadd.f32 %v9827_v38, %v9813_v9  ;;  %v4794_v38 = vld [vmem:[%s20633_s3 + $0xb90] sm:$0xff]  ;;  %v4808_v9 = vld [vmem:[%s20633_s3 + $0xc00] sm:$0xff] }
0x202d   : > { %v9831_v41 = vmax.f32 %v9829_v33, 0.0  ;;  %v16847_v33 = vpack.c.bf16 %v4795_v8, %v4794_v38  ;;  %v4837_v38 = vld [vmem:[%s20633_s3 + $0xce8] sm:$0xff] }
0x202e   : > { %v9830_v45 = vmax.f32 %v9828_v17, 0.0  ;;  %v4809_v17 = vld [vmem:[%s20633_s3 + $0xc08] sm:$0xff] }
0x2030   : > { %v16788_v21 = vpack.c.bf16 %v9831_v41, %v9830_v45  ;;  %v16851_v41 = vpack.c.bf16 %v4809_v17, %v4808_v9  ;;  %v4810_v45 = vld [vmem:[%s20633_s3 + $0xc10] sm:$0xff]  ;;  %v4839_v9 = vld [vmem:[%s20633_s3 + $0xcf8] sm:$0xff] }
0x2032   : > { %16790 = vmatpush3.bf16.msk.msra.mxu0 %vm17540_vm4, %v16788_v21 }
0x2033   : > { %16791 = vmatprep.subr.bf16.mxu0 %v17400_v14 }
0x2035   : > { %15054 = vmatmul.mubr.msk.f32.vlgmr.msra.gmra.mrb[80].mxu0 %vm5114_vm3, %v17639_v47 }
0x2036   : > { %16794 = vmatpush3.bf16.msk.msra.mxu0 %vm17540_vm4, %v16788_v21  ;;  %15060 = vmatprep.mubr.msk.f32.mxu0 %vm17401_vm15, %v17385_v0  ;;  %v4811_v21 = vld [vmem:[%s20633_s3 + $0xc18] sm:$0xff] }
0x2037   : > { %16795 = vmatprep.subr.bf16.mxu0 %v17400_v14 }
0x2039   : > { %15061 = vmatmul.mubr.msk.f32.vlgmr.msra.gmra.mrb[82].mxu0 %vm5114_vm3, %v17687_v13 }
0x203a   : > { %16798 = vmatpush3.bf16.msk.msra.mxu0 %vm18512_vm6, %v17657_v52  ;;  %15067 = vmatprep.mubr.msk.f32.mxu0 %vm17401_vm15, %v17385_v0 }
0x203b   : > { %16799 = vmatprep.subr.bf16.mxu0 %v17400_v14 }
0x2108   : > { %v9901_v24 = vpop.f32.mrb[80].mxu0 }
0x2109   : > { %v15055_v29 = vpop.f32.mrb[81].mxu0 }
0x210a   : > { %v4812_v29 = vld [vmem:[%s20633_s3 + $0xc20] sm:$0xff] }
0x210b   : > { %v16859_v46 = vpack.c.bf16 %v4813_v30, %v4812_v29  ;;  %v4820_v30 = vld [vmem:[%s20633_s3 + $0xc60] sm:$0xff] }
0x210c   : > { %v9971_v32 = vpop.f32.mrb[82].mxu0 }
0x210d   : > { %v9975_v39 = vmax.f32 %v9901_v24, %v9971_v32  ;;  %v15062_v1 = vpop.f32.mrb[83].mxu0  ;;  %v16855_v24 = vpack.c.bf16 %v4811_v21, %v4810_v45  ;;  %v4814_v32 = vld [vmem:[%s20633_s3 + $0xc30] sm:$0xff] }
0x210e   : > { %v4842_v21 = vld [vmem:[%s20633_s3 + $0xd10] sm:$0xff] }
0x210f   : > { %15068 = vmatmul.mubr.msk.f32.vlgmr.msra.gmra.mrb[84].mxu0 %vm5114_vm3, %v9975_v39 }
0x2110   : > { %16802 = vmatpush3.bf16.msk.msra.mxu0 %vm18540_vm9, %v17670_v56  ;;  %15074 = vmatprep.mubr.msk.f32.mxu0 %vm17401_vm15, %v17385_v0 }
0x2111   : > { %16804 = vmatprep.subr.bf16.mxu0 %v16803_v36 }
0x2113   : > { %15075 = vmatmul.mubr.msk.f32.vlgmr.msra.gmra.mrb[86].mxu0 %vm5114_vm3, %v9975_v39  ;;  %v4815_v39 = vld [vmem:[%s20633_s3 + $0xc38] sm:$0xff] }
0x2114   : > { %16806 = vmatpush3.bf16.msra.mxu0 %v16803_v36  ;;  %15101 = vmatprep.mubr.msk.f32.mxu0 %vm411_vm8, %v19623_v6  ;;  %v16863_v1 = vpack.c.bf16 %v4815_v39, %v4814_v32  ;;  %v4816_v36 = vld [vmem:[%s20633_s3 + $0xc40] sm:$0xff]  ;;  %v4822_v39 = vld [vmem:[%s20633_s3 + $0xc70] sm:$0xff] }
0x2115   : > { %16808 = vmatprep.subr.bf16.mxu0 %v16807_v40  ;;  %v16867_v58 = vpack.c.bf16 %v4817_v57, %v4816_v36  ;;  %v4824_v57 = vld [vmem:[%s20633_s3 + $0xc80] sm:$0xff] }
0x2118   : > { %16810 = vmatpush3.bf16.msra.mxu0 %v16807_v40  ;;  %v4818_v40 = vld [vmem:[%s20633_s3 + $0xc50] sm:$0xff] }
0x2119   : > { %16812 = vmatprep.subr.bf16.mxu0 %v16811_v18  ;;  %v16871_v44 = vpack.c.bf16 %v4819_v43, %v4818_v40  ;;  %v4826_v43 = vld [vmem:[%s20633_s3 + $0xc90] sm:$0xff] }
0x211c   : > { %16814 = vmatpush3.bf16.msra.mxu0 %v16811_v18 }
0x211d   : > { %16816 = vmatprep.subr.bf16.mxu0 %v16815_v49 }
0x2120   : > { %16818 = vmatpush3.bf16.msra.mxu0 %v16815_v49 }
0x2121   : > { %16820 = vmatprep.subr.bf16.mxu0 %v16819_v53 }
0x2124   : > { %16822 = vmatpush3.bf16.msra.mxu0 %v16819_v53 }
0x2125   : > { %16824 = vmatprep.subr.bf16.mxu0 %v16823_v12 }
0x2128   : > { %16826 = vmatpush3.bf16.msra.mxu0 %v16823_v12 }
0x2129   : > { %16828 = vmatprep.subr.bf16.mxu0 %v16827_v3 }
0x212b   : > { %15102 = vmatmul.mubr.msk.f32.vlgmr.msra.gmra.mrb[88].mxu0 %vm411_vm8, %v19663_v16 }
0x212c   : > { %16830 = vmatpush3.bf16.msra.mxu0 %v16827_v3  ;;  %15128 = vmatprep.mubr.msk.f32.mxu0 %vm411_vm8, %v19667_v63 }
0x212d   : > { %16832 = vmatprep.subr.bf16.mxu0 %v16831_v54 }
0x2130   : > { %16834 = vmatpush3.bf16.msra.mxu0 %v16831_v54  ;;  %v4832_v54 = vld [vmem:[%s20633_s3 + $0xcc0] sm:$0xff] }
0x2131   : > { %16836 = vmatprep.subr.bf16.mxu0 %v16835_v22  ;;  %v16891_v23 = vpack.c.bf16 %v4833_v61, %v4832_v54  ;;  %v4851_v54 = vld [vmem:[%s20633_s3 + $0xd58] sm:$0xff] }
0x2134   : > { %16838 = vmatpush3.bf16.msra.mxu0 %v16835_v22 }
0x2135   : > { %16840 = vmatprep.subr.bf16.mxu0 %v16839_v25 }
0x2138   : > { %16842 = vmatpush3.bf16.msra.mxu0 %v16839_v25  ;;  %v4834_v25 = vld [vmem:[%s20633_s3 + $0xcd0] sm:$0xff] }
0x2139   : > { %16844 = vmatprep.subr.bf16.mxu0 %v16843_v37  ;;  %v16895_v35 = vpack.c.bf16 %v4835_v34, %v4834_v25 }
0x213c   : > { %16846 = vmatpush3.bf16.msra.mxu0 %v16843_v37  ;;  %v4836_v37 = vld [vmem:[%s20633_s3 + $0xce0] sm:$0xff] }
0x213d   : > { %16848 = vmatprep.subr.bf16.mxu0 %v16847_v33  ;;  %v16899_v8 = vpack.c.bf16 %v4837_v38, %v4836_v37 }
0x2140   : > { %16850 = vmatpush3.bf16.msra.mxu0 %v16847_v33  ;;  %v4838_v33 = vld [vmem:[%s20633_s3 + $0xcf0] sm:$0xff] }
0x2141   : > { %16852 = vmatprep.subr.bf16.mxu0 %v16851_v41  ;;  %v16903_v17 = vpack.c.bf16 %v4839_v9, %v4838_v33 }
0x2143   : > { %15129 = vmatmul.mubr.msk.f32.vlgmr.msra.gmra.mrb[88].mxu0 %vm411_vm8, %v19707_v31 }
0x2144   : > { %16854 = vmatpush3.bf16.msra.mxu0 %v16851_v41  ;;  %15155 = vmatprep.mubr.msk.f32.mxu0 %vm411_vm8, %v19711_v19  ;;  %v4840_v41 = vld [vmem:[%s20633_s3 + $0xd00] sm:$0xff] }
0x2145   : > { %16856 = vmatprep.subr.bf16.mxu0 %v16855_v24 }
0x2148   : > { %16858 = vmatpush3.bf16.msra.mxu0 %v16855_v24  ;;  %v4843_v24 = vld [vmem:[%s20633_s3 + $0xd18] sm:$0xff] }
0x2149   : > { %16860 = vmatprep.subr.bf16.mxu0 %v16859_v46  ;;  %v16911_v29 = vpack.c.bf16 %v4843_v24, %v4842_v21 }
0x214c   : > { %16862 = vmatpush3.bf16.msra.mxu0 %v16859_v46  ;;  %v4821_v46 = vld [vmem:[%s20633_s3 + $0xc68] sm:$0xff] }
0x214d   : > { %16864 = vmatprep.subr.bf16.mxu0 %v16863_v1  ;;  %v16915_v32 = vpack.c.bf16 %v4821_v46, %v4820_v30  ;;  %v11232_v30 = vld [vmem:[%s20635_s5 + $0x10] sm:$0xff]  ;;  %v11233_v46 = vld [vmem:[%s20635_s5 + $0x18] sm:$0xff] }
0x2150   : > { %16866 = vmatpush3.bf16.msra.mxu0 %v16863_v1  ;;  %v4823_v1 = vld [vmem:[%s20633_s3 + $0xc78] sm:$0xff] }
0x2151   : > { %16868 = vmatprep.subr.bf16.mxu0 %v16867_v58  ;;  %v16919_v36 = vpack.c.bf16 %v4823_v1, %v4822_v39  ;;  %v11243_v39 = vld [vmem:[%s20635_s5 + $0x68] sm:$0xff]  ;;  %v11244_v1 = vld [vmem:[%s20635_s5 + $0x70] sm:$0xff] }
0x2154   : > { %16870 = vmatpush3.bf16.msra.mxu0 %v16867_v58  ;;  %v4825_v58 = vld [vmem:[%s20633_s3 + $0xc88] sm:$0xff] }
0x2155   : > { %16872 = vmatprep.subr.bf16.mxu0 %v16871_v44  ;;  %v16923_v40 = vpack.c.bf16 %v4825_v58, %v4824_v57  ;;  %v16983_v57 = vpack.c.bf16 %v11244_v1, %v11243_v39  ;;  %v11234_v58 = vld [vmem:[%s20635_s5 + $0x20] sm:$0xff]  ;;  %v11267_v1 = vld [vmem:[%s20635_s5 + $0x128] sm:$0xff] }
0x2158   : > { %16874 = vmatpush3.bf16.msra.mxu0 %v16871_v44  ;;  %v4827_v44 = vld [vmem:[%s20633_s3 + $0xc98] sm:$0xff] }
0x2159   : > { %16963 = vmatprep.subr.bf16.mxu0 %v17400_v14 }
0x215b   : > { %15156 = vmatmul.mubr.msk.f32.vlgmr.msra.gmra.mrb[88].mxu0 %vm411_vm8, %v19734_v5 }
0x215c   : > { %15271 = vmatprep.mubr.msk.f32.mxu0 %vm17401_vm15, %v17385_v0 }
0x21e2   : > { %v10045_v18 = vpop.f32.mrb[84].mxu0 }
0x21e3   : > { %v15069_v20 = vpop.f32.mrb[85].mxu0 }
0x21e6   : > { %v10115_v42 = vpop.f32.mrb[86].mxu0 }
0x21e7   : > { %v10119_v49 = vmax.f32 %v10045_v18, %v10115_v42  ;;  %v15076_v51 = vpop.f32.mrb[87].mxu0  ;;  %v16927_v18 = vpack.c.bf16 %v4827_v44, %v4826_v43  ;;  %v4830_v42 = vld [vmem:[%s20633_s3 + $0xcb0] sm:$0xff]  ;;  %v11245_v43 = vld [vmem:[%s20635_s5 + $0x78] sm:$0xff]  ;;  %v11246_v44 = vld [vmem:[%s20635_s5 + $0x80] sm:$0xff] }
0x21e9   : > { %11199 = vrot.lane.b32.xlu0 %v10119_v49, %s17415_s16  ;;  %v4831_v49 = vld [vmem:[%s20633_s3 + $0xcb8] sm:$0xff]  ;;  %s17417_s16 = smov 77  }
0x21ea   : > { %v16935_v51 = vpack.c.bf16 %v4831_v49, %v4830_v42  ;;  %v11247_v42 = vld [vmem:[%s20635_s5 + $0x88] sm:$0xff]  ;;  %v11248_v49 = vld [vmem:[%s20635_s5 + $0x90] sm:$0xff] }
0x222e   : > { %v15157_v53 = vpop.f32.mrb[88].mxu0 }
0x222f   : > { %v10352_v55 = vadd.f32 %v15157_v53, %v10350_v15  ;;  %v10336_v10 = vpop.f32.mrb[89].mxu0  ;;  %v4845_v53 = vld [vmem:[%s20633_s3 + $0xd28] sm:$0xff] }
0x2230   : > { %v10351_v12 = vadd.f32 %v10350_v15, %v10336_v10  ;;  %v4844_v15 = vld [vmem:[%s20633_s3 + $0xd20] sm:$0xff]  ;;  %v4846_v10 = vld [vmem:[%s20633_s3 + $0xd30] sm:$0xff] }
0x2231   : > { %v10354_v59 = vmax.f32 %v10352_v55, 0.0  ;;  %v16939_v55 = vpack.c.bf16 %v4845_v53, %v4844_v15  ;;  %v16989_v15 = vpack.c.bf16 %v11248_v49, %v11247_v42  ;;  %v11238_v53 = vld [vmem:[%s20635_s5 + $0x40] sm:$0xff]  ;;  %v11271_v49 = vld [vmem:[%s20635_s5 + $0x148] sm:$0xff] }
0x2232   : > { %v10353_v11 = vmax.f32 %v10351_v12, 0.0  ;;  %v4847_v12 = vld [vmem:[%s20633_s3 + $0xd38] sm:$0xff] }
0x2234   : > { %v16876_v3 = vpack.c.bf16 %v10354_v59, %v10353_v11  ;;  %v16943_v59 = vpack.c.bf16 %v4847_v12, %v4846_v10  ;;  %v4848_v11 = vld [vmem:[%s20633_s3 + $0xd40] sm:$0xff]  ;;  %v11249_v10 = vld [vmem:[%s20635_s5 + $0x98] sm:$0xff] }
0x2235   : > { %v11250_v12 = vld [vmem:[%s20635_s5 + $0xa0] sm:$0xff] }
0x2236   : > { %16878 = vmatpush3.bf16.msk.msra.mxu1 %vm17540_vm4, %v16876_v3 }
0x2237   : > { %16879 = vmatprep.subr.bf16.mxu1 %v17400_v14 }
0x2239   : > { %15163 = vmatmul.mubr.msk.f32.vlgmr.msra.gmra.mrb[84].mxu1 %vm5114_vm3, %v17639_v47 }
0x223a   : > { %16882 = vmatpush3.bf16.msk.msra.mxu1 %vm17540_vm4, %v16876_v3  ;;  %15169 = vmatprep.mubr.msk.f32.mxu1 %vm17401_vm15, %v17385_v0  ;;  %v4849_v3 = vld [vmem:[%s20633_s3 + $0xd48] sm:$0xff] }
0x223b   : > { %16883 = vmatprep.subr.bf16.mxu1 %v17400_v14 }
0x223d   : > { %15170 = vmatmul.mubr.msk.f32.vlgmr.msra.gmra.mrb[86].mxu1 %vm5114_vm3, %v17687_v13 }
0x223e   : > { %16886 = vmatpush3.bf16.msk.msra.mxu1 %vm18512_vm6, %v17657_v52  ;;  %15176 = vmatprep.mubr.msk.f32.mxu1 %vm17401_vm15, %v17385_v0 }
0x223f   : > { %16887 = vmatprep.subr.bf16.mxu1 %v17400_v14 }
0x230c   : > { %v10424_v60 = vpop.f32.mrb[84].mxu1 }
0x230d   : > { %v15164_v2 = vpop.f32.mrb[85].mxu1 }
0x230e   : > { %v4850_v2 = vld [vmem:[%s20633_s3 + $0xd50] sm:$0xff] }
0x230f   : > { %v16951_v61 = vpack.c.bf16 %v4851_v54, %v4850_v2 }
0x2310   : > { %v10494_v50 = vpop.f32.mrb[86].mxu1 }
0x2311   : > { %v10498_v22 = vmax.f32 %v10424_v60, %v10494_v50  ;;  %v15171_v27 = vpop.f32.mrb[87].mxu1  ;;  %v16947_v60 = vpack.c.bf16 %v4849_v3, %v4848_v11  ;;  %v16992_v11 = vpack.c.bf16 %v11250_v12, %v11249_v10  ;;  %v11240_v3 = vld [vmem:[%s20635_s5 + $0x50] sm:$0xf] }
0x2312   : > { %v4855_v27 = vld [vmem:[%s20633_s3 + $0xd78] sm:$0xff] }
0x2313   : > { %15177 = vmatmul.mubr.msk.f32.vlgmr.msra.gmra.mrb[88].mxu1 %vm5114_vm3, %v10498_v22 }
0x2314   : > { %16890 = vmatpush3.bf16.msk.msra.mxu1 %vm18540_vm9, %v17670_v56  ;;  %15183 = vmatprep.mubr.msk.f32.mxu1 %vm17401_vm15, %v17385_v0 }
0x2315   : > { %16892 = vmatprep.subr.bf16.mxu1 %v16891_v23 }
0x2317   : > { %15184 = vmatmul.mubr.msk.f32.vlgmr.msra.gmra.mrb[90].mxu1 %vm5114_vm3, %v10498_v22  ;;  %v4854_v22 = vld [vmem:[%s20633_s3 + $0xd70] sm:$0xff] }
0x2318   : > { %16894 = vmatpush3.bf16.msra.mxu1 %v16891_v23  ;;  %15210 = vmatprep.mubr.msk.f32.mxu1 %vm411_vm8, %v19623_v6  ;;  %v4841_v6 = vld [vmem:[%s20633_s3 + $0xd08] sm:$0xff]  ;;  %v16959_v23 = vpack.c.bf16 %v4855_v27, %v4854_v22  ;;  %v11172_v22 = vpop.permute.xlu1 %11171 }
0x2319   : > { %16896 = vmatprep.subr.bf16.mxu1 %v16895_v35  ;;  %v16907_v45 = vpack.c.bf16 %v4841_v6, %v4840_v41 }
0x231c   : > { %16898 = vmatpush3.bf16.msra.mxu1 %v16895_v35 }
0x231d   : > { %16900 = vmatprep.subr.bf16.mxu1 %v16899_v8 }
0x2320   : > { %16902 = vmatpush3.bf16.msra.mxu1 %v16899_v8  ;;  %v10873_v8 = vstv %s17236_s21  ;;  %s324_s21 = scalar_lea.vmem [#allocation4], %s323_s28 }
0x2321   : > { %16904 = vmatprep.subr.bf16.mxu1 %v16903_v17  ;;  %s11953_s22 = sshll.u32 %s324_s21, 4  ;;  %s20590_s22 = int_to_ptr.vmem [resolvable:$true] %s11953_s22 }
0x2322   : > { %s17321_s29 = scalar_lea.vmem %s20590_s22, 16 }
0x2323   : > { %p17322_p11 = scmp.ne.s32.totalorder %s20590_s22, %s17321_s29 }
0x2324   : > { %16906 = vmatpush3.bf16.msra.mxu1 %v16903_v17 }
0x2325   : > { %16908 = vmatprep.subr.bf16.mxu1 %v16907_v45  ;;  %p17323_p12 = pnand %p17322_p11, %p17507_p5 }
0x2327   : > { %p17324_p13 = pneg %p17323_p12 }
0x2328   : > { %16910 = vmatpush3.bf16.msra.mxu1 %v16907_v45 }
0x2329   : > { %16912 = vmatprep.subr.bf16.mxu1 %v16911_v29 }
0x232c   : > { %16914 = vmatpush3.bf16.msra.mxu1 %v16911_v29 }
0x232d   : > { %16916 = vmatprep.subr.bf16.mxu1 %v16915_v32 }
0x232f   : > { %15211 = vmatmul.mubr.msk.f32.vlgmr.msra.gmra.mrb[92].mxu1 %vm411_vm8, %v19663_v16  ;;  %v4828_v16 = vld [vmem:[%s20633_s3 + $0xca0] sm:$0xff] }
0x2330   : > { %16918 = vmatpush3.bf16.msra.mxu1 %v16915_v32  ;;  %15237 = vmatprep.mubr.msk.f32.mxu1 %vm411_vm8, %v19667_v63  ;;  %v4829_v63 = vld [vmem:[%s20633_s3 + $0xca8] sm:$0xff] }
0x2331   : > { %16920 = vmatprep.subr.bf16.mxu1 %v16919_v36  ;;  %v16931_v20 = vpack.c.bf16 %v4829_v63, %v4828_v16  ;;  %v16986_v16 = vpack.c.bf16 %v11246_v44, %v11245_v43  ;;  %v11236_v63 = vld [vmem:[%s20635_s5 + $0x30] sm:$0xff]  ;;  %v11269_v44 = vld [vmem:[%s20635_s5 + $0x138] sm:$0xff] }
0x2334   : > { %16922 = vmatpush3.bf16.msra.mxu1 %v16919_v36  ;;  %v16998_v36 = vpack.c.bf16 %v11233_v46, %v11232_v30  ;;  %v11254_v46 = vld [vmem:[%s20635_s5 + $0xc0] sm:$0xff] }
0x2335   : > { %16924 = vmatprep.subr.bf16.mxu1 %v16923_v40 }
0x2338   : > { %16926 = vmatpush3.bf16.msra.mxu1 %v16923_v40  ;;  %v11235_v40 = vld [vmem:[%s20635_s5 + $0x28] sm:$0xff] }
0x2339   : > { %16928 = vmatprep.subr.bf16.mxu1 %v16927_v18 }
0x233c   : > { %16930 = vmatpush3.bf16.msra.mxu1 %v16927_v18  ;;  %v17001_v18 = vpack.c.bf16 %v11235_v40, %v11234_v58  ;;  %v11256_v58 = vld [vmem:[%s20635_s5 + $0xd0] sm:$0xff]  ;;  %v11257_v40 = vld [vmem:[%s20635_s5 + $0xd8] sm:$0xff] }
0x233d   : > { %16932 = vmatprep.subr.bf16.mxu1 %v16931_v20 }
0x2340   : > { %16934 = vmatpush3.bf16.msra.mxu1 %v16931_v20  ;;  %v11237_v20 = vld [vmem:[%s20635_s5 + $0x38] sm:$0xff] }
0x2341   : > { %16936 = vmatprep.subr.bf16.mxu1 %v16935_v51 }
0x2344   : > { %16938 = vmatpush3.bf16.msra.mxu1 %v16935_v51  ;;  %v17004_v51 = vpack.c.bf16 %v11237_v20, %v11236_v63  ;;  %v11258_v63 = vld [vmem:[%s20635_s5 + $0xe0] sm:$0xff]  ;;  %v11259_v20 = vld [vmem:[%s20635_s5 + $0xe8] sm:$0xff] }
0x2345   : > { %16940 = vmatprep.subr.bf16.mxu1 %v16939_v55 }
0x2347   : > { %15238 = vmatmul.mubr.msk.f32.vlgmr.msra.gmra.mrb[92].mxu1 %vm411_vm8, %v19707_v31  ;;  %v4852_v31 = vld [vmem:[%s20633_s3 + $0xd60] sm:$0xff] }
0x2348   : > { %16942 = vmatpush3.bf16.msra.mxu1 %v16939_v55  ;;  %15264 = vmatprep.mubr.msk.f32.mxu1 %vm411_vm8, %v19711_v19  ;;  %v4853_v19 = vld [vmem:[%s20633_s3 + $0xd68] sm:$0xff] }
0x2349   : > { %16944 = vmatprep.subr.bf16.mxu1 %v16943_v59  ;;  %v16955_v50 = vpack.c.bf16 %v4853_v19, %v4852_v31  ;;  %v11239_v55 = vld [vmem:[%s20635_s5 + $0x48] sm:$0xff] }
0x234c   : > { %16946 = vmatpush3.bf16.msra.mxu1 %v16943_v59  ;;  %v17007_v59 = vpack.c.bf16 %v11239_v55, %v11238_v53  ;;  %v11260_v53 = vld [vmem:[%s20635_s5 + $0xf0] sm:$0xff]  ;;  %v11261_v55 = vld [vmem:[%s20635_s5 + $0xf8] sm:$0xff] }
0x234d   : > { %16948 = vmatprep.subr.bf16.mxu1 %v16947_v60  ;;  %v17022_v12 = vpack.c.bf16 %v11261_v55, %v11260_v53  ;;  %v11851_v55 = vld [vmem:[%s20637_s7 + $0x18] sm:$0xff] }
0x2350   : > { %16950 = vmatpush3.bf16.msra.mxu1 %v16947_v60  ;;  %v11251_v60 = vld [vmem:[%s20635_s5 + $0xa8] sm:$0xf] }
0x2351   : > { %16952 = vmatprep.subr.bf16.mxu1 %v16951_v61 }
0x2354   : > { %16954 = vmatpush3.bf16.msra.mxu1 %v16951_v61 }
0x2355   : > { %16956 = vmatprep.subr.bf16.mxu1 %v16955_v50 }
0x2358   : > { %16958 = vmatpush3.bf16.msra.mxu1 %v16955_v50  ;;  %v11168_v50 = vpop.permute.xlu0 %11167 }
0x2359   : > { %16960 = vmatprep.subr.bf16.mxu1 %v16959_v23 }
0x235c   : > { %16962 = vmatpush3.bf16.msra.mxu1 %v16959_v23  ;;  %v11176_v27 = vpop.permute.xlu0 %11175  ;;  %v11180_v23 = vpop.permute.xlu1 %11179 }
0x235d   : > { %16994 = vmatprep.subr.bf16.mxu1 %v17400_v14 }
0x235f   : > { %15265 = vmatmul.mubr.msk.f32.vlgmr.msra.gmra.mrb[92].mxu1 %vm411_vm8, %v19734_v5  ;;  %vm11218_vm8 = vcmask 343040  }
0x2360   : > { %15342 = vmatprep.mubr.msk.f32.mxu1 %vm17401_vm15, %v17385_v0 }
0x23e6   : > { %v10568_v25 = vpop.f32.mrb[88].mxu1 }
0x23e7   : > { %v15178_v34 = vpop.f32.mrb[89].mxu1 }
0x23e8   : > { %v11188_v34 = vpop.permute.xlu1 %11187 }
0x23ea   : > { %v10638_v35 = vpop.f32.mrb[90].mxu1 }
0x23eb   : > { %v10642_v37 = vmax.f32 %v10568_v25, %v10638_v35  ;;  %v15185_v38 = vpop.f32.mrb[91].mxu1  ;;  %v11184_v25 = vpop.permute.xlu0 %11183  ;;  %v11211_v35 = vsel %vm11210_vm2, %v5412_v26, %v11168_v50  ;;  %v11288_v50 = vld [vmem:[%s20635_s5 + $0x1d0] sm:$0xff] }
0x23ed   : > { %11203 = vrot.lane.b32.xlu1 %v10642_v37, %s17416_s17  ;;  %v11212_v37 = vsel %vm5114_vm3, %v11211_v35, %v11172_v22  ;;  %v11289_v35 = vld [vmem:[%s20635_s5 + $0x1d8] sm:$0xff]  ;;  %s12431_s17 = sshll.u32 %s17490_s13, 4  ;;  %s17418_s13 = smov [#allocation4]  }
0x23ee   : > { %s20588_s14 = scalar_lea.hbm %s20639_s9, %s12431_s17  ;;  %s17325_s25 = sshll.u32 %s17418_s13, 4  ;;  %s17326_s25 = int_to_ptr.vmem [resolvable:$false] %s17325_s25 }
0x23ef   : > { %v11192_v38 = vpop.permute.xlu0 %11191  ;;  %p17328_p0 = scmp.lt.s32.totalorder %s20590_s22, %s17326_s25 }
0x2432   : > { %v15266_v33 = vpop.f32.mrb[92].mxu1 }
0x2433   : > { %v10875_v9 = vadd.f32 %v15266_v33, %v10873_v8  ;;  %v10859_v17 = vpop.f32.mrb[93].mxu1  ;;  %v11196_v33 = vpop.permute.xlu1 %11195 }
0x2434   : > { %v10874_v41 = vadd.f32 %v10873_v8, %v10859_v17 }
0x2435   : > { %v10877_v6 = vmax.f32 %v10875_v9, 0.0 }
0x2436   : > { %v10876_v45 = vmax.f32 %v10874_v41, 0.0 }
0x2438   : > { %v16964_v21 = vpack.c.bf16 %v10877_v6, %v10876_v45  ;;  %v11200_v6 = vpop.permute.xlu0 %11199 }
0x243a   : > { %16966 = vmatpush3.bf16.msk.msra.mxu0 %vm17540_vm4, %v16964_v21 }
0x243b   : > { %16967 = vmatprep.subr.bf16.mxu0 %v17400_v14 }
0x243d   : > { %15272 = vmatmul.mubr.msk.f32.vlgmr.msra.gmra.mrb[90].mxu0 %vm5114_vm3, %v17639_v47 }
0x243e   : > { %16970 = vmatpush3.bf16.msk.msra.mxu0 %vm17540_vm4, %v16964_v21  ;;  %15278 = vmatprep.mubr.msk.f32.mxu0 %vm17401_vm15, %v17385_v0  ;;  %vm11213_vm4 = vcmask 171008  }
0x243f   : > { %16971 = vmatprep.subr.bf16.mxu0 %v17400_v14  ;;  %v11214_v8 = vsel %vm11213_vm4, %v11212_v37, %v11176_v27  ;;  %v11290_v37 = vld [vmem:[%s20635_s5 + $0x1e0] sm:$0xff] }
0x2440   : > { %v11215_v9 = vsel %vm814_vm7, %v11214_v8, %v11180_v23  ;;  %vm11309_vm7 = vcmask 687104   ;;  %v11276_v23 = vld [vmem:[%s20635_s5 + $0x170] sm:$0xff]  ;;  %v11278_v8 = vld [vmem:[%s20635_s5 + $0x180] sm:$0xff] }
0x2441   : > { %15279 = vmatmul.mubr.msk.f32.vlgmr.msra.gmra.mrb[92].mxu0 %vm5114_vm3, %v17687_v13  ;;  %v11231_v13 = vld [vmem:[%s20635_s5 + $0x8] sm:$0xff]  ;;  %v11217_v17 = vsel %vm11216_vm12, %v11215_v9, %v11184_v25  ;;  %v11277_v25 = vld [vmem:[%s20635_s5 + $0x178] sm:$0xff]  ;;  %v17061_v9 = vpack.c.bf16 %v11290_v37, %v11289_v35 }
0x2442   : > { %16974 = vmatpush3.bf16.msk.msra.mxu0 %vm18512_vm6, %v17657_v52  ;;  %15285 = vmatprep.mubr.msk.f32.mxu0 %vm17401_vm15, %v17385_v0  ;;  %v11230_v52 = vld [vmem:[%s20635_s5] sm:$0xff]  ;;  %v11219_v41 = vsel %vm11218_vm8, %v11217_v17, %v11188_v34  ;;  %v11291_v17 = vld [vmem:[%s20635_s5 + $0x1e8] sm:$0xff] }
0x2443   : > { %16975 = vmatprep.subr.bf16.mxu0 %v17400_v14  ;;  %v16995_v62 = vpack.c.bf16 %v11231_v13, %v11230_v52  ;;  %v11221_v26 = vsel %vm11220_vm10, %v11219_v41, %v11192_v38  ;;  %v11265_v13 = vld [vmem:[%s20635_s5 + $0x118] sm:$0xff]  ;;  %v17043_v38 = vpack.c.bf16 %v11277_v25, %v11276_v23  ;;  %v11292_v41 = vld [vmem:[%s20635_s5 + $0x1f0] sm:$0xff]  ;;  %v11861_v23 = vld [vmem:[%s20637_s7 + $0x68] sm:$0xff] }
0x2444   : > { %v11223_v21 = vsel %vm11222_vm13, %v11221_v26, %v11196_v33  ;;  %v11279_v33 = vld [vmem:[%s20635_s5 + $0x188] sm:$0xff]  ;;  %v17064_v26 = vpack.c.bf16 %v11292_v41, %v11291_v17 }
0x2445   : > { %16996 = vmatpush3.bf16.msra.mxu1 %v16995_v62 }
0x2446   : > { %16997 = vmatprep.subr.bf16.mxu1 %v17400_v14 }
0x2449   : > { %16999 = vmatpush3.bf16.msra.mxu1 %v16998_v36  ;;  %v11268_v36 = vld [vmem:[%s20635_s5 + $0x130] sm:$0xff] }
0x244a   : > { %17000 = vmatprep.subr.bf16.mxu1 %v17400_v14  ;;  %v17031_v43 = vpack.c.bf16 %v11268_v36, %v11267_v1  ;;  %v11299_v1 = vld [vmem:[%s20635_s5 + $0x228] sm:$0xff] }
0x244d   : > { %17002 = vmatpush3.bf16.msra.mxu1 %v17001_v18  ;;  %v11270_v18 = vld [vmem:[%s20635_s5 + $0x140] sm:$0xff] }
0x244e   : > { %17003 = vmatprep.subr.bf16.mxu1 %v17400_v14  ;;  %v17034_v42 = vpack.c.bf16 %v11270_v18, %v11269_v44  ;;  %v11303_v44 = vld [vmem:[%s20635_s5 + $0x248] sm:$0xff] }
0x2451   : > { %17005 = vmatpush3.bf16.msra.mxu1 %v17004_v51  ;;  %v11272_v51 = vld [vmem:[%s20635_s5 + $0x150] sm:$0xff] }
0x2452   : > { %17006 = vmatprep.subr.bf16.mxu1 %v17400_v14  ;;  %v17037_v10 = vpack.c.bf16 %v11272_v51, %v11271_v49  ;;  %v11848_v51 = vld [vmem:[%s20637_s7] sm:$0xff] }
0x2455   : > { %17008 = vmatpush3.bf16.msra.mxu1 %v17007_v59  ;;  %v11285_v59 = vld [vmem:[%s20635_s5 + $0x1b8] sm:$0xff] }
0x2456   : > { %15340 = vmatprep.subr.mxu1 %v17385_v0 }
0x2459   : > { %15341 = vmatpush3.msk.msra.mxu1 %vm821_vm1, %v11240_v3  ;;  %v11273_v3 = vld [vmem:[%s20635_s5 + $0x158] sm:$0xf] }
0x245a   : > { %17024 = vmatprep.subr.bf16.mxu1 %v17400_v14 }
0x245f   : > { %v11204_v45 = vpop.permute.xlu1 %11203 }
0x2510   : > { %v10947_v47 = vpop.f32.mrb[90].mxu0 }
0x2511   : > { %v15273_v7 = vpop.f32.mrb[91].mxu0 }
0x2512   : > { %v11253_v7 = vld [vmem:[%s20635_s5 + $0xb8] sm:$0xff] }
0x2514   : > { %v11017_v5 = vpop.f32.mrb[92].mxu0 }
0x2515   : > { %v11021_v24 = vmax.f32 %v10947_v47, %v11017_v5  ;;  %v15280_v29 = vpop.f32.mrb[93].mxu0  ;;  %v11252_v47 = vld [vmem:[%s20635_s5 + $0xb0] sm:$0xff]  ;;  %v11225_v5 = vsel %vm11224_vm0, %v11223_v21, %v11200_v6  ;;  %v17046_v6 = vpack.c.bf16 %v11279_v33, %v11278_v8  ;;  %v11294_v21 = vld [vmem:[%s20635_s5 + $0x200] sm:$0xff] }
0x2516   : > { %v11227_v29 = vsel %vm11226_vm14, %v11225_v5, %v11204_v45  ;;  %v11293_v45 = vld [vmem:[%s20635_s5 + $0x1f8] sm:$0xff]  ;;  %v11283_v5 = vld [vmem:[%s20635_s5 + $0x1a8] sm:$0xff] }
0x2517   : > { %15286 = vmatmul.mubr.msk.f32.vlgmr.msra.gmra.mrb[94].mxu0 %vm5114_vm3, %v11021_v24 }
0x2518   : > { %16978 = vmatpush3.bf16.msk.msra.mxu0 %vm18540_vm9, %v17670_v56  ;;  %15292 = vmatprep.mubr.msk.f32.mxu0 %vm17401_vm15, %v17385_v0  ;;  %v11241_v56 = vld [vmem:[%s20635_s5 + $0x58] sm:$0xff] }
0x2519   : > { %16979 = vmatprep.subr.bf16.mxu0 %v17400_v14  ;;  %v16980_v32 = vpack.c.bf16 %v11242_v4, %v11241_v56  ;;  %v11266_v56 = vld [vmem:[%s20635_s5 + $0x120] sm:$0xff]  ;;  %v17010_v4 = vpack.c.bf16 %v11253_v7, %v11252_v47 }
0x251a   : > { %v17028_v39 = vpack.c.bf16 %v11266_v56, %v11265_v13  ;;  %v11282_v7 = vld [vmem:[%s20635_s5 + $0x1a0] sm:$0xff]  ;;  %v11296_v13 = vld [vmem:[%s20635_s5 + $0x210] sm:$0xff]  ;;  %v11297_v56 = vld [vmem:[%s20635_s5 + $0x218] sm:$0xff] }
0x251b   : > { %15293 = vmatmul.mubr.msk.f32.vlgmr.msra.gmra.mrb[96].mxu0 %vm5114_vm3, %v11021_v24  ;;  %v17025_v24 = vpack.c.bf16 %v11264_v28, %v11263_v48  ;;  %v11280_v48 = vld [vmem:[%s20635_s5 + $0x190] sm:$0xff]  ;;  %v11281_v28 = vld [vmem:[%s20635_s5 + $0x198] sm:$0xff] }
0x251c   : > { %15317 = vmatprep.mubr.msk.f32.mxu0 %vm17401_vm15, %v17385_v0  ;;  %16981 = vmatpush3.bf16.msra.mxu0 %v16980_v32  ;;  %v11255_v32 = vld [vmem:[%s20635_s5 + $0xc8] sm:$0xff]  ;;  %v17049_v47 = vpack.c.bf16 %v11281_v28, %v11280_v48 }
0x251d   : > { %16982 = vmatprep.subr.bf16.mxu0 %v17400_v14 }
0x2520   : > { %16984 = vmatpush3.bf16.msra.mxu0 %v16983_v57  ;;  %v17013_v57 = vpack.c.bf16 %v11255_v32, %v11254_v46  ;;  %v17070_v46 = vpack.c.bf16 %v11297_v56, %v11296_v13  ;;  %v11863_v56 = vld [vmem:[%s20638_s8] sm:$0x1] }
0x2521   : > { %16985 = vmatprep.subr.bf16.mxu0 %v17400_v14 }
0x2524   : > { %16987 = vmatpush3.bf16.msra.mxu0 %v16986_v16  ;;  %v17016_v16 = vpack.c.bf16 %v11257_v40, %v11256_v58  ;;  %v11301_v58 = vld [vmem:[%s20635_s5 + $0x238] sm:$0xff] }
0x2525   : > { %16988 = vmatprep.subr.bf16.mxu0 %v17400_v14 }
0x2528   : > { %16990 = vmatpush3.bf16.msra.mxu0 %v16989_v15  ;;  %v17019_v15 = vpack.c.bf16 %v11259_v20, %v11258_v63  ;;  %v11305_v63 = vld [vmem:[%s20635_s5 + $0x258] sm:$0xff] }
0x2529   : > { %16991 = vmatprep.subr.bf16.mxu0 %v17400_v14 }
0x252c   : > { %16993 = vmatpush3.bf16.msra.mxu0 %v16992_v11  ;;  %v11286_v11 = vld [vmem:[%s20635_s5 + $0x1c0] sm:$0xff] }
0x252d   : > { %15315 = vmatprep.subr.mxu0 %v17385_v0 }
0x2530   : > { %15316 = vmatpush3.msk.msra.mxu0 %vm821_vm1, %v11251_v60  ;;  %v11274_v60 = vld [vmem:[%s20635_s5 + $0x160] sm:$0xff] }
0x2531   : > { %17009 = vmatprep.subr.bf16.mxu0 %v17400_v14 }
0x25ea   : > { %v11091_v2 = vpop.f32.mrb[94].mxu0 }
0x25eb   : > { %v15287_v54 = vpop.f32.mrb[95].mxu0 }
0x25ec   : > { %v17055_v54 = vpack.c.bf16 %v11286_v11, %v11285_v59  ;;  %v11853_v59 = vld [vmem:[%s20637_s7 + $0x28] sm:$0xff] }
0x25ee   : > { %v11161_v61 = vpop.f32.mrb[96].mxu0 }
0x25ef   : > { %v11165_v31 = vmax.f32 %v11091_v2, %v11161_v61  ;;  %v15294_v19 = vpop.f32.mrb[97].mxu0  ;;  %v11275_v2 = vld [vmem:[%s20635_s5 + $0x168] sm:$0xff] }
0x25f0   : > { %v11287_v19 = vld [vmem:[%s20635_s5 + $0x1c8] sm:$0xff]  ;;  %v17040_v22 = vpack.c.bf16 %v11275_v2, %v11274_v60  ;;  %v11855_v60 = vld [vmem:[%s20637_s7 + $0x38] sm:$0xff] }
0x25f1   : > { %11207 = vrot.lane.b32.xlu0 %v11165_v31, %s17417_s16  ;;  %v11262_v31 = vld [vmem:[%s20635_s5 + $0x100] sm:$0xf]  ;;  %v17058_v34 = vpack.c.bf16 %v11288_v50, %v11287_v19  ;;  %v11858_v19 = vld [vmem:[%s20637_s7 + $0x50] sm:$0xff]  ;;  %v11859_v50 = vld [vmem:[%s20637_s7 + $0x58] sm:$0xff]  ;;  %s17327_s16 = scalar_lea.vmem %s17326_s25, 32 }
0x25f2   : > { %p17329_p1 = scmp.lt.s32.totalorder %s17327_s16, %s17321_s29 }
0x25f4   : > { %p17330_p2 = por %p17329_p1, %p17328_p0 }
0x25f6   : > { %p17331_p3 = pnand %p17330_p2, %p17324_p13 }
0x2663   : > { %v11208_v52 = vpop.permute.xlu0 %11207 }
0x2664   : > { %v20316_v62 = vsel %vm11228_vm11, %v11227_v29, %v11208_v52  ;;  %v17052_v29 = vpack.c.bf16 %v11283_v5, %v11282_v7  ;;  %v11295_v52 = vld [vmem:[%s20635_s5 + $0x208] sm:$0xf]  ;;  %v11845_v5 = vld [vmem:[%s20636_s6] sm:$0x1] }
0x2665   : > { %15343 = vmatmul.mubr.msk.f32.vlgmr.msra.gmra.mrb[94].mxu1 %vm11309_vm7, %v20316_v62  ;;  %v11308_v30 = vrot.slane %v20316_v62, 1  ;;  %v11537_v61 = vrot.slane %v20316_v62, 3  ;;  %v11460_v27 = vrot.slane %v20316_v62, 2  ;;  %v11614_v32 = vrot.slane %v20316_v62, 4 }
0x2666   : > { %17026 = vmatpush3.bf16.msra.mxu1 %v17025_v24  ;;  %15392 = vmatprep.mubr.msk.f32.mxu1 %vm17401_vm15, %v17385_v0  ;;  %v17067_v24 = vpack.c.bf16 %v11294_v21, %v11293_v45  ;;  %v11768_v49 = vrot.slane %v20316_v62, 6 }
0x2667   : > { %15318 = vmatmul.mubr.msk.f32.vlgmr.msra.gmra.mrb[98].mxu0 %vm11309_vm7, %v11308_v30  ;;  %17027 = vmatprep.subr.bf16.mxu1 %v17400_v14  ;;  %v11284_v30 = vld [vmem:[%s20635_s5 + $0x1b0] sm:$0xf] }
0x2668   : > { %17011 = vmatpush3.bf16.msra.mxu0 %v17010_v4  ;;  %15367 = vmatprep.mubr.msk.f32.mxu0 %vm17401_vm15, %v17385_v0  ;;  %v11691_v4 = vrot.slane %v20316_v62, 5  ;;  %v11850_v62 = vld [vmem:[%s20637_s7 + $0x10] sm:$0xff] }
0x2669   : > { %17012 = vmatprep.subr.bf16.mxu0 %v17400_v14 }
0x266a   : > { %17029 = vmatpush3.bf16.msra.mxu1 %v17028_v39  ;;  %v11298_v39 = vld [vmem:[%s20635_s5 + $0x220] sm:$0xff] }
0x266b   : > { %17030 = vmatprep.subr.bf16.mxu1 %v17400_v14  ;;  %v17073_v36 = vpack.c.bf16 %v11299_v1, %v11298_v39 }
0x266c   : > { %17014 = vmatpush3.bf16.msra.mxu0 %v17013_v57  ;;  %v11300_v57 = vld [vmem:[%s20635_s5 + $0x230] sm:$0xff] }
0x266d   : > { %17015 = vmatprep.subr.bf16.mxu0 %v17400_v14  ;;  %v17076_v40 = vpack.c.bf16 %v11301_v58, %v11300_v57 }
0x266e   : > { %17032 = vmatpush3.bf16.msra.mxu1 %v17031_v43  ;;  %v11302_v43 = vld [vmem:[%s20635_s5 + $0x240] sm:$0xff] }
0x266f   : > { %17033 = vmatprep.subr.bf16.mxu1 %v17400_v14  ;;  %v17079_v18 = vpack.c.bf16 %v11303_v44, %v11302_v43 }
0x2670   : > { %17017 = vmatpush3.bf16.msra.mxu0 %v17016_v16  ;;  %v11304_v16 = vld [vmem:[%s20635_s5 + $0x250] sm:$0xff] }
0x2671   : > { %17018 = vmatprep.subr.bf16.mxu0 %v17400_v14  ;;  %v17082_v20 = vpack.c.bf16 %v11305_v63, %v11304_v16 }
0x2672   : > { %17035 = vmatpush3.bf16.msra.mxu1 %v17034_v42  ;;  %v11306_v42 = vld [vmem:[%s20635_s5 + $0x260] sm:$0xf] }
0x2673   : > { %17036 = vmatprep.subr.bf16.mxu1 %v17400_v14 }
0x2674   : > { %17020 = vmatpush3.bf16.msra.mxu0 %v17019_v15  ;;  %v11849_v15 = vld [vmem:[%s20637_s7 + $0x8] sm:$0xff] }
0x2675   : > { %17021 = vmatprep.subr.bf16.mxu0 %v17400_v14  ;;  %v17085_v53 = vpack.c.bf16 %v11849_v15, %v11848_v51 }
0x2676   : > { %17038 = vmatpush3.bf16.msra.mxu1 %v17037_v10  ;;  %v11852_v10 = vld [vmem:[%s20637_s7 + $0x20] sm:$0xff] }
0x2677   : > { %15390 = vmatprep.subr.mxu1 %v17385_v0  ;;  %v17091_v11 = vpack.c.bf16 %v11853_v59, %v11852_v10 }
0x2678   : > { %17023 = vmatpush3.bf16.msra.mxu0 %v17022_v12  ;;  %v17088_v12 = vpack.c.bf16 %v11851_v55, %v11850_v62 }
0x2679   : > { %15365 = vmatprep.subr.mxu0 %v17385_v0 }
0x267a   : > { %15391 = vmatpush3.msk.msra.mxu1 %vm821_vm1, %v11273_v3  ;;  %v11854_v3 = vld [vmem:[%s20637_s7 + $0x30] sm:$0xff] }
0x267b   : > { %15393 = vmatmul.mubr.msk.f32.vlgmr.msra.gmra.mrb[96].mxu1 %vm11309_vm7, %v11537_v61  ;;  %17054 = vmatprep.subr.bf16.mxu1 %v17400_v14  ;;  %v17094_v2 = vpack.c.bf16 %v11855_v60, %v11854_v3  ;;  %v11857_v61 = vld [vmem:[%s20637_s7 + $0x48] sm:$0xff] }
0x267c   : > { %15366 = vmatpush3.msk.msra.mxu0 %vm821_vm1, %v11262_v31  ;;  %17056 = vmatpush3.bf16.msra.mxu1 %v17055_v54  ;;  %v11856_v54 = vld [vmem:[%s20637_s7 + $0x40] sm:$0xff] }
0x267d   : > { %15368 = vmatmul.mubr.msk.f32.vlgmr.msra.gmra.mrb[100].mxu0 %vm11309_vm7, %v11460_v27  ;;  %17039 = vmatprep.subr.bf16.mxu0 %v17400_v14  ;;  %v17097_v31 = vpack.c.bf16 %v11857_v61, %v11856_v54  ;;  %v11860_v27 = vld [vmem:[%s20637_s7 + $0x60] sm:$0xff] }
0x267e   : > { %17041 = vmatpush3.bf16.msra.mxu0 %v17040_v22  ;;  %17057 = vmatprep.subr.bf16.mxu1 %v17400_v14  ;;  %v17100_v22 = vpack.c.bf16 %v11859_v50, %v11858_v19  ;;  %v17103_v25 = vpack.c.bf16 %v11861_v23, %v11860_v27 }
0x267f   : > { %17042 = vmatprep.subr.bf16.mxu0 %v17400_v14  ;;  %15442 = vmatprep.mubr.msk.f32.mxu1 %vm17401_vm15, %v17385_v0 }
0x2680   : > { %17059 = vmatpush3.bf16.msra.mxu1 %v17058_v34  ;;  %15417 = vmatprep.mubr.msk.f32.mxu0 %vm17401_vm15, %v17385_v0  ;;  %v11862_v34 = vld [vmem:[%s20637_s7 + $0x70] sm:$0xff] }
0x2681   : > { %17060 = vmatprep.subr.bf16.mxu1 %v17400_v14 }
0x2682   : > { %17044 = vmatpush3.bf16.msra.mxu0 %v17043_v38 }
0x2683   : > { %17045 = vmatprep.subr.bf16.mxu0 %v17400_v14 }
0x2684   : > { %17062 = vmatpush3.bf16.msra.mxu1 %v17061_v9 }
0x2685   : > { %17063 = vmatprep.subr.bf16.mxu1 %v17400_v14 }
0x2686   : > { %17047 = vmatpush3.bf16.msra.mxu0 %v17046_v6 }
0x2687   : > { %17048 = vmatprep.subr.bf16.mxu0 %v17400_v14 }
0x2688   : > { %17065 = vmatpush3.bf16.msra.mxu1 %v17064_v26 }
0x2689   : > { %17066 = vmatprep.subr.bf16.mxu1 %v17400_v14 }
0x268a   : > { %17050 = vmatpush3.bf16.msra.mxu0 %v17049_v47 }
0x268b   : > { %17051 = vmatprep.subr.bf16.mxu0 %v17400_v14 }
0x268c   : > { %17068 = vmatpush3.bf16.msra.mxu1 %v17067_v24 }
0x268d   : > { %15440 = vmatprep.subr.mxu1 %v17385_v0 }
0x268e   : > { %17053 = vmatpush3.bf16.msra.mxu0 %v17052_v29 }
0x268f   : > { %15415 = vmatprep.subr.mxu0 %v17385_v0 }
0x2690   : > { %15441 = vmatpush3.msk.msra.mxu1 %vm821_vm1, %v11295_v52 }
0x2691   : > { %15443 = vmatmul.mubr.msk.f32.vlgmr.msra.gmra.mrb[98].mxu1 %vm11309_vm7, %v11691_v4  ;;  %17084 = vmatprep.subr.bf16.mxu1 %v17400_v14 }
0x2692   : > { %15416 = vmatpush3.msk.msra.mxu0 %vm821_vm1, %v11284_v30  ;;  %15500 = vmatprep.mubr.msk.f32.mxu1 %vm17401_vm15, %v17385_v0 }
0x2693   : > { %15418 = vmatmul.mubr.msk.f32.vlgmr.msra.gmra.mrb[102].mxu0 %vm11309_vm7, %v11614_v32  ;;  %17069 = vmatprep.subr.bf16.mxu0 %v17400_v14 }
0x2694   : > { %17071 = vmatpush3.bf16.msra.mxu0 %v17070_v46  ;;  %15467 = vmatprep.mubr.msk.f32.mxu0 %vm17401_vm15, %v17385_v0 }
0x2695   : > { %17072 = vmatprep.subr.bf16.mxu0 %v17400_v14  ;;  %17086 = vmatpush3.bf16.msra.mxu1 %v17085_v53 }
0x2696   : > { %17087 = vmatprep.subr.bf16.mxu1 %v17400_v14 }
0x2698   : > { %17074 = vmatpush3.bf16.msra.mxu0 %v17073_v36 }
0x2699   : > { %17075 = vmatprep.subr.bf16.mxu0 %v17400_v14  ;;  %17089 = vmatpush3.bf16.msra.mxu1 %v17088_v12 }
0x269a   : > { %17090 = vmatprep.subr.bf16.mxu1 %v17400_v14 }
0x269c   : > { %17077 = vmatpush3.bf16.msra.mxu0 %v17076_v40 }
0x269d   : > { %17078 = vmatprep.subr.bf16.mxu0 %v17400_v14  ;;  %17092 = vmatpush3.bf16.msra.mxu1 %v17091_v11 }
0x269e   : > { %17093 = vmatprep.subr.bf16.mxu1 %v17400_v14 }
0x26a0   : > { %17080 = vmatpush3.bf16.msra.mxu0 %v17079_v18 }
0x26a1   : > { %17081 = vmatprep.subr.bf16.mxu0 %v17400_v14  ;;  %17095 = vmatpush3.bf16.msra.mxu1 %v17094_v2 }
0x26a2   : > { %17096 = vmatprep.subr.bf16.mxu1 %v17400_v14 }
0x26a4   : > { %17083 = vmatpush3.bf16.msra.mxu0 %v17082_v20 }
0x26a5   : > { %15465 = vmatprep.subr.mxu0 %v17385_v0  ;;  %17098 = vmatpush3.bf16.msra.mxu1 %v17097_v31 }
0x26a6   : > { %17099 = vmatprep.subr.bf16.mxu1 %v17400_v14 }
0x26a8   : > { %15466 = vmatpush3.msk.msra.mxu0 %vm821_vm1, %v11306_v42  ;;  %vm11864_vm1 = vcmask 982016  }
0x26a9   : > { %15468 = vmatmul.mubr.msk.f32.vlgmr.msra.gmra.mrb[104].mxu0 %vm11309_vm7, %v11768_v49  ;;  %17101 = vmatpush3.bf16.msra.mxu1 %v17100_v22 }
0x26aa   : > { %17102 = vmatprep.subr.bf16.mxu1 %v17400_v14 }
0x26ad   : > { %17104 = vmatpush3.bf16.msra.mxu1 %v17103_v25 }
0x26ae   : > { %15498 = vmatprep.subr.mxu1 %v17385_v0 }
0x26b1   : > { %15499 = vmatpush3.msra.mxu1 %v11862_v34 }
0x2738   : > { %v11456_v35 = vpop.f32.mrb[94].mxu1 }
0x2739   : > { %v15344_v37 = vpop.f32.mrb[95].mxu1 }
0x273a   : > { %v11381_v14 = vpop.f32.mrb[98].mxu0 }
0x273b   : > { %v11457_v38 = vadd.f32 %v11456_v35, %v11381_v14  ;;  %v15319_v8 = vpop.f32.mrb[99].mxu0 }
0x274e   : > { %v11609_v33 = vpop.f32.mrb[96].mxu1 }
0x274f   : > { %v15394_v9 = vpop.f32.mrb[97].mxu1 }
0x2750   : > { %v11532_v17 = vpop.f32.mrb[100].mxu0 }
0x2751   : > { %v11536_v41 = vadd.f32 %v11532_v17, %v11457_v38  ;;  %v15369_v6 = vpop.f32.mrb[101].mxu0 }
0x2753   : > { %v11613_v48 = vadd.f32 %v11609_v33, %v11536_v41 }
0x2764   : > { %v11763_v28 = vpop.f32.mrb[98].mxu1 }
0x2765   : > { %v15444_v0 = vpop.f32.mrb[99].mxu1 }
0x2766   : > { %v11686_v26 = vpop.f32.mrb[102].mxu0 }
0x2767   : > { %v11690_v45 = vadd.f32 %v11686_v26, %v11613_v48  ;;  %v15419_v21 = vpop.f32.mrb[103].mxu0 }
0x2769   : > { %v11767_v47 = vadd.f32 %v11763_v28, %v11690_v45 }
0x277c   : > { %v11840_v7 = vpop.f32.mrb[104].mxu0 }
0x277d   : > { %v11844_v24 = vadd.f32 %v11840_v7, %v11767_v47  ;;  %v15469_v29 = vpop.f32.mrb[105].mxu0 }
0x277f   : > { %v11846_v52 = vadd.f32 %v11845_v5, %v11844_v24 }
0x2781   : > { %v11847_v13 = vmax.f32 %v11846_v52, 0.0 }
0x2783   : > { %15501 = vmatmul.mubr.msk.f32.vlgmr.msra.gmra.mrb[100].mxu1 %vm11864_vm1, %v11847_v13 }
0x2856   : > { %v11934_v4 = vpop.f32.mrb[100].mxu1 }
0x2857   : > { %v11935_v30 = vadd.f32 %v11934_v4, %v11863_v56  ;;  %v15502_v46 = vpop.f32.mrb[101].mxu1 }
0x2859   : > { %11939 = vst.msk [vmem:[%s324_s21] sm:$0x1] %vm11938_vm5, %v11935_v30 }
0x285a   : > { %17334 = shalt.err (!%p17331_p3)
}
0x285b   : > { %s17335_s28 = scalar_lea.hbm %s20588_s14, 16  ;;  %s17339_s21 = scalar_lea.hbm %s20639_s9, 32 }
0x285c   : > { %p17336_p4 = scmp.ne.s32.totalorder %s20588_s14, %s17335_s28  ;;  %p17340_p9 = scmp.lt.u32.totalorder %s20588_s14, %s20639_s9 }
0x285d   : > { %p17341_p10 = scmp.lt.u32.totalorder %s17339_s21, %s17335_s28  ;;  %p17343_p12 = scmp.lt.u32.totalorder %s17335_s28, %s20588_s14 }
0x285e   : > { %p17337_p7 = pnand %p17336_p4, %p17507_p5 }
0x285f   : > { %p17342_p11 = por %p17341_p10, %p17340_p9 }
0x2860   : > { %p17338_p8 = pneg %p17337_p7 }
0x2861   : > { %p17344_p13 = por %p17343_p12, %p17342_p11 }
0x2863   : > { %p17345_p0 = pnand %p17344_p13, %p17338_p8 }
0x2865   : > { %17348 = shalt.err (!%p17345_p0)
}
0x2866   : > { %17237 = dma.vmem_to_hbm [thread:$0]  (%p17507_p5), %s20590_s22, 16, %s20588_s14, %s11941_s27  }
0x2867 PF: > { %p17243_p1 = scmp.ge.s32.totalorder %s17383_s12, 2  ;;  %s11965_s29 = sand.u32 1, %s17371_s30  }
0x2868   : > { %s11966_s13 = scalar_lea.sflag [#allocation5], %s11965_s29 }
0x2869   : > { %p17240_p2 = pnand %p17243_p1, %p17511_p6 }
0x286b   : > { %17366 = dma.done.wait (!%p17240_p2), %s11966_s13, 16  }
0x286c   : > { %17368 = vsyncadd (!%p17240_p2), %s11966_s13, 4294967280  ;;  %p19_p3 = scmp.ge.s32.totalorder %s17494_s15, 4   ;;  %s20666_s30 = smov %s17375_s10 }
0x286d   : > { %s20667_s10 = smov %s17379_s11  ;;  %s20668_s11 = smov %s17505_s18 }
0x286e   : > { %s20669_s12 = smov %s17494_s15  ;;  %21 = sbr.rel (!%p19_p3) target bundleno = 3 (0x3), region = 91 }
0x2875   :  { %11970 = vsyncpa [#allocation5], 1 }
0x2876   :  { %11972 = vsyncpa [#allocation5 + $0x1], 1 }

</bundles_post_ra>
